<compile_context>
chip_gen: v7x
topology: tpu7x:2x2x1
jax: 0.10.0
libtpu: 0.0.40
codegen_flags: <defaults>
</compile_context>

<pallas_src>
import functools

import jax
import jax.numpy as jnp
import numpy as np
from jax import lax
from jax.experimental import pallas as pl
from jax.experimental.pallas import tpu as pltpu


def _round_up(x, m):
    return (x + m - 1) // m * m


# ---------------------------------------------------------------------------
# Pallas kernel: fused multi-layer LightGCN propagation, fully VMEM-resident.
#   rn_ref : (U_pad, I_pad) bf16   normalized user->item block of A_tilde
#   u0_ref : (U_pad, D)     f32    layer-0 user embeddings (zero padded)
#   i0_ref : (I_pad, D)     f32    layer-0 item embeddings (zero padded)
#   uo_ref : (U_pad, D)     f32    mean over [E_0..E_L]   (output)
#   io_ref : (I_pad, D)     f32    mean over [E_0..E_L]   (output)
#   u_cur, i_cur : f32 VMEM scratch holding the current layer's embeddings.
# Zero padding is sound: padded rows/cols of Rn are zero, so padded rows of
# the embeddings never contaminate real rows and stay zero themselves.
# ---------------------------------------------------------------------------
def _lightgcn_prop_kernel(n_layers, rn_ref, u0_ref, i0_ref,
                          uo_ref, io_ref, u_cur, i_cur):
    u_cur[...] = u0_ref[...]
    i_cur[...] = i0_ref[...]
    uo_ref[...] = u0_ref[...]          # layer-0 contribution to the sum
    io_ref[...] = i0_ref[...]

    for _ in range(n_layers):          # n_layers is small & static -> unrolled
        rn = rn_ref[...]               # resident in VMEM, read once from HBM
        u_b = u_cur[...].astype(jnp.bfloat16)
        i_b = i_cur[...].astype(jnp.bfloat16)

        # A_tilde = [[0, Rn], [Rn^T, 0]] -> one layer is two small matmuls
        # that both consume the SAME resident Rn (no Rn^T materialization).
        new_u = jnp.dot(rn, i_b, preferred_element_type=jnp.float32)
        new_i = lax.dot_general(
            rn, u_b,
            dimension_numbers=(((0,), (0,)), ((), ())),   # Rn^T @ users
            preferred_element_type=jnp.float32)

        u_cur[...] = new_u
        i_cur[...] = new_i
        uo_ref[...] += new_u           # accumulate mean directly in outputs
        io_ref[...] += new_i

    inv = jnp.float32(1.0 / (n_layers + 1))
    uo_ref[...] = uo_ref[...] * inv
    io_ref[...] = io_ref[...] * inv


def lightgcn_propagate(rn_bf16, user0, item0, *, n_layers):
    """Run all n_layers of propagation in one pallas_call (Rn read once)."""
    u_pad, i_pad = rn_bf16.shape
    d = user0.shape[1]
    vmem = pl.BlockSpec(memory_space=pltpu.MemorySpace.VMEM)
    return pl.pallas_call(
        functools.partial(_lightgcn_prop_kernel, n_layers),
        out_shape=(
            jax.ShapeDtypeStruct((u_pad, d), jnp.float32),
            jax.ShapeDtypeStruct((i_pad, d), jnp.float32),
        ),
        in_specs=[vmem, vmem, vmem],
        out_specs=(vmem, vmem),
        scratch_shapes=[
            pltpu.VMEM((u_pad, d), jnp.float32),
            pltpu.VMEM((i_pad, d), jnp.float32),
        ],
        compiler_params=pltpu.CompilerParams(
            vmem_limit_bytes=56 * 1024 * 1024,   # safe on v5e/v6e, under v7x 64 MiB
        ),
    )(rn_bf16, user0, item0)


# ---------------------------------------------------------------------------
# LightGCN forward (JAX glue around the fused Pallas propagation kernel)
# ---------------------------------------------------------------------------
@functools.partial(jax.jit, static_argnames=("n_layers",))
def lightgcn_forward(user_emb, item_emb, rn_bf16, batch, *, n_layers):
    n_users, _ = user_emb.shape
    n_items = item_emb.shape[0]
    u_pad, i_pad = rn_bf16.shape

    u0 = user_emb
    i0 = item_emb
    if u_pad != n_users:
        u0 = jnp.pad(u0, ((0, u_pad - n_users), (0, 0)))   # tiny (~1 MB real)
    if i_pad != n_items:
        i0 = jnp.pad(i0, ((0, i_pad - n_items), (0, 0)))

    users_out, items_out = lightgcn_propagate(rn_bf16, u0, i0, n_layers=n_layers)
    users_out = users_out[:n_users]
    items_out = items_out[:n_items]

    users_idx = batch[:, 0].astype(jnp.int32)
    items_idx = batch[:, 1].astype(jnp.int32)
    bu = jnp.take(users_out, users_idx, axis=0)
    bi = jnp.take(items_out, items_idx, axis=0)

    # scores = diag(bu @ bi^T) = rowwise dot.  Batch is tiny (8 x 32), so this
    # stays in plain JAX (a Pallas launch here would be pure overhead).
    return jnp.sum(bu * bi, axis=-1)


# ---------------------------------------------------------------------------
# Deterministic synthetic setup + pure-JAX reference (no file I/O)
# ---------------------------------------------------------------------------
def build_normalized_r(key, n_users, n_items, density=0.05):
    """Synthetic symmetric-normalized interaction block Rn = D_u^-1/2 R D_i^-1/2.

    This is the only nonzero block of A_tilde = [[0, Rn], [Rn^T, 0]].
    """
    r = (jax.random.uniform(key, (n_users, n_items)) < density).astype(jnp.float32)
    deg_u = jnp.sum(r, axis=1)
    deg_i = jnp.sum(r, axis=0)
    du = jnp.where(deg_u > 0, 1.0 / jnp.sqrt(deg_u), 0.0)
    di = jnp.where(deg_i > 0, 1.0 / jnp.sqrt(deg_i), 0.0)
    return du[:, None] * r * di[None, :]


def prep_adjacency(r_norm):
    """One-time data prep: zero-pad to aligned shape and cast to bf16.

    Hoisted out of the jitted forward so the f32->bf16 cast + pad HBM round
    trip happens exactly once, not once per forward call.
    """
    n_users, n_items = r_norm.shape
    u_pad = _round_up(n_users, 16)     # bf16 sublane packing
    i_pad = _round_up(n_items, 128)    # lane alignment
    r = r_norm
    if (u_pad, i_pad) != (n_users, n_items):
        r = jnp.pad(r, ((0, u_pad - n_users), (0, i_pad - n_items)))
    return r.astype(jnp.bfloat16)


def reference_forward(user_emb, item_emb, r_norm, batch, n_layers):
    """Pure-JAX f32 reference matching the PyTorch module's forward."""
    n_users = user_emb.shape[0]
    curr = jnp.concatenate([user_emb, item_emb], axis=0)
    n = curr.shape[0]
    a = jnp.zeros((n, n), jnp.float32)
    a = a.at[:n_users, n_users:].set(r_norm)
    a = a.at[n_users:, :n_users].set(r_norm.T)
    embs = [curr]
    for _ in range(n_layers):
        curr = a @ curr
        embs.append(curr)
    e = jnp.mean(jnp.stack(embs, axis=1), axis=1)
    u = e[:n_users][batch[:, 0]]
    i = e[n_users:][batch[:, 1]]
    return jnp.sum(u * i, axis=-1)


if __name__ == "__main__":
    # Small stand-in shapes for n_users=10000, n_items=1000; deliberately
    # non-aligned to exercise the zero-padding path.
    n_users, n_items = 636, 250
    emb_size = 32                       # args.emb_size
    n_layers = 2                        # args.n_layers
    batch_size = 8

    key = jax.random.PRNGKey(0)
    k_user, k_item, k_adj, k_bu, k_bi = jax.random.split(key, 5)

    # nn.init.normal_(std=0.1) on both embedding tables
    user_emb = 0.1 * jax.random.normal(k_user, (n_users, emb_size), jnp.float32)
    item_emb = 0.1 * jax.random.normal(k_item, (n_items, emb_size), jnp.float32)

    r_norm = build_normalized_r(k_adj, n_users, n_items)
    rn_bf16 = jax.block_until_ready(prep_adjacency(r_norm))   # one-time prep

    batch = jnp.stack(
        [
            jax.random.randint(k_bu, (batch_size,), 0, n_users),
            jax.random.randint(k_bi, (batch_size,), 0, n_items),
        ],
        axis=1,
    ).astype(jnp.int32)

    scores = lightgcn_forward(user_emb, item_emb, rn_bf16, batch,
                              n_layers=n_layers)
    jax.block_until_ready(scores)
    assert scores.shape == (batch_size,)

    # Validate against pure-JAX f32 reference (bf16 adjacency -> loose tol).
    ref = reference_forward(user_emb, item_emb, r_norm, batch, n_layers)
    np.testing.assert_allclose(np.asarray(scores), np.asarray(ref),
                               rtol=5e-2, atol=1e-2)
    print("KERNEL_OK")
</pallas_src>

<mosaic_0001>
module attributes {stable_mosaic.version = 11 : i64} {
  func.func @_lightgcn_prop_kernel(%arg0: memref<640x256xbf16, #tpu.memory_space<vmem>>, %arg1: memref<640x32xf32, #tpu.memory_space<vmem>>, %arg2: memref<256x32xf32, #tpu.memory_space<vmem>>, %arg3: memref<640x32xf32, #tpu.memory_space<vmem>>, %arg4: memref<256x32xf32, #tpu.memory_space<vmem>>, %arg5: memref<640x32xf32, #tpu.memory_space<vmem>>, %arg6: memref<256x32xf32, #tpu.memory_space<vmem>>) attributes {dimension_semantics = [], scalar_prefetch = 0 : i64, scratch_operands = 2 : i64, tpu.core_type = #tpu.core_type<tc>} {
    %c0 = arith.constant 0 : index
    %c0_0 = arith.constant 0 : index
    %0 = vector.load %arg1[%c0, %c0_0] : memref<640x32xf32, #tpu.memory_space<vmem>>, vector<640x32xf32>
    %c0_1 = arith.constant 0 : index
    %c0_2 = arith.constant 0 : index
    %1 = vector.load %arg5[%c0_1, %c0_2] : memref<640x32xf32, #tpu.memory_space<vmem>>, vector<640x32xf32>
    tpu.vector_store %arg5[%c0_1, %c0_2], %0 {strides = array<i32>} : memref<640x32xf32, #tpu.memory_space<vmem>>, vector<640x32xf32>,
    %c0_3 = arith.constant 0 : index
    %c0_4 = arith.constant 0 : index
    %2 = vector.load %arg2[%c0_3, %c0_4] : memref<256x32xf32, #tpu.memory_space<vmem>>, vector<256x32xf32>
    %c0_5 = arith.constant 0 : index
    %c0_6 = arith.constant 0 : index
    %3 = vector.load %arg6[%c0_5, %c0_6] : memref<256x32xf32, #tpu.memory_space<vmem>>, vector<256x32xf32>
    tpu.vector_store %arg6[%c0_5, %c0_6], %2 {strides = array<i32>} : memref<256x32xf32, #tpu.memory_space<vmem>>, vector<256x32xf32>,
    %c0_7 = arith.constant 0 : index
    %c0_8 = arith.constant 0 : index
    %4 = vector.load %arg1[%c0_7, %c0_8] : memref<640x32xf32, #tpu.memory_space<vmem>>, vector<640x32xf32>
    %c0_9 = arith.constant 0 : index
    %c0_10 = arith.constant 0 : index
    %5 = vector.load %arg3[%c0_9, %c0_10] : memref<640x32xf32, #tpu.memory_space<vmem>>, vector<640x32xf32>
    tpu.vector_store %arg3[%c0_9, %c0_10], %4 {strides = array<i32>} : memref<640x32xf32, #tpu.memory_space<vmem>>, vector<640x32xf32>,
    %c0_11 = arith.constant 0 : index
    %c0_12 = arith.constant 0 : index
    %6 = vector.load %arg2[%c0_11, %c0_12] : memref<256x32xf32, #tpu.memory_space<vmem>>, vector<256x32xf32>
    %c0_13 = arith.constant 0 : index
    %c0_14 = arith.constant 0 : index
    %7 = vector.load %arg4[%c0_13, %c0_14] : memref<256x32xf32, #tpu.memory_space<vmem>>, vector<256x32xf32>
    tpu.vector_store %arg4[%c0_13, %c0_14], %6 {strides = array<i32>} : memref<256x32xf32, #tpu.memory_space<vmem>>, vector<256x32xf32>,
    %c0_15 = arith.constant 0 : index
    %c0_16 = arith.constant 0 : index
    %8 = vector.load %arg0[%c0_15, %c0_16] : memref<640x256xbf16, #tpu.memory_space<vmem>>, vector<640x256xbf16>
    %c0_17 = arith.constant 0 : index
    %c0_18 = arith.constant 0 : index
    %9 = vector.load %arg5[%c0_17, %c0_18] : memref<640x32xf32, #tpu.memory_space<vmem>>, vector<640x32xf32>
    %10 = arith.truncf %9 : vector<640x32xf32> to vector<640x32xbf16>
    %c0_19 = arith.constant 0 : index
    %c0_20 = arith.constant 0 : index
    %11 = vector.load %arg6[%c0_19, %c0_20] : memref<256x32xf32, #tpu.memory_space<vmem>>, vector<256x32xf32>
    %12 = arith.truncf %11 : vector<256x32xf32> to vector<256x32xbf16>
    %cst = arith.constant dense<0.000000e+00> : vector<640x32xf32>
    %13 = tpu.matmul %8, %12, %cst {dimension_numbers = #tpu.dot_dimension_numbers<[1], [0], [0], [1], [0, 0, 1, 1], [], []>} : vector<640x256xbf16>, vector<256x32xbf16>, vector<640x32xf32> -> vector<640x32xf32>
    %cst_21 = arith.constant dense<0.000000e+00> : vector<256x32xf32>
    %14 = tpu.matmul %8, %10, %cst_21 {dimension_numbers = #tpu.dot_dimension_numbers<[0], [0], [1], [1], [0, 1, 1, 1], [], []>} : vector<640x256xbf16>, vector<640x32xbf16>, vector<256x32xf32> -> vector<256x32xf32>
    %c0_22 = arith.constant 0 : index
    %c0_23 = arith.constant 0 : index
    %15 = vector.load %arg5[%c0_22, %c0_23] : memref<640x32xf32, #tpu.memory_space<vmem>>, vector<640x32xf32>
    tpu.vector_store %arg5[%c0_22, %c0_23], %13 {strides = array<i32>} : memref<640x32xf32, #tpu.memory_space<vmem>>, vector<640x32xf32>,
    %c0_24 = arith.constant 0 : index
    %c0_25 = arith.constant 0 : index
    %16 = vector.load %arg6[%c0_24, %c0_25] : memref<256x32xf32, #tpu.memory_space<vmem>>, vector<256x32xf32>
    tpu.vector_store %arg6[%c0_24, %c0_25], %14 {strides = array<i32>} : memref<256x32xf32, #tpu.memory_space<vmem>>, vector<256x32xf32>,
    %c0_26 = arith.constant 0 : index
    %c0_27 = arith.constant 0 : index
    %17 = vector.load %arg3[%c0_26, %c0_27] : memref<640x32xf32, #tpu.memory_space<vmem>>, vector<640x32xf32>
    %18 = arith.addf %17, %13 : vector<640x32xf32>
    %c0_28 = arith.constant 0 : index
    %c0_29 = arith.constant 0 : index
    %19 = vector.load %arg3[%c0_28, %c0_29] : memref<640x32xf32, #tpu.memory_space<vmem>>, vector<640x32xf32>
    tpu.vector_store %arg3[%c0_28, %c0_29], %18 {strides = array<i32>} : memref<640x32xf32, #tpu.memory_space<vmem>>, vector<640x32xf32>,
    %c0_30 = arith.constant 0 : index
    %c0_31 = arith.constant 0 : index
    %20 = vector.load %arg4[%c0_30, %c0_31] : memref<256x32xf32, #tpu.memory_space<vmem>>, vector<256x32xf32>
    %21 = arith.addf %20, %14 : vector<256x32xf32>
    %c0_32 = arith.constant 0 : index
    %c0_33 = arith.constant 0 : index
    %22 = vector.load %arg4[%c0_32, %c0_33] : memref<256x32xf32, #tpu.memory_space<vmem>>, vector<256x32xf32>
    tpu.vector_store %arg4[%c0_32, %c0_33], %21 {strides = array<i32>} : memref<256x32xf32, #tpu.memory_space<vmem>>, vector<256x32xf32>,
    %c0_34 = arith.constant 0 : index
    %c0_35 = arith.constant 0 : index
    %23 = vector.load %arg0[%c0_34, %c0_35] : memref<640x256xbf16, #tpu.memory_space<vmem>>, vector<640x256xbf16>
    %c0_36 = arith.constant 0 : index
    %c0_37 = arith.constant 0 : index
    %24 = vector.load %arg5[%c0_36, %c0_37] : memref<640x32xf32, #tpu.memory_space<vmem>>, vector<640x32xf32>
    %25 = arith.truncf %24 : vector<640x32xf32> to vector<640x32xbf16>
    %c0_38 = arith.constant 0 : index
    %c0_39 = arith.constant 0 : index
    %26 = vector.load %arg6[%c0_38, %c0_39] : memref<256x32xf32, #tpu.memory_space<vmem>>, vector<256x32xf32>
    %27 = arith.truncf %26 : vector<256x32xf32> to vector<256x32xbf16>
    %cst_40 = arith.constant dense<0.000000e+00> : vector<640x32xf32>
    %28 = tpu.matmul %23, %27, %cst_40 {dimension_numbers = #tpu.dot_dimension_numbers<[1], [0], [0], [1], [0, 0, 1, 1], [], []>} : vector<640x256xbf16>, vector<256x32xbf16>, vector<640x32xf32> -> vector<640x32xf32>
    %cst_41 = arith.constant dense<0.000000e+00> : vector<256x32xf32>
    %29 = tpu.matmul %23, %25, %cst_41 {dimension_numbers = #tpu.dot_dimension_numbers<[0], [0], [1], [1], [0, 1, 1, 1], [], []>} : vector<640x256xbf16>, vector<640x32xbf16>, vector<256x32xf32> -> vector<256x32xf32>
    %c0_42 = arith.constant 0 : index
    %c0_43 = arith.constant 0 : index
    %30 = vector.load %arg5[%c0_42, %c0_43] : memref<640x32xf32, #tpu.memory_space<vmem>>, vector<640x32xf32>
    tpu.vector_store %arg5[%c0_42, %c0_43], %28 {strides = array<i32>} : memref<640x32xf32, #tpu.memory_space<vmem>>, vector<640x32xf32>,
    %c0_44 = arith.constant 0 : index
    %c0_45 = arith.constant 0 : index
    %31 = vector.load %arg6[%c0_44, %c0_45] : memref<256x32xf32, #tpu.memory_space<vmem>>, vector<256x32xf32>
    tpu.vector_store %arg6[%c0_44, %c0_45], %29 {strides = array<i32>} : memref<256x32xf32, #tpu.memory_space<vmem>>, vector<256x32xf32>,
    %c0_46 = arith.constant 0 : index
    %c0_47 = arith.constant 0 : index
    %32 = vector.load %arg3[%c0_46, %c0_47] : memref<640x32xf32, #tpu.memory_space<vmem>>, vector<640x32xf32>
    %33 = arith.addf %32, %28 : vector<640x32xf32>
    %c0_48 = arith.constant 0 : index
    %c0_49 = arith.constant 0 : index
    %34 = vector.load %arg3[%c0_48, %c0_49] : memref<640x32xf32, #tpu.memory_space<vmem>>, vector<640x32xf32>
    tpu.vector_store %arg3[%c0_48, %c0_49], %33 {strides = array<i32>} : memref<640x32xf32, #tpu.memory_space<vmem>>, vector<640x32xf32>,
    %c0_50 = arith.constant 0 : index
    %c0_51 = arith.constant 0 : index
    %35 = vector.load %arg4[%c0_50, %c0_51] : memref<256x32xf32, #tpu.memory_space<vmem>>, vector<256x32xf32>
    %36 = arith.addf %35, %29 : vector<256x32xf32>
    %c0_52 = arith.constant 0 : index
    %c0_53 = arith.constant 0 : index
    %37 = vector.load %arg4[%c0_52, %c0_53] : memref<256x32xf32, #tpu.memory_space<vmem>>, vector<256x32xf32>
    tpu.vector_store %arg4[%c0_52, %c0_53], %36 {strides = array<i32>} : memref<256x32xf32, #tpu.memory_space<vmem>>, vector<256x32xf32>,
    %c0_54 = arith.constant 0 : index
    %c0_55 = arith.constant 0 : index
    %38 = vector.load %arg3[%c0_54, %c0_55] : memref<640x32xf32, #tpu.memory_space<vmem>>, vector<640x32xf32>
    %cst_56 = arith.constant 0.333333343 : f32
    %39 = vector.broadcast %cst_56 : f32 to vector<640x32xf32>
    %40 = arith.mulf %38, %39 : vector<640x32xf32>
    %c0_57 = arith.constant 0 : index
    %c0_58 = arith.constant 0 : index
    %41 = vector.load %arg3[%c0_57, %c0_58] : memref<640x32xf32, #tpu.memory_space<vmem>>, vector<640x32xf32>
    tpu.vector_store %arg3[%c0_57, %c0_58], %40 {strides = array<i32>} : memref<640x32xf32, #tpu.memory_space<vmem>>, vector<640x32xf32>,
    %c0_59 = arith.constant 0 : index
    %c0_60 = arith.constant 0 : index
    %42 = vector.load %arg4[%c0_59, %c0_60] : memref<256x32xf32, #tpu.memory_space<vmem>>, vector<256x32xf32>
    %cst_61 = arith.constant 0.333333343 : f32
    %43 = vector.broadcast %cst_61 : f32 to vector<256x32xf32>
    %44 = arith.mulf %42, %43 : vector<256x32xf32>
    %c0_62 = arith.constant 0 : index
    %c0_63 = arith.constant 0 : index
    %45 = vector.load %arg4[%c0_62, %c0_63] : memref<256x32xf32, #tpu.memory_space<vmem>>, vector<256x32xf32>
    tpu.vector_store %arg4[%c0_62, %c0_63], %44 {strides = array<i32>} : memref<256x32xf32, #tpu.memory_space<vmem>>, vector<256x32xf32>,
    return
  }
}

</mosaic_0001>

<bundles_post_ra>
// kernel: lightgcn_forward.1
= control target key start
LH: loop header
LB: loop body
LE: loop exit
PB: predicated region body
PF: predicated region fallthrough
CT: control target
= control target key end

     0   :  { %v11619_v1 = vmov 0   ;;  %vm97_vm0 = vcmask 261120   ;;  %s11614_s0 = inlined_call_operand.vmem [shape: bf16[640,256], index: 0, kind: input, shape index: {}]   ;;  %s11615_s2 = inlined_call_operand.vmem [shape: f32[256,32], index: 2, kind: input, shape index: {}]   ;;  %s11616_s1 = inlined_call_operand.vmem [shape: f32[640,32], index: 1, kind: input, shape index: {}]   ;;  %s11617_s3 = inlined_call_operand.vmem [shape: f32[640,32], index: 3, kind: output, shape index: {0}]   ;;  %s11618_s4 = inlined_call_operand.vmem [shape: f32[256,32], index: 4, kind: output, shape index: {1}]  }
   0x1   :  { %v5763_v0 = vld [vmem:[%s11614_s0 + $0x80] ss:$8 sps:$4 sm:$0xff]   ;;  %1114 = vmatprep.subr.bf16.mxu0 %v11619_v1  ;;  %v5767_v5 = vld [vmem:[%s11614_s0 + $0x90] ss:$8 sps:$4 sm:$0xff]   ;;  %v5769_v62 = vld [vmem:[%s11614_s0 + $0x94] ss:$8 sps:$4 sm:$0xff]  }
   0x2   :  { %v466_v2 = vld [vmem:[%s11614_s0] sm:$0xff]  ;;  %v467_v3 = vld [vmem:[%s11614_s0 + $0x8] sm:$0xff]  ;;  %1499 = vxpose.xlu0.c.b16.start [1/8] %v5763_v0, 128  ;;  %v6058_v7 = vld [vmem:[%s11614_s0 + $0x10] ss:$8 sps:$4 sm:$0xff]  }
   0x3   :  { %v6047_v4 = vld [vmem:[%s11614_s0] ss:$8 sps:$4 sm:$0xff]   ;;  %v6052_v6 = vcombine.high %v466_v2, %v467_v3  ;;  %v180_v12 = vld [vmem:[%s11615_s2 + $0x10] sm:$0xff]  ;;  %v181_v13 = vld [vmem:[%s11615_s2 + $0x18] sm:$0xff] }
   0x4   :  { %1467 = vxpose.xlu1.c.b16.start [1/8] %v6047_v4, 128  ;;  %v178_v8 = vld [vmem:[%s11615_s2] sm:$0xff]  ;;  %v179_v9 = vld [vmem:[%s11615_s2 + $0x8] sm:$0xff]  ;;  %212 = vst.msk [vmem:[#allocation3 + $0x10] sm:$0xff] %vm97_vm0, %v180_v12  ;;  %213 = vst.msk [vmem:[#allocation3 + $0x18] sm:$0xff] %vm97_vm0, %v181_v13 }
   0x5   :  { %1146 = vmatprep.mubr.bf16.mxu0 %v6052_v6  ;;  %210 = vst.msk [vmem:[#allocation3] sm:$0xff] %vm97_vm0, %v178_v8  ;;  %211 = vst.msk [vmem:[#allocation3 + $0x8] sm:$0xff] %vm97_vm0, %v179_v9  ;;  %v5773_v10 = vld [vmem:[%s11614_s0 + $0xa0] ss:$8 sps:$4 sm:$0xff]   ;;  %v5779_v14 = vld [vmem:[%s11614_s0 + $0xb0] ss:$8 sps:$4 sm:$0xff]  }
   0x6   :  { %1500 = vxpose.xlu0.c.b16.cont [2/8] %v5767_v5, 128  ;;  %v6076_v11 = vld [vmem:[%s11614_s0 + $0x20] ss:$8 sps:$4 sm:$0xff]   ;;  %v6093_v15 = vld [vmem:[%s11614_s0 + $0x30] ss:$8 sps:$4 sm:$0xff]   ;;  %v6227_v3 = vld [vmem:[%s11614_s0 + $0x14] ss:$8 sps:$4 sm:$0xff]  }
   0x7   :  { %v182_v16 = vld [vmem:[%s11615_s2 + $0x20] sm:$0xff]  ;;  %v183_v17 = vld [vmem:[%s11615_s2 + $0x28] sm:$0xff]  ;;  %v184_v23 = vld [vmem:[%s11615_s2 + $0x30] sm:$0xff] }
   0x8   :  { %1468 = vxpose.xlu1.c.b16.cont [2/8] %v6058_v7, 128  ;;  %214 = vst.msk [vmem:[#allocation3 + $0x20] sm:$0xff] %vm97_vm0, %v182_v16  ;;  %215 = vst.msk [vmem:[#allocation3 + $0x28] sm:$0xff] %vm97_vm0, %v183_v17  ;;  %v5785_v21 = vld [vmem:[%s11614_s0 + $0xc0] ss:$8 sps:$4 sm:$0xff]   ;;  %v185_v24 = vld [vmem:[%s11615_s2 + $0x38] sm:$0xff] }
   0x9   :  { %v6110_v22 = vld [vmem:[%s11614_s0 + $0x40] ss:$8 sps:$4 sm:$0xff]   ;;  %216 = vst.msk [vmem:[#allocation3 + $0x30] sm:$0xff] %vm97_vm0, %v184_v23  ;;  %217 = vst.msk [vmem:[#allocation3 + $0x38] sm:$0xff] %vm97_vm0, %v185_v24  ;;  %v5791_v28 = vld [vmem:[%s11614_s0 + $0xd0] ss:$8 sps:$4 sm:$0xff]  }
   0xa   :  { %1501 = vxpose.xlu0.c.b16.cont [3/8] %v5773_v10, 128  ;;  %v6128_v31 = vld [vmem:[%s11614_s0 + $0x50] ss:$8 sps:$4 sm:$0xff]   ;;  %v186_v33 = vld [vmem:[%s11615_s2 + $0x40] sm:$0xff]  ;;  %v187_v34 = vld [vmem:[%s11615_s2 + $0x48] sm:$0xff] }
   0xb   :  { %v668_v25 = vld [vmem:[#allocation3 + $0x10] sm:$0xff]  ;;  %v669_v26 = vld [vmem:[#allocation3 + $0x18] sm:$0xff]  ;;  %218 = vst.msk [vmem:[#allocation3 + $0x40] sm:$0xff] %vm97_vm0, %v186_v33  ;;  %219 = vst.msk [vmem:[#allocation3 + $0x48] sm:$0xff] %vm97_vm0, %v187_v34 }
   0xc   :  { %1469 = vxpose.xlu1.c.b16.cont [3/8] %v6076_v11, 128  ;;  %v666_v18 = vld [vmem:[#allocation3] sm:$0xff]  ;;  %v667_v19 = vld [vmem:[#allocation3 + $0x8] sm:$0xff]  ;;  %v699_v27 = vpack.c.bf16 %v669_v26, %v668_v25  ;;  %v188_v40 = vld [vmem:[%s11615_s2 + $0x50] sm:$0xff] }
   0xd   :  { %v698_v20 = vpack.c.bf16 %v667_v19, %v666_v18  ;;  %v5797_v35 = vld [vmem:[%s11614_s0 + $0xe0] ss:$8 sps:$4 sm:$0xff]   ;;  %v189_v41 = vld [vmem:[%s11615_s2 + $0x58] sm:$0xff]  ;;  %220 = vst.msk [vmem:[#allocation3 + $0x50] sm:$0xff] %vm97_vm0, %v188_v40  ;;  %v192_v50 = vld [vmem:[%s11615_s2 + $0x70] sm:$0xff] }
   0xe   :  { %1502 = vxpose.xlu0.c.b16.cont [4/8] %v5779_v14, 128  ;;  %v5800_v38 = vld [vmem:[%s11614_s0 + $0x60] ss:$8 sps:$4 sm:$0xff]   ;;  %221 = vst.msk [vmem:[#allocation3 + $0x58] sm:$0xff] %vm97_vm0, %v189_v41  ;;  %v5803_v44 = vld [vmem:[%s11614_s0 + $0xf0] ss:$8 sps:$4 sm:$0xff]   ;;  %224 = vst.msk [vmem:[#allocation3 + $0x70] sm:$0xff] %vm97_vm0, %v192_v50 }
   0xf   :  { %1115 = vmatpush1.bf16.msra.mxu0 %v698_v20  ;;  %v670_v29 = vld [vmem:[#allocation3 + $0x20] sm:$0xff]  ;;  %v671_v30 = vld [vmem:[#allocation3 + $0x28] sm:$0xff]  ;;  %v5806_v45 = vld [vmem:[%s11614_s0 + $0x70] ss:$8 sps:$4 sm:$0xff]  }
  0x10   :  { %1470 = vxpose.xlu1.c.b16.cont [4/8] %v6093_v15, 128  ;;  %1116 = vmatprep.subr.bf16.mxu0 %v11619_v1  ;;  %v700_v32 = vpack.c.bf16 %v671_v30, %v670_v29  ;;  %v672_v36 = vld [vmem:[#allocation3 + $0x30] sm:$0xff]  ;;  %v673_v37 = vld [vmem:[#allocation3 + $0x38] sm:$0xff]  ;;  %v482_v42 = vld [vmem:[%s11614_s0 + $0x80] sm:$0xff] }
  0x11   :  { %v701_v39 = vpack.c.bf16 %v673_v37, %v672_v36  ;;  %v483_v43 = vld [vmem:[%s11614_s0 + $0x88] sm:$0xff]  ;;  %v190_v46 = vld [vmem:[%s11615_s2 + $0x60] sm:$0xff]  ;;  %v193_v52 = vld [vmem:[%s11615_s2 + $0x78] sm:$0xff] }
  0x12   :  { %1503 = vxpose.xlu0.c.b16.cont [5/8] %v5785_v21, 128  ;;  %v191_v47 = vld [vmem:[%s11615_s2 + $0x68] sm:$0xff]  ;;  %v674_v48 = vld [vmem:[#allocation3 + $0x40] sm:$0xff]  ;;  %222 = vst.msk [vmem:[#allocation3 + $0x60] sm:$0xff] %vm97_vm0, %v190_v46  ;;  %225 = vst.msk [vmem:[#allocation3 + $0x78] sm:$0xff] %vm97_vm0, %v193_v52  ;;  %v6201_v58 = vcombine.high %v482_v42, %v483_v43 }
  0x13   :  { %1117 = vmatpush1.bf16.msra.mxu0 %v699_v27  ;;  %v675_v49 = vld [vmem:[#allocation3 + $0x48] sm:$0xff]  ;;  %223 = vst.msk [vmem:[#allocation3 + $0x68] sm:$0xff] %vm97_vm0, %v191_v47  ;;  %v194_v53 = vld [vmem:[%s11615_s2 + $0x80] sm:$0xff]  ;;  %v196_v55 = vld [vmem:[%s11615_s2 + $0x90] sm:$0xff] }
  0x14   :  { %1471 = vxpose.xlu1.c.b16.cont [5/8] %v6110_v22, 128  ;;  %1118 = vmatprep.subr.bf16.mxu0 %v11619_v1  ;;  %v702_v51 = vpack.c.bf16 %v675_v49, %v674_v48  ;;  %v195_v54 = vld [vmem:[%s11615_s2 + $0x88] sm:$0xff]  ;;  %226 = vst.msk [vmem:[#allocation3 + $0x80] sm:$0xff] %vm97_vm0, %v194_v53  ;;  %v197_v56 = vld [vmem:[%s11615_s2 + $0x98] sm:$0xff]  ;;  %v198_v57 = vld [vmem:[%s11615_s2 + $0xa0] sm:$0xff] }
  0x15   :  { %227 = vst.msk [vmem:[#allocation3 + $0x88] sm:$0xff] %vm97_vm0, %v195_v54  ;;  %228 = vst.msk [vmem:[#allocation3 + $0x90] sm:$0xff] %vm97_vm0, %v196_v55  ;;  %v199_v59 = vld [vmem:[%s11615_s2 + $0xa8] sm:$0xff]  ;;  %v200_v60 = vld [vmem:[%s11615_s2 + $0xb0] sm:$0xff] }
  0x16   :  { %1504 = vxpose.xlu0.c.b16.cont [6/8] %v5791_v28, 128  ;;  %229 = vst.msk [vmem:[#allocation3 + $0x98] sm:$0xff] %vm97_vm0, %v197_v56  ;;  %230 = vst.msk [vmem:[#allocation3 + $0xa0] sm:$0xff] %vm97_vm0, %v198_v57  ;;  %v201_v61 = vld [vmem:[%s11615_s2 + $0xb8] sm:$0xff]  ;;  %v676_v63 = vld [vmem:[#allocation3 + $0x50] sm:$0xff] }
  0x17   :  { %1119 = vmatpush1.bf16.msra.mxu0 %v700_v32  ;;  %v677_v0 = vld [vmem:[#allocation3 + $0x58] sm:$0xff]  ;;  %231 = vst.msk [vmem:[#allocation3 + $0xa8] sm:$0xff] %vm97_vm0, %v199_v59  ;;  %232 = vst.msk [vmem:[#allocation3 + $0xb0] sm:$0xff] %vm97_vm0, %v200_v60  ;;  %v202_v2 = vld [vmem:[%s11615_s2 + $0xc0] sm:$0xff] }
  0x18   :  { %1472 = vxpose.xlu1.c.b16.cont [6/8] %v6128_v31, 128  ;;  %1120 = vmatprep.subr.bf16.mxu0 %v11619_v1  ;;  %233 = vst.msk [vmem:[#allocation3 + $0xb8] sm:$0xff] %vm97_vm0, %v201_v61  ;;  %v703_v5 = vpack.c.bf16 %v677_v0, %v676_v63  ;;  %v203_v8 = vld [vmem:[%s11615_s2 + $0xc8] sm:$0xff]  ;;  %234 = vst.msk [vmem:[#allocation3 + $0xc0] sm:$0xff] %vm97_vm0, %v202_v2  ;;  %v204_v9 = vld [vmem:[%s11615_s2 + $0xd0] sm:$0xff] }
  0x19   :  { %v205_v10 = vld [vmem:[%s11615_s2 + $0xd8] sm:$0xff]  ;;  %235 = vst.msk [vmem:[#allocation3 + $0xc8] sm:$0xff] %vm97_vm0, %v203_v8  ;;  %236 = vst.msk [vmem:[#allocation3 + $0xd0] sm:$0xff] %vm97_vm0, %v204_v9  ;;  %v206_v12 = vld [vmem:[%s11615_s2 + $0xe0] sm:$0xff] }
  0x1a   :  { %1505 = vxpose.xlu0.c.b16.cont [7/8] %v5797_v35, 128  ;;  %237 = vst.msk [vmem:[#allocation3 + $0xd8] sm:$0xff] %vm97_vm0, %v205_v10  ;;  %v207_v13 = vld [vmem:[%s11615_s2 + $0xe8] sm:$0xff]  ;;  %v208_v14 = vld [vmem:[%s11615_s2 + $0xf0] sm:$0xff]  ;;  %v678_v16 = vld [vmem:[#allocation3 + $0x60] sm:$0xff] }
  0x1b   :  { %1121 = vmatpush1.bf16.msra.mxu0 %v701_v39  ;;  %v679_v17 = vld [vmem:[#allocation3 + $0x68] sm:$0xff]  ;;  %238 = vst.msk [vmem:[#allocation3 + $0xe0] sm:$0xff] %vm97_vm0, %v206_v12  ;;  %239 = vst.msk [vmem:[#allocation3 + $0xe8] sm:$0xff] %vm97_vm0, %v207_v13  ;;  %v209_v18 = vld [vmem:[%s11615_s2 + $0xf8] sm:$0xff] }
  0x1c   :  { %1473 = vxpose.xlu1.c.b16.cont [7/8] %v5800_v38, 128  ;;  %1122 = vmatprep.subr.bf16.mxu0 %v11619_v1  ;;  %240 = vst.msk [vmem:[#allocation3 + $0xf0] sm:$0xff] %vm97_vm0, %v208_v14  ;;  %v704_v19 = vpack.c.bf16 %v679_v17, %v678_v16  ;;  %241 = vst.msk [vmem:[#allocation3 + $0xf8] sm:$0xff] %vm97_vm0, %v209_v18  ;;  %v33_v20 = vld [vmem:[%s11616_s1 + $0x80] sm:$0xff]  ;;  %v34_v21 = vld [vmem:[%s11616_s1 + $0x88] sm:$0xff] }
  0x1d   :  { %v681_v23 = vld [vmem:[#allocation3 + $0x78] sm:$0xff]  ;;  %114 = vst.msk [vmem:[#allocation2 + $0x80] sm:$0xff] %vm97_vm0, %v33_v20  ;;  %115 = vst.msk [vmem:[#allocation2 + $0x88] sm:$0xff] %vm97_vm0, %v34_v21  ;;  %v6273_v24 = vld [vmem:[%s11614_s0 + $0xa4] ss:$8 sps:$4 sm:$0xff]  }
  0x1e   :  { %1506 = vxpose.xlu0.c.b16.end [8/8] %v5803_v44, 128  ;;  %v6278_v25 = vld [vmem:[%s11614_s0 + $0x24] ss:$8 sps:$4 sm:$0xff]   ;;  %v6293_v32 = vld [vmem:[%s11614_s0 + $0xb4] ss:$8 sps:$4 sm:$0xff]  }
  0x1f   :  { %1123 = vmatpush1.bf16.msra.mxu0 %v702_v51  ;;  %v17_v27 = vld [vmem:[%s11616_s1] sm:$0xff]  ;;  %v18_v28 = vld [vmem:[%s11616_s1 + $0x8] sm:$0xff]  ;;  %v6298_v33 = vld [vmem:[%s11614_s0 + $0x34] ss:$8 sps:$4 sm:$0xff]  }
  0x20   :  { %1474 = vxpose.xlu1.c.b16.end [8/8] %v5806_v45, 128  ;;  %1124 = vmatprep.subr.bf16.mxu0 %v11619_v1  ;;  %v682_v29 = vld [vmem:[#allocation3 + $0x80] sm:$0xff]  ;;  %v683_v30 = vld [vmem:[#allocation3 + $0x88] sm:$0xff]  ;;  %98 = vst.msk [vmem:[#allocation2] sm:$0xff] %vm97_vm0, %v17_v27  ;;  %99 = vst.msk [vmem:[#allocation2 + $0x8] sm:$0xff] %vm97_vm0, %v18_v28 }
  0x21   :  { %v6301_v34 = vld [vmem:[#allocation3 + $0x90] sm:$0xff]  ;;  %v6303_v35 = vld [vmem:[#allocation3 + $0x98] sm:$0xff]  ;;  %v6315_v38 = vld [vmem:[%s11614_s0 + $0xc4] ss:$8 sps:$4 sm:$0xff]   ;;  %v706_v39 = vpack.c.bf16 %v683_v30, %v682_v29 }
  0x22   :  { %1515 = vxpose.xlu0.c.b16.start [1/8] %v6201_v58, 128  ;;  %v35_v36 = vld [vmem:[%s11616_s1 + $0x90] sm:$0xff]  ;;  %v36_v37 = vld [vmem:[%s11616_s1 + $0x98] sm:$0xff]  ;;  %v6325_v43 = vld [vmem:[%s11614_s0 + $0x44] ss:$8 sps:$4 sm:$0xff]   ;;  %v707_v57 = vpack.c.bf16 %v6303_v35, %v6301_v34 }
  0x23   :  { %1125 = vmatpush1.bf16.msra.mxu0 %v703_v5  ;;  %116 = vst.msk [vmem:[#allocation2 + $0x90] sm:$0xff] %vm97_vm0, %v35_v36  ;;  %117 = vst.msk [vmem:[#allocation2 + $0x98] sm:$0xff] %vm97_vm0, %v36_v37  ;;  %v19_v42 = vld [vmem:[%s11616_s1 + $0x10] sm:$0xff]  ;;  %v20_v45 = vld [vmem:[%s11616_s1 + $0x18] sm:$0xff] }
  0x24   :  { %1483 = vxpose.xlu1.c.b16.start [1/8] %v6052_v6, 128  ;;  %1126 = vmatprep.subr.bf16.mxu0 %v11619_v1  ;;  %v680_v6 = vld [vmem:[#allocation3 + $0x70] sm:$0xff]  ;;  %v562_v40 = vld [vmem:[#allocation2 + $0x80] sm:$0xff]  ;;  %v563_v41 = vld [vmem:[#allocation2 + $0x88] sm:$0xff]  ;;  %100 = vst.msk [vmem:[#allocation2 + $0x10] sm:$0xff] %vm97_vm0, %v19_v42 }
  0x25   :  { %v705_v26 = vpack.c.bf16 %v681_v23, %v680_v6  ;;  %v634_v44 = vpack.c.bf16 %v563_v41, %v562_v40  ;;  %v37_v46 = vld [vmem:[%s11616_s1 + $0xa0] sm:$0xff]  ;;  %v38_v47 = vld [vmem:[%s11616_s1 + $0xa8] sm:$0xff]  ;;  %101 = vst.msk [vmem:[#allocation2 + $0x18] sm:$0xff] %vm97_vm0, %v20_v45  ;;  %v39_v50 = vld [vmem:[%s11616_s1 + $0xb0] sm:$0xff] }
  0x26   :  { %1516 = vxpose.xlu0.c.b16.cont [2/8] %v5769_v62, 128  ;;  %118 = vst.msk [vmem:[#allocation2 + $0xa0] sm:$0xff] %vm97_vm0, %v37_v46  ;;  %119 = vst.msk [vmem:[#allocation2 + $0xa8] sm:$0xff] %vm97_vm0, %v38_v47  ;;  %v21_v48 = vld [vmem:[%s11616_s1 + $0x20] sm:$0xff]  ;;  %v22_v49 = vld [vmem:[%s11616_s1 + $0x28] sm:$0xff] }
  0x27   :  { %1127 = vmatpush1.bf16.msra.mxu0 %v704_v19  ;;  %v6351_v51 = vld [vmem:[#allocation3 + $0xa0] sm:$0xff]  ;;  %v6353_v52 = vld [vmem:[#allocation3 + $0xa8] sm:$0xff]  ;;  %5154 = vmatprep.subr.bf16.mxu1 %v634_v44  ;;  %102 = vst.msk [vmem:[#allocation2 + $0x20] sm:$0xff] %vm97_vm0, %v21_v48  ;;  %103 = vst.msk [vmem:[#allocation2 + $0x28] sm:$0xff] %vm97_vm0, %v22_v49 }
  0x28   :  { %1484 = vxpose.xlu1.c.b16.cont [2/8] %v6227_v3, 128  ;;  %1128 = vmatprep.subr.bf16.mxu0 %v11619_v1  ;;  %v40_v53 = vld [vmem:[%s11616_s1 + $0xb8] sm:$0xff]  ;;  %120 = vst.msk [vmem:[#allocation2 + $0xb0] sm:$0xff] %vm97_vm0, %v39_v50  ;;  %v23_v54 = vld [vmem:[%s11616_s1 + $0x30] sm:$0xff]  ;;  %v546_v59 = vld [vmem:[#allocation2] sm:$0xff]  ;;  %v708_v19 = vpack.c.bf16 %v6353_v52, %v6351_v51 }
  0x29   :  { %v24_v55 = vld [vmem:[%s11616_s1 + $0x38] sm:$0xff]  ;;  %v547_v60 = vld [vmem:[#allocation2 + $0x8] sm:$0xff]  ;;  %121 = vst.msk [vmem:[#allocation2 + $0xb8] sm:$0xff] %vm97_vm0, %v40_v53  ;;  %104 = vst.msk [vmem:[#allocation2 + $0x30] sm:$0xff] %vm97_vm0, %v23_v54 }
  0x2a   :  { %1517 = vxpose.xlu0.c.b16.cont [3/8] %v6273_v24, 128  ;;  %v6371_v56 = vld [vmem:[%s11614_s0 + $0xd4] ss:$8 sps:$4 sm:$0xff]   ;;  %105 = vst.msk [vmem:[#allocation2 + $0x38] sm:$0xff] %vm97_vm0, %v24_v55  ;;  %v41_v61 = vld [vmem:[%s11616_s1 + $0xc0] sm:$0xff]  ;;  %v626_v63 = vpack.c.bf16 %v547_v60, %v546_v59  ;;  %v42_v0 = vld [vmem:[%s11616_s1 + $0xc8] sm:$0xff] }
  0x2b   :  { %1129 = vmatpush1.bf16.msra.mxu0 %v705_v26  ;;  %v6384_v62 = vld [vmem:[%s11614_s0 + $0x54] ss:$8 sps:$4 sm:$0xff]   ;;  %122 = vst.msk [vmem:[#allocation2 + $0xc0] sm:$0xff] %vm97_vm0, %v41_v61  ;;  %v25_v2 = vld [vmem:[%s11616_s1 + $0x40] sm:$0xff]  ;;  %v26_v5 = vld [vmem:[%s11616_s1 + $0x48] sm:$0xff] }
  0x2c   :  { %1485 = vxpose.xlu1.c.b16.cont [3/8] %v6278_v25, 128  ;;  %1130 = vmatprep.subr.bf16.mxu0 %v11619_v1  ;;  %123 = vst.msk [vmem:[#allocation2 + $0xc8] sm:$0xff] %vm97_vm0, %v42_v0  ;;  %106 = vst.msk [vmem:[#allocation2 + $0x40] sm:$0xff] %vm97_vm0, %v25_v2  ;;  %v43_v8 = vld [vmem:[%s11616_s1 + $0xd0] sm:$0xff]  ;;  %v44_v9 = vld [vmem:[%s11616_s1 + $0xd8] sm:$0xff] }
  0x2d   :  { %107 = vst.msk [vmem:[#allocation2 + $0x48] sm:$0xff] %vm97_vm0, %v26_v5  ;;  %v27_v10 = vld [vmem:[%s11616_s1 + $0x50] sm:$0xff]  ;;  %v689_v13 = vld [vmem:[#allocation3 + $0xb8] sm:$0xff]  ;;  %5155 = vmatpush3.bf16.msra.mxu1 %v626_v63  ;;  %124 = vst.msk [vmem:[#allocation2 + $0xd0] sm:$0xff] %vm97_vm0, %v43_v8 }
  0x2e   :  { %1518 = vxpose.xlu0.c.b16.cont [4/8] %v6293_v32, 128  ;;  %v688_v12 = vld [vmem:[#allocation3 + $0xb0] sm:$0xff]  ;;  %v565_v16 = vld [vmem:[#allocation2 + $0x98] sm:$0xff]  ;;  %125 = vst.msk [vmem:[#allocation2 + $0xd8] sm:$0xff] %vm97_vm0, %v44_v9  ;;  %108 = vst.msk [vmem:[#allocation2 + $0x50] sm:$0xff] %vm97_vm0, %v27_v10 }
  0x2f   :  { %1131 = vmatpush1.bf16.msra.mxu0 %v706_v39  ;;  %v564_v14 = vld [vmem:[#allocation2 + $0x90] sm:$0xff]  ;;  %v28_v17 = vld [vmem:[%s11616_s1 + $0x58] sm:$0xff]  ;;  %v6420_v18 = vld [vmem:[%s11614_s0 + $0xe4] ss:$8 sps:$4 sm:$0xff]   ;;  %v709_v41 = vpack.c.bf16 %v689_v13, %v688_v12 }
  0x30   :  { %1486 = vxpose.xlu1.c.b16.cont [4/8] %v6298_v33, 128  ;;  %1132 = vmatprep.subr.bf16.mxu0 %v11619_v1  ;;  %v635_v20 = vpack.c.bf16 %v565_v16, %v564_v14  ;;  %v548_v21 = vld [vmem:[#allocation2 + $0x10] sm:$0xff]  ;;  %109 = vst.msk [vmem:[#allocation2 + $0x58] sm:$0xff] %vm97_vm0, %v28_v17  ;;  %v45_v6 = vld [vmem:[%s11616_s1 + $0xe0] sm:$0xff]  ;;  %v46_v23 = vld [vmem:[%s11616_s1 + $0xe8] sm:$0xff] }
  0x31   :  { %v549_v26 = vld [vmem:[#allocation2 + $0x18] sm:$0xff]  ;;  %v566_v27 = vld [vmem:[#allocation2 + $0xa0] sm:$0xff]  ;;  %v567_v28 = vld [vmem:[#allocation2 + $0xa8] sm:$0xff]  ;;  %126 = vst.msk [vmem:[#allocation2 + $0xe0] sm:$0xff] %vm97_vm0, %v45_v6 }
  0x32   :  { %1519 = vxpose.xlu0.c.b16.cont [5/8] %v6315_v38, 128  ;;  %127 = vst.msk [vmem:[#allocation2 + $0xe8] sm:$0xff] %vm97_vm0, %v46_v23  ;;  %5156 = vmatprep.subr.bf16.mxu1 %v635_v20  ;;  %v627_v29 = vpack.c.bf16 %v549_v26, %v548_v21  ;;  %v636_v30 = vpack.c.bf16 %v567_v28, %v566_v27  ;;  %v550_v34 = vld [vmem:[#allocation2 + $0x20] sm:$0xff]  ;;  %v551_v35 = vld [vmem:[#allocation2 + $0x28] sm:$0xff]  ;;  %v568_v36 = vld [vmem:[#allocation2 + $0xb0] sm:$0xff] }
  0x33   :  { %1133 = vmatpush1.bf16.msra.mxu0 %v707_v57  ;;  %v6438_v37 = vld [vmem:[%s11614_s0 + $0x64] ss:$8 sps:$4 sm:$0xff]   ;;  %v569_v39 = vld [vmem:[#allocation2 + $0xb8] sm:$0xff]  ;;  %v628_v44 = vpack.c.bf16 %v551_v35, %v550_v34  ;;  %v552_v49 = vld [vmem:[#allocation2 + $0x30] sm:$0xff] }
  0x34   :  { %1487 = vxpose.xlu1.c.b16.cont [5/8] %v6325_v43, 128  ;;  %1134 = vmatprep.subr.bf16.mxu0 %v11619_v1  ;;  %v6444_v40 = vld [vmem:[%s11614_s0 + $0xf4] ss:$8 sps:$4 sm:$0xff]   ;;  %v690_v42 = vld [vmem:[#allocation3 + $0xc0] sm:$0xff]  ;;  %v30_v46 = vld [vmem:[%s11616_s1 + $0x68] sm:$0xff]  ;;  %v637_v48 = vpack.c.bf16 %v569_v39, %v568_v36 }
  0x35   :  { %5157 = vmatpush3.bf16.msra.mxu1 %v627_v29  ;;  %v29_v45 = vld [vmem:[%s11616_s1 + $0x60] sm:$0xff]  ;;  %v691_v47 = vld [vmem:[#allocation3 + $0xc8] sm:$0xff]  ;;  %v553_v50 = vld [vmem:[#allocation2 + $0x38] sm:$0xff]  ;;  %111 = vst.msk [vmem:[#allocation2 + $0x68] sm:$0xff] %vm97_vm0, %v30_v46 }
  0x36   :  { %1520 = vxpose.xlu0.c.b16.cont [6/8] %v6371_v56, 128  ;;  %5158 = vmatprep.subr.bf16.mxu1 %v636_v30  ;;  %110 = vst.msk [vmem:[#allocation2 + $0x60] sm:$0xff] %vm97_vm0, %v29_v45  ;;  %v6458_v51 = vld [vmem:[%s11614_s0 + $0x74] ss:$8 sps:$4 sm:$0xff]   ;;  %v570_v52 = vld [vmem:[#allocation2 + $0xc0] sm:$0xff]  ;;  %v571_v53 = vld [vmem:[#allocation2 + $0xc8] sm:$0xff]  ;;  %v710_v63 = vpack.c.bf16 %v691_v47, %v690_v42  ;;  %v629_v0 = vpack.c.bf16 %v553_v50, %v552_v49 }
  0x37   :  { %1135 = vmatpush1.bf16.msra.mxu0 %v708_v19  ;;  %v692_v54 = vld [vmem:[#allocation3 + $0xd0] sm:$0xff]  ;;  %v693_v55 = vld [vmem:[#allocation3 + $0xd8] sm:$0xff]  ;;  %v554_v57 = vld [vmem:[#allocation2 + $0x40] sm:$0xff]  ;;  %v638_v9 = vpack.c.bf16 %v571_v53, %v570_v52 }
  0x38   :  { %1488 = vxpose.xlu1.c.b16.cont [6/8] %v6384_v62, 128  ;;  %1136 = vmatprep.subr.bf16.mxu0 %v11619_v1  ;;  %v555_v59 = vld [vmem:[#allocation2 + $0x48] sm:$0xff]  ;;  %v47_v60 = vld [vmem:[%s11616_s1 + $0xf0] sm:$0xff]  ;;  %v48_v61 = vld [vmem:[%s11616_s1 + $0xf8] sm:$0xff]  ;;  %v711_v6 = vpack.c.bf16 %v693_v55, %v692_v54 }
  0x39   :  { %5159 = vmatpush3.bf16.msra.mxu1 %v628_v44  ;;  %v572_v2 = vld [vmem:[#allocation2 + $0xd0] sm:$0xff]  ;;  %v573_v5 = vld [vmem:[#allocation2 + $0xd8] sm:$0xff]  ;;  %128 = vst.msk [vmem:[#allocation2 + $0xf0] sm:$0xff] %vm97_vm0, %v47_v60  ;;  %129 = vst.msk [vmem:[#allocation2 + $0xf8] sm:$0xff] %vm97_vm0, %v48_v61  ;;  %v630_v27 = vpack.c.bf16 %v555_v59, %v554_v57 }
  0x3a   :  { %1521 = vxpose.xlu0.c.b16.cont [7/8] %v6420_v18, 128  ;;  %v31_v8 = vld [vmem:[%s11616_s1 + $0x70] sm:$0xff]  ;;  %5160 = vmatprep.subr.bf16.mxu1 %v637_v48  ;;  %v32_v10 = vld [vmem:[%s11616_s1 + $0x78] sm:$0xff]  ;;  %v65_v12 = vld [vmem:[%s11616_s1 + $0x180] sm:$0xff]  ;;  %v639_v28 = vpack.c.bf16 %v573_v5, %v572_v2 }
  0x3b   :  { %1137 = vmatpush1.bf16.msra.mxu0 %v709_v41  ;;  %112 = vst.msk [vmem:[#allocation2 + $0x70] sm:$0xff] %vm97_vm0, %v31_v8  ;;  %v66_v13 = vld [vmem:[%s11616_s1 + $0x188] sm:$0xff]  ;;  %113 = vst.msk [vmem:[#allocation2 + $0x78] sm:$0xff] %vm97_vm0, %v32_v10  ;;  %v49_v14 = vld [vmem:[%s11616_s1 + $0x100] sm:$0xff] }
  0x3c   :  { %1489 = vxpose.xlu1.c.b16.cont [7/8] %v6438_v37, 128  ;;  %1138 = vmatprep.subr.bf16.mxu0 %v11619_v1  ;;  %146 = vst.msk [vmem:[#allocation2 + $0x180] sm:$0xff] %vm97_vm0, %v65_v12  ;;  %147 = vst.msk [vmem:[#allocation2 + $0x188] sm:$0xff] %vm97_vm0, %v66_v13  ;;  %v50_v16 = vld [vmem:[%s11616_s1 + $0x108] sm:$0xff]  ;;  %v67_v17 = vld [vmem:[%s11616_s1 + $0x190] sm:$0xff] }
  0x3d   :  { %130 = vst.msk [vmem:[#allocation2 + $0x100] sm:$0xff] %vm97_vm0, %v49_v14  ;;  %131 = vst.msk [vmem:[#allocation2 + $0x108] sm:$0xff] %vm97_vm0, %v50_v16  ;;  %v68_v19 = vld [vmem:[%s11616_s1 + $0x198] sm:$0xff]  ;;  %v51_v20 = vld [vmem:[%s11616_s1 + $0x110] sm:$0xff]  ;;  %5161 = vmatpush3.bf16.msra.mxu1 %v629_v0 }
  0x3e   :  { %1522 = vxpose.xlu0.c.b16.end [8/8] %v6444_v40, 128  ;;  %148 = vst.msk [vmem:[#allocation2 + $0x190] sm:$0xff] %vm97_vm0, %v67_v17  ;;  %v52_v21 = vld [vmem:[%s11616_s1 + $0x118] sm:$0xff]  ;;  %v694_v23 = vld [vmem:[#allocation3 + $0xe0] sm:$0xff]  ;;  %v695_v26 = vld [vmem:[#allocation3 + $0xe8] sm:$0xff]  ;;  %5162 = vmatprep.subr.bf16.mxu1 %v638_v9 }
  0x3f   :  { %1139 = vmatpush1.bf16.msra.mxu0 %v710_v63  ;;  %149 = vst.msk [vmem:[#allocation2 + $0x198] sm:$0xff] %vm97_vm0, %v68_v19  ;;  %132 = vst.msk [vmem:[#allocation2 + $0x110] sm:$0xff] %vm97_vm0, %v51_v20  ;;  %v556_v29 = vld [vmem:[#allocation2 + $0x50] sm:$0xff]  ;;  %v557_v30 = vld [vmem:[#allocation2 + $0x58] sm:$0xff]  ;;  %v712_v41 = vpack.c.bf16 %v695_v26, %v694_v23 }
  0x40   :  { %1490 = vxpose.xlu1.c.b16.end [8/8] %v6458_v51, 128  ;;  %133 = vst.msk [vmem:[#allocation2 + $0x118] sm:$0xff] %vm97_vm0, %v52_v21  ;;  %1140 = vmatprep.subr.bf16.mxu0 %v11619_v1  ;;  %v5809_v34 = vld [vmem:[%s11614_s0 + $0x180] ss:$8 sps:$4 sm:$0xff]   ;;  %v696_v42 = vld [vmem:[#allocation3 + $0xf0] sm:$0xff]  ;;  %v631_v44 = vpack.c.bf16 %v557_v30, %v556_v29  ;;  %v697_v46 = vld [vmem:[#allocation3 + $0xf8] sm:$0xff] }
  0x41   :  { %v574_v35 = vld [vmem:[#allocation2 + $0xe0] sm:$0xff]  ;;  %v575_v36 = vld [vmem:[#allocation2 + $0xe8] sm:$0xff]  ;;  %5163 = vmatpush3.bf16.msra.mxu1 %v630_v27  ;;  %v5813_v45 = vld [vmem:[%s11614_s0 + $0x190] ss:$8 sps:$4 sm:$0xff]   ;;  %v713_v53 = vpack.c.bf16 %v697_v46, %v696_v42 }
  0x42   :  { %v6520_v39 = vld [vmem:[%s11614_s0 + $0x100] ss:$8 sps:$4 sm:$0xff]   ;;  %1563 = vxpose.xlu0.c.b16.start [1/8] %v5809_v34, 128  ;;  %5164 = vmatprep.subr.bf16.mxu1 %v639_v28  ;;  %v640_v47 = vpack.c.bf16 %v575_v36, %v574_v35  ;;  %v576_v50 = vld [vmem:[#allocation2 + $0xf0] sm:$0xff]  ;;  %v577_v52 = vld [vmem:[#allocation2 + $0xf8] sm:$0xff] }
  0x43   :  { %1141 = vmatpush1.bf16.msra.mxu0 %v711_v6  ;;  %v558_v48 = vld [vmem:[#allocation2 + $0x60] sm:$0xff]  ;;  %v559_v49 = vld [vmem:[#allocation2 + $0x68] sm:$0xff]  ;;  %v560_v55 = vld [vmem:[#allocation2 + $0x70] sm:$0xff]  ;;  %v641_v59 = vpack.c.bf16 %v577_v52, %v576_v50 }
  0x44   :  { %1142 = vmatprep.subr.bf16.mxu0 %v11619_v1  ;;  %1531 = vxpose.xlu1.c.b16.start [1/8] %v6520_v39, 128  ;;  %v632_v54 = vpack.c.bf16 %v559_v49, %v558_v48  ;;  %v6530_v57 = vld [vmem:[%s11614_s0 + $0x110] ss:$8 sps:$4 sm:$0xff]   ;;  %v5817_v61 = vld [vmem:[%s11614_s0 + $0x1a0] ss:$8 sps:$4 sm:$0xff]  }
  0x45   :  { %5165 = vmatpush3.bf16.msra.mxu1 %v631_v44  ;;  %v561_v60 = vld [vmem:[#allocation2 + $0x78] sm:$0xff]  ;;  %v69_v63 = vld [vmem:[%s11616_s1 + $0x1a0] sm:$0xff]  ;;  %v595_v2 = vld [vmem:[#allocation2 + $0x188] sm:$0xff] }
  0x46   :  { %1564 = vxpose.xlu0.c.b16.cont [2/8] %v5813_v45, 128  ;;  %5166 = vmatprep.subr.bf16.mxu1 %v640_v47  ;;  %v594_v0 = vld [vmem:[#allocation2 + $0x180] sm:$0xff]  ;;  %v70_v5 = vld [vmem:[%s11616_s1 + $0x1a8] sm:$0xff]  ;;  %150 = vst.msk [vmem:[#allocation2 + $0x1a0] sm:$0xff] %vm97_vm0, %v69_v63  ;;  %v633_v12 = vpack.c.bf16 %v561_v60, %v560_v55  ;;  %v5821_v13 = vld [vmem:[%s11614_s0 + $0x1b0] ss:$8 sps:$4 sm:$0xff]  }
  0x47   :  { %1143 = vmatpush1.bf16.msra.mxu0 %v712_v41  ;;  %151 = vst.msk [vmem:[#allocation2 + $0x1a8] sm:$0xff] %vm97_vm0, %v70_v5  ;;  %v6548_v8 = vld [vmem:[%s11614_s0 + $0x120] ss:$8 sps:$4 sm:$0xff]   ;;  %v650_v14 = vpack.c.bf16 %v595_v2, %v594_v0  ;;  %v6565_v16 = vld [vmem:[%s11614_s0 + $0x130] ss:$8 sps:$4 sm:$0xff]  }
  0x48   :  { %1144 = vmatprep.subr.bf16.mxu0 %v11619_v1  ;;  %1532 = vxpose.xlu1.c.b16.cont [2/8] %v6530_v57, 128  ;;  %v53_v9 = vld [vmem:[%s11616_s1 + $0x120] sm:$0xff]  ;;  %v54_v10 = vld [vmem:[%s11616_s1 + $0x128] sm:$0xff]  ;;  %v71_v20 = vld [vmem:[%s11616_s1 + $0x1b0] sm:$0xff] }
  0x49   :  { %5167 = vmatpush3.bf16.msra.mxu1 %v632_v54  ;;  %134 = vst.msk [vmem:[#allocation2 + $0x120] sm:$0xff] %vm97_vm0, %v53_v9  ;;  %135 = vst.msk [vmem:[#allocation2 + $0x128] sm:$0xff] %vm97_vm0, %v54_v10  ;;  %v5825_v17 = vld [vmem:[%s11614_s0 + $0x1c0] ss:$8 sps:$4 sm:$0xff]   ;;  %v6593_v21 = vld [vmem:[%s11614_s0 + $0x150] ss:$8 sps:$4 sm:$0xff]  }
  0x4a   :  { %1565 = vxpose.xlu0.c.b16.cont [3/8] %v5817_v61, 128  ;;  %5168 = vmatprep.subr.bf16.mxu1 %v641_v59  ;;  %v6576_v19 = vld [vmem:[%s11614_s0 + $0x140] ss:$8 sps:$4 sm:$0xff]   ;;  %152 = vst.msk [vmem:[#allocation2 + $0x1b0] sm:$0xff] %vm97_vm0, %v71_v20  ;;  %v55_v6 = vld [vmem:[%s11616_s1 + $0x130] sm:$0xff]  ;;  %v56_v23 = vld [vmem:[%s11616_s1 + $0x138] sm:$0xff] }
  0x4b   :  { %1145 = vmatpush1.bf16.msra.mxu0 %v713_v53  ;;  %v5833_v26 = vld [vmem:[%s11614_s0 + $0x1e0] ss:$8 sps:$4 sm:$0xff]   ;;  %136 = vst.msk [vmem:[#allocation2 + $0x130] sm:$0xff] %vm97_vm0, %v55_v6  ;;  %137 = vst.msk [vmem:[#allocation2 + $0x138] sm:$0xff] %vm97_vm0, %v56_v23  ;;  %v5837_v28 = vld [vmem:[%s11614_s0 + $0x1f0] ss:$8 sps:$4 sm:$0xff]  }
  0x4c   :  { %1533 = vxpose.xlu1.c.b16.cont [3/8] %v6548_v8, 128  ;;  %v6611_v27 = vld [vmem:[%s11614_s0 + $0x160] ss:$8 sps:$4 sm:$0xff]   ;;  %v75_v34 = vld [vmem:[%s11616_s1 + $0x1d0] sm:$0xff]  ;;  %v76_v35 = vld [vmem:[%s11616_s1 + $0x1d8] sm:$0xff] }
  0x4d   :  { %5169 = vmatpush3.bf16.msra.mxu1 %v633_v12  ;;  %v74_v29 = vld [vmem:[%s11616_s1 + $0x1c8] sm:$0xff]  ;;  %v59_v36 = vld [vmem:[%s11616_s1 + $0x150] sm:$0xff]  ;;  %156 = vst.msk [vmem:[#allocation2 + $0x1d0] sm:$0xff] %vm97_vm0, %v75_v34  ;;  %157 = vst.msk [vmem:[#allocation2 + $0x1d8] sm:$0xff] %vm97_vm0, %v76_v35 }
  0x4e   :  { %1147 = vmatmul.mubr.bf16.vlgmr.msra.gmra.mrb[0].mxu0 %v6047_v4  ;;  %1566 = vxpose.xlu0.c.b16.cont [4/8] %v5821_v13, 128  ;;  %v5829_v4 = vld [vmem:[%s11614_s0 + $0x1d0] ss:$8 sps:$4 sm:$0xff]   ;;  %v58_v30 = vld [vmem:[%s11616_s1 + $0x148] sm:$0xff]  ;;  %155 = vst.msk [vmem:[#allocation2 + $0x1c8] sm:$0xff] %vm97_vm0, %v74_v29  ;;  %140 = vst.msk [vmem:[#allocation2 + $0x150] sm:$0xff] %vm97_vm0, %v59_v36 }
  0x4f   :  { %1154 = vmatprep.mubr.bf16.mxu0 %v6227_v3  ;;  %5266 = vmatprep.subr.bf16.mxu1 %v650_v14  ;;  %v72_v3 = vld [vmem:[%s11616_s1 + $0x1b8] sm:$0xff]  ;;  %139 = vst.msk [vmem:[#allocation2 + $0x148] sm:$0xff] %vm97_vm0, %v58_v30  ;;  %v77_v42 = vld [vmem:[%s11616_s1 + $0x1e0] sm:$0xff]  ;;  %v78_v44 = vld [vmem:[%s11616_s1 + $0x1e8] sm:$0xff] }
  0x50   :  { %1534 = vxpose.xlu1.c.b16.cont [4/8] %v6565_v16, 128  ;;  %153 = vst.msk [vmem:[#allocation2 + $0x1b8] sm:$0xff] %vm97_vm0, %v72_v3  ;;  %v60_v41 = vld [vmem:[%s11616_s1 + $0x158] sm:$0xff]  ;;  %v514_v45 = vld [vmem:[%s11614_s0 + $0x180] sm:$0xff]  ;;  %v515_v46 = vld [vmem:[%s11614_s0 + $0x188] sm:$0xff] }
  0x51   :  { %141 = vst.msk [vmem:[#allocation2 + $0x158] sm:$0xff] %vm97_vm0, %v60_v41  ;;  %158 = vst.msk [vmem:[#allocation2 + $0x1e0] sm:$0xff] %vm97_vm0, %v77_v42  ;;  %v61_v47 = vld [vmem:[%s11616_s1 + $0x160] sm:$0xff]  ;;  %v499_v49 = vld [vmem:[%s11614_s0 + $0x108] sm:$0xff]  ;;  %v6687_v54 = vcombine.high %v514_v45, %v515_v46 }
  0x52   :  { %1567 = vxpose.xlu0.c.b16.cont [5/8] %v5825_v17, 128  ;;  %159 = vst.msk [vmem:[#allocation2 + $0x1e8] sm:$0xff] %vm97_vm0, %v78_v44  ;;  %v498_v48 = vld [vmem:[%s11614_s0 + $0x100] sm:$0xff]  ;;  %v62_v50 = vld [vmem:[%s11616_s1 + $0x168] sm:$0xff]  ;;  %142 = vst.msk [vmem:[#allocation2 + $0x160] sm:$0xff] %vm97_vm0, %v61_v47 }
  0x53   :  { %v516_v52 = vld [vmem:[%s11614_s0 + $0x190] sm:$0xff]  ;;  %143 = vst.msk [vmem:[#allocation2 + $0x168] sm:$0xff] %vm97_vm0, %v62_v50  ;;  %v80_v59 = vld [vmem:[%s11616_s1 + $0x1f8] sm:$0xff]  ;;  %v6710_v63 = vcombine.high %v498_v48, %v499_v49  ;;  %v579_v9 = vld [vmem:[#allocation2 + $0x108] sm:$0xff] }
  0x54   :  { %1535 = vxpose.xlu1.c.b16.cont [5/8] %v6576_v19, 128  ;;  %v6683_v53 = vld [vmem:[%s11614_s0 + $0x170] ss:$8 sps:$4 sm:$0xff]   ;;  %161 = vst.msk [vmem:[#allocation2 + $0x1f8] sm:$0xff] %vm97_vm0, %v80_v59  ;;  %v518_v10 = vld [vmem:[%s11614_s0 + $0x1a0] sm:$0xff]  ;;  %v519_v12 = vld [vmem:[%s11614_s0 + $0x1a8] sm:$0xff] }
  0x55   :  { %v79_v55 = vld [vmem:[%s11616_s1 + $0x1f0] sm:$0xff]  ;;  %v64_v61 = vld [vmem:[%s11616_s1 + $0x178] sm:$0xff]  ;;  %v502_v20 = vld [vmem:[%s11614_s0 + $0x120] sm:$0xff]  ;;  %v6738_v6 = vcombine.high %v518_v10, %v519_v12 }
  0x56   :  { %1155 = vmatmul.mubr.bf16.gmra.mrb[4].mxu0 %v6058_v7  ;;  %1568 = vxpose.xlu0.c.b16.cont [6/8] %v5829_v4, 128  ;;  %v73_v7 = vld [vmem:[%s11616_s1 + $0x1c0] sm:$0xff]  ;;  %v63_v60 = vld [vmem:[%s11616_s1 + $0x170] sm:$0xff]  ;;  %160 = vst.msk [vmem:[#allocation2 + $0x1f0] sm:$0xff] %vm97_vm0, %v79_v55  ;;  %145 = vst.msk [vmem:[#allocation2 + $0x178] sm:$0xff] %vm97_vm0, %v64_v61 }
  0x57   :  { %1162 = vmatprep.mubr.bf16.mxu0 %v6278_v25  ;;  %154 = vst.msk [vmem:[#allocation2 + $0x1c0] sm:$0xff] %vm97_vm0, %v73_v7  ;;  %v57_v25 = vld [vmem:[%s11616_s1 + $0x140] sm:$0xff]  ;;  %144 = vst.msk [vmem:[#allocation2 + $0x170] sm:$0xff] %vm97_vm0, %v63_v60  ;;  %v500_v0 = vld [vmem:[%s11614_s0 + $0x110] sm:$0xff] }
  0x58   :  { %1536 = vxpose.xlu1.c.b16.cont [6/8] %v6593_v21, 128  ;;  %138 = vst.msk [vmem:[#allocation2 + $0x140] sm:$0xff] %vm97_vm0, %v57_v25  ;;  %v501_v2 = vld [vmem:[%s11614_s0 + $0x118] sm:$0xff]  ;;  %v596_v13 = vld [vmem:[#allocation2 + $0x190] sm:$0xff]  ;;  %v503_v3 = vld [vmem:[%s11614_s0 + $0x128] sm:$0xff] }
  0x59   :  { %v597_v14 = vld [vmem:[#allocation2 + $0x198] sm:$0xff]  ;;  %v6728_v17 = vcombine.high %v500_v0, %v501_v2  ;;  %v580_v7 = vld [vmem:[#allocation2 + $0x110] sm:$0xff]  ;;  %v598_v29 = vld [vmem:[#allocation2 + $0x1a0] sm:$0xff]  ;;  %v6748_v35 = vcombine.high %v502_v20, %v503_v3 }
  0x5a   :  { %1569 = vxpose.xlu0.c.b16.cont [7/8] %v5833_v26, 128  ;;  %v651_v26 = vpack.c.bf16 %v597_v14, %v596_v13  ;;  %v599_v25 = vld [vmem:[#allocation2 + $0x1a8] sm:$0xff]  ;;  %v520_v30 = vld [vmem:[%s11614_s0 + $0x1b0] sm:$0xff]  ;;  %v521_v34 = vld [vmem:[%s11614_s0 + $0x1b8] sm:$0xff] }
  0x5b   :  { %v504_v36 = vld [vmem:[%s11614_s0 + $0x130] sm:$0xff]  ;;  %v505_v41 = vld [vmem:[%s11614_s0 + $0x138] sm:$0xff]  ;;  %v652_v44 = vpack.c.bf16 %v599_v25, %v598_v29  ;;  %v582_v45 = vld [vmem:[#allocation2 + $0x120] sm:$0xff]  ;;  %v6757_v49 = vcombine.high %v520_v30, %v521_v34 }
  0x5c   :  { %1537 = vxpose.xlu1.c.b16.cont [7/8] %v6611_v27, 128  ;;  %v583_v46 = vld [vmem:[#allocation2 + $0x128] sm:$0xff]  ;;  %v600_v47 = vld [vmem:[#allocation2 + $0x1b0] sm:$0xff]  ;;  %v601_v48 = vld [vmem:[#allocation2 + $0x1b8] sm:$0xff]  ;;  %v6769_v59 = vcombine.high %v504_v36, %v505_v41 }
  0x5d   :  { %v522_v50 = vld [vmem:[%s11614_s0 + $0x1c0] sm:$0xff]  ;;  %v507_v61 = vld [vmem:[%s11614_s0 + $0x148] sm:$0xff]  ;;  %v585_v10 = vld [vmem:[#allocation2 + $0x138] sm:$0xff] }
  0x5e   :  { %1163 = vmatmul.mubr.bf16.gmra.mrb[8].mxu0 %v6076_v11  ;;  %1570 = vxpose.xlu0.c.b16.end [8/8] %v5837_v28, 128  ;;  %v517_v11 = vld [vmem:[%s11614_s0 + $0x198] sm:$0xff]  ;;  %v506_v55 = vld [vmem:[%s11614_s0 + $0x140] sm:$0xff]  ;;  %v82_v0 = vld [vmem:[%s11616_s1 + $0x208] sm:$0xff] }
  0x5f   :  { %1170 = vmatprep.mubr.bf16.mxu0 %v6298_v33  ;;  %v578_v33 = vld [vmem:[#allocation2 + $0x100] sm:$0xff]  ;;  %v6719_v5 = vcombine.high %v516_v52, %v517_v11  ;;  %v581_v28 = vld [vmem:[#allocation2 + $0x118] sm:$0xff]  ;;  %v523_v52 = vld [vmem:[%s11614_s0 + $0x1c8] sm:$0xff]  ;;  %v644_v11 = vpack.c.bf16 %v583_v46, %v582_v45  ;;  %163 = vst.msk [vmem:[#allocation2 + $0x208] sm:$0xff] %vm97_vm0, %v82_v0  ;;  %v6794_v20 = vcombine.high %v506_v55, %v507_v61 }
  0x60   :  { %1538 = vxpose.xlu1.c.b16.end [8/8] %v6683_v53, 128  ;;  %v642_v4 = vpack.c.bf16 %v579_v9, %v578_v33  ;;  %v81_v33 = vld [vmem:[%s11616_s1 + $0x200] sm:$0xff]  ;;  %v584_v9 = vld [vmem:[#allocation2 + $0x130] sm:$0xff]  ;;  %v603_v13 = vld [vmem:[#allocation2 + $0x1c8] sm:$0xff]  ;;  %v6785_v14 = vcombine.high %v522_v50, %v523_v52 }
  0x61   :  { %162 = vst.msk [vmem:[#allocation2 + $0x200] sm:$0xff] %vm97_vm0, %v81_v33  ;;  %v602_v12 = vld [vmem:[#allocation2 + $0x1c0] sm:$0xff]  ;;  %v508_v3 = vld [vmem:[%s11614_s0 + $0x150] sm:$0xff]  ;;  %v605_v25 = vld [vmem:[#allocation2 + $0x1d8] sm:$0xff] }
  0x62   :  { %1579 = vxpose.xlu0.c.b16.start [1/8] %v6687_v54, 128  ;;  %v604_v29 = vld [vmem:[#allocation2 + $0x1d0] sm:$0xff]  ;;  %v526_v34 = vld [vmem:[%s11614_s0 + $0x1e0] sm:$0xff]  ;;  %v589_v50 = vld [vmem:[#allocation2 + $0x158] sm:$0xff] }
  0x63   :  { %v606_v52 = vld [vmem:[#allocation2 + $0x1e0] sm:$0xff]  ;;  %v512_v61 = vld [vmem:[%s11614_s0 + $0x170] sm:$0xff]  ;;  %v513_v33 = vld [vmem:[%s11614_s0 + $0x178] sm:$0xff] }
  0x64   :  { %1547 = vxpose.xlu1.c.b16.start [1/8] %v6710_v63, 128 }
  0x66   :  { %1171 = vmatmul.mubr.bf16.gmra.mrb[12].mxu0 %v6093_v15  ;;  %1580 = vxpose.xlu0.c.b16.cont [2/8] %v6719_v5, 128 }
  0x67   :  { %1178 = vmatprep.mubr.bf16.mxu0 %v6325_v43  ;;  %v643_v43 = vpack.c.bf16 %v581_v28, %v580_v7  ;;  %v654_v7 = vpack.c.bf16 %v603_v13, %v602_v12  ;;  %v586_v28 = vld [vmem:[#allocation2 + $0x140] sm:$0xff]  ;;  %v609_v12 = vld [vmem:[#allocation2 + $0x1f8] sm:$0xff] }
  0x68   :  { %v1507_v23 = vpop.trf.xlu0  ;;  %1548 = vxpose.xlu1.c.b16.cont [2/8] %v6728_v17, 128 }
  0x69   :  { %1659 = vmatprep.mubr.bf16.mxu1 %v1507_v23  ;;  %v509_v23 = vld [vmem:[%s11614_s0 + $0x158] sm:$0xff] }
  0x6a   :  { %v1475_v15 = vpop.trf.xlu1  ;;  %1581 = vxpose.xlu0.c.b16.cont [3/8] %v6738_v6, 128  ;;  %v6812_v36 = vcombine.high %v508_v3, %v509_v23 }
  0x6b   :  { %1660 = vmatmul.mubr.bf16.vlgmr.msra.gmra.mrb[0].mxu1 %v1475_v15  ;;  %v587_v15 = vld [vmem:[#allocation2 + $0x148] sm:$0xff] }
  0x6c   :  { %5267 = vmatpush3.bf16.msra.mxu1 %v642_v4  ;;  %v1508_v42 = vpop.trf.xlu0  ;;  %1549 = vxpose.xlu1.c.b16.cont [3/8] %v6748_v35, 128  ;;  %v525_v4 = vld [vmem:[%s11614_s0 + $0x1d8] sm:$0xff]  ;;  %v646_v45 = vpack.c.bf16 %v587_v15, %v586_v28 }
  0x6d   :  { %5268 = vmatprep.subr.bf16.mxu1 %v651_v26  ;;  %1667 = vmatprep.mubr.bf16.mxu1 %v1508_v42  ;;  %v645_v26 = vpack.c.bf16 %v585_v10, %v584_v9  ;;  %v510_v42 = vld [vmem:[%s11614_s0 + $0x160] sm:$0xff]  ;;  %v591_v9 = vld [vmem:[#allocation2 + $0x168] sm:$0xff]  ;;  %v608_v10 = vld [vmem:[#allocation2 + $0x1f0] sm:$0xff] }
  0x6e   :  { %1179 = vmatmul.mubr.bf16.gmra.mrb[16].mxu0 %v6110_v22  ;;  %v1476_v60 = vpop.trf.xlu1  ;;  %v653_v22 = vpack.c.bf16 %v601_v48, %v600_v47  ;;  %1582 = vxpose.xlu0.c.b16.cont [4/8] %v6757_v49, 128  ;;  %v655_v47 = vpack.c.bf16 %v605_v25, %v604_v29  ;;  %v588_v48 = vld [vmem:[#allocation2 + $0x150] sm:$0xff]  ;;  %v657_v15 = vpack.c.bf16 %v609_v12, %v608_v10  ;;  %v593_v25 = vld [vmem:[#allocation2 + $0x178] sm:$0xff]  ;;  %v5853_v10 = vld [vmem:[%s11614_s0 + $0x260] ss:$8 sps:$4 sm:$0xff]  }
  0x6f   :  { %1186 = vmatprep.mubr.bf16.mxu0 %v6384_v62  ;;  %v524_v62 = vld [vmem:[%s11614_s0 + $0x1d0] sm:$0xff]  ;;  %v647_v0 = vpack.c.bf16 %v589_v50, %v588_v48  ;;  %v5845_v48 = vld [vmem:[%s11614_s0 + $0x220] ss:$8 sps:$4 sm:$0xff]  }
  0x70   :  { %5269 = vmatpush3.bf16.msra.mxu1 %v643_v43  ;;  %v1509_v2 = vpop.trf.xlu0  ;;  %1550 = vxpose.xlu1.c.b16.cont [4/8] %v6769_v59, 128  ;;  %v6803_v30 = vcombine.high %v524_v62, %v525_v4  ;;  %v527_v43 = vld [vmem:[%s11614_s0 + $0x1e8] sm:$0xff]  ;;  %v6844_v62 = vcombine.high %v512_v61, %v513_v33  ;;  %v592_v29 = vld [vmem:[#allocation2 + $0x170] sm:$0xff]  ;;  %v530_v12 = vld [vmem:[%s11614_s0 + $0x200] sm:$0xff] }
  0x71   :  { %5270 = vmatprep.subr.bf16.mxu1 %v652_v44  ;;  %v511_v44 = vld [vmem:[%s11614_s0 + $0x168] sm:$0xff]  ;;  %v6823_v55 = vcombine.high %v526_v34, %v527_v43  ;;  %v610_v34 = vld [vmem:[#allocation2 + $0x200] sm:$0xff]  ;;  %v5847_v50 = vld [vmem:[%s11614_s0 + $0x230] ss:$8 sps:$4 sm:$0xff]  }
  0x72   :  { %1583 = vxpose.xlu0.c.b16.cont [5/8] %v6785_v14, 128  ;;  %v1477_v41 = vpop.trf.xlu1  ;;  %v5939_v4 = vld [vmem:[%s11614_s0 + $0x60] ss:$8 sps:$4 sm:$0xff]  }
  0x73   :  { %1668 = vmatmul.mubr.bf16.gmra.mrb[4].mxu1 %v1476_v60  ;;  %v528_v60 = vld [vmem:[%s11614_s0 + $0x1f0] sm:$0xff]  ;;  %v611_v43 = vld [vmem:[#allocation2 + $0x208] sm:$0xff] }
  0x74   :  { %1675 = vmatprep.mubr.bf16.mxu1 %v1509_v2  ;;  %5271 = vmatpush3.bf16.msra.mxu1 %v644_v11  ;;  %v1510_v46 = vpop.trf.xlu0  ;;  %v6832_v11 = vcombine.high %v510_v42, %v511_v44  ;;  %v6863_v42 = vpack.c.bf16 %v611_v43, %v610_v34  ;;  %v5843_v44 = vld [vmem:[%s11614_s0 + $0x210] ss:$8 sps:$4 sm:$0xff]   ;;  %v5849_v33 = vld [vmem:[%s11614_s0 + $0x240] ss:$8 sps:$4 sm:$0xff]  }
  0x75   :  { %5272 = vmatprep.subr.bf16.mxu1 %v653_v22  ;;  %1551 = vxpose.xlu1.c.b16.cont [5/8] %v6794_v20, 128  ;;  %v590_v22 = vld [vmem:[#allocation2 + $0x160] sm:$0xff]  ;;  %v535_v43 = vld [vmem:[%s11614_s0 + $0x228] sm:$0xff] }
  0x76   :  { %1187 = vmatmul.mubr.bf16.gmra.mrb[20].mxu0 %v6128_v31  ;;  %v607_v31 = vld [vmem:[#allocation2 + $0x1e8] sm:$0xff]  ;;  %1584 = vxpose.xlu0.c.b16.cont [6/8] %v6803_v30, 128  ;;  %v1478_v3 = vpop.trf.xlu1  ;;  %v648_v23 = vpack.c.bf16 %v591_v9, %v590_v22  ;;  %v534_v34 = vld [vmem:[%s11614_s0 + $0x220] sm:$0xff] }
  0x77   :  { %1194 = vmatprep.mubr.bf16.mxu0 %v6438_v37  ;;  %v529_v37 = vld [vmem:[%s11614_s0 + $0x1f8] sm:$0xff]  ;;  %v656_v2 = vpack.c.bf16 %v607_v31, %v606_v52  ;;  %v5941_v52 = vld [vmem:[%s11614_s0 + $0x80] ss:$8 sps:$4 sm:$0xff]  }
  0x78   :  { %5273 = vmatpush3.bf16.msra.mxu1 %v645_v26  ;;  %v6841_v13 = vcombine.high %v528_v60, %v529_v37  ;;  %v83_v26 = vld [vmem:[%s11616_s1 + $0x210] sm:$0xff]  ;;  %v1511_v28 = vpop.trf.xlu0  ;;  %v85_v31 = vld [vmem:[%s11616_s1 + $0x220] sm:$0xff]  ;;  %v86_v60 = vld [vmem:[%s11616_s1 + $0x228] sm:$0xff] }
  0x79   :  { %5274 = vmatprep.subr.bf16.mxu1 %v654_v7  ;;  %1552 = vxpose.xlu1.c.b16.cont [6/8] %v6812_v36, 128  ;;  %v84_v7 = vld [vmem:[%s11616_s1 + $0x218] sm:$0xff]  ;;  %164 = vst.msk [vmem:[#allocation2 + $0x210] sm:$0xff] %vm97_vm0, %v83_v26  ;;  %166 = vst.msk [vmem:[#allocation2 + $0x220] sm:$0xff] %vm97_vm0, %v85_v31  ;;  %v87_v26 = vld [vmem:[%s11616_s1 + $0x230] sm:$0xff] }
  0x7a   :  { %1585 = vxpose.xlu0.c.b16.cont [7/8] %v6823_v55, 128  ;;  %165 = vst.msk [vmem:[#allocation2 + $0x218] sm:$0xff] %vm97_vm0, %v84_v7  ;;  %v5942_v37 = vld [vmem:[%s11614_s0 + $0x94] ss:$8 sps:$4 sm:$0xff]   ;;  %167 = vst.msk [vmem:[#allocation2 + $0x228] sm:$0xff] %vm97_vm0, %v86_v60  ;;  %v5946_v60 = vld [vmem:[%s11614_s0 + $0xc0] ss:$8 sps:$4 sm:$0xff]  }
  0x7b   :  { %1676 = vmatmul.mubr.bf16.gmra.mrb[8].mxu1 %v1477_v41  ;;  %v5841_v41 = vld [vmem:[%s11614_s0 + $0x200] ss:$8 sps:$4 sm:$0xff]   ;;  %v88_v7 = vld [vmem:[%s11616_s1 + $0x238] sm:$0xff]  ;;  %168 = vst.msk [vmem:[#allocation2 + $0x230] sm:$0xff] %vm97_vm0, %v87_v26 }
  0x7c   :  { %1683 = vmatprep.mubr.bf16.mxu1 %v1510_v46  ;;  %5275 = vmatpush3.bf16.msra.mxu1 %v646_v45  ;;  %v5940_v45 = vld [vmem:[%s11614_s0 + $0x70] ss:$8 sps:$4 sm:$0xff]   ;;  %v1479_v46 = vpop.trf.xlu1  ;;  %169 = vst.msk [vmem:[#allocation2 + $0x238] sm:$0xff] %vm97_vm0, %v88_v7  ;;  %v247_v26 = vld [vmem:[%s11616_s1 + $0x28] sm:$0xff] }
  0x7d   :  { %5276 = vmatprep.subr.bf16.mxu1 %v655_v47  ;;  %1553 = vxpose.xlu1.c.b16.cont [7/8] %v6832_v11, 128  ;;  %v1512_v47 = vpop.trf.xlu0  ;;  %327 = vst.msk [vmem:[%s11617_s3 + $0x28] sm:$0xff] %vm97_vm0, %v247_v26 }
  0x7e   :  { %1195 = vmatmul.mubr.bf16.gmra.mrb[24].mxu0 %v5939_v4  ;;  %1586 = vxpose.xlu0.c.b16.end [8/8] %v6841_v13, 128  ;;  %v531_v4 = vld [vmem:[%s11614_s0 + $0x208] sm:$0xff] }
  0x7f   :  { %1202 = vmatprep.mubr.bf16.mxu0 %v6458_v51  ;;  %v649_v51 = vpack.c.bf16 %v593_v25, %v592_v29  ;;  %v242_v29 = vld [vmem:[%s11616_s1] sm:$0xff]  ;;  %v533_v25 = vld [vmem:[%s11614_s0 + $0x218] sm:$0xff] }
  0x80   :  { %5277 = vmatpush3.bf16.msra.mxu1 %v647_v0  ;;  %v5851_v0 = vld [vmem:[%s11614_s0 + $0x250] ss:$8 sps:$4 sm:$0xff]   ;;  %322 = vst.msk [vmem:[%s11617_s3] sm:$0xff] %vm97_vm0, %v242_v29 }
  0x81   :  { %5278 = vmatprep.subr.bf16.mxu1 %v656_v2  ;;  %1554 = vxpose.xlu1.c.b16.end [8/8] %v6844_v62, 128  ;;  %v1513_v61 = vpop.trf.xlu0  ;;  %v5943_v2 = vld [vmem:[%s11614_s0 + $0x90] ss:$8 sps:$4 sm:$0xff]  }
  0x82   :  { %1595 = vxpose.xlu0.c.b16.start [1/8] %v5841_v41, 128  ;;  %v248_v29 = vld [vmem:[%s11616_s1 + $0x30] sm:$0xff] }
  0x83   :  { %1684 = vmatmul.mubr.bf16.gmra.mrb[12].mxu1 %v1478_v3  ;;  %v5944_v3 = vld [vmem:[%s11614_s0 + $0xa0] ss:$8 sps:$4 sm:$0xff]   ;;  %328 = vst.msk [vmem:[%s11617_s3 + $0x30] sm:$0xff] %vm97_vm0, %v248_v29  ;;  %v95_v29 = vld [vmem:[%s11616_s1 + $0x270] sm:$0xff] }
  0x84   :  { %1691 = vmatprep.mubr.bf16.mxu1 %v1511_v28  ;;  %5279 = vmatpush3.bf16.msra.mxu1 %v648_v23  ;;  %v6924_v28 = vcombine.high %v530_v12, %v531_v4  ;;  %v542_v12 = vld [vmem:[%s11614_s0 + $0x260] sm:$0xff]  ;;  %v543_v4 = vld [vmem:[%s11614_s0 + $0x268] sm:$0xff]  ;;  %176 = vst.msk [vmem:[#allocation2 + $0x270] sm:$0xff] %vm97_vm0, %v95_v29 }
  0x85   :  { %5280 = vmatprep.subr.bf16.mxu1 %v657_v15  ;;  %v1514_v9 = vpop.trf.xlu0 }
  0x86   :  { %1203 = vmatmul.mubr.bf16.gmra.mrb[28].mxu0 %v5940_v45  ;;  %1596 = vxpose.xlu0.c.b16.cont [2/8] %v5843_v44, 128  ;;  %v243_v45 = vld [vmem:[%s11616_s1 + $0x8] sm:$0xff] }
  0x87   :  { %1210 = vmatprep.mubr.bf16.mxu0 %v6201_v58  ;;  %v1480_v58 = vpop.trf.xlu1  ;;  %1611 = vxpose.xlu1.c.b16.start [1/8] %v6924_v28, 128  ;;  %323 = vst.msk [vmem:[%s11617_s3 + $0x8] sm:$0xff] %vm97_vm0, %v243_v45 }
  0x88   :  { %5281 = vmatpush3.bf16.msra.mxu1 %v649_v51  ;;  %v5945_v51 = vld [vmem:[%s11614_s0 + $0xb0] ss:$8 sps:$4 sm:$0xff]  }
  0x89   :  { %5650 = vmatprep.subr.bf16.mxu1 %v6863_v42  ;;  %v1523_v15 = vpop.trf.xlu0 }
  0x8a   :  { %1597 = vxpose.xlu0.c.b16.cont [3/8] %v5845_v48, 128  ;;  %v244_v48 = vld [vmem:[%s11616_s1 + $0x10] sm:$0xff] }
  0x8b   :  { %1692 = vmatmul.mubr.bf16.gmra.mrb[16].mxu1 %v1479_v46  ;;  %v1481_v22 = vpop.trf.xlu1  ;;  %324 = vst.msk [vmem:[%s11617_s3 + $0x10] sm:$0xff] %vm97_vm0, %v244_v48  ;;  %v250_v48 = vld [vmem:[%s11616_s1 + $0x40] sm:$0xff] }
  0x8c   :  { %1699 = vmatprep.mubr.bf16.mxu1 %v1512_v47  ;;  %v6963_v47 = vcombine.high %v534_v34, %v535_v43  ;;  %v5948_v34 = vld [vmem:[%s11614_s0 + $0xe0] ss:$8 sps:$4 sm:$0xff]   ;;  %330 = vst.msk [vmem:[%s11617_s3 + $0x40] sm:$0xff] %vm97_vm0, %v250_v48 }
  0x8d   :  { %v1524_v46 = vpop.trf.xlu0 }
  0x8e   :  { %1211 = vmatmul.mubr.bf16.gmra.mrb[32].mxu0 %v5941_v52  ;;  %1598 = vxpose.xlu0.c.b16.cont [4/8] %v5847_v50, 128  ;;  %v537_v50 = vld [vmem:[%s11614_s0 + $0x238] sm:$0xff]  ;;  %v538_v52 = vld [vmem:[%s11614_s0 + $0x240] sm:$0xff] }
  0x8f   :  { %1218 = vmatprep.mubr.bf16.mxu0 %v5942_v37  ;;  %v1482_v23 = vpop.trf.xlu1 }
  0x92   :  { %1599 = vxpose.xlu0.c.b16.cont [5/8] %v5849_v33, 128  ;;  %v89_v33 = vld [vmem:[%s11616_s1 + $0x240] sm:$0xff] }
  0x93   :  { %1700 = vmatmul.mubr.bf16.gmra.mrb[20].mxu1 %v1480_v58  ;;  %v1491_v44 = vpop.trf.xlu1  ;;  %v539_v58 = vld [vmem:[%s11614_s0 + $0x248] sm:$0xff]  ;;  %170 = vst.msk [vmem:[#allocation2 + $0x240] sm:$0xff] %vm97_vm0, %v89_v33 }
  0x94   :  { %1707 = vmatprep.mubr.bf16.mxu1 %v1513_v61  ;;  %v245_v61 = vld [vmem:[%s11616_s1 + $0x18] sm:$0xff] }
  0x95   :  { %325 = vst.msk [vmem:[%s11617_s3 + $0x18] sm:$0xff] %vm97_vm0, %v245_v61  ;;  %v94_v61 = vld [vmem:[%s11616_s1 + $0x268] sm:$0xff] }
  0x96   :  { %1219 = vmatmul.mubr.bf16.gmra.mrb[36].mxu0 %v5943_v2  ;;  %1600 = vxpose.xlu0.c.b16.cont [6/8] %v5851_v0, 128  ;;  %v1525_v0 = vpop.trf.xlu0  ;;  %v90_v2 = vld [vmem:[%s11616_s1 + $0x248] sm:$0xff]  ;;  %175 = vst.msk [vmem:[#allocation2 + $0x268] sm:$0xff] %vm97_vm0, %v94_v61 }
  0x97   :  { %1226 = vmatprep.mubr.bf16.mxu0 %v6273_v24  ;;  %v5855_v24 = vld [vmem:[%s11614_s0 + $0x270] ss:$8 sps:$4 sm:$0xff]   ;;  %v1492_v37 = vpop.trf.xlu1  ;;  %171 = vst.msk [vmem:[#allocation2 + $0x248] sm:$0xff] %vm97_vm0, %v90_v2  ;;  %v254_v2 = vld [vmem:[%s11616_s1 + $0x60] sm:$0xff] }
  0x98   :  { %334 = vst.msk [vmem:[%s11617_s3 + $0x60] sm:$0xff] %vm97_vm0, %v254_v2 }
  0x9a   :  { %1601 = vxpose.xlu0.c.b16.cont [7/8] %v5853_v10, 128  ;;  %v541_v10 = vld [vmem:[%s11614_s0 + $0x258] sm:$0xff]  ;;  %v1526_v7 = vpop.trf.xlu0  ;;  %v618_v2 = vld [vmem:[#allocation2 + $0x240] sm:$0xff] }
  0x9b   :  { %1708 = vmatmul.mubr.bf16.gmra.mrb[24].mxu1 %v1481_v22  ;;  %v7006_v22 = vcombine.high %v538_v52, %v539_v58  ;;  %v252_v58 = vld [vmem:[%s11616_s1 + $0x50] sm:$0xff] }
  0x9c   :  { %1715 = vmatprep.mubr.bf16.mxu1 %v1514_v9  ;;  %v540_v9 = vld [vmem:[%s11614_s0 + $0x250] sm:$0xff]  ;;  %332 = vst.msk [vmem:[%s11617_s3 + $0x50] sm:$0xff] %vm97_vm0, %v252_v58  ;;  %v5883_v58 = vld [vmem:[%s11614_s0 + $0xe0] ss:$8 sps:$4 sm:$0xff]  }
  0x9d   :  { %v623_v29 = vld [vmem:[#allocation2 + $0x268] sm:$0xff] }
  0x9e   :  { %1227 = vmatmul.mubr.bf16.gmra.mrb[40].mxu0 %v5944_v3  ;;  %1602 = vxpose.xlu0.c.b16.end [8/8] %v5855_v24, 128  ;;  %v7029_v24 = vcombine.high %v540_v9, %v541_v10  ;;  %v5947_v3 = vld [vmem:[%s11614_s0 + $0xd0] ss:$8 sps:$4 sm:$0xff]   ;;  %v1527_v45 = vpop.trf.xlu0 }
  0x9f   :  { %1234 = vmatprep.mubr.bf16.mxu0 %v6293_v32  ;;  %v532_v32 = vld [vmem:[%s11614_s0 + $0x210] sm:$0xff] }
  0xa0   :  { %v6949_v41 = vcombine.high %v532_v32, %v533_v25  ;;  %v545_v32 = vld [vmem:[%s11614_s0 + $0x278] sm:$0xff] }
  0xa1   :  { %v5865_v9 = vld [vmem:[%s11614_s0 + $0x10] ss:$8 sps:$4 sm:$0xff]  }
  0xa2   :  { %1612 = vxpose.xlu1.c.b16.cont [2/8] %v6949_v41, 128  ;;  %v1528_v52 = vpop.trf.xlu0 }
  0xa3   :  { %1716 = vmatmul.mubr.bf16.gmra.mrb[28].mxu1 %v1482_v23  ;;  %v1493_v23 = vpop.trf.xlu1 }
  0xa4   :  { %1723 = vmatprep.mubr.bf16.mxu1 %v1523_v15  ;;  %v7043_v15 = vcombine.high %v542_v12, %v543_v4  ;;  %v255_v12 = vld [vmem:[%s11616_s1 + $0x68] sm:$0xff]  ;;  %v256_v4 = vld [vmem:[%s11616_s1 + $0x70] sm:$0xff] }
  0xa5   :  { %335 = vst.msk [vmem:[%s11617_s3 + $0x68] sm:$0xff] %vm97_vm0, %v255_v12  ;;  %336 = vst.msk [vmem:[%s11617_s3 + $0x70] sm:$0xff] %vm97_vm0, %v256_v4 }
  0xa6   :  { %1235 = vmatmul.mubr.bf16.gmra.mrb[44].mxu0 %v5945_v51  ;;  %1613 = vxpose.xlu1.c.b16.cont [3/8] %v6963_v47, 128  ;;  %v249_v51 = vld [vmem:[%s11616_s1 + $0x38] sm:$0xff]  ;;  %v1529_v33 = vpop.trf.xlu0 }
  0xa7   :  { %1242 = vmatprep.mubr.bf16.mxu0 %v6315_v38  ;;  %v536_v38 = vld [vmem:[%s11614_s0 + $0x230] sm:$0xff]  ;;  %v1494_v43 = vpop.trf.xlu1  ;;  %329 = vst.msk [vmem:[%s11617_s3 + $0x38] sm:$0xff] %vm97_vm0, %v249_v51  ;;  %v613_v51 = vld [vmem:[#allocation2 + $0x218] sm:$0xff] }
  0xa8   :  { %v6985_v31 = vcombine.high %v536_v38, %v537_v50  ;;  %v251_v50 = vld [vmem:[%s11616_s1 + $0x48] sm:$0xff] }
  0xa9   :  { %331 = vst.msk [vmem:[%s11617_s3 + $0x48] sm:$0xff] %vm97_vm0, %v251_v50  ;;  %v615_v50 = vld [vmem:[#allocation2 + $0x228] sm:$0xff] }
  0xaa   :  { %1614 = vxpose.xlu1.c.b16.cont [4/8] %v6985_v31, 128  ;;  %v1530_v10 = vpop.trf.xlu0 }
  0xab   :  { %1724 = vmatmul.mubr.bf16.gmra.mrb[32].mxu1 %v1491_v44  ;;  %v91_v44 = vld [vmem:[%s11616_s1 + $0x250] sm:$0xff]  ;;  %v1495_v38 = vpop.trf.xlu1 }
  0xac   :  { %1731 = vmatprep.mubr.bf16.mxu1 %v1524_v46  ;;  %v92_v46 = vld [vmem:[%s11616_s1 + $0x258] sm:$0xff]  ;;  %172 = vst.msk [vmem:[#allocation2 + $0x250] sm:$0xff] %vm97_vm0, %v91_v44  ;;  %v259_v44 = vld [vmem:[%s11616_s1 + $0x88] sm:$0xff] }
  0xad   :  { %173 = vst.msk [vmem:[#allocation2 + $0x258] sm:$0xff] %vm97_vm0, %v92_v46  ;;  %339 = vst.msk [vmem:[%s11617_s3 + $0x88] sm:$0xff] %vm97_vm0, %v259_v44  ;;  %v268_v44 = vld [vmem:[%s11616_s1 + $0xd0] sm:$0xff] }
  0xae   :  { %1243 = vmatmul.mubr.bf16.gmra.mrb[48].mxu0 %v5946_v60  ;;  %1615 = vxpose.xlu1.c.b16.cont [5/8] %v7006_v22, 128  ;;  %348 = vst.msk [vmem:[%s11617_s3 + $0xd0] sm:$0xff] %vm97_vm0, %v268_v44 }
  0xaf   :  { %1250 = vmatprep.mubr.bf16.mxu0 %v6371_v56  ;;  %v246_v56 = vld [vmem:[%s11616_s1 + $0x20] sm:$0xff]  ;;  %v1496_v60 = vpop.trf.xlu1 }
  0xb0   :  { %326 = vst.msk [vmem:[%s11617_s3 + $0x20] sm:$0xff] %vm97_vm0, %v246_v56 }
  0xb2   :  { %1616 = vxpose.xlu1.c.b16.cont [6/8] %v7029_v24, 128 }
  0xb3   :  { %1732 = vmatmul.mubr.bf16.gmra.mrb[36].mxu1 %v1492_v37  ;;  %v93_v37 = vld [vmem:[%s11616_s1 + $0x260] sm:$0xff]  ;;  %v1497_v56 = vpop.trf.xlu1 }
  0xb4   :  { %1739 = vmatprep.mubr.bf16.mxu1 %v1525_v0  ;;  %174 = vst.msk [vmem:[#allocation2 + $0x260] sm:$0xff] %vm97_vm0, %v93_v37  ;;  %v5860_v0 = vld [vmem:[%s11614_s0] ss:$8 sps:$4 sm:$0xff]   ;;  %v621_v12 = vld [vmem:[#allocation2 + $0x258] sm:$0xff] }
  0xb5   :  { %v5885_v37 = vld [vmem:[%s11614_s0 + $0x60] ss:$8 sps:$4 sm:$0xff]  }
  0xb6   :  { %1251 = vmatmul.mubr.bf16.gmra.mrb[52].mxu0 %v5947_v3  ;;  %1617 = vxpose.xlu1.c.b16.cont [7/8] %v7043_v15, 128  ;;  %v5871_v3 = vld [vmem:[%s11614_s0 + $0xb0] ss:$8 sps:$4 sm:$0xff]  }
  0xb7   :  { %1258 = vmatprep.mubr.bf16.mxu0 %v6420_v18  ;;  %v544_v18 = vld [vmem:[%s11614_s0 + $0x270] sm:$0xff]  ;;  %v1498_v26 = vpop.trf.xlu1 }
  0xb8   :  { %v7059_v25 = vcombine.high %v544_v18, %v545_v32  ;;  %v96_v18 = vld [vmem:[%s11616_s1 + $0x278] sm:$0xff]  ;;  %v1571_v32 = vpop.trf.xlu0 }
  0xb9   :  { %177 = vst.msk [vmem:[#allocation2 + $0x278] sm:$0xff] %vm97_vm0, %v96_v18 }
  0xba   :  { %1618 = vxpose.xlu1.c.b16.end [8/8] %v7059_v25, 128 }
  0xbb   :  { %1740 = vmatmul.mubr.bf16.gmra.mrb[40].mxu1 %v1493_v23  ;;  %v5873_v23 = vld [vmem:[%s11614_s0 + $0x30] ss:$8 sps:$4 sm:$0xff]   ;;  %v1539_v46 = vpop.trf.xlu1 }
  0xbc   :  { %1747 = vmatprep.mubr.bf16.mxu1 %v1526_v7  ;;  %v257_v7 = vld [vmem:[%s11616_s1 + $0x78] sm:$0xff]  ;;  %v1572_v48 = vpop.trf.xlu0 }
  0xbd   :  { %337 = vst.msk [vmem:[%s11617_s3 + $0x78] sm:$0xff] %vm97_vm0, %v257_v7  ;;  %v622_v7 = vld [vmem:[#allocation2 + $0x260] sm:$0xff] }
  0xbe   :  { %1259 = vmatmul.mubr.bf16.gmra.mrb[56].mxu0 %v5948_v34  ;;  %3559 = vxpose.xlu1.c.b16.start [1/8] %v5860_v0, 128  ;;  %v5877_v34 = vld [vmem:[%s11614_s0 + $0x40] ss:$8 sps:$4 sm:$0xff]  }
  0xbf   :  { %1266 = vmatprep.mubr.bf16.mxu0 %v6444_v40  ;;  %v5949_v40 = vld [vmem:[%s11614_s0 + $0xf0] ss:$8 sps:$4 sm:$0xff]   ;;  %v1540_v61 = vpop.trf.xlu1 }
  0xc0   :  { %v625_v18 = vld [vmem:[#allocation2 + $0x278] sm:$0xff] }
  0xc2   :  { %3560 = vxpose.xlu1.c.b16.cont [2/8] %v5865_v9, 128  ;;  %v262_v9 = vld [vmem:[%s11616_s1 + $0xa0] sm:$0xff] }
  0xc3   :  { %1748 = vmatmul.mubr.bf16.gmra.mrb[44].mxu1 %v1494_v43  ;;  %v612_v43 = vld [vmem:[#allocation2 + $0x210] sm:$0xff]  ;;  %342 = vst.msk [vmem:[%s11617_s3 + $0xa0] sm:$0xff] %vm97_vm0, %v262_v9  ;;  %v1541_v4 = vpop.trf.xlu1  ;;  %v2582_v9 = vld [vmem:[%s11614_s0 + $0xc0] sm:$0xff] }
  0xc4   :  { %1755 = vmatprep.mubr.bf16.mxu1 %v1527_v45  ;;  %v5879_v45 = vld [vmem:[%s11614_s0 + $0xd0] ss:$8 sps:$4 sm:$0xff]  }
  0xc6   :  { %1267 = vmatmul.mubr.bf16.gmra.mrb[60].mxu0 %v5949_v40  ;;  %v659_v40 = vpack.c.bf16 %v613_v51, %v612_v43  ;;  %v266_v43 = vld [vmem:[%s11616_s1 + $0xc0] sm:$0xff] }
  0xc7   :  { %1274 = vmatprep.mubr.bf16.mxu0 %v6710_v63  ;;  %v253_v63 = vld [vmem:[%s11616_s1 + $0x58] sm:$0xff]  ;;  %346 = vst.msk [vmem:[%s11617_s3 + $0xc0] sm:$0xff] %vm97_vm0, %v266_v43 }
  0xc8   :  { %333 = vst.msk [vmem:[%s11617_s3 + $0x58] sm:$0xff] %vm97_vm0, %v253_v63  ;;  %v616_v63 = vld [vmem:[#allocation2 + $0x230] sm:$0xff]  ;;  %v2569_v43 = vld [vmem:[%s11614_s0 + $0x58] sm:$0xff] }
  0xcb   :  { %1756 = vmatmul.mubr.bf16.gmra.mrb[48].mxu1 %v1495_v38  ;;  %v614_v38 = vld [vmem:[#allocation2 + $0x220] sm:$0xff] }
  0xcc   :  { %1763 = vmatprep.mubr.bf16.mxu1 %v1528_v52  ;;  %v5881_v52 = vld [vmem:[%s11614_s0 + $0x50] ss:$8 sps:$4 sm:$0xff]  }
  0xce   :  { %1275 = vmatmul.mubr.bf16.gmra.mrb[64].mxu0 %v6520_v39  ;;  %v5857_v39 = vld [vmem:[%s11614_s0 + $0x80] ss:$8 sps:$4 sm:$0xff]  }
  0xcf   :  { %1282 = vmatprep.mubr.bf16.mxu0 %v6728_v17  ;;  %3591 = vxpose.xlu0.c.b16.start [1/8] %v5857_v39, 128  ;;  %v5863_v17 = vld [vmem:[%s11614_s0 + $0x90] ss:$8 sps:$4 sm:$0xff]   ;;  %v1573_v39 = vpop.trf.xlu0 }
  0xd3   :  { %1764 = vmatmul.mubr.bf16.gmra.mrb[52].mxu1 %v1496_v60  ;;  %3592 = vxpose.xlu0.c.b16.cont [2/8] %v5863_v17, 128  ;;  %v617_v60 = vld [vmem:[#allocation2 + $0x238] sm:$0xff]  ;;  %v619_v17 = vld [vmem:[#allocation2 + $0x248] sm:$0xff] }
  0xd4   :  { %1771 = vmatprep.mubr.bf16.mxu1 %v1529_v33  ;;  %v5887_v33 = vld [vmem:[%s11614_s0 + $0xf0] ss:$8 sps:$4 sm:$0xff]   ;;  %v661_v0 = vpack.c.bf16 %v617_v60, %v616_v63 }
  0xd5   :  { %v5951_v60 = vld [vmem:[%s11614_s0 + $0x190] ss:$8 sps:$4 sm:$0xff]  }
  0xd6   :  { %1283 = vmatmul.mubr.bf16.gmra.mrb[68].mxu0 %v6530_v57  ;;  %v5867_v57 = vld [vmem:[%s11614_s0 + $0xa0] ss:$8 sps:$4 sm:$0xff]  }
  0xd7   :  { %1290 = vmatprep.mubr.bf16.mxu0 %v6748_v35  ;;  %v5869_v35 = vld [vmem:[%s11614_s0 + $0x20] ss:$8 sps:$4 sm:$0xff]   ;;  %3593 = vxpose.xlu0.c.b16.cont [3/8] %v5867_v57, 128  ;;  %v5862_v57 = vld [vmem:[%s11614_s0 + $0x4] ss:$8 sps:$4 sm:$0xff]  }
  0xd8   :  { %3561 = vxpose.xlu1.c.b16.cont [3/8] %v5869_v35, 128  ;;  %v263_v35 = vld [vmem:[%s11616_s1 + $0xa8] sm:$0xff] }
  0xd9   :  { %343 = vst.msk [vmem:[%s11617_s3 + $0xa8] sm:$0xff] %vm97_vm0, %v263_v35 }
  0xdb   :  { %1772 = vmatmul.mubr.bf16.gmra.mrb[56].mxu1 %v1497_v56  ;;  %3594 = vxpose.xlu0.c.b16.cont [4/8] %v5871_v3, 128  ;;  %v5889_v56 = vld [vmem:[%s11614_s0 + $0x70] ss:$8 sps:$4 sm:$0xff]   ;;  %v1574_v3 = vpop.trf.xlu0 }
  0xdc   :  { %1779 = vmatprep.mubr.bf16.mxu1 %v1530_v10  ;;  %3562 = vxpose.xlu1.c.b16.cont [4/8] %v5873_v23, 128  ;;  %v620_v10 = vld [vmem:[#allocation2 + $0x250] sm:$0xff] }
  0xdd   :  { %v663_v23 = vpack.c.bf16 %v621_v12, %v620_v10  ;;  %v2566_v10 = vld [vmem:[%s11614_s0 + $0x40] sm:$0xff]  ;;  %v2567_v12 = vld [vmem:[%s11614_s0 + $0x48] sm:$0xff] }
  0xde   :  { %1291 = vmatmul.mubr.bf16.gmra.mrb[72].mxu0 %v6548_v8  ;;  %v258_v8 = vld [vmem:[%s11616_s1 + $0x80] sm:$0xff] }
  0xdf   :  { %1298 = vmatprep.mubr.bf16.mxu0 %v6769_v59  ;;  %338 = vst.msk [vmem:[%s11617_s3 + $0x80] sm:$0xff] %vm97_vm0, %v258_v8  ;;  %v5875_v59 = vld [vmem:[%s11614_s0 + $0xc0] ss:$8 sps:$4 sm:$0xff]   ;;  %v1542_v8 = vpop.trf.xlu1 }
  0xe0   :  { %3595 = vxpose.xlu0.c.b16.cont [5/8] %v5875_v59, 128  ;;  %3563 = vxpose.xlu1.c.b16.cont [5/8] %v5877_v34, 128  ;;  %v1575_v59 = vpop.trf.xlu0 }
  0xe3   :  { %1780 = vmatmul.mubr.bf16.gmra.mrb[60].mxu1 %v1498_v26  ;;  %v264_v26 = vld [vmem:[%s11616_s1 + $0xb0] sm:$0xff] }
  0xe4   :  { %1820 = vmatprep.mubr.bf16.mxu1 %v1571_v32  ;;  %3596 = vxpose.xlu0.c.b16.cont [6/8] %v5879_v45, 128  ;;  %344 = vst.msk [vmem:[%s11617_s3 + $0xb0] sm:$0xff] %vm97_vm0, %v264_v26  ;;  %v265_v32 = vld [vmem:[%s11616_s1 + $0xb8] sm:$0xff]  ;;  %v1576_v51 = vpop.trf.xlu0  ;;  %v2222_v26 = vld [vmem:[%s11617_s3] sm:$0xff] }
  0xe5   :  { %3564 = vxpose.xlu1.c.b16.cont [6/8] %v5881_v52, 128  ;;  %345 = vst.msk [vmem:[%s11617_s3 + $0xb8] sm:$0xff] %vm97_vm0, %v265_v32  ;;  %v271_v52 = vld [vmem:[%s11616_s1 + $0xe8] sm:$0xff] }
  0xe6   :  { %1299 = vmatmul.mubr.bf16.gmra.mrb[76].mxu0 %v6565_v16  ;;  %v260_v16 = vld [vmem:[%s11616_s1 + $0x90] sm:$0xff]  ;;  %351 = vst.msk [vmem:[%s11617_s3 + $0xe8] sm:$0xff] %vm97_vm0, %v271_v52 }
  0xe7   :  { %1306 = vmatprep.mubr.bf16.mxu0 %v6794_v20  ;;  %340 = vst.msk [vmem:[%s11617_s3 + $0x90] sm:$0xff] %vm97_vm0, %v260_v16  ;;  %v660_v20 = vpack.c.bf16 %v615_v50, %v614_v38  ;;  %v2577_v38 = vld [vmem:[%s11614_s0 + $0x98] sm:$0xff]  ;;  %v2588_v52 = vld [vmem:[%s11614_s0 + $0xf0] sm:$0xff] }
  0xe8   :  { %3597 = vxpose.xlu0.c.b16.cont [7/8] %v5883_v58, 128  ;;  %v2561_v50 = vld [vmem:[%s11614_s0 + $0x18] sm:$0xff]  ;;  %v2578_v58 = vld [vmem:[%s11614_s0 + $0xa0] sm:$0xff] }
  0xe9   :  { %3565 = vxpose.xlu1.c.b16.cont [7/8] %v5885_v37, 128 }
  0xeb   :  { %1821 = vmatmul.mubr.bf16.vlgmr.msra.gmra.mrb[64].mxu1 %v1539_v46  ;;  %v1577_v46 = vpop.trf.xlu0 }
  0xec   :  { %5651 = vmatpush3.bf16.msra.mxu1 %v6863_v42  ;;  %1828 = vmatprep.mubr.bf16.mxu1 %v1572_v48  ;;  %v261_v42 = vld [vmem:[%s11616_s1 + $0x98] sm:$0xff]  ;;  %v270_v48 = vld [vmem:[%s11616_s1 + $0xe0] sm:$0xff] }
  0xed   :  { %5652 = vmatprep.subr.bf16.mxu1 %v659_v40  ;;  %341 = vst.msk [vmem:[%s11617_s3 + $0x98] sm:$0xff] %vm97_vm0, %v261_v42  ;;  %3598 = vxpose.xlu0.c.b16.end [8/8] %v5887_v33, 128  ;;  %350 = vst.msk [vmem:[%s11617_s3 + $0xe0] sm:$0xff] %vm97_vm0, %v270_v48  ;;  %v2562_v42 = vld [vmem:[%s11614_s0 + $0x20] sm:$0xff] }
  0xee   :  { %1307 = vmatmul.mubr.bf16.gmra.mrb[80].mxu0 %v6576_v19  ;;  %v5859_v19 = vld [vmem:[%s11614_s0 + $0x84] ss:$8 sps:$4 sm:$0xff]   ;;  %3566 = vxpose.xlu1.c.b16.end [8/8] %v5889_v56, 128  ;;  %v2565_v56 = vld [vmem:[%s11614_s0 + $0x38] sm:$0xff] }
  0xef   :  { %1314 = vmatprep.mubr.bf16.mxu0 %v6812_v36  ;;  %v662_v36 = vpack.c.bf16 %v619_v17, %v618_v2  ;;  %v1578_v33 = vpop.trf.xlu0  ;;  %v2580_v2 = vld [vmem:[%s11614_s0 + $0xb0] sm:$0xff] }
  0xf0   :  { %5653 = vmatpush3.bf16.msra.mxu1 %v659_v40  ;;  %v2576_v40 = vld [vmem:[%s11614_s0 + $0x90] sm:$0xff] }
  0xf1   :  { %5654 = vmatprep.subr.bf16.mxu1 %v660_v20  ;;  %3607 = vxpose.xlu0.c.b16.start [1/8] %v5859_v19, 128  ;;  %v7339_v16 = vcombine.high %v2576_v40, %v2577_v38  ;;  %v2564_v19 = vld [vmem:[%s11614_s0 + $0x30] sm:$0xff] }
  0xf2   :  { %3575 = vxpose.xlu1.c.b16.start [1/8] %v5862_v57, 128  ;;  %v273_v57 = vld [vmem:[%s11616_s1 + $0xf8] sm:$0xff] }
  0xf3   :  { %1829 = vmatmul.mubr.bf16.gmra.mrb[68].mxu1 %v1540_v61  ;;  %11662 = vst [vmem:[#allocation4_spill] sm:$0xff] %v7339_v16  ;;  %v2563_v61 = vld [vmem:[%s11614_s0 + $0x28] sm:$0xff]  ;;  %353 = vst.msk [vmem:[%s11617_s3 + $0xf8] sm:$0xff] %vm97_vm0, %v273_v57  ;;  %v5953_v40 = vld [vmem:[%s11614_s0 + $0x1b0] ss:$8 sps:$4 sm:$0xff]  }
  0xf4   :  { %1836 = vmatprep.mubr.bf16.mxu1 %v1573_v39  ;;  %5655 = vmatpush3.bf16.msra.mxu1 %v660_v20  ;;  %v2579_v20 = vld [vmem:[%s11614_s0 + $0xa8] sm:$0xff]  ;;  %v272_v39 = vld [vmem:[%s11616_s1 + $0xf0] sm:$0xff]  ;;  %v7380_v17 = vcombine.high %v2562_v42, %v2563_v61  ;;  %v2225_v61 = vld [vmem:[%s11617_s3 + $0x18] sm:$0xff] }
  0xf5   :  { %5656 = vmatprep.subr.bf16.mxu1 %v661_v0  ;;  %3608 = vxpose.xlu0.c.b16.cont [2/8] %v7339_v16, 128  ;;  %352 = vst.msk [vmem:[%s11617_s3 + $0xf0] sm:$0xff] %vm97_vm0, %v272_v39 }
  0xf6   :  { %1315 = vmatmul.mubr.bf16.gmra.mrb[84].mxu0 %v6593_v21  ;;  %v664_v21 = vpack.c.bf16 %v623_v29, %v622_v7  ;;  %v1587_v7 = vpop.trf.xlu0  ;;  %v2584_v29 = vld [vmem:[%s11614_s0 + $0xd0] sm:$0xff] }
  0xf7   :  { %1322 = vmatprep.mubr.bf16.mxu0 %v6832_v11  ;;  %v624_v11 = vld [vmem:[#allocation2 + $0x270] sm:$0xff] }
  0xf8   :  { %5657 = vmatpush3.bf16.msra.mxu1 %v661_v0  ;;  %v665_v34 = vpack.c.bf16 %v625_v18, %v624_v11  ;;  %v7372_v0 = vcombine.high %v2578_v58, %v2579_v20  ;;  %v7430_v18 = vcombine.high %v2566_v10, %v2567_v12  ;;  %v2589_v58 = vld [vmem:[%s11614_s0 + $0xf8] sm:$0xff]  ;;  %v2226_v12 = vld [vmem:[%s11617_s3 + $0x20] sm:$0xff] }
  0xf9   :  { %5658 = vmatprep.subr.bf16.mxu1 %v662_v36 }
  0xfa   :  { %11663 = vst [vmem:[#allocation5_spill] sm:$0xff] %v7372_v0  ;;  %3609 = vxpose.xlu0.c.b16.cont [3/8] %v7372_v0, 128  ;;  %11667 = vst [vmem:[#allocation9_spill] sm:$0xff] %v7430_v18 }
  0xfb   :  { %1837 = vmatmul.mubr.bf16.gmra.mrb[72].mxu1 %v1541_v4  ;;  %v7411_v4 = vcombine.high %v2564_v19, %v2565_v56 }
  0xfc   :  { %1844 = vmatprep.mubr.bf16.mxu1 %v1574_v3  ;;  %5659 = vmatpush3.bf16.msra.mxu1 %v662_v36  ;;  %v2583_v36 = vld [vmem:[%s11614_s0 + $0xc8] sm:$0xff] }
  0xfd   :  { %5660 = vmatprep.subr.bf16.mxu1 %v663_v23  ;;  %11665 = vst [vmem:[#allocation7_spill] sm:$0xff] %v7411_v4  ;;  %v5952_v3 = vld [vmem:[%s11614_s0 + $0x1a0] ss:$8 sps:$4 sm:$0xff]   ;;  %v7428_v11 = vcombine.high %v2582_v9, %v2583_v36 }
  0xfe   :  { %1323 = vmatmul.mubr.bf16.gmra.mrb[88].mxu0 %v6611_v27  ;;  %v267_v27 = vld [vmem:[%s11616_s1 + $0xc8] sm:$0xff] }
  0xff   :  { %1330 = vmatprep.mubr.bf16.mxu0 %v6844_v62  ;;  %347 = vst.msk [vmem:[%s11617_s3 + $0xc8] sm:$0xff] %vm97_vm0, %v267_v27  ;;  %v1543_v62 = vpop.trf.xlu1  ;;  %11666 = vst [vmem:[#allocation8_spill] sm:$0xff] %v7428_v11  ;;  %v5954_v36 = vld [vmem:[%s11614_s0 + $0x1c0] ss:$8 sps:$4 sm:$0xff]  }
 0x100   :  { %5661 = vmatpush3.bf16.msra.mxu1 %v663_v23 }
 0x101   :  { %5662 = vmatprep.subr.bf16.mxu1 %v664_v21 }
 0x103   :  { %1845 = vmatmul.mubr.bf16.gmra.mrb[76].mxu1 %v1542_v8  ;;  %v1544_v45 = vpop.trf.xlu1 }
 0x104   :  { %1852 = vmatprep.mubr.bf16.mxu1 %v1575_v59  ;;  %5663 = vmatpush3.bf16.msra.mxu1 %v664_v21  ;;  %v2585_v21 = vld [vmem:[%s11614_s0 + $0xd8] sm:$0xff] }
 0x105   :  { %5664 = vmatprep.subr.bf16.mxu1 %v665_v34  ;;  %v7443_v27 = vcombine.high %v2584_v29, %v2585_v21 }
 0x106   :  { %1331 = vmatmul.mubr.bf16.gmra.mrb[92].mxu0 %v6683_v53  ;;  %v269_v53 = vld [vmem:[%s11616_s1 + $0xd8] sm:$0xff] }
 0x107   :  { %1338 = vmatprep.mubr.bf16.mxu0 %v6687_v54  ;;  %349 = vst.msk [vmem:[%s11617_s3 + $0xd8] sm:$0xff] %vm97_vm0, %v269_v53  ;;  %v5950_v54 = vld [vmem:[%s11614_s0 + $0x180] ss:$8 sps:$4 sm:$0xff]   ;;  %v1545_v37 = vpop.trf.xlu1  ;;  %11668 = vst [vmem:[#allocation10_spill] sm:$0xff] %v7443_v27 }
 0x108   :  { %5665 = vmatpush3.bf16.msra.mxu1 %v665_v34  ;;  %v2568_v34 = vld [vmem:[%s11614_s0 + $0x50] sm:$0xff] }
 0x109   :  { %3206 = vmatprep.subr.bf16.mxu1 %v11619_v1  ;;  %v7463_v48 = vcombine.high %v2568_v34, %v2569_v43  ;;  %v5891_v34 = vld [vmem:[%s11614_s0 + $0x180] ss:$8 sps:$4 sm:$0xff]  }
 0x10a   :  { %v2614_v1 = vld [vmem:[%s11614_s0 + $0x1c0] sm:$0xff] }
 0x10b   :  { %1853 = vmatmul.mubr.bf16.gmra.mrb[80].mxu1 %v1543_v62  ;;  %v1546_v23 = vpop.trf.xlu1  ;;  %11669 = vst [vmem:[#allocation11_spill] sm:$0xff] %v7463_v48 }
 0x10c   :  { %1860 = vmatprep.mubr.bf16.mxu1 %v1576_v51  ;;  %v2586_v51 = vld [vmem:[%s11614_s0 + $0xe0] sm:$0xff] }
 0x10e   :  { %1339 = vmatmul.mubr.bf16.gmra.mrb[96].mxu0 %v5950_v54  ;;  %v2587_v54 = vld [vmem:[%s11614_s0 + $0xe8] sm:$0xff] }
 0x10f   :  { %1346 = vmatprep.mubr.bf16.mxu0 %v6719_v5  ;;  %v2560_v5 = vld [vmem:[%s11614_s0 + $0x10] sm:$0xff]  ;;  %v1555_v38 = vpop.trf.xlu1  ;;  %v7484_v20 = vcombine.high %v2586_v51, %v2587_v54 }
 0x110   :  { %v7351_v63 = vcombine.high %v2560_v5, %v2561_v50  ;;  %v2224_v5 = vld [vmem:[%s11617_s3 + $0x10] sm:$0xff]  ;;  %v1588_v50 = vpop.trf.xlu0 }
 0x111   :  { %11670 = vst [vmem:[#allocation12_spill] sm:$0xff] %v7484_v20 }
 0x112   :  { %3576 = vxpose.xlu1.c.b16.cont [2/8] %v7351_v63, 128 }
 0x113   :  { %1861 = vmatmul.mubr.bf16.gmra.mrb[84].mxu1 %v1544_v45  ;;  %v2570_v45 = vld [vmem:[%s11614_s0 + $0x60] sm:$0xff]  ;;  %v1556_v10 = vpop.trf.xlu1 }
 0x114   :  { %1868 = vmatprep.mubr.bf16.mxu1 %v1577_v46  ;;  %v2571_v46 = vld [vmem:[%s11614_s0 + $0x68] sm:$0xff]  ;;  %v1589_v57 = vpop.trf.xlu0 }
 0x116   :  { %1347 = vmatmul.mubr.bf16.gmra.mrb[100].mxu0 %v5951_v60  ;;  %3577 = vxpose.xlu1.c.b16.cont [3/8] %v7380_v17, 128  ;;  %v7486_v60 = vcombine.high %v2570_v45, %v2571_v46  ;;  %v5893_v46 = vld [vmem:[%s11614_s0 + $0x100] ss:$8 sps:$4 sm:$0xff]  }
 0x117   :  { %1354 = vmatprep.mubr.bf16.mxu0 %v6738_v6  ;;  %v2581_v6 = vld [vmem:[%s11614_s0 + $0xb8] sm:$0xff] }
 0x118   :  { %v7405_v35 = vcombine.high %v2580_v2, %v2581_v6  ;;  %11671 = vst [vmem:[#allocation13_spill] sm:$0xff] %v7486_v60  ;;  %v7499_v2 = vcombine.high %v2588_v52, %v2589_v58  ;;  %v2230_v58 = vld [vmem:[%s11617_s3 + $0x40] sm:$0xff] }
 0x11a   :  { %11664 = vst [vmem:[#allocation6_spill] sm:$0xff] %v7405_v35  ;;  %3610 = vxpose.xlu0.c.b16.cont [4/8] %v7405_v35, 128  ;;  %3578 = vxpose.xlu1.c.b16.cont [4/8] %v7411_v4, 128  ;;  %11672 = vst [vmem:[#allocation14_spill] sm:$0xff] %v7499_v2 }
 0x11b   :  { %1869 = vmatmul.mubr.bf16.gmra.mrb[88].mxu1 %v1545_v37  ;;  %v2572_v37 = vld [vmem:[%s11614_s0 + $0x70] sm:$0xff] }
 0x11c   :  { %1876 = vmatprep.mubr.bf16.mxu1 %v1578_v33 }
 0x11e   :  { %1355 = vmatmul.mubr.bf16.gmra.mrb[104].mxu0 %v5952_v3  ;;  %3611 = vxpose.xlu0.c.b16.cont [5/8] %v7428_v11, 128 }
 0x11f   :  { %1362 = vmatprep.mubr.bf16.mxu0 %v6757_v49  ;;  %v2223_v49 = vld [vmem:[%s11617_s3 + $0x8] sm:$0xff]  ;;  %3579 = vxpose.xlu1.c.b16.cont [5/8] %v7430_v18, 128 }
 0x121   :  { %v1148_v32 = vpop.f32.mrb[0].mxu0 }
 0x122   :  { %2110 = vst.msk [vmem:[#allocation2] sm:$0xff] %vm97_vm0, %v1148_v32  ;;  %v2302_v8 = vadd.f32 %v2222_v26, %v1148_v32  ;;  %v1150_v59 = vpop.f32.mrb[1].mxu0  ;;  %3612 = vxpose.xlu0.c.b16.cont [6/8] %v7443_v27, 128  ;;  %v5955_v32 = vld [vmem:[%s11614_s0 + $0x1d0] ss:$8 sps:$4 sm:$0xff]  }
 0x123   :  { %1877 = vmatmul.mubr.bf16.gmra.mrb[92].mxu1 %v1546_v23  ;;  %v1151_v62 = vpop.f32.mrb[2].mxu0  ;;  %3580 = vxpose.xlu1.c.b16.cont [6/8] %v7463_v48, 128  ;;  %v2227_v23 = vld [vmem:[%s11617_s3 + $0x28] sm:$0xff]  ;;  %v1590_v59 = vpop.trf.xlu0  ;;  %v5925_v48 = vld [vmem:[%s11614_s0 + $0x210] ss:$8 sps:$4 sm:$0xff]  }
 0x124   :  { %1884 = vmatprep.mubr.bf16.mxu1 %v1587_v7  ;;  %2382 = vst.msk [vmem:[%s11617_s3] sm:$0xff] %vm97_vm0, %v2302_v8  ;;  %2111 = vst.msk [vmem:[#allocation2 + $0x8] sm:$0xff] %vm97_vm0, %v1151_v62  ;;  %v2303_v44 = vadd.f32 %v2223_v49, %v1151_v62  ;;  %v1153_v53 = vpop.f32.mrb[3].mxu0  ;;  %v1557_v49 = vpop.trf.xlu1  ;;  %v2228_v8 = vld [vmem:[%s11617_s3 + $0x30] sm:$0xff]  ;;  %v2229_v62 = vld [vmem:[%s11617_s3 + $0x38] sm:$0xff] }
 0x126   :  { %1363 = vmatmul.mubr.bf16.gmra.mrb[108].mxu0 %v5953_v40  ;;  %2383 = vst.msk [vmem:[%s11617_s3 + $0x8] sm:$0xff] %vm97_vm0, %v2303_v44  ;;  %3613 = vxpose.xlu0.c.b16.cont [7/8] %v7484_v20, 128 }
 0x127   :  { %1370 = vmatprep.mubr.bf16.mxu0 %v6785_v14  ;;  %v2573_v14 = vld [vmem:[%s11614_s0 + $0x78] sm:$0xff]  ;;  %3581 = vxpose.xlu1.c.b16.cont [7/8] %v7486_v60, 128 }
 0x128   :  { %v7502_v19 = vcombine.high %v2572_v37, %v2573_v14  ;;  %v1558_v52 = vpop.trf.xlu1  ;;  %v1591_v14 = vpop.trf.xlu0 }
 0x129   :  { %v1156_v42 = vpop.f32.mrb[4].mxu0 }
 0x12a   :  { %2112 = vst.msk [vmem:[#allocation2 + $0x10] sm:$0xff] %vm97_vm0, %v1156_v42  ;;  %v2304_v33 = vadd.f32 %v2224_v5, %v1156_v42  ;;  %v1158_v39 = vpop.f32.mrb[5].mxu0  ;;  %11673 = vst [vmem:[#allocation15_spill] sm:$0xff] %v7502_v19  ;;  %3614 = vxpose.xlu0.c.b16.end [8/8] %v7499_v2, 128 }
 0x12b   :  { %1885 = vmatmul.mubr.bf16.gmra.mrb[96].mxu1 %v1555_v38  ;;  %v1159_v6 = vpop.f32.mrb[6].mxu0  ;;  %3582 = vxpose.xlu1.c.b16.end [8/8] %v7502_v19, 128  ;;  %v5956_v38 = vld [vmem:[%s11614_s0 + $0x1e0] ss:$8 sps:$4 sm:$0xff]  }
 0x12c   :  { %1892 = vmatprep.mubr.bf16.mxu1 %v1588_v50  ;;  %2384 = vst.msk [vmem:[%s11617_s3 + $0x10] sm:$0xff] %vm97_vm0, %v2304_v33  ;;  %2113 = vst.msk [vmem:[#allocation2 + $0x18] sm:$0xff] %vm97_vm0, %v1159_v6  ;;  %v2305_v56 = vadd.f32 %v2225_v61, %v1159_v6  ;;  %v1161_v9 = vpop.f32.mrb[7].mxu0  ;;  %v5895_v61 = vld [vmem:[%s11614_s0 + $0x190] ss:$8 sps:$4 sm:$0xff]   ;;  %v2231_v39 = vld [vmem:[%s11617_s3 + $0x48] sm:$0xff] }
 0x12e   :  { %1371 = vmatmul.mubr.bf16.gmra.mrb[112].mxu0 %v5954_v36  ;;  %2385 = vst.msk [vmem:[%s11617_s3 + $0x18] sm:$0xff] %vm97_vm0, %v2305_v56  ;;  %3655 = vxpose.xlu0.c.b16.start [1/8] %v5891_v34, 128  ;;  %v5899_v36 = vld [vmem:[%s11614_s0 + $0x1a0] ss:$8 sps:$4 sm:$0xff]  }
 0x12f   :  { %1378 = vmatprep.mubr.bf16.mxu0 %v6803_v30  ;;  %3623 = vxpose.xlu1.c.b16.start [1/8] %v5893_v46, 128 }
 0x131   :  { %v1164_v3 = vpop.f32.mrb[8].mxu0 }
 0x132   :  { %2114 = vst.msk [vmem:[#allocation2 + $0x20] sm:$0xff] %vm97_vm0, %v1164_v3  ;;  %v2306_v26 = vadd.f32 %v2226_v12, %v1164_v3  ;;  %v1166_v7 = vpop.f32.mrb[9].mxu0  ;;  %3656 = vxpose.xlu0.c.b16.cont [2/8] %v5895_v61, 128  ;;  %v5901_v3 = vld [vmem:[%s11614_s0 + $0x120] ss:$8 sps:$4 sm:$0xff]  }
 0x133   :  { %1893 = vmatmul.mubr.bf16.gmra.mrb[100].mxu1 %v1556_v10  ;;  %v1167_v29 = vpop.f32.mrb[10].mxu0  ;;  %v5957_v7 = vld [vmem:[%s11614_s0 + $0x1f0] ss:$8 sps:$4 sm:$0xff]   ;;  %v2234_v61 = vld [vmem:[%s11617_s3 + $0x60] sm:$0xff] }
 0x134   :  { %1900 = vmatprep.mubr.bf16.mxu1 %v1589_v57  ;;  %2386 = vst.msk [vmem:[%s11617_s3 + $0x20] sm:$0xff] %vm97_vm0, %v2306_v26  ;;  %2115 = vst.msk [vmem:[#allocation2 + $0x28] sm:$0xff] %vm97_vm0, %v1167_v29  ;;  %v2307_v30 = vadd.f32 %v2227_v23, %v1167_v29  ;;  %v1169_v21 = vpop.f32.mrb[11].mxu0  ;;  %v1592_v26 = vpop.trf.xlu0 }
 0x135   :  { %v1559_v21 = vpop.trf.xlu1 }
 0x136   :  { %1379 = vmatmul.mubr.bf16.gmra.mrb[116].mxu0 %v5955_v32  ;;  %2387 = vst.msk [vmem:[%s11617_s3 + $0x28] sm:$0xff] %vm97_vm0, %v2307_v30  ;;  %3657 = vxpose.xlu0.c.b16.cont [3/8] %v5899_v36, 128  ;;  %v2232_v32 = vld [vmem:[%s11617_s3 + $0x50] sm:$0xff] }
 0x137   :  { %1386 = vmatprep.mubr.bf16.mxu0 %v6823_v55 }
 0x139   :  { %v1172_v43 = vpop.f32.mrb[12].mxu0 }
 0x13a   :  { %2116 = vst.msk [vmem:[#allocation2 + $0x30] sm:$0xff] %vm97_vm0, %v1172_v43  ;;  %v2308_v51 = vadd.f32 %v2228_v8, %v1172_v43  ;;  %v1174_v44 = vpop.f32.mrb[13].mxu0  ;;  %v2233_v43 = vld [vmem:[%s11617_s3 + $0x58] sm:$0xff] }
 0x13b   :  { %1901 = vmatmul.mubr.bf16.gmra.mrb[104].mxu1 %v1557_v49  ;;  %v1175_v53 = vpop.f32.mrb[14].mxu0 }
 0x13c   :  { %1908 = vmatprep.mubr.bf16.mxu1 %v1590_v59  ;;  %2388 = vst.msk [vmem:[%s11617_s3 + $0x30] sm:$0xff] %vm97_vm0, %v2308_v51  ;;  %2117 = vst.msk [vmem:[#allocation2 + $0x38] sm:$0xff] %vm97_vm0, %v1175_v53  ;;  %v2309_v55 = vadd.f32 %v2229_v62, %v1175_v53  ;;  %v1177_v54 = vpop.f32.mrb[15].mxu0  ;;  %v5903_v59 = vld [vmem:[%s11614_s0 + $0x1b0] ss:$8 sps:$4 sm:$0xff]   ;;  %v1593_v62 = vpop.trf.xlu0 }
 0x13d   :  { %3658 = vxpose.xlu0.c.b16.cont [4/8] %v5903_v59, 128  ;;  %v5959_v59 = vld [vmem:[%s11614_s0 + $0x210] ss:$8 sps:$4 sm:$0xff]  }
 0x13e   :  { %v5170_v45 = vpop.f32.mrb[0].mxu1  ;;  %1387 = vmatmul.mubr.bf16.gmra.mrb[120].mxu0 %v5956_v38  ;;  %2389 = vst.msk [vmem:[%s11617_s3 + $0x38] sm:$0xff] %vm97_vm0, %v2309_v55  ;;  %v5907_v55 = vld [vmem:[%s11614_s0 + $0x1c0] ss:$8 sps:$4 sm:$0xff]  }
 0x13f   :  { %v5171_v40 = vpop.f32.mrb[1].mxu1  ;;  %1394 = vmatprep.mubr.bf16.mxu0 %v6841_v13  ;;  %v5897_v13 = vld [vmem:[%s11614_s0 + $0x110] ss:$8 sps:$4 sm:$0xff]  }
 0x140   :  { %v7564_v5 = vadd.f32 %v5171_v40, %v5170_v45  ;;  %v5173_v50 = vpop.f32.mrb[2].mxu1  ;;  %3624 = vxpose.xlu1.c.b16.cont [2/8] %v5897_v13, 128  ;;  %v5909_v40 = vld [vmem:[%s11614_s0 + $0x140] ss:$8 sps:$4 sm:$0xff]  }
 0x141   :  { %v5174_v37 = vpop.f32.mrb[3].mxu1  ;;  %v1180_v33 = vpop.f32.mrb[16].mxu0  ;;  %3659 = vxpose.xlu0.c.b16.cont [5/8] %v5907_v55, 128  ;;  %v2235_v13 = vld [vmem:[%s11617_s3 + $0x68] sm:$0xff] }
 0x142   :  { %v7570_v42 = vadd.f32 %v5174_v37, %v5173_v50  ;;  %2118 = vst.msk [vmem:[#allocation2 + $0x40] sm:$0xff] %vm97_vm0, %v1180_v33  ;;  %v2310_v6 = vadd.f32 %v2230_v58, %v1180_v33  ;;  %v1182_v56 = vpop.f32.mrb[17].mxu0  ;;  %v1594_v50 = vpop.trf.xlu0 }
 0x143   :  { %1909 = vmatmul.mubr.bf16.gmra.mrb[108].mxu1 %v1558_v52  ;;  %v1183_v9 = vpop.f32.mrb[18].mxu0  ;;  %v1560_v37 = vpop.trf.xlu1 }
 0x144   :  { %1916 = vmatprep.mubr.bf16.mxu1 %v1591_v14  ;;  %2390 = vst.msk [vmem:[%s11617_s3 + $0x40] sm:$0xff] %vm97_vm0, %v2310_v6  ;;  %2119 = vst.msk [vmem:[#allocation2 + $0x48] sm:$0xff] %vm97_vm0, %v1183_v9  ;;  %v2311_v10 = vadd.f32 %v2231_v39, %v1183_v9  ;;  %v1185_v12 = vpop.f32.mrb[19].mxu0  ;;  %3625 = vxpose.xlu1.c.b16.cont [3/8] %v5901_v3, 128  ;;  %v5958_v14 = vld [vmem:[%s11614_s0 + $0x200] ss:$8 sps:$4 sm:$0xff]  }
 0x145   :  { %v5911_v6 = vld [vmem:[%s11614_s0 + $0x1d0] ss:$8 sps:$4 sm:$0xff]  }
 0x146   :  { %v5176_v57 = vpop.f32.mrb[4].mxu1  ;;  %1395 = vmatmul.mubr.bf16.gmra.mrb[124].mxu0 %v5957_v7  ;;  %2391 = vst.msk [vmem:[%s11617_s3 + $0x48] sm:$0xff] %vm97_vm0, %v2311_v10  ;;  %3660 = vxpose.xlu0.c.b16.cont [6/8] %v5911_v6, 128  ;;  %v7654_v12 = vpop.trf.xlu0  ;;  %v5917_v7 = vld [vmem:[%s11614_s0 + $0x160] ss:$8 sps:$4 sm:$0xff]  }
 0x147   :  { %v5177_v23 = vpop.f32.mrb[5].mxu1  ;;  %1402 = vmatprep.mubr.bf16.mxu0 %v6924_v28  ;;  %v5905_v28 = vld [vmem:[%s11614_s0 + $0x130] ss:$8 sps:$4 sm:$0xff]  }
 0x148   :  { %v7600_v29 = vadd.f32 %v5177_v23, %v5176_v57  ;;  %v5179_v30 = vpop.f32.mrb[6].mxu1  ;;  %3626 = vxpose.xlu1.c.b16.cont [4/8] %v5905_v28, 128  ;;  %v5915_v57 = vld [vmem:[%s11614_s0 + $0x1e0] ss:$8 sps:$4 sm:$0xff]  }
 0x149   :  { %v5180_v49 = vpop.f32.mrb[7].mxu1  ;;  %v1188_v34 = vpop.f32.mrb[20].mxu0 }
 0x14a   :  { %v7606_v8 = vadd.f32 %v5180_v49, %v5179_v30  ;;  %2120 = vst.msk [vmem:[#allocation2 + $0x50] sm:$0xff] %vm97_vm0, %v1188_v34  ;;  %v2312_v51 = vadd.f32 %v2232_v32, %v1188_v34  ;;  %v1190_v44 = vpop.f32.mrb[21].mxu0  ;;  %v1561_v49 = vpop.trf.xlu1  ;;  %3661 = vxpose.xlu0.c.b16.cont [7/8] %v5915_v57, 128  ;;  %v274_v34 = vld [vmem:[%s11616_s1 + $0x100] sm:$0xff] }
 0x14b   :  { %1917 = vmatmul.mubr.bf16.gmra.mrb[112].mxu1 %v1559_v21  ;;  %v1191_v53 = vpop.f32.mrb[22].mxu0  ;;  %354 = vst.msk [vmem:[%s11617_s3 + $0x100] sm:$0xff] %vm97_vm0, %v274_v34  ;;  %v5919_v44 = vld [vmem:[%s11614_s0 + $0x1f0] ss:$8 sps:$4 sm:$0xff]   ;;  %v7695_v55 = vpop.trf.xlu0 }
 0x14c   :  { %1924 = vmatprep.mubr.bf16.mxu1 %v1592_v26  ;;  %2392 = vst.msk [vmem:[%s11617_s3 + $0x50] sm:$0xff] %vm97_vm0, %v2312_v51  ;;  %2121 = vst.msk [vmem:[#allocation2 + $0x58] sm:$0xff] %vm97_vm0, %v1191_v53  ;;  %v2313_v54 = vadd.f32 %v2233_v43, %v1191_v53  ;;  %v1193_v45 = vpop.f32.mrb[23].mxu0  ;;  %3627 = vxpose.xlu1.c.b16.cont [5/8] %v5909_v40, 128  ;;  %v2236_v43 = vld [vmem:[%s11617_s3 + $0x70] sm:$0xff]  ;;  %v2237_v53 = vld [vmem:[%s11617_s3 + $0x78] sm:$0xff] }
 0x14d   :  { %v5921_v45 = vld [vmem:[%s11614_s0 + $0x170] ss:$8 sps:$4 sm:$0xff]  }
 0x14e   :  { %v5182_v46 = vpop.f32.mrb[8].mxu1  ;;  %2393 = vst.msk [vmem:[%s11617_s3 + $0x58] sm:$0xff] %vm97_vm0, %v2313_v54  ;;  %1403 = vmatmul.mubr.bf16.gmra.mrb[128].mxu0 %v5958_v14  ;;  %3662 = vxpose.xlu0.c.b16.end [8/8] %v5919_v44, 128  ;;  %v276_v40 = vld [vmem:[%s11616_s1 + $0x110] sm:$0xff]  ;;  %v277_v14 = vld [vmem:[%s11616_s1 + $0x118] sm:$0xff] }
 0x14f   :  { %v5183_v38 = vpop.f32.mrb[9].mxu1  ;;  %1410 = vmatprep.mubr.bf16.mxu0 %v6949_v41  ;;  %v5913_v41 = vld [vmem:[%s11614_s0 + $0x150] ss:$8 sps:$4 sm:$0xff]   ;;  %356 = vst.msk [vmem:[%s11617_s3 + $0x110] sm:$0xff] %vm97_vm0, %v276_v40  ;;  %357 = vst.msk [vmem:[%s11617_s3 + $0x118] sm:$0xff] %vm97_vm0, %v277_v14  ;;  %v2638_v40 = vld [vmem:[#allocation2] sm:$0xff] }
 0x150   :  { %v7633_v52 = vadd.f32 %v5183_v38, %v5182_v46  ;;  %v5185_v58 = vpop.f32.mrb[10].mxu1  ;;  %3628 = vxpose.xlu1.c.b16.cont [6/8] %v5913_v41, 128  ;;  %v275_v46 = vld [vmem:[%s11616_s1 + $0x108] sm:$0xff] }
 0x151   :  { %v5186_v33 = vpop.f32.mrb[11].mxu1  ;;  %v1196_v56 = vpop.f32.mrb[24].mxu0  ;;  %355 = vst.msk [vmem:[%s11617_s3 + $0x108] sm:$0xff] %vm97_vm0, %v275_v46 }
 0x152   :  { %v7642_v39 = vadd.f32 %v5186_v33, %v5185_v58  ;;  %2122 = vst.msk [vmem:[#allocation2 + $0x60] sm:$0xff] %vm97_vm0, %v1196_v56  ;;  %v2314_v9 = vadd.f32 %v2234_v61, %v1196_v56  ;;  %v1198_v36 = vpop.f32.mrb[25].mxu0  ;;  %v1562_v56 = vpop.trf.xlu1 }
 0x153   :  { %1925 = vmatmul.mubr.bf16.gmra.mrb[116].mxu1 %v1560_v37  ;;  %v1199_v10 = vpop.f32.mrb[26].mxu0  ;;  %v2238_v36 = vld [vmem:[%s11617_s3 + $0x80] sm:$0xff] }
 0x154   :  { %1932 = vmatprep.mubr.bf16.mxu1 %v1593_v62  ;;  %2394 = vst.msk [vmem:[%s11617_s3 + $0x60] sm:$0xff] %vm97_vm0, %v2314_v9  ;;  %2123 = vst.msk [vmem:[#allocation2 + $0x68] sm:$0xff] %vm97_vm0, %v1199_v10  ;;  %v2315_v3 = vadd.f32 %v2235_v13, %v1199_v10  ;;  %v1201_v23 = vpop.f32.mrb[27].mxu0  ;;  %3629 = vxpose.xlu1.c.b16.cont [7/8] %v5917_v7, 128  ;;  %v5960_v13 = vld [vmem:[%s11614_s0 + $0x220] ss:$8 sps:$4 sm:$0xff]   ;;  %v1605_v10 = vpop.trf.xlu0 }
 0x155   :  { %v278_v9 = vld [vmem:[%s11616_s1 + $0x120] sm:$0xff]  ;;  %v280_v23 = vld [vmem:[%s11616_s1 + $0x130] sm:$0xff] }
 0x156   :  { %v5188_v26 = vpop.f32.mrb[12].mxu1  ;;  %2395 = vst.msk [vmem:[%s11617_s3 + $0x68] sm:$0xff] %vm97_vm0, %v2315_v3  ;;  %1411 = vmatmul.mubr.bf16.gmra.mrb[132].mxu0 %v5959_v59  ;;  %358 = vst.msk [vmem:[%s11617_s3 + $0x120] sm:$0xff] %vm97_vm0, %v278_v9  ;;  %v279_v3 = vld [vmem:[%s11616_s1 + $0x128] sm:$0xff] }
 0x157   :  { %v5189_v30 = vpop.f32.mrb[13].mxu1  ;;  %1418 = vmatprep.mubr.bf16.mxu0 %v6963_v47  ;;  %359 = vst.msk [vmem:[%s11617_s3 + $0x128] sm:$0xff] %vm97_vm0, %v279_v3  ;;  %360 = vst.msk [vmem:[%s11617_s3 + $0x130] sm:$0xff] %vm97_vm0, %v280_v23  ;;  %v285_v23 = vld [vmem:[%s11616_s1 + $0x158] sm:$0xff] }
 0x158   :  { %v7671_v21 = vadd.f32 %v5189_v30, %v5188_v26  ;;  %v5191_v32 = vpop.f32.mrb[14].mxu1  ;;  %3630 = vxpose.xlu1.c.b16.end [8/8] %v5921_v45, 128  ;;  %v1606_v44 = vpop.trf.xlu0  ;;  %365 = vst.msk [vmem:[%s11617_s3 + $0x158] sm:$0xff] %vm97_vm0, %v285_v23  ;;  %v5963_v23 = vld [vmem:[%s11614_s0 + $0x250] ss:$8 sps:$4 sm:$0xff]  }
 0x159   :  { %v5192_v62 = vpop.f32.mrb[15].mxu1  ;;  %v1204_v28 = vpop.f32.mrb[28].mxu0 }
 0x15a   :  { %v7687_v51 = vadd.f32 %v5192_v62, %v5191_v32  ;;  %2124 = vst.msk [vmem:[#allocation2 + $0x70] sm:$0xff] %vm97_vm0, %v1204_v28  ;;  %v2316_v47 = vadd.f32 %v2236_v43, %v1204_v28  ;;  %v1206_v54 = vpop.f32.mrb[29].mxu0  ;;  %v281_v43 = vld [vmem:[%s11616_s1 + $0x138] sm:$0xff] }
 0x15b   :  { %1933 = vmatmul.mubr.bf16.gmra.mrb[120].mxu1 %v1561_v49  ;;  %v1207_v38 = vpop.f32.mrb[30].mxu0  ;;  %361 = vst.msk [vmem:[%s11617_s3 + $0x138] sm:$0xff] %vm97_vm0, %v281_v43  ;;  %v2240_v54 = vld [vmem:[%s11617_s3 + $0x90] sm:$0xff] }
 0x15c   :  { %1940 = vmatprep.mubr.bf16.mxu1 %v1594_v50  ;;  %2396 = vst.msk [vmem:[%s11617_s3 + $0x70] sm:$0xff] %vm97_vm0, %v2316_v47  ;;  %2125 = vst.msk [vmem:[#allocation2 + $0x78] sm:$0xff] %vm97_vm0, %v1207_v38  ;;  %v2317_v50 = vadd.f32 %v2237_v53, %v1207_v38  ;;  %v1209_v58 = vpop.f32.mrb[31].mxu0  ;;  %v5961_v53 = vld [vmem:[%s11614_s0 + $0x230] ss:$8 sps:$4 sm:$0xff]   ;;  %v282_v47 = vld [vmem:[%s11616_s1 + $0x140] sm:$0xff]  ;;  %v1607_v9 = vpop.trf.xlu0 }
 0x15d   :  { %362 = vst.msk [vmem:[%s11617_s3 + $0x140] sm:$0xff] %vm97_vm0, %v282_v47  ;;  %v2639_v38 = vld [vmem:[#allocation2 + $0x8] sm:$0xff] }
 0x15e   :  { %v5194_v37 = vpop.f32.mrb[16].mxu1  ;;  %2397 = vst.msk [vmem:[%s11617_s3 + $0x78] sm:$0xff] %vm97_vm0, %v2317_v50  ;;  %1419 = vmatmul.mubr.bf16.gmra.mrb[136].mxu0 %v5960_v13  ;;  %v283_v50 = vld [vmem:[%s11616_s1 + $0x148] sm:$0xff]  ;;  %v7821_v13 = vpack.c.bf16 %v2639_v38, %v2638_v40 }
 0x15f   :  { %v5195_v61 = vpop.f32.mrb[17].mxu1  ;;  %1426 = vmatprep.mubr.bf16.mxu0 %v6985_v31  ;;  %v2239_v31 = vld [vmem:[%s11617_s3 + $0x88] sm:$0xff]  ;;  %363 = vst.msk [vmem:[%s11617_s3 + $0x148] sm:$0xff] %vm97_vm0, %v283_v50 }
 0x160   :  { %v7731_v33 = vadd.f32 %v5195_v61, %v5194_v37  ;;  %v5197_v6 = vpop.f32.mrb[18].mxu1  ;;  %v2241_v37 = vld [vmem:[%s11617_s3 + $0x98] sm:$0xff] }
 0x161   :  { %v5198_v41 = vpop.f32.mrb[19].mxu1  ;;  %v1212_v26 = vpop.f32.mrb[32].mxu0 }
 0x162   :  { %v7747_v57 = vadd.f32 %v5198_v41, %v5197_v6  ;;  %2126 = vst.msk [vmem:[#allocation2 + $0x80] sm:$0xff] %vm97_vm0, %v1212_v26  ;;  %v2318_v7 = vadd.f32 %v2238_v36, %v1212_v26  ;;  %v1214_v30 = vpop.f32.mrb[33].mxu0 }
 0x163   :  { %1941 = vmatmul.mubr.bf16.gmra.mrb[124].mxu1 %v1562_v56  ;;  %v1215_v32 = vpop.f32.mrb[34].mxu0  ;;  %v5962_v30 = vld [vmem:[%s11614_s0 + $0x240] ss:$8 sps:$4 sm:$0xff]  }
 0x164   :  { %5666 = vmatprep.mubr.bf16.mxu1 %v7654_v12  ;;  %2398 = vst.msk [vmem:[%s11617_s3 + $0x80] sm:$0xff] %vm97_vm0, %v2318_v7  ;;  %2127 = vst.msk [vmem:[#allocation2 + $0x88] sm:$0xff] %vm97_vm0, %v1215_v32  ;;  %v2319_v49 = vadd.f32 %v2239_v31, %v1215_v32  ;;  %v1217_v59 = vpop.f32.mrb[35].mxu0  ;;  %v286_v32 = vld [vmem:[%s11616_s1 + $0x160] sm:$0xff] }
 0x165   :  { %366 = vst.msk [vmem:[%s11617_s3 + $0x160] sm:$0xff] %vm97_vm0, %v286_v32 }
 0x166   :  { %v5200_v34 = vpop.f32.mrb[20].mxu1  ;;  %2399 = vst.msk [vmem:[%s11617_s3 + $0x88] sm:$0xff] %vm97_vm0, %v2319_v49  ;;  %1427 = vmatmul.mubr.bf16.gmra.mrb[140].mxu0 %v5961_v53  ;;  %v2242_v49 = vld [vmem:[%s11617_s3 + $0xa0] sm:$0xff]  ;;  %v288_v53 = vld [vmem:[%s11616_s1 + $0x170] sm:$0xff] }
 0x167   :  { %v5201_v62 = vpop.f32.mrb[21].mxu1  ;;  %1434 = vmatprep.mubr.bf16.mxu0 %v7006_v22  ;;  %v284_v22 = vld [vmem:[%s11616_s1 + $0x150] sm:$0xff]  ;;  %368 = vst.msk [vmem:[%s11617_s3 + $0x170] sm:$0xff] %vm97_vm0, %v288_v53  ;;  %v291_v53 = vld [vmem:[%s11616_s1 + $0x188] sm:$0xff] }
 0x168   :  { %v7784_v12 = vadd.f32 %v5201_v62, %v5200_v34  ;;  %v5203_v28 = vpop.f32.mrb[22].mxu1  ;;  %364 = vst.msk [vmem:[%s11617_s3 + $0x150] sm:$0xff] %vm97_vm0, %v284_v22  ;;  %v2640_v34 = vld [vmem:[#allocation2 + $0x10] sm:$0xff]  ;;  %v2641_v62 = vld [vmem:[#allocation2 + $0x18] sm:$0xff]  ;;  %371 = vst.msk [vmem:[%s11617_s3 + $0x188] sm:$0xff] %vm97_vm0, %v291_v53 }
 0x169   :  { %v5204_v45 = vpop.f32.mrb[23].mxu1  ;;  %v1220_v58 = vpop.f32.mrb[36].mxu0  ;;  %v2654_v14 = vld [vmem:[#allocation2 + $0x80] sm:$0xff] }
 0x16a   :  { %v7800_v46 = vadd.f32 %v5204_v45, %v5203_v28  ;;  %2128 = vst.msk [vmem:[#allocation2 + $0x90] sm:$0xff] %vm97_vm0, %v1220_v58  ;;  %v2320_v61 = vadd.f32 %v2240_v54, %v1220_v58  ;;  %v1222_v6 = vpop.f32.mrb[37].mxu0  ;;  %v287_v28 = vld [vmem:[%s11616_s1 + $0x168] sm:$0xff]  ;;  %v1608_v45 = vpop.trf.xlu0 }
 0x16b   :  { %5667 = vmatmul.mubr.bf16.vlgmr.msra.gmra.mrb[128].mxu1 %v7695_v55  ;;  %v1223_v55 = vpop.f32.mrb[38].mxu0  ;;  %v2655_v56 = vld [vmem:[#allocation2 + $0x88] sm:$0xff]  ;;  %367 = vst.msk [vmem:[%s11617_s3 + $0x168] sm:$0xff] %vm97_vm0, %v287_v28  ;;  %v2590_v28 = vld [vmem:[%s11614_s0 + $0x100] sm:$0xff] }
 0x16c   :  { %5670 = vmatprep.mubr.bf16.mxu1 %v1605_v10  ;;  %2400 = vst.msk [vmem:[%s11617_s3 + $0x90] sm:$0xff] %vm97_vm0, %v2320_v61  ;;  %2129 = vst.msk [vmem:[#allocation2 + $0x98] sm:$0xff] %vm97_vm0, %v1223_v55  ;;  %v2321_v36 = vadd.f32 %v2241_v37, %v1223_v55  ;;  %v7828_v41 = vpack.c.bf16 %v2655_v56, %v2654_v14  ;;  %v1225_v10 = vpop.f32.mrb[39].mxu0  ;;  %v7879_v37 = vpack.c.bf16 %v2641_v62, %v2640_v34  ;;  %v289_v55 = vld [vmem:[%s11616_s1 + $0x178] sm:$0xff]  ;;  %v2643_v62 = vld [vmem:[#allocation2 + $0x28] sm:$0xff] }
 0x16d   :  { %369 = vst.msk [vmem:[%s11617_s3 + $0x178] sm:$0xff] %vm97_vm0, %v289_v55  ;;  %v5964_v53 = vld [vmem:[%s11614_s0 + $0x260] ss:$8 sps:$4 sm:$0xff]  }
 0x16e   :  { %v5206_v3 = vpop.f32.mrb[24].mxu1  ;;  %2401 = vst.msk [vmem:[%s11617_s3 + $0x98] sm:$0xff] %vm97_vm0, %v2321_v36  ;;  %5402 = vmatprep.subr.bf16.mxu0 %v7828_v41  ;;  %1435 = vmatmul.mubr.bf16.gmra.mrb[144].mxu0 %v5962_v30  ;;  %v2607_v36 = vld [vmem:[%s11614_s0 + $0x188] sm:$0xff]  ;;  %v2245_v30 = vld [vmem:[%s11617_s3 + $0xb8] sm:$0xff] }
 0x16f   :  { %v5207_v26 = vpop.f32.mrb[25].mxu1  ;;  %5403 = vmatpush3.bf16.msra.mxu0 %v7821_v13  ;;  %1442 = vmatprep.mubr.bf16.mxu0 %v7029_v24  ;;  %v2243_v24 = vld [vmem:[%s11617_s3 + $0xa8] sm:$0xff] }
 0x170   :  { %v7842_v31 = vadd.f32 %v5207_v26, %v5206_v3  ;;  %v5209_v7 = vpop.f32.mrb[26].mxu1  ;;  %v290_v26 = vld [vmem:[%s11616_s1 + $0x180] sm:$0xff] }
 0x171   :  { %v5210_v59 = vpop.f32.mrb[27].mxu1  ;;  %v1228_v47 = vpop.f32.mrb[40].mxu0  ;;  %v2656_v54 = vld [vmem:[#allocation2 + $0x90] sm:$0xff]  ;;  %370 = vst.msk [vmem:[%s11617_s3 + $0x180] sm:$0xff] %vm97_vm0, %v290_v26 }
 0x172   :  { %v7859_v43 = vadd.f32 %v5210_v59, %v5209_v7  ;;  %2130 = vst.msk [vmem:[#allocation2 + $0xa0] sm:$0xff] %vm97_vm0, %v1228_v47  ;;  %v2322_v40 = vadd.f32 %v2242_v49, %v1228_v47  ;;  %v1230_v38 = vpop.f32.mrb[41].mxu0  ;;  %v2244_v7 = vld [vmem:[%s11617_s3 + $0xb0] sm:$0xff]  ;;  %v2642_v49 = vld [vmem:[#allocation2 + $0x20] sm:$0xff]  ;;  %v1609_v59 = vpop.trf.xlu0 }
 0x173   :  { %5671 = vmatmul.mubr.bf16.gmra.mrb[132].mxu1 %v1606_v44  ;;  %v1231_v50 = vpop.f32.mrb[42].mxu0  ;;  %v2657_v58 = vld [vmem:[#allocation2 + $0x98] sm:$0xff]  ;;  %v7881_v44 = vpop.trf.xlu1  ;;  %v292_v38 = vld [vmem:[%s11616_s1 + $0x190] sm:$0xff] }
 0x174   :  { %5674 = vmatprep.mubr.bf16.mxu1 %v1607_v9  ;;  %2402 = vst.msk [vmem:[%s11617_s3 + $0xa0] sm:$0xff] %vm97_vm0, %v2322_v40  ;;  %2131 = vst.msk [vmem:[#allocation2 + $0xa8] sm:$0xff] %vm97_vm0, %v1231_v50  ;;  %v2323_v14 = vadd.f32 %v2243_v24, %v1231_v50  ;;  %v7888_v22 = vpack.c.bf16 %v2657_v58, %v2656_v54  ;;  %v1233_v61 = vpop.f32.mrb[43].mxu0  ;;  %v2606_v9 = vld [vmem:[%s11614_s0 + $0x180] sm:$0xff]  ;;  %v2591_v40 = vld [vmem:[%s11614_s0 + $0x108] sm:$0xff] }
 0x175   :  { %v7936_v47 = vcombine.high %v2606_v9, %v2607_v36  ;;  %372 = vst.msk [vmem:[%s11617_s3 + $0x190] sm:$0xff] %vm97_vm0, %v292_v38  ;;  %v7956_v61 = vpack.c.bf16 %v2643_v62, %v2642_v49  ;;  %v2608_v36 = vld [vmem:[%s11614_s0 + $0x190] sm:$0xff]  ;;  %v2246_v49 = vld [vmem:[%s11617_s3 + $0xc0] sm:$0xff] }
 0x176   :  { %v5212_v6 = vpop.f32.mrb[28].mxu1  ;;  %2403 = vst.msk [vmem:[%s11617_s3 + $0xa8] sm:$0xff] %vm97_vm0, %v2323_v14  ;;  %5404 = vmatprep.subr.bf16.mxu0 %v7888_v22  ;;  %1443 = vmatmul.mubr.bf16.gmra.mrb[148].mxu0 %v5963_v23  ;;  %v293_v23 = vld [vmem:[%s11616_s1 + $0x198] sm:$0xff]  ;;  %v2644_v38 = vld [vmem:[#allocation2 + $0x30] sm:$0xff] }
 0x177   :  { %v5213_v56 = vpop.f32.mrb[29].mxu1  ;;  %5405 = vmatpush3.bf16.msra.mxu0 %v7879_v37  ;;  %1450 = vmatprep.mubr.bf16.mxu0 %v7043_v15  ;;  %11674 = vst [vmem:[#allocation16_spill] sm:$0xff] %v7936_v47  ;;  %v7938_v54 = vpop.trf.xlu1  ;;  %373 = vst.msk [vmem:[%s11617_s3 + $0x198] sm:$0xff] %vm97_vm0, %v293_v23  ;;  %v296_v23 = vld [vmem:[%s11616_s1 + $0x1b0] sm:$0xff] }
 0x178   :  { %v7908_v10 = vadd.f32 %v5213_v56, %v5212_v6  ;;  %v5215_v3 = vpop.f32.mrb[30].mxu1  ;;  %3671 = vxpose.xlu0.c.b16.start [1/8] %v7936_v47, 128  ;;  %376 = vst.msk [vmem:[%s11617_s3 + $0x1b0] sm:$0xff] %vm97_vm0, %v296_v23 }
 0x179   :  { %v5216_v32 = vpop.f32.mrb[31].mxu1  ;;  %v1236_v24 = vpop.f32.mrb[44].mxu0  ;;  %v2658_v15 = vld [vmem:[#allocation2 + $0xa0] sm:$0xff] }
 0x17a   :  { %v7928_v34 = vadd.f32 %v5216_v32, %v5215_v3  ;;  %2132 = vst.msk [vmem:[#allocation2 + $0xb0] sm:$0xff] %vm97_vm0, %v1236_v24  ;;  %v2324_v50 = vadd.f32 %v2244_v7, %v1236_v24  ;;  %v1238_v58 = vpop.f32.mrb[45].mxu0  ;;  %v7968_v3 = vcombine.high %v2590_v28, %v2591_v40  ;;  %v2609_v7 = vld [vmem:[%s11614_s0 + $0x198] sm:$0xff]  ;;  %v1610_v28 = vpop.trf.xlu0  ;;  %v294_v24 = vld [vmem:[%s11616_s1 + $0x1a0] sm:$0xff] }
 0x17b   :  { %5675 = vmatmul.mubr.bf16.gmra.mrb[136].mxu1 %v1608_v45  ;;  %v1239_v45 = vpop.f32.mrb[46].mxu0  ;;  %v2659_v14 = vld [vmem:[#allocation2 + $0xa8] sm:$0xff]  ;;  %v2593_v32 = vld [vmem:[%s11614_s0 + $0x118] sm:$0xff]  ;;  %v2610_v58 = vld [vmem:[%s11614_s0 + $0x1a0] sm:$0xff]  ;;  %374 = vst.msk [vmem:[%s11617_s3 + $0x1a0] sm:$0xff] %vm97_vm0, %v294_v24 }
 0x17c   :  { %5678 = vmatprep.mubr.bf16.mxu1 %v1609_v59  ;;  %2404 = vst.msk [vmem:[%s11617_s3 + $0xb0] sm:$0xff] %vm97_vm0, %v2324_v50  ;;  %2133 = vst.msk [vmem:[#allocation2 + $0xb8] sm:$0xff] %vm97_vm0, %v1239_v45  ;;  %v2325_v6 = vadd.f32 %v2245_v30, %v1239_v45  ;;  %v7963_v55 = vpack.c.bf16 %v2659_v14, %v2658_v15  ;;  %v1241_v56 = vpop.f32.mrb[47].mxu0  ;;  %v2592_v30 = vld [vmem:[%s11614_s0 + $0x110] sm:$0xff]  ;;  %v2247_v15 = vld [vmem:[%s11617_s3 + $0xc8] sm:$0xff]  ;;  %v8006_v50 = vpop.trf.xlu1  ;;  %3639 = vxpose.xlu1.c.b16.start [1/8] %v7968_v3, 128 }
 0x17d   :  { %11675 = vst [vmem:[#allocation17_spill] sm:$0xff] %v7968_v3  ;;  %v2611_v45 = vld [vmem:[%s11614_s0 + $0x1a8] sm:$0xff]  ;;  %v8022_v56 = vcombine.high %v2608_v36, %v2609_v7 }
 0x17e   :  { %v5218_v9 = vpop.f32.mrb[32].mxu1  ;;  %2405 = vst.msk [vmem:[%s11617_s3 + $0xb8] sm:$0xff] %vm97_vm0, %v2325_v6  ;;  %5406 = vmatprep.subr.bf16.mxu0 %v7963_v55  ;;  %1451 = vmatmul.mubr.bf16.gmra.mrb[152].mxu0 %v5964_v53  ;;  %v2645_v6 = vld [vmem:[#allocation2 + $0x38] sm:$0xff]  ;;  %v2595_v36 = vld [vmem:[%s11614_s0 + $0x128] sm:$0xff] }
 0x17f   :  { %v5219_v26 = vpop.f32.mrb[33].mxu1  ;;  %5407 = vmatpush3.bf16.msra.mxu0 %v7956_v61  ;;  %1458 = vmatprep.mubr.bf16.mxu0 %v7059_v25  ;;  %11676 = vst [vmem:[#allocation18_spill] sm:$0xff] %v8022_v56  ;;  %v8024_v25 = vcombine.high %v2592_v30, %v2593_v32  ;;  %v8049_v24 = vpack.c.bf16 %v2645_v6, %v2644_v38 }
 0x180   :  { %v7994_v59 = vadd.f32 %v5219_v26, %v5218_v9  ;;  %v5221_v62 = vpop.f32.mrb[34].mxu1  ;;  %v295_v9 = vld [vmem:[%s11616_s1 + $0x1a8] sm:$0xff]  ;;  %3672 = vxpose.xlu0.c.b16.cont [2/8] %v8022_v56, 128  ;;  %v8062_v38 = vcombine.high %v2610_v58, %v2611_v45  ;;  %v2597_v58 = vld [vmem:[%s11614_s0 + $0x138] sm:$0xff] }
 0x181   :  { %v5222_v40 = vpop.f32.mrb[35].mxu1  ;;  %11677 = vst [vmem:[#allocation19_spill] sm:$0xff] %v8024_v25  ;;  %v1244_v26 = vpop.f32.mrb[48].mxu0  ;;  %v2660_v53 = vld [vmem:[#allocation2 + $0xb0] sm:$0xff]  ;;  %375 = vst.msk [vmem:[%s11617_s3 + $0x1a8] sm:$0xff] %vm97_vm0, %v295_v9  ;;  %3640 = vxpose.xlu1.c.b16.cont [2/8] %v8024_v25, 128 }
 0x182   :  { %v8019_v14 = vadd.f32 %v5222_v40, %v5221_v62  ;;  %v2594_v62 = vld [vmem:[%s11614_s0 + $0x120] sm:$0xff]  ;;  %2134 = vst.msk [vmem:[#allocation2 + $0xc0] sm:$0xff] %vm97_vm0, %v1244_v26  ;;  %v2326_v7 = vadd.f32 %v2246_v49, %v1244_v26  ;;  %v1246_v30 = vpop.f32.mrb[49].mxu0  ;;  %v3599_v40 = vpop.trf.xlu0  ;;  %11678 = vst [vmem:[#allocation20_spill] sm:$0xff] %v8062_v38 }
 0x183   :  { %5679 = vmatmul.mubr.bf16.gmra.mrb[140].mxu1 %v1610_v28  ;;  %v1247_v32 = vpop.f32.mrb[50].mxu0  ;;  %v2661_v28 = vld [vmem:[#allocation2 + $0xb8] sm:$0xff]  ;;  %v8064_v6 = vcombine.high %v2594_v62, %v2595_v36 }
 0x184   :  { %5682 = vmatprep.mubr.bf16.mxu1 %v7881_v44  ;;  %2406 = vst.msk [vmem:[%s11617_s3 + $0xc0] sm:$0xff] %vm97_vm0, %v2326_v7  ;;  %2135 = vst.msk [vmem:[#allocation2 + $0xc8] sm:$0xff] %vm97_vm0, %v1247_v32  ;;  %v2327_v9 = vadd.f32 %v2247_v15, %v1247_v32  ;;  %v8056_v23 = vpack.c.bf16 %v2661_v28, %v2660_v53  ;;  %v1249_v49 = vpop.f32.mrb[51].mxu0  ;;  %v2612_v44 = vld [vmem:[%s11614_s0 + $0x1b0] sm:$0xff]  ;;  %v297_v7 = vld [vmem:[%s11616_s1 + $0x1b8] sm:$0xff]  ;;  %v8069_v15 = vpop.trf.xlu1  ;;  %3673 = vxpose.xlu0.c.b16.cont [3/8] %v8062_v38, 128 }
 0x185   :  { %11679 = vst [vmem:[#allocation21_spill] sm:$0xff] %v8064_v6  ;;  %v2613_v53 = vld [vmem:[%s11614_s0 + $0x1b8] sm:$0xff]  ;;  %v2596_v32 = vld [vmem:[%s11614_s0 + $0x130] sm:$0xff]  ;;  %377 = vst.msk [vmem:[%s11617_s3 + $0x1b8] sm:$0xff] %vm97_vm0, %v297_v7  ;;  %3641 = vxpose.xlu1.c.b16.cont [3/8] %v8064_v6, 128 }
 0x186   :  { %v5224_v26 = vpop.f32.mrb[36].mxu1  ;;  %2407 = vst.msk [vmem:[%s11617_s3 + $0xc8] sm:$0xff] %vm97_vm0, %v2327_v9  ;;  %5408 = vmatprep.subr.bf16.mxu0 %v8056_v23  ;;  %v5965_v36 = vld [vmem:[%s11614_s0 + $0x270] ss:$8 sps:$4 sm:$0xff]   ;;  %v298_v28 = vld [vmem:[%s11616_s1 + $0x1c0] sm:$0xff]  ;;  %v8115_v56 = vcombine.high %v2612_v44, %v2613_v53  ;;  %v8117_v47 = vcombine.high %v2596_v32, %v2597_v58  ;;  %v2599_v58 = vld [vmem:[%s11614_s0 + $0x148] sm:$0xff] }
 0x187   :  { %v5225_v30 = vpop.f32.mrb[37].mxu1  ;;  %1459 = vmatmul.mubr.bf16.gmra.mrb[156].mxu0 %v5965_v36  ;;  %v2248_v9 = vld [vmem:[%s11617_s3 + $0xd0] sm:$0xff]  ;;  %v2249_v49 = vld [vmem:[%s11617_s3 + $0xd8] sm:$0xff]  ;;  %v2646_v7 = vld [vmem:[#allocation2 + $0x40] sm:$0xff]  ;;  %378 = vst.msk [vmem:[%s11617_s3 + $0x1c0] sm:$0xff] %vm97_vm0, %v298_v28 }
 0x188   :  { %v8089_v45 = vadd.f32 %v5225_v30, %v5224_v26  ;;  %v5227_v62 = vpop.f32.mrb[38].mxu1  ;;  %5409 = vmatpush3.bf16.msra.mxu0 %v8049_v24  ;;  %3751 = vmatprep.mubr.bf16.mxu0 %v3599_v40  ;;  %v2647_v36 = vld [vmem:[#allocation2 + $0x48] sm:$0xff]  ;;  %11680 = vst [vmem:[#allocation22_spill] sm:$0xff] %v8115_v56  ;;  %11681 = vst [vmem:[#allocation23_spill] sm:$0xff] %v8117_v47  ;;  %v300_v44 = vld [vmem:[%s11616_s1 + $0x1d0] sm:$0xff] }
 0x189   :  { %v5228_v26 = vpop.f32.mrb[39].mxu1  ;;  %v299_v40 = vld [vmem:[%s11616_s1 + $0x1c8] sm:$0xff]  ;;  %v1252_v28 = vpop.f32.mrb[52].mxu0  ;;  %380 = vst.msk [vmem:[%s11617_s3 + $0x1d0] sm:$0xff] %vm97_vm0, %v300_v44  ;;  %v8145_v6 = vpack.c.bf16 %v2647_v36, %v2646_v7  ;;  %3674 = vxpose.xlu0.c.b16.cont [4/8] %v8115_v56, 128  ;;  %3642 = vxpose.xlu1.c.b16.cont [4/8] %v8117_v47, 128  ;;  %v301_v7 = vld [vmem:[%s11616_s1 + $0x1d8] sm:$0xff] }
 0x18a   :  { %v8108_v30 = vadd.f32 %v5228_v26, %v5227_v62  ;;  %v2662_v62 = vld [vmem:[#allocation2 + $0xc0] sm:$0xff]  ;;  %v2615_v26 = vld [vmem:[%s11614_s0 + $0x1c8] sm:$0xff]  ;;  %379 = vst.msk [vmem:[%s11617_s3 + $0x1c8] sm:$0xff] %vm97_vm0, %v299_v40  ;;  %2136 = vst.msk [vmem:[#allocation2 + $0xd0] sm:$0xff] %vm97_vm0, %v1252_v28  ;;  %v2328_v53 = vadd.f32 %v2248_v9, %v1252_v28  ;;  %v1254_v32 = vpop.f32.mrb[53].mxu0  ;;  %v1623_v9 = vpop.trf.xlu1 }
 0x18b   :  { %5683 = vmatmul.mubr.bf16.gmra.mrb[144].mxu1 %v7938_v54  ;;  %v2598_v54 = vld [vmem:[%s11614_s0 + $0x140] sm:$0xff]  ;;  %v1255_v40 = vpop.f32.mrb[54].mxu0  ;;  %v2663_v38 = vld [vmem:[#allocation2 + $0xc8] sm:$0xff]  ;;  %11682 = vst [vmem:[#allocation24_spill] sm:$0xff] %v8145_v6  ;;  %v8156_v44 = vcombine.high %v2614_v1, %v2615_v26  ;;  %381 = vst.msk [vmem:[%s11617_s3 + $0x1d8] sm:$0xff] %vm97_vm0, %v301_v7 }
 0x18c   :  { %5686 = vmatprep.mubr.bf16.mxu1 %v8006_v50  ;;  %2408 = vst.msk [vmem:[%s11617_s3 + $0xd0] sm:$0xff] %vm97_vm0, %v2328_v53  ;;  %2137 = vst.msk [vmem:[#allocation2 + $0xd8] sm:$0xff] %vm97_vm0, %v1255_v40  ;;  %v2329_v50 = vadd.f32 %v2249_v49, %v1255_v40  ;;  %v8152_v28 = vpack.c.bf16 %v2663_v38, %v2662_v62  ;;  %v1257_v32 = vpop.f32.mrb[55].mxu0  ;;  %v8161_v3 = vcombine.high %v2598_v54, %v2599_v58  ;;  %v302_v49 = vld [vmem:[%s11616_s1 + $0x1e0] sm:$0xff]  ;;  %v2251_v26 = vld [vmem:[%s11617_s3 + $0xe8] sm:$0xff] }
 0x18d   :  { %11683 = vst [vmem:[#allocation25_spill] sm:$0xff] %v8156_v44  ;;  %v2250_v62 = vld [vmem:[%s11617_s3 + $0xe0] sm:$0xff]  ;;  %382 = vst.msk [vmem:[%s11617_s3 + $0x1e0] sm:$0xff] %vm97_vm0, %v302_v49  ;;  %v2648_v58 = vld [vmem:[#allocation2 + $0x50] sm:$0xff]  ;;  %3675 = vxpose.xlu0.c.b16.cont [5/8] %v8156_v44, 128 }
 0x18e   :  { %v5230_v25 = vpop.f32.mrb[40].mxu1  ;;  %11684 = vst [vmem:[#allocation26_spill] sm:$0xff] %v8161_v3  ;;  %2409 = vst.msk [vmem:[%s11617_s3 + $0xd8] sm:$0xff] %vm97_vm0, %v2329_v50  ;;  %5410 = vmatprep.subr.bf16.mxu0 %v8152_v28  ;;  %v2649_v40 = vld [vmem:[#allocation2 + $0x58] sm:$0xff]  ;;  %3643 = vxpose.xlu1.c.b16.cont [5/8] %v8161_v3, 128 }
 0x18f   :  { %v5231_v36 = vpop.f32.mrb[41].mxu1  ;;  %5411 = vmatpush3.bf16.msra.mxu0 %v8145_v6  ;;  %v2617_v50 = vld [vmem:[%s11614_s0 + $0x1d8] sm:$0xff]  ;;  %v8206_v47 = vpack.c.bf16 %v2649_v40, %v2648_v58  ;;  %v2618_v58 = vld [vmem:[%s11614_s0 + $0x1e0] sm:$0xff]  ;;  %v304_v40 = vld [vmem:[%s11616_s1 + $0x1f0] sm:$0xff] }
 0x190   :  { %v8172_v1 = vadd.f32 %v5231_v36, %v5230_v25  ;;  %v5233_v38 = vpop.f32.mrb[42].mxu1  ;;  %v2616_v25 = vld [vmem:[%s11614_s0 + $0x1d0] sm:$0xff]  ;;  %v1624_v36 = vpop.trf.xlu1  ;;  %v2601_v49 = vld [vmem:[%s11614_s0 + $0x158] sm:$0xff]  ;;  %384 = vst.msk [vmem:[%s11617_s3 + $0x1f0] sm:$0xff] %vm97_vm0, %v304_v40 }
 0x191   :  { %v5234_v53 = vpop.f32.mrb[43].mxu1  ;;  %v1260_v32 = vpop.f32.mrb[56].mxu0  ;;  %v2664_v7 = vld [vmem:[#allocation2 + $0xd0] sm:$0xff]  ;;  %11685 = vst [vmem:[#allocation27_spill] sm:$0xff] %v8206_v47  ;;  %v8215_v11 = vcombine.high %v2616_v25, %v2617_v50  ;;  %v2603_v25 = vld [vmem:[%s11614_s0 + $0x168] sm:$0xff]  ;;  %v2621_v40 = vld [vmem:[%s11614_s0 + $0x1f8] sm:$0xff] }
 0x192   :  { %v8191_v54 = vadd.f32 %v5234_v53, %v5233_v38  ;;  %v2600_v38 = vld [vmem:[%s11614_s0 + $0x150] sm:$0xff]  ;;  %2138 = vst.msk [vmem:[#allocation2 + $0xe0] sm:$0xff] %vm97_vm0, %v1260_v32  ;;  %v2330_v53 = vadd.f32 %v2250_v62, %v1260_v32  ;;  %v1262_v56 = vpop.f32.mrb[57].mxu0 }
 0x193   :  { %5687 = vmatmul.mubr.bf16.gmra.mrb[148].mxu1 %v8069_v15  ;;  %v1263_v44 = vpop.f32.mrb[58].mxu0  ;;  %v2665_v3 = vld [vmem:[#allocation2 + $0xd8] sm:$0xff]  ;;  %11687 = vst [vmem:[#allocation29_spill] sm:$0xff] %v8215_v11  ;;  %v8217_v56 = vcombine.high %v2600_v38, %v2601_v49  ;;  %3676 = vxpose.xlu0.c.b16.cont [6/8] %v8215_v11, 128  ;;  %v2650_v49 = vld [vmem:[#allocation2 + $0x60] sm:$0xff]  ;;  %v2620_v11 = vld [vmem:[%s11614_s0 + $0x1f0] sm:$0xff] }
 0x194   :  { %5690 = vmatprep.mubr.bf16.mxu1 %v1623_v9  ;;  %2410 = vst.msk [vmem:[%s11617_s3 + $0xe0] sm:$0xff] %vm97_vm0, %v2330_v53  ;;  %2139 = vst.msk [vmem:[#allocation2 + $0xe8] sm:$0xff] %vm97_vm0, %v1263_v44  ;;  %v2331_v15 = vadd.f32 %v2251_v26, %v1263_v44  ;;  %v8213_v2 = vpack.c.bf16 %v2665_v3, %v2664_v7  ;;  %v1265_v20 = vpop.f32.mrb[59].mxu0  ;;  %v303_v9 = vld [vmem:[%s11616_s1 + $0x1e8] sm:$0xff]  ;;  %v2602_v26 = vld [vmem:[%s11614_s0 + $0x160] sm:$0xff]  ;;  %v1625_v32 = vpop.trf.xlu1 }
 0x195   :  { %11688 = vst [vmem:[#allocation30_spill] sm:$0xff] %v8217_v56  ;;  %v2619_v3 = vld [vmem:[%s11614_s0 + $0x1e8] sm:$0xff]  ;;  %383 = vst.msk [vmem:[%s11617_s3 + $0x1e8] sm:$0xff] %vm97_vm0, %v303_v9  ;;  %3644 = vxpose.xlu1.c.b16.cont [6/8] %v8217_v56, 128  ;;  %v2253_v7 = vld [vmem:[%s11617_s3 + $0xf8] sm:$0xff]  ;;  %v8271_v56 = vcombine.high %v2602_v26, %v2603_v25 }
 0x196   :  { %11686 = vst [vmem:[#allocation28_spill] sm:$0xff] %v8213_v2  ;;  %v5236_v27 = vpop.f32.mrb[44].mxu1  ;;  %2411 = vst.msk [vmem:[%s11617_s3 + $0xe8] sm:$0xff] %vm97_vm0, %v2331_v15  ;;  %5412 = vmatprep.subr.bf16.mxu0 %v8213_v2  ;;  %v2651_v53 = vld [vmem:[#allocation2 + $0x68] sm:$0xff]  ;;  %v8263_v15 = vcombine.high %v2618_v58, %v2619_v3  ;;  %v2604_v58 = vld [vmem:[%s11614_s0 + $0x170] sm:$0xff] }
 0x197   :  { %v5237_v62 = vpop.f32.mrb[45].mxu1  ;;  %5413 = vmatpush3.bf16.msra.mxu0 %v8206_v47  ;;  %11690 = vst [vmem:[#allocation32_spill] sm:$0xff] %v8271_v56  ;;  %v8281_v0 = vpack.c.bf16 %v2651_v53, %v2650_v49  ;;  %v8294_v49 = vcombine.high %v2620_v11, %v2621_v40  ;;  %v2254_v40 = vld [vmem:[%s11617_s3 + $0x100] sm:$0xff]  ;;  %v428_v6 = vld [vmem:[%s11615_s2 + $0xd0] sm:$0xff] }
 0x198   :  { %v8237_v20 = vadd.f32 %v5237_v62, %v5236_v27  ;;  %v5239_v44 = vpop.f32.mrb[46].mxu1  ;;  %v2252_v27 = vld [vmem:[%s11617_s3 + $0xf0] sm:$0xff]  ;;  %11689 = vst [vmem:[#allocation31_spill] sm:$0xff] %v8263_v15  ;;  %3677 = vxpose.xlu0.c.b16.cont [7/8] %v8263_v15, 128  ;;  %v1626_v11 = vpop.trf.xlu1  ;;  %460 = vst.msk [vmem:[%s11618_s4 + $0xd0] sm:$0xff] %vm97_vm0, %v428_v6 }
 0x199   :  { %v5240_v50 = vpop.f32.mrb[47].mxu1  ;;  %v1268_v9 = vpop.f32.mrb[60].mxu0  ;;  %v2666_v62 = vld [vmem:[#allocation2 + $0xe0] sm:$0xff]  ;;  %11691 = vst [vmem:[#allocation33_spill] sm:$0xff] %v8281_v0  ;;  %3645 = vxpose.xlu1.c.b16.cont [7/8] %v8271_v56, 128  ;;  %11693 = vst [vmem:[#allocation35_spill] sm:$0xff] %v8294_v49  ;;  %v2632_v6 = vld [vmem:[%s11614_s0 + $0x250] sm:$0xff] }
 0x19a   :  { %v8261_v38 = vadd.f32 %v5240_v50, %v5239_v44  ;;  %2140 = vst.msk [vmem:[#allocation2 + $0xf0] sm:$0xff] %vm97_vm0, %v1268_v9  ;;  %v2332_v44 = vadd.f32 %v2252_v27, %v1268_v9  ;;  %v1270_v50 = vpop.f32.mrb[61].mxu0  ;;  %v305_v9 = vld [vmem:[%s11616_s1 + $0x1f8] sm:$0xff] }
 0x19b   :  { %5691 = vmatmul.mubr.bf16.gmra.mrb[152].mxu1 %v1624_v36  ;;  %v2605_v36 = vld [vmem:[%s11614_s0 + $0x178] sm:$0xff]  ;;  %v1271_v3 = vpop.f32.mrb[62].mxu0  ;;  %v2667_v35 = vld [vmem:[#allocation2 + $0xe8] sm:$0xff]  ;;  %385 = vst.msk [vmem:[%s11617_s3 + $0x1f8] sm:$0xff] %vm97_vm0, %v305_v9 }
 0x19c   :  { %5694 = vmatprep.mubr.bf16.mxu1 %v1625_v32  ;;  %2412 = vst.msk [vmem:[%s11617_s3 + $0xf0] sm:$0xff] %vm97_vm0, %v2332_v44  ;;  %2141 = vst.msk [vmem:[#allocation2 + $0xf8] sm:$0xff] %vm97_vm0, %v1271_v3  ;;  %v2333_v26 = vadd.f32 %v2253_v7, %v1271_v3  ;;  %v8289_v25 = vpack.c.bf16 %v2667_v35, %v2666_v62  ;;  %v1273_v32 = vpop.f32.mrb[63].mxu0  ;;  %v8300_v44 = vcombine.high %v2604_v58, %v2605_v36  ;;  %v2652_v58 = vld [vmem:[#allocation2 + $0x70] sm:$0xff]  ;;  %v2653_v36 = vld [vmem:[#allocation2 + $0x78] sm:$0xff] }
 0x19d   :  { %3678 = vxpose.xlu0.c.b16.end [8/8] %v8294_v49, 128 }
 0x19e   :  { %11692 = vst [vmem:[#allocation34_spill] sm:$0xff] %v8289_v25  ;;  %v5242_v27 = vpop.f32.mrb[48].mxu1  ;;  %11694 = vst [vmem:[#allocation36_spill] sm:$0xff] %v8300_v44  ;;  %5414 = vmatprep.subr.bf16.mxu0 %v8289_v25  ;;  %3646 = vxpose.xlu1.c.b16.end [8/8] %v8300_v44, 128 }
 0x19f   :  { %v5243_v53 = vpop.f32.mrb[49].mxu1  ;;  %2413 = vst.msk [vmem:[%s11617_s3 + $0xf8] sm:$0xff] %vm97_vm0, %v2333_v26  ;;  %5415 = vmatpush3.bf16.msra.mxu0 %v8281_v0 }
 0x1a0   :  { %v8307_v35 = vadd.f32 %v5243_v53, %v5242_v27  ;;  %v5245_v7 = vpop.f32.mrb[50].mxu1  ;;  %v2255_v27 = vld [vmem:[%s11617_s3 + $0x108] sm:$0xff] }
 0x1a1   :  { %v5246_v62 = vpop.f32.mrb[51].mxu1  ;;  %v2668_v3 = vld [vmem:[#allocation2 + $0xf0] sm:$0xff]  ;;  %v1276_v26 = vpop.f32.mrb[64].mxu0  ;;  %v5966_v53 = vld [vmem:[%s11614_s0 + $0x4] ss:$8 sps:$4 sm:$0xff]  }
 0x1a2   :  { %v8315_v50 = vadd.f32 %v5246_v62, %v5245_v7  ;;  %2142 = vst.msk [vmem:[#allocation2 + $0x100] sm:$0xff] %vm97_vm0, %v1276_v26  ;;  %v2334_v32 = vadd.f32 %v2254_v40, %v1276_v26  ;;  %v1278_v9 = vpop.f32.mrb[65].mxu0  ;;  %v8324_v62 = vpack.c.bf16 %v2653_v36, %v2652_v58 }
 0x1a3   :  { %5695 = vmatmul.mubr.bf16.gmra.mrb[156].mxu1 %v1626_v11  ;;  %v2669_v7 = vld [vmem:[#allocation2 + $0xf8] sm:$0xff]  ;;  %v1279_v49 = vpop.f32.mrb[66].mxu0 }
 0x1a4   :  { %3238 = vmatprep.mubr.bf16.mxu1 %v5966_v53  ;;  %11695 = vst [vmem:[#allocation37_spill] sm:$0xff] %v8324_v62  ;;  %v8326_v15 = vpack.c.bf16 %v2669_v7, %v2668_v3  ;;  %2414 = vst.msk [vmem:[%s11617_s3 + $0x100] sm:$0xff] %vm97_vm0, %v2334_v32  ;;  %v2335_v40 = vadd.f32 %v2255_v27, %v1279_v49  ;;  %v1281_v26 = vpop.f32.mrb[67].mxu0  ;;  %v3567_v3 = vpop.trf.xlu1 }
 0x1a5   :  { %2143 = vst.msk [vmem:[#allocation2 + $0x108] sm:$0xff] %vm97_vm0, %v1279_v49  ;;  %v2256_v49 = vld [vmem:[%s11617_s3 + $0x110] sm:$0xff]  ;;  %v3600_v32 = vpop.trf.xlu0 }
 0x1a6   :  { %11696 = vst [vmem:[#allocation38_spill] sm:$0xff] %v8326_v15  ;;  %v5248_v11 = vpop.f32.mrb[52].mxu1  ;;  %5416 = vmatprep.subr.bf16.mxu0 %v8326_v15  ;;  %2415 = vst.msk [vmem:[%s11617_s3 + $0x108] sm:$0xff] %vm97_vm0, %v2335_v40 }
 0x1a7   :  { %v5249_v9 = vpop.f32.mrb[53].mxu1  ;;  %5417 = vmatpush3.bf16.msra.mxu0 %v8324_v62 }
 0x1a8   :  { %v8334_v53 = vadd.f32 %v5249_v9, %v5248_v11  ;;  %v5251_v58 = vpop.f32.mrb[54].mxu1  ;;  %v2257_v11 = vld [vmem:[%s11617_s3 + $0x118] sm:$0xff] }
 0x1a9   :  { %v5252_v36 = vpop.f32.mrb[55].mxu1  ;;  %v1284_v7 = vpop.f32.mrb[68].mxu0 }
 0x1aa   :  { %v8344_v27 = vadd.f32 %v5252_v36, %v5251_v58  ;;  %3752 = vmatmul.mubr.bf16.vlgmr.msra.gmra.mrb[160].mxu0 %v3567_v3  ;;  %2144 = vst.msk [vmem:[#allocation2 + $0x110] sm:$0xff] %vm97_vm0, %v1284_v7  ;;  %v2336_v40 = vadd.f32 %v2256_v49, %v1284_v7  ;;  %v1286_v26 = vpop.f32.mrb[69].mxu0  ;;  %v2258_v7 = vld [vmem:[%s11617_s3 + $0x120] sm:$0xff] }
 0x1ab   :  { %3759 = vmatprep.mubr.bf16.mxu0 %v3600_v32  ;;  %v1287_v9 = vpop.f32.mrb[70].mxu0  ;;  %v3568_v32 = vpop.trf.xlu1 }
 0x1ac   :  { %2416 = vst.msk [vmem:[%s11617_s3 + $0x110] sm:$0xff] %vm97_vm0, %v2336_v40  ;;  %2145 = vst.msk [vmem:[#allocation2 + $0x118] sm:$0xff] %vm97_vm0, %v1287_v9  ;;  %v2337_v58 = vadd.f32 %v2257_v11, %v1287_v9  ;;  %v1289_v36 = vpop.f32.mrb[71].mxu0  ;;  %v3601_v26 = vpop.trf.xlu0 }
 0x1ae   :  { %v5254_v44 = vpop.f32.mrb[56].mxu1  ;;  %2417 = vst.msk [vmem:[%s11617_s3 + $0x118] sm:$0xff] %vm97_vm0, %v2337_v58 }
 0x1af   :  { %v5255_v56 = vpop.f32.mrb[57].mxu1 }
 0x1b0   :  { %v8355_v16 = vadd.f32 %v5255_v56, %v5254_v44  ;;  %v5257_v3 = vpop.f32.mrb[58].mxu1  ;;  %v2259_v56 = vld [vmem:[%s11617_s3 + $0x128] sm:$0xff] }
 0x1b1   :  { %v5258_v49 = vpop.f32.mrb[59].mxu1  ;;  %v1292_v11 = vpop.f32.mrb[72].mxu0 }
 0x1b2   :  { %v8364_v40 = vadd.f32 %v5258_v49, %v5257_v3  ;;  %3760 = vmatmul.mubr.bf16.gmra.mrb[164].mxu0 %v3568_v32  ;;  %2146 = vst.msk [vmem:[#allocation2 + $0x120] sm:$0xff] %vm97_vm0, %v1292_v11  ;;  %v2338_v44 = vadd.f32 %v2258_v7, %v1292_v11  ;;  %v1294_v9 = vpop.f32.mrb[73].mxu0  ;;  %v2260_v11 = vld [vmem:[%s11617_s3 + $0x130] sm:$0xff] }
 0x1b3   :  { %3767 = vmatprep.mubr.bf16.mxu0 %v3601_v26  ;;  %v1295_v58 = vpop.f32.mrb[74].mxu0  ;;  %v3569_v26 = vpop.trf.xlu1 }
 0x1b4   :  { %2418 = vst.msk [vmem:[%s11617_s3 + $0x120] sm:$0xff] %vm97_vm0, %v2338_v44  ;;  %2147 = vst.msk [vmem:[#allocation2 + $0x128] sm:$0xff] %vm97_vm0, %v1295_v58  ;;  %v2339_v3 = vadd.f32 %v2259_v56, %v1295_v58  ;;  %v1297_v49 = vpop.f32.mrb[75].mxu0  ;;  %v3602_v9 = vpop.trf.xlu0 }
 0x1b6   :  { %v5260_v36 = vpop.f32.mrb[60].mxu1  ;;  %2419 = vst.msk [vmem:[%s11617_s3 + $0x128] sm:$0xff] %vm97_vm0, %v2339_v3  ;;  %v5923_v3 = vld [vmem:[%s11614_s0 + $0x200] ss:$8 sps:$4 sm:$0xff]  }
 0x1b7   :  { %v5261_v19 = vpop.f32.mrb[61].mxu1  ;;  %3687 = vxpose.xlu0.c.b16.start [1/8] %v5923_v3, 128  ;;  %v403_v3 = vld [vmem:[%s11615_s2 + $0x8] sm:$0xff] }
 0x1b8   :  { %v8375_v60 = vadd.f32 %v5261_v19, %v5260_v36  ;;  %v5263_v32 = vpop.f32.mrb[62].mxu1  ;;  %v2261_v19 = vld [vmem:[%s11617_s3 + $0x138] sm:$0xff]  ;;  %435 = vst.msk [vmem:[%s11618_s4 + $0x8] sm:$0xff] %vm97_vm0, %v403_v3 }
 0x1b9   :  { %v5264_v7 = vpop.f32.mrb[63].mxu1  ;;  %v1300_v56 = vpop.f32.mrb[76].mxu0 }
 0x1ba   :  { %v8384_v44 = vadd.f32 %v5264_v7, %v5263_v32  ;;  %3768 = vmatmul.mubr.bf16.gmra.mrb[168].mxu0 %v3569_v26  ;;  %2148 = vst.msk [vmem:[#allocation2 + $0x130] sm:$0xff] %vm97_vm0, %v1300_v56  ;;  %v2340_v58 = vadd.f32 %v2260_v11, %v1300_v56  ;;  %v1302_v36 = vpop.f32.mrb[77].mxu0  ;;  %v404_v32 = vld [vmem:[%s11615_s2 + $0x10] sm:$0xff] }
 0x1bb   :  { %3775 = vmatprep.mubr.bf16.mxu0 %v3602_v9  ;;  %v1303_v49 = vpop.f32.mrb[78].mxu0  ;;  %436 = vst.msk [vmem:[%s11618_s4 + $0x10] sm:$0xff] %vm97_vm0, %v404_v32  ;;  %v402_v9 = vld [vmem:[%s11615_s2] sm:$0xff]  ;;  %v3570_v32 = vpop.trf.xlu1  ;;  %3688 = vxpose.xlu0.c.b16.cont [2/8] %v5925_v48, 128 }
 0x1bc   :  { %2420 = vst.msk [vmem:[%s11617_s3 + $0x130] sm:$0xff] %vm97_vm0, %v2340_v58  ;;  %2149 = vst.msk [vmem:[#allocation2 + $0x138] sm:$0xff] %vm97_vm0, %v1303_v49  ;;  %v2341_v26 = vadd.f32 %v2261_v19, %v1303_v49  ;;  %v1305_v11 = vpop.f32.mrb[79].mxu0  ;;  %v405_v19 = vld [vmem:[%s11615_s2 + $0x18] sm:$0xff] }
 0x1bd   :  { %434 = vst.msk [vmem:[%s11618_s4] sm:$0xff] %vm97_vm0, %v402_v9  ;;  %437 = vst.msk [vmem:[%s11618_s4 + $0x18] sm:$0xff] %vm97_vm0, %v405_v19  ;;  %v3603_v11 = vpop.trf.xlu0  ;;  %v2263_v19 = vld [vmem:[%s11617_s3 + $0x148] sm:$0xff] }
 0x1be   :  { %v5282_v7 = vpop.f32.mrb[64].mxu1  ;;  %2421 = vst.msk [vmem:[%s11617_s3 + $0x138] sm:$0xff] %vm97_vm0, %v2341_v26 }
 0x1bf   :  { %v5283_v56 = vpop.f32.mrb[65].mxu1 }
 0x1c0   :  { %v5284_v58 = vadd.f32 %v5283_v56, %v5282_v7  ;;  %v5285_v36 = vpop.f32.mrb[66].mxu1  ;;  %v2262_v7 = vld [vmem:[%s11617_s3 + $0x140] sm:$0xff] }
 0x1c1   :  { %v5286_v49 = vpop.f32.mrb[67].mxu1  ;;  %v1308_v56 = vpop.f32.mrb[80].mxu0 }
 0x1c2   :  { %v5287_v26 = vadd.f32 %v5286_v49, %v5285_v36  ;;  %v8434_v9 = vadd.f32 %v5284_v58, %v7564_v5  ;;  %3776 = vmatmul.mubr.bf16.gmra.mrb[172].mxu0 %v3570_v32  ;;  %2150 = vst.msk [vmem:[#allocation2 + $0x140] sm:$0xff] %vm97_vm0, %v1308_v56  ;;  %v2342_v62 = vadd.f32 %v2262_v7, %v1308_v56  ;;  %v1310_v15 = vpop.f32.mrb[81].mxu0  ;;  %v408_v58 = vld [vmem:[%s11615_s2 + $0x30] sm:$0xff]  ;;  %v406_v32 = vld [vmem:[%s11615_s2 + $0x20] sm:$0xff] }
 0x1c3   :  { %3783 = vmatprep.mubr.bf16.mxu0 %v3603_v11  ;;  %v1311_v5 = vpop.f32.mrb[82].mxu0  ;;  %440 = vst.msk [vmem:[%s11618_s4 + $0x30] sm:$0xff] %vm97_vm0, %v408_v58  ;;  %438 = vst.msk [vmem:[%s11618_s4 + $0x20] sm:$0xff] %vm97_vm0, %v406_v32  ;;  %v407_v11 = vld [vmem:[%s11615_s2 + $0x28] sm:$0xff] }
 0x1c4   :  { %v8444_v36 = vadd.f32 %v5287_v26, %v7570_v42  ;;  %2422 = vst.msk [vmem:[%s11617_s3 + $0x140] sm:$0xff] %vm97_vm0, %v2342_v62  ;;  %2151 = vst.msk [vmem:[#allocation2 + $0x148] sm:$0xff] %vm97_vm0, %v1311_v5  ;;  %v2343_v49 = vadd.f32 %v2263_v19, %v1311_v5  ;;  %v1313_v15 = vpop.f32.mrb[83].mxu0  ;;  %v5927_v42 = vld [vmem:[%s11614_s0 + $0x220] ss:$8 sps:$4 sm:$0xff]   ;;  %v409_v26 = vld [vmem:[%s11615_s2 + $0x38] sm:$0xff]  ;;  %v3571_v19 = vpop.trf.xlu1 }
 0x1c5   :  { %v2264_v5 = vld [vmem:[%s11617_s3 + $0x150] sm:$0xff]  ;;  %3689 = vxpose.xlu0.c.b16.cont [3/8] %v5927_v42, 128  ;;  %441 = vst.msk [vmem:[%s11618_s4 + $0x38] sm:$0xff] %vm97_vm0, %v409_v26  ;;  %439 = vst.msk [vmem:[%s11618_s4 + $0x28] sm:$0xff] %vm97_vm0, %v407_v11 }
 0x1c6   :  { %v5288_v3 = vpop.f32.mrb[68].mxu1  ;;  %2423 = vst.msk [vmem:[%s11617_s3 + $0x148] sm:$0xff] %vm97_vm0, %v2343_v49  ;;  %v5929_v42 = vld [vmem:[%s11614_s0 + $0x230] ss:$8 sps:$4 sm:$0xff]  }
 0x1c7   :  { %v5289_v48 = vpop.f32.mrb[69].mxu1 }
 0x1c8   :  { %v5290_v7 = vadd.f32 %v5289_v48, %v5288_v3  ;;  %v5291_v62 = vpop.f32.mrb[70].mxu1  ;;  %v3604_v3 = vpop.trf.xlu0  ;;  %v2265_v48 = vld [vmem:[%s11617_s3 + $0x158] sm:$0xff] }
 0x1c9   :  { %v5292_v56 = vpop.f32.mrb[71].mxu1  ;;  %v1316_v15 = vpop.f32.mrb[84].mxu0  ;;  %3690 = vxpose.xlu0.c.b16.cont [4/8] %v5929_v42, 128  ;;  %v411_v42 = vld [vmem:[%s11615_s2 + $0x48] sm:$0xff] }
 0x1ca   :  { %v5293_v58 = vadd.f32 %v5292_v56, %v5291_v62  ;;  %v8490_v49 = vadd.f32 %v5290_v7, %v7600_v29  ;;  %3784 = vmatmul.mubr.bf16.gmra.mrb[176].mxu0 %v3571_v19  ;;  %2152 = vst.msk [vmem:[#allocation2 + $0x150] sm:$0xff] %vm97_vm0, %v1316_v15  ;;  %v2344_v32 = vadd.f32 %v2264_v5, %v1316_v15  ;;  %v1318_v26 = vpop.f32.mrb[85].mxu0  ;;  %v412_v7 = vld [vmem:[%s11615_s2 + $0x50] sm:$0xff]  ;;  %443 = vst.msk [vmem:[%s11618_s4 + $0x48] sm:$0xff] %vm97_vm0, %v411_v42 }
 0x1cb   :  { %3791 = vmatprep.mubr.bf16.mxu0 %v3604_v3  ;;  %v1319_v29 = vpop.f32.mrb[86].mxu0  ;;  %444 = vst.msk [vmem:[%s11618_s4 + $0x50] sm:$0xff] %vm97_vm0, %v412_v7  ;;  %v413_v3 = vld [vmem:[%s11615_s2 + $0x58] sm:$0xff]  ;;  %v3572_v26 = vpop.trf.xlu1 }
 0x1cc   :  { %v8500_v62 = vadd.f32 %v5293_v58, %v7606_v8  ;;  %2424 = vst.msk [vmem:[%s11617_s3 + $0x150] sm:$0xff] %vm97_vm0, %v2344_v32  ;;  %2153 = vst.msk [vmem:[#allocation2 + $0x158] sm:$0xff] %vm97_vm0, %v1319_v29  ;;  %v2345_v56 = vadd.f32 %v2265_v48, %v1319_v29  ;;  %v1321_v19 = vpop.f32.mrb[87].mxu0  ;;  %v5931_v8 = vld [vmem:[%s11614_s0 + $0x240] ss:$8 sps:$4 sm:$0xff]  }
 0x1cd   :  { %v410_v58 = vld [vmem:[%s11615_s2 + $0x40] sm:$0xff]  ;;  %445 = vst.msk [vmem:[%s11618_s4 + $0x58] sm:$0xff] %vm97_vm0, %v413_v3  ;;  %3691 = vxpose.xlu0.c.b16.cont [5/8] %v5931_v8, 128 }
 0x1ce   :  { %v5294_v11 = vpop.f32.mrb[72].mxu1  ;;  %2425 = vst.msk [vmem:[%s11617_s3 + $0x158] sm:$0xff] %vm97_vm0, %v2345_v56  ;;  %442 = vst.msk [vmem:[%s11618_s4 + $0x40] sm:$0xff] %vm97_vm0, %v410_v58  ;;  %v2266_v29 = vld [vmem:[%s11617_s3 + $0x160] sm:$0xff]  ;;  %v5933_v58 = vld [vmem:[%s11614_s0 + $0x250] ss:$8 sps:$4 sm:$0xff]  }
 0x1cf   :  { %v5295_v5 = vpop.f32.mrb[73].mxu1 }
 0x1d0   :  { %v5296_v15 = vadd.f32 %v5295_v5, %v5294_v11  ;;  %v5297_v48 = vpop.f32.mrb[74].mxu1  ;;  %v3605_v11 = vpop.trf.xlu0  ;;  %v2267_v5 = vld [vmem:[%s11617_s3 + $0x168] sm:$0xff] }
 0x1d1   :  { %v5298_v32 = vpop.f32.mrb[75].mxu1  ;;  %v1324_v19 = vpop.f32.mrb[88].mxu0  ;;  %3692 = vxpose.xlu0.c.b16.cont [6/8] %v5933_v58, 128  ;;  %v415_v58 = vld [vmem:[%s11615_s2 + $0x68] sm:$0xff] }
 0x1d2   :  { %v5299_v7 = vadd.f32 %v5298_v32, %v5297_v48  ;;  %v8546_v56 = vadd.f32 %v5296_v15, %v7633_v52  ;;  %3792 = vmatmul.mubr.bf16.gmra.mrb[180].mxu0 %v3572_v26  ;;  %2154 = vst.msk [vmem:[#allocation2 + $0x160] sm:$0xff] %vm97_vm0, %v1324_v19  ;;  %v2346_v8 = vadd.f32 %v2266_v29, %v1324_v19  ;;  %v1326_v3 = vpop.f32.mrb[89].mxu0  ;;  %v416_v15 = vld [vmem:[%s11615_s2 + $0x70] sm:$0xff]  ;;  %447 = vst.msk [vmem:[%s11618_s4 + $0x68] sm:$0xff] %vm97_vm0, %v415_v58 }
 0x1d3   :  { %3799 = vmatprep.mubr.bf16.mxu0 %v3605_v11  ;;  %v1327_v52 = vpop.f32.mrb[90].mxu0  ;;  %448 = vst.msk [vmem:[%s11618_s4 + $0x70] sm:$0xff] %vm97_vm0, %v416_v15  ;;  %v3573_v3 = vpop.trf.xlu1 }
 0x1d4   :  { %v8556_v48 = vadd.f32 %v5299_v7, %v7642_v39  ;;  %2426 = vst.msk [vmem:[%s11617_s3 + $0x160] sm:$0xff] %vm97_vm0, %v2346_v8  ;;  %2155 = vst.msk [vmem:[#allocation2 + $0x168] sm:$0xff] %vm97_vm0, %v1327_v52  ;;  %v2347_v32 = vadd.f32 %v2267_v5, %v1327_v52  ;;  %v1329_v26 = vpop.f32.mrb[91].mxu0  ;;  %v5935_v39 = vld [vmem:[%s11614_s0 + $0x260] ss:$8 sps:$4 sm:$0xff]   ;;  %v417_v5 = vld [vmem:[%s11615_s2 + $0x78] sm:$0xff] }
 0x1d5   :  { %v414_v7 = vld [vmem:[%s11615_s2 + $0x60] sm:$0xff]  ;;  %v2268_v52 = vld [vmem:[%s11617_s3 + $0x170] sm:$0xff]  ;;  %3693 = vxpose.xlu0.c.b16.cont [7/8] %v5935_v39, 128  ;;  %449 = vst.msk [vmem:[%s11618_s4 + $0x78] sm:$0xff] %vm97_vm0, %v417_v5 }
 0x1d6   :  { %v5300_v42 = vpop.f32.mrb[76].mxu1  ;;  %2427 = vst.msk [vmem:[%s11617_s3 + $0x168] sm:$0xff] %vm97_vm0, %v2347_v32  ;;  %446 = vst.msk [vmem:[%s11618_s4 + $0x60] sm:$0xff] %vm97_vm0, %v414_v7  ;;  %v2269_v32 = vld [vmem:[%s11617_s3 + $0x178] sm:$0xff]  ;;  %v2623_v7 = vld [vmem:[%s11614_s0 + $0x208] sm:$0xff] }
 0x1d7   :  { %v5301_v29 = vpop.f32.mrb[77].mxu1 }
 0x1d8   :  { %v5302_v11 = vadd.f32 %v5301_v29, %v5300_v42  ;;  %v5303_v19 = vpop.f32.mrb[78].mxu1  ;;  %v3606_v42 = vpop.trf.xlu0  ;;  %v2622_v29 = vld [vmem:[%s11614_s0 + $0x200] sm:$0xff] }
 0x1d9   :  { %v5304_v8 = vpop.f32.mrb[79].mxu1  ;;  %v1332_v39 = vpop.f32.mrb[92].mxu0 }
 0x1da   :  { %v5305_v15 = vadd.f32 %v5304_v8, %v5303_v19  ;;  %v8605_v26 = vadd.f32 %v5302_v11, %v7671_v21  ;;  %v5937_v19 = vld [vmem:[%s11614_s0 + $0x270] ss:$8 sps:$4 sm:$0xff]   ;;  %3800 = vmatmul.mubr.bf16.gmra.mrb[184].mxu0 %v3573_v3  ;;  %2156 = vst.msk [vmem:[#allocation2 + $0x170] sm:$0xff] %vm97_vm0, %v1332_v39  ;;  %v2348_v5 = vadd.f32 %v2268_v52, %v1332_v39  ;;  %v1334_v58 = vpop.f32.mrb[93].mxu0 }
 0x1db   :  { %3807 = vmatprep.mubr.bf16.mxu0 %v3606_v42  ;;  %v1335_v11 = vpop.f32.mrb[94].mxu0  ;;  %3694 = vxpose.xlu0.c.b16.end [8/8] %v5937_v19, 128  ;;  %v420_v8 = vld [vmem:[%s11615_s2 + $0x90] sm:$0xff]  ;;  %v8628_v39 = vcombine.high %v2622_v29, %v2623_v7  ;;  %v421_v42 = vld [vmem:[%s11615_s2 + $0x98] sm:$0xff]  ;;  %v3574_v58 = vpop.trf.xlu1 }
 0x1dc   :  { %v8618_v21 = vadd.f32 %v5305_v15, %v7687_v51  ;;  %2428 = vst.msk [vmem:[%s11617_s3 + $0x170] sm:$0xff] %vm97_vm0, %v2348_v5  ;;  %2157 = vst.msk [vmem:[#allocation2 + $0x178] sm:$0xff] %vm97_vm0, %v1335_v11  ;;  %v2349_v3 = vadd.f32 %v2269_v32, %v1335_v11  ;;  %v1337_v52 = vpop.f32.mrb[95].mxu0  ;;  %v418_v51 = vld [vmem:[%s11615_s2 + $0x80] sm:$0xff]  ;;  %v2624_v7 = vld [vmem:[%s11614_s0 + $0x210] sm:$0xff] }
 0x1dd   :  { %11697 = vst [vmem:[#allocation39_spill] sm:$0xff] %v8628_v39  ;;  %452 = vst.msk [vmem:[%s11618_s4 + $0x90] sm:$0xff] %vm97_vm0, %v420_v8  ;;  %v2625_v19 = vld [vmem:[%s11614_s0 + $0x218] sm:$0xff]  ;;  %3703 = vxpose.xlu1.c.b16.start [1/8] %v8628_v39, 128  ;;  %v2270_v11 = vld [vmem:[%s11617_s3 + $0x180] sm:$0xff] }
 0x1de   :  { %v5306_v18 = vpop.f32.mrb[80].mxu1  ;;  %450 = vst.msk [vmem:[%s11618_s4 + $0x80] sm:$0xff] %vm97_vm0, %v418_v51  ;;  %2429 = vst.msk [vmem:[%s11617_s3 + $0x178] sm:$0xff] %vm97_vm0, %v2349_v3  ;;  %v3615_v3 = vpop.trf.xlu0  ;;  %v2627_v39 = vld [vmem:[%s11614_s0 + $0x228] sm:$0xff]  ;;  %v8681_v0 = vcombine.high %v2624_v7, %v2625_v19 }
 0x1df   :  { %v5307_v15 = vpop.f32.mrb[81].mxu1  ;;  %453 = vst.msk [vmem:[%s11618_s4 + $0x98] sm:$0xff] %vm97_vm0, %v421_v42  ;;  %v2626_v42 = vld [vmem:[%s11614_s0 + $0x220] sm:$0xff] }
 0x1e0   :  { %v5308_v32 = vadd.f32 %v5307_v15, %v5306_v18  ;;  %v5309_v29 = vpop.f32.mrb[82].mxu1  ;;  %v419_v18 = vld [vmem:[%s11615_s2 + $0x88] sm:$0xff]  ;;  %11698 = vst [vmem:[#allocation40_spill] sm:$0xff] %v8681_v0 }
 0x1e1   :  { %v5310_v5 = vpop.f32.mrb[83].mxu1  ;;  %451 = vst.msk [vmem:[%s11618_s4 + $0x88] sm:$0xff] %vm97_vm0, %v419_v18  ;;  %v1340_v51 = vpop.f32.mrb[96].mxu0  ;;  %v2271_v15 = vld [vmem:[%s11617_s3 + $0x188] sm:$0xff]  ;;  %3704 = vxpose.xlu1.c.b16.cont [2/8] %v8681_v0, 128 }
 0x1e2   :  { %v5311_v8 = vadd.f32 %v5310_v5, %v5309_v29  ;;  %v8670_v52 = vadd.f32 %v5308_v32, %v7731_v33  ;;  %3808 = vmatmul.mubr.bf16.gmra.mrb[188].mxu0 %v3574_v58  ;;  %2158 = vst.msk [vmem:[#allocation2 + $0x180] sm:$0xff] %vm97_vm0, %v1340_v51  ;;  %v2350_v33 = vadd.f32 %v2270_v11, %v1340_v51  ;;  %v1342_v32 = vpop.f32.mrb[97].mxu0  ;;  %v424_v5 = vld [vmem:[%s11615_s2 + $0xb0] sm:$0xff]  ;;  %v422_v58 = vld [vmem:[%s11615_s2 + $0xa0] sm:$0xff] }
 0x1e3   :  { %3815 = vmatprep.mubr.bf16.mxu0 %v3615_v3  ;;  %v1343_v18 = vpop.f32.mrb[98].mxu0  ;;  %456 = vst.msk [vmem:[%s11618_s4 + $0xb0] sm:$0xff] %vm97_vm0, %v424_v5  ;;  %454 = vst.msk [vmem:[%s11618_s4 + $0xa0] sm:$0xff] %vm97_vm0, %v422_v58  ;;  %v2628_v51 = vld [vmem:[%s11614_s0 + $0x230] sm:$0xff]  ;;  %v3616_v5 = vpop.trf.xlu0  ;;  %v2671_v58 = vld [vmem:[#allocation2 + $0x108] sm:$0xff] }
 0x1e4   :  { %v8685_v29 = vadd.f32 %v5311_v8, %v7747_v57  ;;  %2430 = vst.msk [vmem:[%s11617_s3 + $0x180] sm:$0xff] %vm97_vm0, %v2350_v33  ;;  %2159 = vst.msk [vmem:[#allocation2 + $0x188] sm:$0xff] %vm97_vm0, %v1343_v18  ;;  %v2351_v7 = vadd.f32 %v2271_v15, %v1343_v18  ;;  %v1345_v19 = vpop.f32.mrb[99].mxu0  ;;  %v8696_v57 = vcombine.high %v2626_v42, %v2627_v39  ;;  %v425_v39 = vld [vmem:[%s11615_s2 + $0xb8] sm:$0xff]  ;;  %v3583_v33 = vpop.trf.xlu1  ;;  %v2272_v32 = vld [vmem:[%s11617_s3 + $0x190] sm:$0xff] }
 0x1e5   :  { %v2629_v15 = vld [vmem:[%s11614_s0 + $0x238] sm:$0xff]  ;;  %457 = vst.msk [vmem:[%s11618_s4 + $0xb8] sm:$0xff] %vm97_vm0, %v425_v39  ;;  %v2670_v19 = vld [vmem:[#allocation2 + $0x100] sm:$0xff] }
 0x1e6   :  { %v5312_v25 = vpop.f32.mrb[84].mxu1  ;;  %11699 = vst [vmem:[#allocation41_spill] sm:$0xff] %v8696_v57  ;;  %2431 = vst.msk [vmem:[%s11617_s3 + $0x188] sm:$0xff] %vm97_vm0, %v2351_v7  ;;  %3705 = vxpose.xlu1.c.b16.cont [3/8] %v8696_v57, 128  ;;  %v2273_v7 = vld [vmem:[%s11617_s3 + $0x198] sm:$0xff]  ;;  %v2630_v57 = vld [vmem:[%s11614_s0 + $0x240] sm:$0xff]  ;;  %v2734_v4 = vpack.c.bf16 %v2671_v58, %v2670_v19 }
 0x1e7   :  { %v5313_v11 = vpop.f32.mrb[85].mxu1  ;;  %v427_v19 = vld [vmem:[%s11615_s2 + $0xc8] sm:$0xff] }
 0x1e8   :  { %v5314_v8 = vadd.f32 %v5313_v11, %v5312_v25  ;;  %v5315_v3 = vpop.f32.mrb[86].mxu1  ;;  %v423_v25 = vld [vmem:[%s11615_s2 + $0xa8] sm:$0xff]  ;;  %459 = vst.msk [vmem:[%s11618_s4 + $0xc8] sm:$0xff] %vm97_vm0, %v427_v19 }
 0x1e9   :  { %v5316_v42 = vpop.f32.mrb[87].mxu1  ;;  %455 = vst.msk [vmem:[%s11618_s4 + $0xa8] sm:$0xff] %vm97_vm0, %v423_v25  ;;  %v1348_v39 = vpop.f32.mrb[100].mxu0  ;;  %v2686_v0 = vld [vmem:[#allocation2 + $0x180] sm:$0xff]  ;;  %v8749_v25 = vcombine.high %v2628_v51, %v2629_v15 }
 0x1ea   :  { %v5317_v18 = vadd.f32 %v5316_v42, %v5315_v3  ;;  %v8741_v11 = vadd.f32 %v5314_v8, %v7784_v12  ;;  %v2631_v3 = vld [vmem:[%s11614_s0 + $0x248] sm:$0xff]  ;;  %3816 = vmatmul.mubr.bf16.gmra.mrb[192].mxu0 %v3583_v33  ;;  %2160 = vst.msk [vmem:[#allocation2 + $0x190] sm:$0xff] %vm97_vm0, %v1348_v39  ;;  %v2352_v42 = vadd.f32 %v2272_v32, %v1348_v39  ;;  %v1350_v47 = vpop.f32.mrb[101].mxu0  ;;  %v426_v32 = vld [vmem:[%s11615_s2 + $0xc0] sm:$0xff] }
 0x1eb   :  { %11700 = vst [vmem:[#allocation42_spill] sm:$0xff] %v8749_v25  ;;  %3823 = vmatprep.mubr.bf16.mxu0 %v3616_v5  ;;  %v1351_v8 = vpop.f32.mrb[102].mxu0  ;;  %v2687_v2 = vld [vmem:[#allocation2 + $0x188] sm:$0xff]  ;;  %3706 = vxpose.xlu1.c.b16.cont [4/8] %v8749_v25, 128  ;;  %v8764_v33 = vcombine.high %v2630_v57, %v2631_v3  ;;  %458 = vst.msk [vmem:[%s11618_s4 + $0xc0] sm:$0xff] %vm97_vm0, %v426_v32  ;;  %v3584_v5 = vpop.trf.xlu1  ;;  %v2274_v39 = vld [vmem:[%s11617_s3 + $0x1a0] sm:$0xff] }
 0x1ec   :  { %v8753_v12 = vadd.f32 %v5317_v18, %v7800_v46  ;;  %2432 = vst.msk [vmem:[%s11617_s3 + $0x190] sm:$0xff] %vm97_vm0, %v2352_v42  ;;  %2161 = vst.msk [vmem:[#allocation2 + $0x198] sm:$0xff] %vm97_vm0, %v1351_v8  ;;  %v2353_v46 = vadd.f32 %v2273_v7, %v1351_v8  ;;  %v1353_v47 = vpop.f32.mrb[103].mxu0  ;;  %v2742_v15 = vpack.c.bf16 %v2687_v2, %v2686_v0  ;;  %v429_v0 = vld [vmem:[%s11615_s2 + $0xd8] sm:$0xff]  ;;  %v3617_v3 = vpop.trf.xlu0  ;;  %v2275_v8 = vld [vmem:[%s11617_s3 + $0x1a8] sm:$0xff] }
 0x1ed   :  { %11701 = vst [vmem:[#allocation43_spill] sm:$0xff] %v8764_v33  ;;  %v2633_v7 = vld [vmem:[%s11614_s0 + $0x258] sm:$0xff]  ;;  %461 = vst.msk [vmem:[%s11618_s4 + $0xd8] sm:$0xff] %vm97_vm0, %v429_v0 }
 0x1ee   :  { %v5318_v51 = vpop.f32.mrb[88].mxu1  ;;  %2433 = vst.msk [vmem:[%s11617_s3 + $0x198] sm:$0xff] %vm97_vm0, %v2353_v46  ;;  %5514 = vmatprep.subr.bf16.mxu0 %v2742_v15  ;;  %v2673_v46 = vld [vmem:[#allocation2 + $0x118] sm:$0xff]  ;;  %v8817_v0 = vcombine.high %v2632_v6, %v2633_v7  ;;  %v432_v6 = vld [vmem:[%s11615_s2 + $0xf0] sm:$0xff] }
 0x1ef   :  { %v5319_v18 = vpop.f32.mrb[89].mxu1  ;;  %5515 = vmatpush3.bf16.msra.mxu0 %v2734_v4  ;;  %3707 = vxpose.xlu1.c.b16.cont [5/8] %v8764_v33, 128  ;;  %v2634_v4 = vld [vmem:[%s11614_s0 + $0x260] sm:$0xff]  ;;  %464 = vst.msk [vmem:[%s11618_s4 + $0xf0] sm:$0xff] %vm97_vm0, %v432_v6 }
 0x1f0   :  { %v5320_v2 = vadd.f32 %v5319_v18, %v5318_v51  ;;  %v5321_v57 = vpop.f32.mrb[90].mxu1  ;;  %v2672_v51 = vld [vmem:[#allocation2 + $0x110] sm:$0xff]  ;;  %v2635_v18 = vld [vmem:[%s11614_s0 + $0x268] sm:$0xff]  ;;  %v3618_v25 = vpop.trf.xlu0 }
 0x1f1   :  { %v5322_v58 = vpop.f32.mrb[91].mxu1  ;;  %v1356_v15 = vpop.f32.mrb[104].mxu0  ;;  %v2688_v32 = vld [vmem:[#allocation2 + $0x190] sm:$0xff]  ;;  %v2735_v33 = vpack.c.bf16 %v2673_v46, %v2672_v51 }
 0x1f2   :  { %v5323_v42 = vadd.f32 %v5322_v58, %v5321_v57  ;;  %v8809_v47 = vadd.f32 %v5320_v2, %v7842_v31  ;;  %3824 = vmatmul.mubr.bf16.gmra.mrb[196].mxu0 %v3584_v5  ;;  %2162 = vst.msk [vmem:[#allocation2 + $0x1a0] sm:$0xff] %vm97_vm0, %v1356_v15  ;;  %v2354_v57 = vadd.f32 %v2274_v39, %v1356_v15  ;;  %v1358_v19 = vpop.f32.mrb[105].mxu0 }
 0x1f3   :  { %v1359_v2 = vpop.f32.mrb[106].mxu0  ;;  %3831 = vmatprep.mubr.bf16.mxu0 %v3617_v3  ;;  %v2689_v58 = vld [vmem:[#allocation2 + $0x198] sm:$0xff]  ;;  %3708 = vxpose.xlu1.c.b16.cont [6/8] %v8817_v0, 128  ;;  %v8832_v3 = vcombine.high %v2634_v4, %v2635_v18  ;;  %v2636_v4 = vld [vmem:[%s11614_s0 + $0x270] sm:$0xff] }
 0x1f4   :  { %v8821_v31 = vadd.f32 %v5323_v42, %v7859_v43  ;;  %2434 = vst.msk [vmem:[%s11617_s3 + $0x1a0] sm:$0xff] %vm97_vm0, %v2354_v57  ;;  %2163 = vst.msk [vmem:[#allocation2 + $0x1a8] sm:$0xff] %vm97_vm0, %v1359_v2  ;;  %v2355_v43 = vadd.f32 %v2275_v8, %v1359_v2  ;;  %v1361_v5 = vpop.f32.mrb[107].mxu0  ;;  %v2743_v39 = vpack.c.bf16 %v2689_v58, %v2688_v32  ;;  %v430_v42 = vld [vmem:[%s11615_s2 + $0xe0] sm:$0xff]  ;;  %v433_v8 = vld [vmem:[%s11615_s2 + $0xf8] sm:$0xff]  ;;  %v3585_v32 = vpop.trf.xlu1 }
 0x1f5   :  { %11702 = vst [vmem:[#allocation44_spill] sm:$0xff] %v8832_v3  ;;  %462 = vst.msk [vmem:[%s11618_s4 + $0xe0] sm:$0xff] %vm97_vm0, %v430_v42  ;;  %v2637_v18 = vld [vmem:[%s11614_s0 + $0x278] sm:$0xff]  ;;  %v431_v57 = vld [vmem:[%s11615_s2 + $0xe8] sm:$0xff]  ;;  %v3619_v58 = vpop.trf.xlu0 }
 0x1f6   :  { %v5324_v7 = vpop.f32.mrb[92].mxu1  ;;  %2435 = vst.msk [vmem:[%s11617_s3 + $0x1a8] sm:$0xff] %vm97_vm0, %v2355_v43  ;;  %5516 = vmatprep.subr.bf16.mxu0 %v2743_v39  ;;  %465 = vst.msk [vmem:[%s11618_s4 + $0xf8] sm:$0xff] %vm97_vm0, %v433_v8  ;;  %v2276_v2 = vld [vmem:[%s11617_s3 + $0x1b0] sm:$0xff]  ;;  %v2675_v43 = vld [vmem:[#allocation2 + $0x128] sm:$0xff] }
 0x1f7   :  { %v5325_v51 = vpop.f32.mrb[93].mxu1  ;;  %5517 = vmatpush3.bf16.msra.mxu0 %v2735_v33  ;;  %3709 = vxpose.xlu1.c.b16.cont [7/8] %v8832_v3, 128  ;;  %463 = vst.msk [vmem:[%s11618_s4 + $0xe8] sm:$0xff] %vm97_vm0, %v431_v57  ;;  %v2277_v42 = vld [vmem:[%s11617_s3 + $0x1b8] sm:$0xff] }
 0x1f8   :  { %v5326_v46 = vadd.f32 %v5325_v51, %v5324_v7  ;;  %v5327_v15 = vpop.f32.mrb[94].mxu1  ;;  %v2674_v7 = vld [vmem:[#allocation2 + $0x120] sm:$0xff]  ;;  %v8879_v51 = vcombine.high %v2636_v4, %v2637_v18  ;;  %v308_v18 = vld [vmem:[%s11616_s1 + $0x210] sm:$0xff] }
 0x1f9   :  { %v5328_v19 = vpop.f32.mrb[95].mxu1  ;;  %v1364_v39 = vpop.f32.mrb[108].mxu0  ;;  %v2690_v33 = vld [vmem:[#allocation2 + $0x1a0] sm:$0xff]  ;;  %388 = vst.msk [vmem:[%s11617_s3 + $0x210] sm:$0xff] %vm97_vm0, %v308_v18 }
 0x1fa   :  { %v5329_v6 = vadd.f32 %v5328_v19, %v5327_v15  ;;  %v8874_v5 = vadd.f32 %v5326_v46, %v7908_v10  ;;  %2164 = vst.msk [vmem:[#allocation2 + $0x1b0] sm:$0xff] %vm97_vm0, %v1364_v39  ;;  %v2356_v8 = vadd.f32 %v2276_v2, %v1364_v39  ;;  %v1366_v3 = vpop.f32.mrb[109].mxu0  ;;  %3832 = vmatmul.mubr.bf16.gmra.mrb[200].mxu0 %v3585_v32  ;;  %v306_v19 = vld [vmem:[%s11616_s1 + $0x200] sm:$0xff] }
 0x1fb   :  { %v1367_v57 = vpop.f32.mrb[110].mxu0  ;;  %3839 = vmatprep.mubr.bf16.mxu0 %v3618_v25  ;;  %v2691_v10 = vld [vmem:[#allocation2 + $0x1a8] sm:$0xff]  ;;  %v2736_v46 = vpack.c.bf16 %v2675_v43, %v2674_v7  ;;  %3710 = vxpose.xlu1.c.b16.end [8/8] %v8879_v51, 128  ;;  %386 = vst.msk [vmem:[%s11617_s3 + $0x200] sm:$0xff] %vm97_vm0, %v306_v19 }
 0x1fc   :  { %v8883_v15 = vadd.f32 %v5329_v6, %v7928_v34  ;;  %2436 = vst.msk [vmem:[%s11617_s3 + $0x1b0] sm:$0xff] %vm97_vm0, %v2356_v8  ;;  %2165 = vst.msk [vmem:[#allocation2 + $0x1b8] sm:$0xff] %vm97_vm0, %v1367_v57  ;;  %v2357_v34 = vadd.f32 %v2277_v42, %v1367_v57  ;;  %v1369_v3 = vpop.f32.mrb[111].mxu0  ;;  %v2744_v32 = vpack.c.bf16 %v2691_v10, %v2690_v33  ;;  %v307_v25 = vld [vmem:[%s11616_s1 + $0x208] sm:$0xff]  ;;  %v8904_v6 = vpop.trf.xlu0  ;;  %v2278_v42 = vld [vmem:[%s11617_s3 + $0x1c0] sm:$0xff] }
 0x1fd   :  { %387 = vst.msk [vmem:[%s11617_s3 + $0x208] sm:$0xff] %vm97_vm0, %v307_v25  ;;  %v3586_v33 = vpop.trf.xlu1  ;;  %v2676_v57 = vld [vmem:[#allocation2 + $0x130] sm:$0xff]  ;;  %v2677_v10 = vld [vmem:[#allocation2 + $0x138] sm:$0xff]  ;;  %v2279_v3 = vld [vmem:[%s11617_s3 + $0x1c8] sm:$0xff] }
 0x1fe   :  { %v5330_v4 = vpop.f32.mrb[96].mxu1  ;;  %2437 = vst.msk [vmem:[%s11617_s3 + $0x1b8] sm:$0xff] %vm97_vm0, %v2357_v34  ;;  %5518 = vmatprep.subr.bf16.mxu0 %v2744_v32 }
 0x1ff   :  { %v5331_v2 = vpop.f32.mrb[97].mxu1  ;;  %5519 = vmatpush3.bf16.msra.mxu0 %v2736_v46  ;;  %v309_v46 = vld [vmem:[%s11616_s1 + $0x218] sm:$0xff] }
 0x200   :  { %v5332_v7 = vadd.f32 %v5331_v2, %v5330_v4  ;;  %v5333_v43 = vpop.f32.mrb[98].mxu1  ;;  %v311_v2 = vld [vmem:[%s11616_s1 + $0x228] sm:$0xff]  ;;  %389 = vst.msk [vmem:[%s11617_s3 + $0x218] sm:$0xff] %vm97_vm0, %v309_v46 }
 0x201   :  { %v5334_v39 = vpop.f32.mrb[99].mxu1  ;;  %v1372_v4 = vpop.f32.mrb[112].mxu0  ;;  %v2692_v34 = vld [vmem:[#allocation2 + $0x1b0] sm:$0xff]  ;;  %391 = vst.msk [vmem:[%s11617_s3 + $0x228] sm:$0xff] %vm97_vm0, %v311_v2  ;;  %v2679_v2 = vld [vmem:[#allocation2 + $0x148] sm:$0xff] }
 0x202   :  { %v5335_v8 = vadd.f32 %v5334_v39, %v5333_v43  ;;  %v8922_v19 = vadd.f32 %v5332_v7, %v7994_v59  ;;  %2166 = vst.msk [vmem:[#allocation2 + $0x1c0] sm:$0xff] %vm97_vm0, %v1372_v4  ;;  %v2358_v32 = vadd.f32 %v2278_v42, %v1372_v4  ;;  %v1374_v25 = vpop.f32.mrb[113].mxu0  ;;  %3840 = vmatmul.mubr.bf16.gmra.mrb[204].mxu0 %v3586_v33  ;;  %v310_v59 = vld [vmem:[%s11616_s1 + $0x220] sm:$0xff]  ;;  %v8940_v42 = vpop.trf.xlu0 }
 0x203   :  { %v1375_v7 = vpop.f32.mrb[114].mxu0  ;;  %v2693_v43 = vld [vmem:[#allocation2 + $0x1b8] sm:$0xff]  ;;  %v2737_v39 = vpack.c.bf16 %v2677_v10, %v2676_v57  ;;  %3847 = vmatprep.mubr.bf16.mxu0 %v3619_v58  ;;  %390 = vst.msk [vmem:[%s11617_s3 + $0x220] sm:$0xff] %vm97_vm0, %v310_v59  ;;  %v2678_v59 = vld [vmem:[#allocation2 + $0x140] sm:$0xff] }
 0x204   :  { %v8929_v18 = vadd.f32 %v5335_v8, %v8019_v14  ;;  %v312_v14 = vld [vmem:[%s11616_s1 + $0x230] sm:$0xff]  ;;  %2438 = vst.msk [vmem:[%s11617_s3 + $0x1c0] sm:$0xff] %vm97_vm0, %v2358_v32  ;;  %2167 = vst.msk [vmem:[#allocation2 + $0x1c8] sm:$0xff] %vm97_vm0, %v1375_v7  ;;  %v2359_v33 = vadd.f32 %v2279_v3, %v1375_v7  ;;  %v1377_v8 = vpop.f32.mrb[115].mxu0  ;;  %v2745_v57 = vpack.c.bf16 %v2693_v43, %v2692_v34  ;;  %v3587_v34 = vpop.trf.xlu1 }
 0x205   :  { %392 = vst.msk [vmem:[%s11617_s3 + $0x230] sm:$0xff] %vm97_vm0, %v312_v14  ;;  %v2280_v3 = vld [vmem:[%s11617_s3 + $0x1d0] sm:$0xff]  ;;  %v2281_v14 = vld [vmem:[%s11617_s3 + $0x1d8] sm:$0xff] }
 0x206   :  { %v5336_v58 = vpop.f32.mrb[100].mxu1  ;;  %2439 = vst.msk [vmem:[%s11617_s3 + $0x1c8] sm:$0xff] %vm97_vm0, %v2359_v33  ;;  %5520 = vmatprep.subr.bf16.mxu0 %v2745_v57  ;;  %v8980_v57 = vpop.trf.xlu0 }
 0x207   :  { %v5337_v10 = vpop.f32.mrb[101].mxu1  ;;  %5521 = vmatpush3.bf16.msra.mxu0 %v2737_v39  ;;  %11703 = vst [vmem:[#allocation45_spill] sm:$0xff] %v8980_v57 }
 0x208   :  { %v5338_v4 = vadd.f32 %v5337_v10, %v5336_v58  ;;  %v5339_v25 = vpop.f32.mrb[102].mxu1 }
 0x209   :  { %v5340_v32 = vpop.f32.mrb[103].mxu1  ;;  %v1380_v43 = vpop.f32.mrb[116].mxu0  ;;  %v2694_v58 = vld [vmem:[#allocation2 + $0x1c0] sm:$0xff] }
 0x20a   :  { %v5341_v46 = vadd.f32 %v5340_v32, %v5339_v25  ;;  %v8974_v7 = vadd.f32 %v5338_v4, %v8089_v45  ;;  %2168 = vst.msk [vmem:[#allocation2 + $0x1d0] sm:$0xff] %vm97_vm0, %v1380_v43  ;;  %v2360_v33 = vadd.f32 %v2280_v3, %v1380_v43  ;;  %v1382_v8 = vpop.f32.mrb[117].mxu0  ;;  %3848 = vmatmul.mubr.bf16.gmra.mrb[208].mxu0 %v3587_v34  ;;  %v313_v4 = vld [vmem:[%s11616_s1 + $0x238] sm:$0xff] }
 0x20b   :  { %v1383_v10 = vpop.f32.mrb[118].mxu0  ;;  %v2695_v25 = vld [vmem:[#allocation2 + $0x1c8] sm:$0xff]  ;;  %v2738_v45 = vpack.c.bf16 %v2679_v2, %v2678_v59  ;;  %3855 = vmatprep.mubr.bf16.mxu0 %v8904_v6  ;;  %393 = vst.msk [vmem:[%s11617_s3 + $0x238] sm:$0xff] %vm97_vm0, %v313_v4  ;;  %v314_v6 = vld [vmem:[%s11616_s1 + $0x240] sm:$0xff]  ;;  %v316_v59 = vld [vmem:[%s11616_s1 + $0x250] sm:$0xff]  ;;  %v3663_v4 = vpop.trf.xlu0 }
 0x20c   :  { %v8983_v39 = vadd.f32 %v5341_v46, %v8108_v30  ;;  %2440 = vst.msk [vmem:[%s11617_s3 + $0x1d0] sm:$0xff] %vm97_vm0, %v2360_v33  ;;  %2169 = vst.msk [vmem:[#allocation2 + $0x1d8] sm:$0xff] %vm97_vm0, %v1383_v10  ;;  %v2361_v3 = vadd.f32 %v2281_v14, %v1383_v10  ;;  %v1385_v30 = vpop.f32.mrb[119].mxu0  ;;  %v2746_v34 = vpack.c.bf16 %v2695_v25, %v2694_v58  ;;  %v315_v46 = vld [vmem:[%s11616_s1 + $0x248] sm:$0xff]  ;;  %v2282_v58 = vld [vmem:[%s11617_s3 + $0x1e0] sm:$0xff] }
 0x20d   :  { %394 = vst.msk [vmem:[%s11617_s3 + $0x240] sm:$0xff] %vm97_vm0, %v314_v6  ;;  %395 = vst.msk [vmem:[%s11617_s3 + $0x248] sm:$0xff] %vm97_vm0, %v315_v46  ;;  %v2680_v10 = vld [vmem:[#allocation2 + $0x150] sm:$0xff]  ;;  %v2681_v25 = vld [vmem:[#allocation2 + $0x158] sm:$0xff] }
 0x20e   :  { %v5342_v32 = vpop.f32.mrb[104].mxu1  ;;  %396 = vst.msk [vmem:[%s11617_s3 + $0x250] sm:$0xff] %vm97_vm0, %v316_v59  ;;  %2441 = vst.msk [vmem:[%s11617_s3 + $0x1d8] sm:$0xff] %vm97_vm0, %v2361_v3  ;;  %5522 = vmatprep.subr.bf16.mxu0 %v2746_v34  ;;  %v3588_v3 = vpop.trf.xlu1 }
 0x20f   :  { %v5343_v2 = vpop.f32.mrb[105].mxu1  ;;  %5523 = vmatpush3.bf16.msra.mxu0 %v2738_v45 }
 0x210   :  { %v5344_v43 = vadd.f32 %v5343_v2, %v5342_v32  ;;  %v5345_v14 = vpop.f32.mrb[106].mxu1  ;;  %v2283_v32 = vld [vmem:[%s11617_s3 + $0x1e8] sm:$0xff]  ;;  %v318_v2 = vld [vmem:[%s11616_s1 + $0x260] sm:$0xff] }
 0x211   :  { %v5346_v33 = vpop.f32.mrb[107].mxu1  ;;  %v1388_v6 = vpop.f32.mrb[120].mxu0  ;;  %v2696_v34 = vld [vmem:[#allocation2 + $0x1d0] sm:$0xff]  ;;  %398 = vst.msk [vmem:[%s11617_s3 + $0x260] sm:$0xff] %vm97_vm0, %v318_v2  ;;  %v2683_v2 = vld [vmem:[#allocation2 + $0x168] sm:$0xff] }
 0x212   :  { %v5347_v8 = vadd.f32 %v5346_v33, %v5345_v14  ;;  %v9027_v30 = vadd.f32 %v5344_v43, %v8172_v1  ;;  %2170 = vst.msk [vmem:[#allocation2 + $0x1e0] sm:$0xff] %vm97_vm0, %v1388_v6  ;;  %v2362_v46 = vadd.f32 %v2282_v58, %v1388_v6  ;;  %v1390_v59 = vpop.f32.mrb[121].mxu0  ;;  %3856 = vmatmul.mubr.bf16.gmra.mrb[212].mxu0 %v3588_v3  ;;  %v317_v1 = vld [vmem:[%s11616_s1 + $0x258] sm:$0xff]  ;;  %v319_v43 = vld [vmem:[%s11616_s1 + $0x268] sm:$0xff] }
 0x213   :  { %v1391_v14 = vpop.f32.mrb[122].mxu0  ;;  %v2697_v33 = vld [vmem:[#allocation2 + $0x1d8] sm:$0xff]  ;;  %v2739_v58 = vpack.c.bf16 %v2681_v25, %v2680_v10  ;;  %3912 = vmatprep.mubr.bf16.mxu0 %v3663_v4  ;;  %397 = vst.msk [vmem:[%s11617_s3 + $0x258] sm:$0xff] %vm97_vm0, %v317_v1  ;;  %399 = vst.msk [vmem:[%s11617_s3 + $0x268] sm:$0xff] %vm97_vm0, %v319_v43  ;;  %v2682_v1 = vld [vmem:[#allocation2 + $0x160] sm:$0xff] }
 0x214   :  { %v9034_v45 = vadd.f32 %v5347_v8, %v8191_v54  ;;  %v320_v54 = vld [vmem:[%s11616_s1 + $0x270] sm:$0xff]  ;;  %2442 = vst.msk [vmem:[%s11617_s3 + $0x1e0] sm:$0xff] %vm97_vm0, %v2362_v46  ;;  %2171 = vst.msk [vmem:[#allocation2 + $0x1e8] sm:$0xff] %vm97_vm0, %v1391_v14  ;;  %v2363_v8 = vadd.f32 %v2283_v32, %v1391_v14  ;;  %v1393_v10 = vpop.f32.mrb[123].mxu0  ;;  %v2747_v4 = vpack.c.bf16 %v2697_v33, %v2696_v34  ;;  %v2285_v33 = vld [vmem:[%s11617_s3 + $0x1f8] sm:$0xff] }
 0x215   :  { %400 = vst.msk [vmem:[%s11617_s3 + $0x270] sm:$0xff] %vm97_vm0, %v320_v54  ;;  %v2284_v32 = vld [vmem:[%s11617_s3 + $0x1f0] sm:$0xff] }
 0x216   :  { %v5348_v25 = vpop.f32.mrb[108].mxu1  ;;  %2443 = vst.msk [vmem:[%s11617_s3 + $0x1e8] sm:$0xff] %vm97_vm0, %v2363_v8  ;;  %5524 = vmatprep.subr.bf16.mxu0 %v2747_v4  ;;  %v9086_v4 = vpop.trf.xlu1 }
 0x217   :  { %v5349_v6 = vpop.f32.mrb[109].mxu1  ;;  %5525 = vmatpush3.bf16.msra.mxu0 %v2739_v58  ;;  %11704 = vst [vmem:[#allocation46_spill] sm:$0xff] %v9086_v4 }
 0x218   :  { %v5350_v3 = vadd.f32 %v5349_v6, %v5348_v25  ;;  %v5351_v59 = vpop.f32.mrb[110].mxu1 }
 0x219   :  { %v5352_v46 = vpop.f32.mrb[111].mxu1  ;;  %v1396_v14 = vpop.f32.mrb[124].mxu0  ;;  %v2698_v54 = vld [vmem:[#allocation2 + $0x1e0] sm:$0xff] }
 0x21a   :  { %v5353_v34 = vadd.f32 %v5352_v46, %v5351_v59  ;;  %v9077_v43 = vadd.f32 %v5350_v3, %v8237_v20  ;;  %2172 = vst.msk [vmem:[#allocation2 + $0x1f0] sm:$0xff] %vm97_vm0, %v1396_v14  ;;  %v2364_v8 = vadd.f32 %v2284_v32, %v1396_v14  ;;  %v1398_v10 = vpop.f32.mrb[125].mxu0  ;;  %v2740_v59 = vpack.c.bf16 %v2683_v2, %v2682_v1  ;;  %v321_v20 = vld [vmem:[%s11616_s1 + $0x278] sm:$0xff] }
 0x21b   :  { %v1399_v58 = vpop.f32.mrb[126].mxu0  ;;  %v2699_v6 = vld [vmem:[#allocation2 + $0x1e8] sm:$0xff]  ;;  %401 = vst.msk [vmem:[%s11617_s3 + $0x278] sm:$0xff] %vm97_vm0, %v321_v20  ;;  %v2685_v10 = vld [vmem:[#allocation2 + $0x178] sm:$0xff] }
 0x21c   :  { %v9084_v25 = vadd.f32 %v5353_v34, %v8261_v38  ;;  %2444 = vst.msk [vmem:[%s11617_s3 + $0x1f0] sm:$0xff] %vm97_vm0, %v2364_v8  ;;  %2173 = vst.msk [vmem:[#allocation2 + $0x1f8] sm:$0xff] %vm97_vm0, %v1399_v58  ;;  %v2365_v3 = vadd.f32 %v2285_v33, %v1399_v58  ;;  %v2748_v38 = vpack.c.bf16 %v2699_v6, %v2698_v54  ;;  %v1401_v46 = vpop.f32.mrb[127].mxu0  ;;  %v2286_v33 = vld [vmem:[%s11617_s3 + $0x200] sm:$0xff]  ;;  %v2684_v8 = vld [vmem:[#allocation2 + $0x170] sm:$0xff]  ;;  %v9110_v6 = vpop.trf.xlu1 }
 0x21d   :  { %11705 = vst [vmem:[#allocation47_spill] sm:$0xff] %v9110_v6 }
 0x21e   :  { %v5354_v32 = vpop.f32.mrb[112].mxu1  ;;  %2445 = vst.msk [vmem:[%s11617_s3 + $0x1f8] sm:$0xff] %vm97_vm0, %v2365_v3  ;;  %5526 = vmatprep.subr.bf16.mxu0 %v2748_v38  ;;  %v2287_v3 = vld [vmem:[%s11617_s3 + $0x208] sm:$0xff] }
 0x21f   :  { %v5355_v34 = vpop.f32.mrb[113].mxu1  ;;  %5527 = vmatpush3.bf16.msra.mxu0 %v2740_v59 }
 0x220   :  { %v5356_v1 = vadd.f32 %v5355_v34, %v5354_v32  ;;  %v5357_v2 = vpop.f32.mrb[114].mxu1 }
 0x221   :  { %v5358_v14 = vpop.f32.mrb[115].mxu1  ;;  %v2700_v20 = vld [vmem:[#allocation2 + $0x1f0] sm:$0xff]  ;;  %v1404_v46 = vpop.f32.mrb[128].mxu0 }
 0x222   :  { %v5359_v54 = vadd.f32 %v5358_v14, %v5357_v2  ;;  %v9108_v58 = vadd.f32 %v5356_v1, %v8307_v35  ;;  %2174 = vst.msk [vmem:[#allocation2 + $0x200] sm:$0xff] %vm97_vm0, %v1404_v46  ;;  %v2366_v32 = vadd.f32 %v2286_v33, %v1404_v46  ;;  %v1406_v38 = vpop.f32.mrb[129].mxu0  ;;  %v2741_v2 = vpack.c.bf16 %v2685_v10, %v2684_v8  ;;  %v3631_v33 = vpop.trf.xlu1  ;;  %v2288_v10 = vld [vmem:[%s11617_s3 + $0x210] sm:$0xff] }
 0x223   :  { %v2701_v34 = vld [vmem:[#allocation2 + $0x1f8] sm:$0xff]  ;;  %v1407_v14 = vpop.f32.mrb[130].mxu0  ;;  %v3664_v46 = vpop.trf.xlu0 }
 0x224   :  { %v9116_v59 = vadd.f32 %v5359_v54, %v8315_v50  ;;  %v2749_v35 = vpack.c.bf16 %v2701_v34, %v2700_v20  ;;  %2446 = vst.msk [vmem:[%s11617_s3 + $0x200] sm:$0xff] %vm97_vm0, %v2366_v32  ;;  %2175 = vst.msk [vmem:[#allocation2 + $0x208] sm:$0xff] %vm97_vm0, %v1407_v14  ;;  %v2367_v6 = vadd.f32 %v2287_v3, %v1407_v14  ;;  %v1409_v57 = vpop.f32.mrb[131].mxu0  ;;  %v2289_v32 = vld [vmem:[%s11617_s3 + $0x218] sm:$0xff] }
 0x226   :  { %v5360_v1 = vpop.f32.mrb[116].mxu1  ;;  %5528 = vmatprep.subr.bf16.mxu0 %v2749_v35  ;;  %2447 = vst.msk [vmem:[%s11617_s3 + $0x208] sm:$0xff] %vm97_vm0, %v2367_v6 }
 0x227   :  { %v5361_v50 = vpop.f32.mrb[117].mxu1  ;;  %5529 = vmatpush3.bf16.msra.mxu0 %v2741_v2 }
 0x228   :  { %v5362_v54 = vadd.f32 %v5361_v50, %v5360_v1  ;;  %v5363_v4 = vpop.f32.mrb[118].mxu1 }
 0x229   :  { %v5364_v8 = vpop.f32.mrb[119].mxu1  ;;  %v1412_v3 = vpop.f32.mrb[132].mxu0  ;;  %v2702_v38 = vld [vmem:[#allocation2 + $0x200] sm:$0xff] }
 0x22a   :  { %v5365_v20 = vadd.f32 %v5364_v8, %v5363_v4  ;;  %v9132_v57 = vadd.f32 %v5362_v54, %v8334_v53  ;;  %3913 = vmatmul.mubr.bf16.vlgmr.msra.gmra.mrb[216].mxu0 %v3631_v33  ;;  %2176 = vst.msk [vmem:[#allocation2 + $0x210] sm:$0xff] %vm97_vm0, %v1412_v3  ;;  %v2368_v34 = vadd.f32 %v2288_v10, %v1412_v3  ;;  %v1414_v2 = vpop.f32.mrb[133].mxu0  ;;  %v3632_v8 = vpop.trf.xlu1 }
 0x22b   :  { %3920 = vmatprep.mubr.bf16.mxu0 %v3664_v46  ;;  %v1415_v4 = vpop.f32.mrb[134].mxu0  ;;  %v2703_v14 = vld [vmem:[#allocation2 + $0x208] sm:$0xff]  ;;  %v3665_v3 = vpop.trf.xlu0 }
 0x22c   :  { %v9138_v6 = vadd.f32 %v5365_v20, %v8344_v27  ;;  %2448 = vst.msk [vmem:[%s11617_s3 + $0x210] sm:$0xff] %vm97_vm0, %v2368_v34  ;;  %2177 = vst.msk [vmem:[#allocation2 + $0x218] sm:$0xff] %vm97_vm0, %v1415_v4  ;;  %v2369_v53 = vadd.f32 %v2289_v32, %v1415_v4  ;;  %v1417_v1 = vpop.f32.mrb[135].mxu0  ;;  %v2750_v50 = vpack.c.bf16 %v2703_v14, %v2702_v38  ;;  %v2290_v20 = vld [vmem:[%s11617_s3 + $0x220] sm:$0xff]  ;;  %v2291_v34 = vld [vmem:[%s11617_s3 + $0x228] sm:$0xff] }
 0x22e   :  { %v5366_v35 = vpop.f32.mrb[120].mxu1  ;;  %2449 = vst.msk [vmem:[%s11617_s3 + $0x218] sm:$0xff] %vm97_vm0, %v2369_v53  ;;  %5698 = vmatprep.subr.bf16.mxu0 %v2750_v50 }
 0x22f   :  { %v5367_v27 = vpop.f32.mrb[121].mxu1  ;;  %5699 = vmatpush3.bf16.msra.mxu0 %v2750_v50 }
 0x230   :  { %v5368_v54 = vadd.f32 %v5367_v27, %v5366_v35  ;;  %v5369_v33 = vpop.f32.mrb[122].mxu1 }
 0x231   :  { %v5370_v10 = vpop.f32.mrb[123].mxu1  ;;  %v1420_v38 = vpop.f32.mrb[136].mxu0  ;;  %v2704_v2 = vld [vmem:[#allocation2 + $0x210] sm:$0xff] }
 0x232   :  { %v5371_v46 = vadd.f32 %v5370_v10, %v5369_v33  ;;  %v9154_v32 = vadd.f32 %v5368_v54, %v8355_v16  ;;  %3921 = vmatmul.mubr.bf16.gmra.mrb[220].mxu0 %v3632_v8  ;;  %2178 = vst.msk [vmem:[#allocation2 + $0x220] sm:$0xff] %vm97_vm0, %v1420_v38  ;;  %v2370_v14 = vadd.f32 %v2290_v20, %v1420_v38  ;;  %v1422_v35 = vpop.f32.mrb[137].mxu0  ;;  %v3633_v10 = vpop.trf.xlu1 }
 0x233   :  { %3928 = vmatprep.mubr.bf16.mxu0 %v3665_v3  ;;  %v1423_v53 = vpop.f32.mrb[138].mxu0  ;;  %v2705_v1 = vld [vmem:[#allocation2 + $0x218] sm:$0xff]  ;;  %v3666_v38 = vpop.trf.xlu0 }
 0x234   :  { %v9160_v4 = vadd.f32 %v5371_v46, %v8364_v40  ;;  %2450 = vst.msk [vmem:[%s11617_s3 + $0x220] sm:$0xff] %vm97_vm0, %v2370_v14  ;;  %2179 = vst.msk [vmem:[#allocation2 + $0x228] sm:$0xff] %vm97_vm0, %v1423_v53  ;;  %v2371_v16 = vadd.f32 %v2291_v34, %v1423_v53  ;;  %v1425_v27 = vpop.f32.mrb[139].mxu0  ;;  %v2751_v54 = vpack.c.bf16 %v2705_v1, %v2704_v2  ;;  %v2292_v46 = vld [vmem:[%s11617_s3 + $0x230] sm:$0xff]  ;;  %v2293_v14 = vld [vmem:[%s11617_s3 + $0x238] sm:$0xff] }
 0x236   :  { %v5372_v50 = vpop.f32.mrb[124].mxu1  ;;  %2451 = vst.msk [vmem:[%s11617_s3 + $0x228] sm:$0xff] %vm97_vm0, %v2371_v16  ;;  %5700 = vmatprep.subr.bf16.mxu0 %v2751_v54 }
 0x237   :  { %v5373_v40 = vpop.f32.mrb[125].mxu1  ;;  %5701 = vmatpush3.bf16.msra.mxu0 %v2751_v54 }
 0x238   :  { %v5374_v33 = vadd.f32 %v5373_v40, %v5372_v50  ;;  %v5375_v8 = vpop.f32.mrb[126].mxu1 }
 0x239   :  { %v5376_v20 = vpop.f32.mrb[127].mxu1  ;;  %v1428_v2 = vpop.f32.mrb[140].mxu0  ;;  %v2706_v35 = vld [vmem:[#allocation2 + $0x220] sm:$0xff] }
 0x23a   :  { %v5377_v3 = vadd.f32 %v5376_v20, %v5375_v8  ;;  %v9176_v34 = vadd.f32 %v5374_v33, %v8375_v60  ;;  %3929 = vmatmul.mubr.bf16.gmra.mrb[224].mxu0 %v3633_v10  ;;  %2180 = vst.msk [vmem:[#allocation2 + $0x230] sm:$0xff] %vm97_vm0, %v1428_v2  ;;  %v2372_v1 = vadd.f32 %v2292_v46, %v1428_v2  ;;  %v1430_v50 = vpop.f32.mrb[141].mxu0  ;;  %v2464_v60 = vld [vmem:[%s11618_s4 + $0x10] sm:$0xff]  ;;  %v2462_v20 = vld [vmem:[%s11618_s4] sm:$0xff]  ;;  %v3634_v2 = vpop.trf.xlu1 }
 0x23b   :  { %3936 = vmatprep.mubr.bf16.mxu0 %v3666_v38  ;;  %v1431_v16 = vpop.f32.mrb[142].mxu0  ;;  %v2707_v27 = vld [vmem:[#allocation2 + $0x228] sm:$0xff]  ;;  %v2465_v38 = vld [vmem:[%s11618_s4 + $0x18] sm:$0xff] }
 0x23c   :  { %v9182_v53 = vadd.f32 %v5377_v3, %v8384_v44  ;;  %2452 = vst.msk [vmem:[%s11617_s3 + $0x230] sm:$0xff] %vm97_vm0, %v2372_v1  ;;  %2181 = vst.msk [vmem:[#allocation2 + $0x238] sm:$0xff] %vm97_vm0, %v1431_v16  ;;  %v2373_v44 = vadd.f32 %v2293_v14, %v1431_v16  ;;  %v1433_v40 = vpop.f32.mrb[143].mxu0  ;;  %v2752_v33 = vpack.c.bf16 %v2707_v27, %v2706_v35  ;;  %v2294_v1 = vld [vmem:[%s11617_s3 + $0x240] sm:$0xff]  ;;  %v3667_v27 = vpop.trf.xlu0 }
 0x23e   :  { %v5668_v54 = vpop.f32.mrb[128].mxu1  ;;  %2453 = vst.msk [vmem:[%s11617_s3 + $0x238] sm:$0xff] %vm97_vm0, %v2373_v44  ;;  %5702 = vmatprep.subr.bf16.mxu0 %v2752_v33 }
 0x23f   :  { %v1992_v8 = vadd.f32 %v5668_v54, %v8490_v49  ;;  %v1983_v10 = vpop.f32.mrb[129].mxu1  ;;  %5703 = vmatpush3.bf16.msra.mxu0 %v2752_v33 }
 0x240   :  { %v1984_v46 = vadd.f32 %v1983_v10, %v8434_v9  ;;  %v5669_v3 = vpop.f32.mrb[130].mxu1  ;;  %v2463_v9 = vld [vmem:[%s11618_s4 + $0x8] sm:$0xff] }
 0x241   :  { %2192 = vst.msk [vmem:[#allocation3 + $0x10] sm:$0xff] %vm97_vm0, %v1992_v8  ;;  %v2496_v49 = vadd.f32 %v2464_v60, %v1992_v8  ;;  %v1995_v14 = vadd.f32 %v5669_v3, %v8500_v62  ;;  %v1986_v35 = vpop.f32.mrb[131].mxu1  ;;  %v1436_v54 = vpop.f32.mrb[144].mxu0  ;;  %v2295_v60 = vld [vmem:[%s11617_s3 + $0x248] sm:$0xff]  ;;  %v2708_v44 = vld [vmem:[#allocation2 + $0x230] sm:$0xff] }
 0x242   :  { %2190 = vst.msk [vmem:[#allocation3] sm:$0xff] %vm97_vm0, %v1984_v46  ;;  %v2494_v50 = vadd.f32 %v2462_v20, %v1984_v46  ;;  %v1987_v16 = vadd.f32 %v1986_v35, %v8444_v36  ;;  %3937 = vmatmul.mubr.bf16.gmra.mrb[228].mxu0 %v3634_v2  ;;  %2182 = vst.msk [vmem:[#allocation2 + $0x240] sm:$0xff] %vm97_vm0, %v1436_v54  ;;  %v2374_v40 = vadd.f32 %v2294_v1, %v1436_v54  ;;  %v1438_v33 = vpop.f32.mrb[145].mxu0  ;;  %v2468_v46 = vld [vmem:[%s11618_s4 + $0x30] sm:$0xff]  ;;  %v2466_v35 = vld [vmem:[%s11618_s4 + $0x20] sm:$0xff] }
 0x243   :  { %2528 = vst.msk [vmem:[%s11618_s4 + $0x10] sm:$0xff] %vm97_vm0, %v2496_v49  ;;  %2193 = vst.msk [vmem:[#allocation3 + $0x18] sm:$0xff] %vm97_vm0, %v1995_v14  ;;  %v2497_v62 = vadd.f32 %v2465_v38, %v1995_v14  ;;  %3944 = vmatprep.mubr.bf16.mxu0 %v3667_v27  ;;  %v1439_v8 = vpop.f32.mrb[146].mxu0  ;;  %v2709_v10 = vld [vmem:[#allocation2 + $0x238] sm:$0xff]  ;;  %v2296_v54 = vld [vmem:[%s11617_s3 + $0x250] sm:$0xff] }
 0x244   :  { %2526 = vst.msk [vmem:[%s11618_s4] sm:$0xff] %vm97_vm0, %v2494_v50  ;;  %2191 = vst.msk [vmem:[#allocation3 + $0x8] sm:$0xff] %vm97_vm0, %v1987_v16  ;;  %v2495_v36 = vadd.f32 %v2463_v9, %v1987_v16  ;;  %v2375_v3 = vadd.f32 %v2295_v60, %v1439_v8  ;;  %v1441_v38 = vpop.f32.mrb[147].mxu0  ;;  %v2753_v2 = vpack.c.bf16 %v2709_v10, %v2708_v44  ;;  %v2469_v50 = vld [vmem:[%s11618_s4 + $0x38] sm:$0xff]  ;;  %v3635_v16 = vpop.trf.xlu1 }
 0x245   :  { %2529 = vst.msk [vmem:[%s11618_s4 + $0x18] sm:$0xff] %vm97_vm0, %v2497_v62  ;;  %2454 = vst.msk [vmem:[%s11617_s3 + $0x240] sm:$0xff] %vm97_vm0, %v2374_v40 }
 0x246   :  { %2527 = vst.msk [vmem:[%s11618_s4 + $0x8] sm:$0xff] %vm97_vm0, %v2495_v36  ;;  %v5672_v20 = vpop.f32.mrb[132].mxu1  ;;  %2183 = vst.msk [vmem:[#allocation2 + $0x248] sm:$0xff] %vm97_vm0, %v1439_v8  ;;  %5704 = vmatprep.subr.bf16.mxu0 %v2753_v2  ;;  %v3668_v36 = vpop.trf.xlu0 }
 0x247   :  { %v2008_v49 = vadd.f32 %v5672_v20, %v8605_v26  ;;  %v1999_v14 = vpop.f32.mrb[133].mxu1  ;;  %2455 = vst.msk [vmem:[%s11617_s3 + $0x248] sm:$0xff] %vm97_vm0, %v2375_v3  ;;  %5705 = vmatpush3.bf16.msra.mxu0 %v2753_v2 }
 0x248   :  { %v2000_v9 = vadd.f32 %v1999_v14, %v8546_v56  ;;  %v5673_v1 = vpop.f32.mrb[134].mxu1  ;;  %v2467_v56 = vld [vmem:[%s11618_s4 + $0x28] sm:$0xff] }
 0x249   :  { %2196 = vst.msk [vmem:[#allocation3 + $0x30] sm:$0xff] %vm97_vm0, %v2008_v49  ;;  %v2500_v26 = vadd.f32 %v2468_v46, %v2008_v49  ;;  %v2011_v27 = vadd.f32 %v5673_v1, %v8618_v21  ;;  %v2002_v62 = vpop.f32.mrb[135].mxu1  ;;  %v2297_v21 = vld [vmem:[%s11617_s3 + $0x258] sm:$0xff]  ;;  %v2758_v33 = vld [vmem:[#allocation3] sm:$0xff]  ;;  %v1444_v10 = vpop.f32.mrb[148].mxu0 }
 0x24a   :  { %2194 = vst.msk [vmem:[#allocation3 + $0x20] sm:$0xff] %vm97_vm0, %v2000_v9  ;;  %v2498_v60 = vadd.f32 %v2466_v35, %v2000_v9  ;;  %v2003_v44 = vadd.f32 %v2002_v62, %v8556_v48  ;;  %v2710_v20 = vld [vmem:[#allocation2 + $0x240] sm:$0xff]  ;;  %3945 = vmatmul.mubr.bf16.gmra.mrb[232].mxu0 %v3635_v16  ;;  %2184 = vst.msk [vmem:[#allocation2 + $0x250] sm:$0xff] %vm97_vm0, %v1444_v10  ;;  %v2376_v3 = vadd.f32 %v2296_v54, %v1444_v10  ;;  %v1446_v38 = vpop.f32.mrb[149].mxu0  ;;  %v2761_v2 = vld [vmem:[#allocation3 + $0x18] sm:$0xff] }
 0x24b   :  { %2532 = vst.msk [vmem:[%s11618_s4 + $0x30] sm:$0xff] %vm97_vm0, %v2500_v26  ;;  %2197 = vst.msk [vmem:[#allocation3 + $0x38] sm:$0xff] %vm97_vm0, %v2011_v27  ;;  %v2501_v40 = vadd.f32 %v2469_v50, %v2011_v27  ;;  %v2759_v8 = vld [vmem:[#allocation3 + $0x8] sm:$0xff]  ;;  %3952 = vmatprep.mubr.bf16.mxu0 %v3668_v36  ;;  %v1447_v49 = vpop.f32.mrb[150].mxu0  ;;  %v2472_v9 = vld [vmem:[%s11618_s4 + $0x50] sm:$0xff] }
 0x24c   :  { %2530 = vst.msk [vmem:[%s11618_s4 + $0x20] sm:$0xff] %vm97_vm0, %v2498_v60  ;;  %2195 = vst.msk [vmem:[#allocation3 + $0x28] sm:$0xff] %vm97_vm0, %v2003_v44  ;;  %v2499_v48 = vadd.f32 %v2467_v56, %v2003_v44  ;;  %v2790_v46 = vpack.c.bf16 %v2759_v8, %v2758_v33  ;;  %v2377_v1 = vadd.f32 %v2297_v21, %v1447_v49  ;;  %v1449_v50 = vpop.f32.mrb[151].mxu0  ;;  %v2470_v62 = vld [vmem:[%s11618_s4 + $0x40] sm:$0xff]  ;;  %v11706_v56 = vmov 0   ;;  %v2760_v54 = vld [vmem:[#allocation3 + $0x10] sm:$0xff] }
 0x24d   :  { %2533 = vst.msk [vmem:[%s11618_s4 + $0x38] sm:$0xff] %vm97_vm0, %v2501_v40  ;;  %v2711_v14 = vld [vmem:[#allocation2 + $0x248] sm:$0xff]  ;;  %2456 = vst.msk [vmem:[%s11617_s3 + $0x250] sm:$0xff] %vm97_vm0, %v2376_v3  ;;  %v2473_v36 = vld [vmem:[%s11618_s4 + $0x58] sm:$0xff]  ;;  %v2791_v21 = vpack.c.bf16 %v2761_v2, %v2760_v54 }
 0x24e   :  { %2531 = vst.msk [vmem:[%s11618_s4 + $0x28] sm:$0xff] %vm97_vm0, %v2499_v48  ;;  %v5676_v35 = vpop.f32.mrb[136].mxu1  ;;  %3207 = vmatpush1.bf16.msra.mxu1 %v2790_v46  ;;  %2185 = vst.msk [vmem:[#allocation2 + $0x258] sm:$0xff] %vm97_vm0, %v1447_v49  ;;  %v2754_v16 = vpack.c.bf16 %v2711_v14, %v2710_v20  ;;  %v2298_v10 = vld [vmem:[%s11617_s3 + $0x260] sm:$0xff]  ;;  %v3669_v46 = vpop.trf.xlu0 }
 0x24f   :  { %v2024_v26 = vadd.f32 %v5676_v35, %v8741_v11  ;;  %v2015_v27 = vpop.f32.mrb[137].mxu1  ;;  %3208 = vmatprep.subr.bf16.mxu1 %v11706_v56  ;;  %2457 = vst.msk [vmem:[%s11617_s3 + $0x258] sm:$0xff] %vm97_vm0, %v2377_v1  ;;  %v3636_v11 = vpop.trf.xlu1 }
 0x250   :  { %v2016_v60 = vadd.f32 %v2015_v27, %v8670_v52  ;;  %v5677_v44 = vpop.f32.mrb[138].mxu1  ;;  %5706 = vmatprep.subr.bf16.mxu0 %v2754_v16  ;;  %v2471_v52 = vld [vmem:[%s11618_s4 + $0x48] sm:$0xff] }
 0x251   :  { %2200 = vst.msk [vmem:[#allocation3 + $0x50] sm:$0xff] %vm97_vm0, %v2024_v26  ;;  %v2504_v40 = vadd.f32 %v2472_v9, %v2024_v26  ;;  %v2027_v33 = vadd.f32 %v5677_v44, %v8753_v12  ;;  %v2018_v8 = vpop.f32.mrb[139].mxu1  ;;  %5707 = vmatpush3.bf16.msra.mxu0 %v2754_v16  ;;  %v2299_v12 = vld [vmem:[%s11617_s3 + $0x268] sm:$0xff]  ;;  %v2762_v38 = vld [vmem:[#allocation3 + $0x20] sm:$0xff]  ;;  %v1452_v49 = vpop.f32.mrb[152].mxu0 }
 0x252   :  { %2198 = vst.msk [vmem:[#allocation3 + $0x40] sm:$0xff] %vm97_vm0, %v2016_v60  ;;  %v2502_v20 = vadd.f32 %v2470_v62, %v2016_v60  ;;  %v2019_v48 = vadd.f32 %v2018_v8, %v8685_v29  ;;  %3209 = vmatpush1.bf16.msra.mxu1 %v2791_v21  ;;  %v2712_v29 = vld [vmem:[#allocation2 + $0x250] sm:$0xff]  ;;  %3953 = vmatmul.mubr.bf16.gmra.mrb[236].mxu0 %v3636_v11  ;;  %2186 = vst.msk [vmem:[#allocation2 + $0x260] sm:$0xff] %vm97_vm0, %v1452_v49  ;;  %v1454_v1 = vpop.f32.mrb[153].mxu0  ;;  %v2765_v50 = vld [vmem:[#allocation3 + $0x38] sm:$0xff] }
 0x253   :  { %2536 = vst.msk [vmem:[%s11618_s4 + $0x50] sm:$0xff] %vm97_vm0, %v2504_v40  ;;  %2201 = vst.msk [vmem:[#allocation3 + $0x58] sm:$0xff] %vm97_vm0, %v2027_v33  ;;  %v2505_v3 = vadd.f32 %v2473_v36, %v2027_v33  ;;  %3210 = vmatprep.subr.bf16.mxu1 %v11706_v56  ;;  %v2763_v2 = vld [vmem:[#allocation3 + $0x28] sm:$0xff]  ;;  %v2378_v9 = vadd.f32 %v2298_v10, %v1452_v49  ;;  %3960 = vmatprep.mubr.bf16.mxu0 %v3669_v46  ;;  %v1455_v16 = vpop.f32.mrb[154].mxu0  ;;  %v2476_v62 = vld [vmem:[%s11618_s4 + $0x70] sm:$0xff] }
 0x254   :  { %2534 = vst.msk [vmem:[%s11618_s4 + $0x40] sm:$0xff] %vm97_vm0, %v2502_v20  ;;  %2199 = vst.msk [vmem:[#allocation3 + $0x48] sm:$0xff] %vm97_vm0, %v2019_v48  ;;  %v2503_v14 = vadd.f32 %v2471_v52, %v2019_v48  ;;  %v2792_v35 = vpack.c.bf16 %v2763_v2, %v2762_v38  ;;  %v2379_v54 = vadd.f32 %v2299_v12, %v1455_v16  ;;  %v1457_v60 = vpop.f32.mrb[155].mxu0  ;;  %v2474_v11 = vld [vmem:[%s11618_s4 + $0x60] sm:$0xff]  ;;  %v2764_v40 = vld [vmem:[#allocation3 + $0x30] sm:$0xff]  ;;  %v3670_v2 = vpop.trf.xlu0 }
 0x255   :  { %2537 = vst.msk [vmem:[%s11618_s4 + $0x58] sm:$0xff] %vm97_vm0, %v2505_v3  ;;  %v2713_v26 = vld [vmem:[#allocation2 + $0x258] sm:$0xff]  ;;  %2458 = vst.msk [vmem:[%s11617_s3 + $0x260] sm:$0xff] %vm97_vm0, %v2378_v9  ;;  %v2793_v10 = vpack.c.bf16 %v2765_v50, %v2764_v40  ;;  %v2300_v12 = vld [vmem:[%s11617_s3 + $0x270] sm:$0xff] }
 0x256   :  { %2535 = vst.msk [vmem:[%s11618_s4 + $0x48] sm:$0xff] %vm97_vm0, %v2503_v14  ;;  %v5680_v27 = vpop.f32.mrb[140].mxu1  ;;  %3211 = vmatpush1.bf16.msra.mxu1 %v2792_v35  ;;  %2187 = vst.msk [vmem:[#allocation2 + $0x268] sm:$0xff] %vm97_vm0, %v1455_v16  ;;  %v2755_v44 = vpack.c.bf16 %v2713_v26, %v2712_v29  ;;  %v2477_v52 = vld [vmem:[%s11618_s4 + $0x78] sm:$0xff]  ;;  %v2480_v60 = vld [vmem:[%s11618_s4 + $0x90] sm:$0xff] }
 0x257   :  { %v2040_v36 = vadd.f32 %v5680_v27, %v8874_v5  ;;  %v2031_v21 = vpop.f32.mrb[141].mxu1  ;;  %3212 = vmatprep.subr.bf16.mxu1 %v11706_v56  ;;  %2459 = vst.msk [vmem:[%s11617_s3 + $0x268] sm:$0xff] %vm97_vm0, %v2379_v54  ;;  %v3637_v5 = vpop.trf.xlu1 }
 0x258   :  { %v2032_v33 = vadd.f32 %v2031_v21, %v8809_v47  ;;  %v5681_v8 = vpop.f32.mrb[142].mxu1  ;;  %5708 = vmatprep.subr.bf16.mxu0 %v2755_v44  ;;  %v2475_v47 = vld [vmem:[%s11618_s4 + $0x68] sm:$0xff] }
 0x259   :  { %2204 = vst.msk [vmem:[#allocation3 + $0x70] sm:$0xff] %vm97_vm0, %v2040_v36  ;;  %v2508_v20 = vadd.f32 %v2476_v62, %v2040_v36  ;;  %v2043_v48 = vadd.f32 %v5681_v8, %v8883_v15  ;;  %v2034_v46 = vpop.f32.mrb[143].mxu1  ;;  %5709 = vmatpush3.bf16.msra.mxu0 %v2755_v44  ;;  %v2301_v15 = vld [vmem:[%s11617_s3 + $0x278] sm:$0xff]  ;;  %v2766_v29 = vld [vmem:[#allocation3 + $0x40] sm:$0xff]  ;;  %v2768_v8 = vld [vmem:[#allocation3 + $0x50] sm:$0xff] }
 0x25a   :  { %2202 = vst.msk [vmem:[#allocation3 + $0x60] sm:$0xff] %vm97_vm0, %v2032_v33  ;;  %v2506_v3 = vadd.f32 %v2474_v11, %v2032_v33  ;;  %v2035_v38 = vadd.f32 %v2034_v46, %v8821_v31  ;;  %3213 = vmatpush1.bf16.msra.mxu1 %v2793_v10  ;;  %v1460_v35 = vpop.f32.mrb[156].mxu0  ;;  %v2714_v31 = vld [vmem:[#allocation2 + $0x260] sm:$0xff]  ;;  %3961 = vmatmul.mubr.bf16.gmra.mrb[240].mxu0 %v3637_v5  ;;  %v2769_v26 = vld [vmem:[#allocation3 + $0x58] sm:$0xff] }
 0x25b   :  { %2540 = vst.msk [vmem:[%s11618_s4 + $0x70] sm:$0xff] %vm97_vm0, %v2508_v20  ;;  %2205 = vst.msk [vmem:[#allocation3 + $0x78] sm:$0xff] %vm97_vm0, %v2043_v48  ;;  %v2509_v49 = vadd.f32 %v2477_v52, %v2043_v48  ;;  %3214 = vmatprep.subr.bf16.mxu1 %v11706_v56  ;;  %v2767_v14 = vld [vmem:[#allocation3 + $0x48] sm:$0xff]  ;;  %v2380_v50 = vadd.f32 %v2300_v12, %v1460_v35  ;;  %v1462_v16 = vpop.f32.mrb[157].mxu0  ;;  %3968 = vmatprep.mubr.bf16.mxu0 %v3670_v2  ;;  %v2478_v33 = vld [vmem:[%s11618_s4 + $0x80] sm:$0xff] }
 0x25c   :  { %2538 = vst.msk [vmem:[%s11618_s4 + $0x60] sm:$0xff] %vm97_vm0, %v2506_v3  ;;  %2203 = vst.msk [vmem:[#allocation3 + $0x68] sm:$0xff] %vm97_vm0, %v2035_v38  ;;  %v2507_v9 = vadd.f32 %v2475_v47, %v2035_v38  ;;  %v2794_v1 = vpack.c.bf16 %v2767_v14, %v2766_v29  ;;  %v1463_v27 = vpop.f32.mrb[158].mxu0  ;;  %v2481_v5 = vld [vmem:[%s11618_s4 + $0x98] sm:$0xff]  ;;  %v2795_v20 = vpack.c.bf16 %v2769_v26, %v2768_v8  ;;  %v3679_v38 = vpop.trf.xlu0  ;;  %v2482_v26 = vld [vmem:[%s11618_s4 + $0xa0] sm:$0xff] }
 0x25d   :  { %2188 = vst.msk [vmem:[#allocation2 + $0x270] sm:$0xff] %vm97_vm0, %v1460_v35  ;;  %2541 = vst.msk [vmem:[%s11618_s4 + $0x78] sm:$0xff] %vm97_vm0, %v2509_v49  ;;  %v2715_v62 = vld [vmem:[#allocation2 + $0x268] sm:$0xff]  ;;  %v2381_v44 = vadd.f32 %v2301_v15, %v1463_v27  ;;  %v1465_v21 = vpop.f32.mrb[159].mxu0 }
 0x25e   :  { %2539 = vst.msk [vmem:[%s11618_s4 + $0x68] sm:$0xff] %vm97_vm0, %v2507_v9  ;;  %v5684_v54 = vpop.f32.mrb[144].mxu1  ;;  %3215 = vmatpush1.bf16.msra.mxu1 %v2794_v1  ;;  %2460 = vst.msk [vmem:[%s11617_s3 + $0x270] sm:$0xff] %vm97_vm0, %v2380_v50  ;;  %v2756_v36 = vpack.c.bf16 %v2715_v62, %v2714_v31  ;;  %v2484_v9 = vld [vmem:[%s11618_s4 + $0xb0] sm:$0xff] }
 0x25f   :  { %2189 = vst.msk [vmem:[#allocation2 + $0x278] sm:$0xff] %vm97_vm0, %v1463_v27  ;;  %v2056_v11 = vadd.f32 %v5684_v54, %v8974_v7  ;;  %v2047_v40 = vpop.f32.mrb[145].mxu1  ;;  %3216 = vmatprep.subr.bf16.mxu1 %v11706_v56  ;;  %2461 = vst.msk [vmem:[%s11617_s3 + $0x278] sm:$0xff] %vm97_vm0, %v2381_v44  ;;  %v3638_v7 = vpop.trf.xlu1 }
 0x260   :  { %v2048_v52 = vadd.f32 %v2047_v40, %v8922_v19  ;;  %v5685_v10 = vpop.f32.mrb[146].mxu1  ;;  %5710 = vmatprep.subr.bf16.mxu0 %v2756_v36  ;;  %v2479_v19 = vld [vmem:[%s11618_s4 + $0x88] sm:$0xff]  ;;  %v2772_v27 = vld [vmem:[#allocation3 + $0x70] sm:$0xff]  ;;  %v3680_v8 = vpop.trf.xlu0 }
 0x261   :  { %2208 = vst.msk [vmem:[#allocation3 + $0x90] sm:$0xff] %vm97_vm0, %v2056_v11  ;;  %v2512_v48 = vadd.f32 %v2480_v60, %v2056_v11  ;;  %v2059_v46 = vadd.f32 %v5685_v10, %v8983_v39  ;;  %v2050_v47 = vpop.f32.mrb[147].mxu1  ;;  %5711 = vmatpush3.bf16.msra.mxu0 %v2756_v36  ;;  %v2770_v2 = vld [vmem:[#allocation3 + $0x60] sm:$0xff]  ;;  %v2485_v60 = vld [vmem:[%s11618_s4 + $0xb8] sm:$0xff]  ;;  %v2483_v40 = vld [vmem:[%s11618_s4 + $0xa8] sm:$0xff] }
 0x262   :  { %2206 = vst.msk [vmem:[#allocation3 + $0x80] sm:$0xff] %vm97_vm0, %v2048_v52  ;;  %v2510_v12 = vadd.f32 %v2478_v33, %v2048_v52  ;;  %v2051_v3 = vadd.f32 %v2050_v47, %v8929_v18  ;;  %3217 = vmatpush1.bf16.msra.mxu1 %v2795_v20  ;;  %3969 = vmatmul.mubr.bf16.gmra.mrb[244].mxu0 %v3638_v7  ;;  %v2773_v14 = vld [vmem:[#allocation3 + $0x78] sm:$0xff] }
 0x263   :  { %2544 = vst.msk [vmem:[%s11618_s4 + $0x90] sm:$0xff] %vm97_vm0, %v2512_v48  ;;  %2209 = vst.msk [vmem:[#allocation3 + $0x98] sm:$0xff] %vm97_vm0, %v2059_v46  ;;  %v2513_v39 = vadd.f32 %v2481_v5, %v2059_v46  ;;  %3218 = vmatprep.subr.bf16.mxu1 %v11706_v56  ;;  %v2771_v15 = vld [vmem:[#allocation3 + $0x68] sm:$0xff]  ;;  %3976 = vmatprep.mubr.bf16.mxu0 %v3679_v38  ;;  %v2797_v44 = vpack.c.bf16 %v2773_v14, %v2772_v27  ;;  %v3647_v36 = vpop.trf.xlu1  ;;  %v2488_v48 = vld [vmem:[%s11618_s4 + $0xd0] sm:$0xff] }
 0x264   :  { %v2716_v49 = vld [vmem:[#allocation2 + $0x270] sm:$0xff]  ;;  %2542 = vst.msk [vmem:[%s11618_s4 + $0x80] sm:$0xff] %vm97_vm0, %v2510_v12  ;;  %2207 = vst.msk [vmem:[#allocation3 + $0x88] sm:$0xff] %vm97_vm0, %v2051_v3  ;;  %v2511_v18 = vadd.f32 %v2479_v19, %v2051_v3  ;;  %v2796_v29 = vpack.c.bf16 %v2771_v15, %v2770_v2  ;;  %v2486_v19 = vld [vmem:[%s11618_s4 + $0xc0] sm:$0xff] }
 0x265   :  { %2545 = vst.msk [vmem:[%s11618_s4 + $0x98] sm:$0xff] %vm97_vm0, %v2513_v39  ;;  %v2489_v39 = vld [vmem:[%s11618_s4 + $0xd8] sm:$0xff] }
 0x266   :  { %v2717_v35 = vld [vmem:[#allocation2 + $0x278] sm:$0xff]  ;;  %2543 = vst.msk [vmem:[%s11618_s4 + $0x88] sm:$0xff] %vm97_vm0, %v2511_v18  ;;  %v5688_v31 = vpop.f32.mrb[148].mxu1  ;;  %3219 = vmatpush1.bf16.msra.mxu1 %v2796_v29  ;;  %v2487_v29 = vld [vmem:[%s11618_s4 + $0xc8] sm:$0xff] }
 0x267   :  { %v2757_v1 = vpack.c.bf16 %v2717_v35, %v2716_v49  ;;  %v2072_v50 = vadd.f32 %v5688_v31, %v9077_v43  ;;  %v2063_v16 = vpop.f32.mrb[149].mxu1  ;;  %3220 = vmatprep.subr.bf16.mxu1 %v11706_v56  ;;  %v3648_v15 = vpop.trf.xlu1 }
 0x268   :  { %v2064_v62 = vadd.f32 %v2063_v16, %v9027_v30  ;;  %v5689_v54 = vpop.f32.mrb[150].mxu1  ;;  %v2776_v12 = vld [vmem:[#allocation3 + $0x90] sm:$0xff]  ;;  %v3681_v35 = vpop.trf.xlu0 }
 0x269   :  { %5712 = vmatprep.subr.bf16.mxu0 %v2757_v1  ;;  %2212 = vst.msk [vmem:[#allocation3 + $0xb0] sm:$0xff] %vm97_vm0, %v2072_v50  ;;  %v2516_v43 = vadd.f32 %v2484_v9, %v2072_v50  ;;  %v2075_v21 = vadd.f32 %v5689_v54, %v9084_v25  ;;  %v2066_v11 = vpop.f32.mrb[151].mxu1  ;;  %v2774_v52 = vld [vmem:[#allocation3 + $0x80] sm:$0xff] }
 0x26a   :  { %5713 = vmatpush3.bf16.msra.mxu0 %v2757_v1  ;;  %2210 = vst.msk [vmem:[#allocation3 + $0xa0] sm:$0xff] %vm97_vm0, %v2064_v62  ;;  %v2514_v30 = vadd.f32 %v2482_v26, %v2064_v62  ;;  %v2067_v33 = vadd.f32 %v2066_v11, %v9034_v45  ;;  %3221 = vmatpush1.bf16.msra.mxu1 %v2797_v44  ;;  %v2777_v20 = vld [vmem:[#allocation3 + $0x98] sm:$0xff]  ;;  %v2492_v26 = vld [vmem:[%s11618_s4 + $0xf0] sm:$0xff]  ;;  %v2490_v54 = vld [vmem:[%s11618_s4 + $0xe0] sm:$0xff] }
 0x26b   :  { %2548 = vst.msk [vmem:[%s11618_s4 + $0xb0] sm:$0xff] %vm97_vm0, %v2516_v43  ;;  %2213 = vst.msk [vmem:[#allocation3 + $0xb8] sm:$0xff] %vm97_vm0, %v2075_v21  ;;  %v2517_v25 = vadd.f32 %v2485_v60, %v2075_v21  ;;  %3222 = vmatprep.subr.bf16.mxu1 %v11706_v56  ;;  %v2775_v10 = vld [vmem:[#allocation3 + $0x88] sm:$0xff]  ;;  %3977 = vmatmul.mubr.bf16.gmra.mrb[248].mxu0 %v3647_v36  ;;  %v2799_v2 = vpack.c.bf16 %v2777_v20, %v2776_v12  ;;  %v2493_v43 = vld [vmem:[%s11618_s4 + $0xf8] sm:$0xff]  ;;  %v3649_v11 = vpop.trf.xlu1 }
 0x26c   :  { %2546 = vst.msk [vmem:[%s11618_s4 + $0xa0] sm:$0xff] %vm97_vm0, %v2514_v30  ;;  %2211 = vst.msk [vmem:[#allocation3 + $0xa8] sm:$0xff] %vm97_vm0, %v2067_v33  ;;  %v2515_v45 = vadd.f32 %v2483_v40, %v2067_v33  ;;  %v2798_v5 = vpack.c.bf16 %v2775_v10, %v2774_v52  ;;  %3984 = vmatprep.mubr.bf16.mxu0 %v3680_v8  ;;  %v2491_v33 = vld [vmem:[%s11618_s4 + $0xe8] sm:$0xff] }
 0x26d   :  { %2549 = vst.msk [vmem:[%s11618_s4 + $0xb8] sm:$0xff] %vm97_vm0, %v2517_v25  ;;  %v3682_v25 = vpop.trf.xlu0 }
 0x26e   :  { %2547 = vst.msk [vmem:[%s11618_s4 + $0xa8] sm:$0xff] %vm97_vm0, %v2515_v45  ;;  %v5692_v7 = vpop.f32.mrb[152].mxu1  ;;  %3223 = vmatpush1.bf16.msra.mxu1 %v2798_v5 }
 0x26f   :  { %v2088_v46 = vadd.f32 %v5692_v7, %v9132_v57  ;;  %v2079_v47 = vpop.f32.mrb[153].mxu1  ;;  %3224 = vmatprep.subr.bf16.mxu1 %v11706_v56 }
 0x270   :  { %v2080_v3 = vadd.f32 %v2079_v47, %v9108_v58  ;;  %v5693_v38 = vpop.f32.mrb[154].mxu1  ;;  %v2780_v60 = vld [vmem:[#allocation3 + $0xb0] sm:$0xff]  ;;  %v3650_v47 = vpop.trf.xlu1 }
 0x271   :  { %2216 = vst.msk [vmem:[#allocation3 + $0xd0] sm:$0xff] %vm97_vm0, %v2088_v46  ;;  %v2520_v57 = vadd.f32 %v2488_v48, %v2088_v46  ;;  %v2091_v49 = vadd.f32 %v5693_v38, %v9138_v6  ;;  %v2082_v18 = vpop.f32.mrb[155].mxu1  ;;  %v2778_v31 = vld [vmem:[#allocation3 + $0xa0] sm:$0xff] }
 0x272   :  { %2214 = vst.msk [vmem:[#allocation3 + $0xc0] sm:$0xff] %vm97_vm0, %v2080_v3  ;;  %v2518_v58 = vadd.f32 %v2486_v19, %v2080_v3  ;;  %v2083_v14 = vadd.f32 %v2082_v18, %v9116_v59  ;;  %3225 = vmatpush1.bf16.msra.mxu1 %v2799_v2  ;;  %v2781_v50 = vld [vmem:[#allocation3 + $0xb8] sm:$0xff]  ;;  %v3683_v3 = vpop.trf.xlu0 }
 0x273   :  { %2552 = vst.msk [vmem:[%s11618_s4 + $0xd0] sm:$0xff] %vm97_vm0, %v2520_v57  ;;  %2217 = vst.msk [vmem:[#allocation3 + $0xd8] sm:$0xff] %vm97_vm0, %v2091_v49  ;;  %v2521_v6 = vadd.f32 %v2489_v39, %v2091_v49  ;;  %3226 = vmatprep.subr.bf16.mxu1 %v11706_v56  ;;  %v2779_v9 = vld [vmem:[#allocation3 + $0xa8] sm:$0xff]  ;;  %3985 = vmatmul.mubr.bf16.gmra.mrb[252].mxu0 %v3648_v15  ;;  %v2801_v21 = vpack.c.bf16 %v2781_v50, %v2780_v60 }
 0x274   :  { %2550 = vst.msk [vmem:[%s11618_s4 + $0xc0] sm:$0xff] %vm97_vm0, %v2518_v58  ;;  %2215 = vst.msk [vmem:[#allocation3 + $0xc8] sm:$0xff] %vm97_vm0, %v2083_v14  ;;  %v2519_v59 = vadd.f32 %v2487_v29, %v2083_v14  ;;  %v2800_v1 = vpack.c.bf16 %v2779_v9, %v2778_v31  ;;  %3992 = vmatprep.mubr.bf16.mxu0 %v3681_v35 }
 0x275   :  { %2553 = vst.msk [vmem:[%s11618_s4 + $0xd8] sm:$0xff] %vm97_vm0, %v2521_v6  ;;  %v3651_v6 = vpop.trf.xlu1 }
 0x276   :  { %2551 = vst.msk [vmem:[%s11618_s4 + $0xc8] sm:$0xff] %vm97_vm0, %v2519_v59  ;;  %v5696_v16 = vpop.f32.mrb[156].mxu1  ;;  %3227 = vmatpush1.bf16.msra.mxu1 %v2800_v1  ;;  %v3684_v14 = vpop.trf.xlu0 }
 0x277   :  { %v2104_v27 = vadd.f32 %v5696_v16, %v9176_v34  ;;  %v2095_v62 = vpop.f32.mrb[157].mxu1  ;;  %3228 = vmatprep.subr.bf16.mxu1 %v11706_v56 }
 0x278   :  { %v2096_v44 = vadd.f32 %v2095_v62, %v9154_v32  ;;  %v5697_v36 = vpop.f32.mrb[158].mxu1  ;;  %v2784_v20 = vld [vmem:[#allocation3 + $0xd0] sm:$0xff] }
 0x279   :  { %2220 = vst.msk [vmem:[#allocation3 + $0xf0] sm:$0xff] %vm97_vm0, %v2104_v27  ;;  %v2524_v34 = vadd.f32 %v2492_v26, %v2104_v27  ;;  %v2107_v40 = vadd.f32 %v5697_v36, %v9182_v53  ;;  %v2098_v30 = vpop.f32.mrb[159].mxu1  ;;  %v2782_v52 = vld [vmem:[#allocation3 + $0xc0] sm:$0xff] }
 0x27a   :  { %2218 = vst.msk [vmem:[#allocation3 + $0xe0] sm:$0xff] %vm97_vm0, %v2096_v44  ;;  %v2522_v32 = vadd.f32 %v2490_v54, %v2096_v44  ;;  %v2099_v8 = vadd.f32 %v2098_v30, %v9160_v4  ;;  %3229 = vmatpush1.bf16.msra.mxu1 %v2801_v21  ;;  %v2785_v5 = vld [vmem:[#allocation3 + $0xd8] sm:$0xff]  ;;  %v3685_v50 = vpop.trf.xlu0 }
 0x27b   :  { %2556 = vst.msk [vmem:[%s11618_s4 + $0xf0] sm:$0xff] %vm97_vm0, %v2524_v34  ;;  %2221 = vst.msk [vmem:[#allocation3 + $0xf8] sm:$0xff] %vm97_vm0, %v2107_v40  ;;  %v2525_v53 = vadd.f32 %v2493_v43, %v2107_v40  ;;  %3230 = vmatprep.subr.bf16.mxu1 %v11706_v56  ;;  %v2783_v10 = vld [vmem:[#allocation3 + $0xc8] sm:$0xff]  ;;  %3993 = vmatmul.mubr.bf16.gmra.mrb[0].mxu0 %v3649_v11  ;;  %v2803_v48 = vpack.c.bf16 %v2785_v5, %v2784_v20  ;;  %v11708_v34 = vld [vmem:[#allocation7_spill] sm:$0xff] }
 0x27c   :  { %2554 = vst.msk [vmem:[%s11618_s4 + $0xe0] sm:$0xff] %vm97_vm0, %v2522_v32  ;;  %2219 = vst.msk [vmem:[#allocation3 + $0xe8] sm:$0xff] %vm97_vm0, %v2099_v8  ;;  %v2523_v4 = vadd.f32 %v2491_v33, %v2099_v8  ;;  %v2802_v45 = vpack.c.bf16 %v2783_v10, %v2782_v52  ;;  %4000 = vmatprep.mubr.bf16.mxu0 %v3682_v25  ;;  %v11709_v40 = vld [vmem:[#allocation28_spill] sm:$0xff]  ;;  %v11710_v8 = vld [vmem:[#allocation27_spill] sm:$0xff] }
 0x27d   :  { %2557 = vst.msk [vmem:[%s11618_s4 + $0xf8] sm:$0xff] %vm97_vm0, %v2525_v53  ;;  %v5418_v7 = vpop.f32.mrb[160].mxu0  ;;  %v11711_v52 = vld [vmem:[#allocation34_spill] sm:$0xff]  ;;  %v11713_v5 = vld [vmem:[#allocation9_spill] sm:$0xff] }
 0x27e   :  { %2555 = vst.msk [vmem:[%s11618_s4 + $0xe8] sm:$0xff] %vm97_vm0, %v2523_v4  ;;  %3231 = vmatpush1.bf16.msra.mxu1 %v2802_v45  ;;  %v5419_v46 = vpop.f32.mrb[161].mxu0  ;;  %v3686_v26 = vpop.trf.xlu0  ;;  %v5970_v4 = vld [vmem:[%s11614_s0 + $0x30] ss:$8 sps:$4 sm:$0xff]   ;;  %v11712_v45 = vld [vmem:[#allocation33_spill] sm:$0xff] }
 0x27f   :  { %3232 = vmatprep.subr.bf16.mxu1 %v11706_v56  ;;  %v9559_v19 = vadd.f32 %v5419_v46, %v5418_v7  ;;  %v5421_v12 = vpop.f32.mrb[162].mxu0  ;;  %v11714_v20 = vld [vmem:[#allocation38_spill] sm:$0xff] }
 0x280   :  { %v5422_v38 = vpop.f32.mrb[163].mxu0  ;;  %v2788_v18 = vld [vmem:[#allocation3 + $0xf0] sm:$0xff] }
 0x281   :  { %v2786_v39 = vld [vmem:[#allocation3 + $0xe0] sm:$0xff]  ;;  %v9562_v15 = vadd.f32 %v5422_v38, %v5421_v12 }
 0x282   :  { %3233 = vmatpush1.bf16.msra.mxu1 %v2803_v48  ;;  %v2789_v49 = vld [vmem:[#allocation3 + $0xf8] sm:$0xff] }
 0x283   :  { %3234 = vmatprep.subr.bf16.mxu1 %v11706_v56  ;;  %v2787_v2 = vld [vmem:[#allocation3 + $0xe8] sm:$0xff]  ;;  %4001 = vmatmul.mubr.bf16.gmra.mrb[4].mxu0 %v3650_v47  ;;  %v2805_v58 = vpack.c.bf16 %v2789_v49, %v2788_v18  ;;  %v11716_v49 = vld [vmem:[#allocation11_spill] sm:$0xff] }
 0x284   :  { %v2804_v57 = vpack.c.bf16 %v2787_v2, %v2786_v39  ;;  %4008 = vmatprep.mubr.bf16.mxu0 %v3683_v3  ;;  %v11715_v3 = vld [vmem:[#allocation37_spill] sm:$0xff] }
 0x285   :  { %v5424_v29 = vpop.f32.mrb[164].mxu0  ;;  %v5971_v2 = vld [vmem:[%s11614_s0 + $0x40] ss:$8 sps:$4 sm:$0xff]  }
 0x286   :  { %3235 = vmatpush1.bf16.msra.mxu1 %v2804_v57  ;;  %v5425_v35 = vpop.f32.mrb[165].mxu0 }
 0x287   :  { %3236 = vmatprep.subr.bf16.mxu1 %v11706_v56  ;;  %v9565_v31 = vadd.f32 %v5425_v35, %v5424_v29  ;;  %v5427_v9 = vpop.f32.mrb[166].mxu0  ;;  %v5967_v56 = vld [vmem:[%s11614_s0] ss:$8 sps:$4 sm:$0xff]  }
 0x288   :  { %v5428_v59 = vpop.f32.mrb[167].mxu0 }
 0x289   :  { %v9568_v1 = vadd.f32 %v5428_v59, %v5427_v9  ;;  %v5972_v59 = vld [vmem:[%s11614_s0 + $0x50] ss:$8 sps:$4 sm:$0xff]  }
 0x28a   :  { %3237 = vmatpush1.bf16.msra.mxu1 %v2805_v58 }
 0x28b   :  { %5746 = vmatprep.subr.bf16.mxu1 %v7828_v41  ;;  %4009 = vmatmul.mubr.bf16.gmra.mrb[8].mxu0 %v3651_v6  ;;  %v3652_v41 = vpop.trf.xlu1 }
 0x28c   :  { %4016 = vmatprep.mubr.bf16.mxu0 %v3684_v14 }
 0x28d   :  { %3239 = vmatmul.mubr.bf16.vlgmr.msra.gmra.mrb[160].mxu1 %v5967_v56  ;;  %v5430_v16 = vpop.f32.mrb[168].mxu0 }
 0x28e   :  { %5754 = vmatpush3.bf16.msra.mxu1 %v7821_v13  ;;  %3246 = vmatprep.mubr.bf16.mxu1 %v7351_v63  ;;  %v5431_v27 = vpop.f32.mrb[169].mxu0  ;;  %v5968_v63 = vld [vmem:[%s11614_s0 + $0x10] ss:$8 sps:$4 sm:$0xff]   ;;  %v3695_v13 = vpop.trf.xlu0 }
 0x28f   :  { %5747 = vmatprep.subr.bf16.mxu1 %v7888_v22  ;;  %v9576_v62 = vadd.f32 %v5431_v27, %v5430_v16  ;;  %v5433_v54 = vpop.f32.mrb[170].mxu0  ;;  %v3653_v36 = vpop.trf.xlu1 }
 0x290   :  { %v5434_v60 = vpop.f32.mrb[171].mxu0 }
 0x291   :  { %v9580_v44 = vadd.f32 %v5434_v60, %v5433_v54 }
 0x292   :  { %5755 = vmatpush3.bf16.msra.mxu1 %v7879_v37 }
 0x293   :  { %5748 = vmatprep.subr.bf16.mxu1 %v7963_v55  ;;  %4017 = vmatmul.mubr.bf16.gmra.mrb[12].mxu0 %v3652_v41  ;;  %v3654_v33 = vpop.trf.xlu1 }
 0x294   :  { %4024 = vmatprep.mubr.bf16.mxu0 %v3685_v50  ;;  %v11717_v50 = vld [vmem:[#allocation13_spill] sm:$0xff] }
 0x295   :  { %3247 = vmatmul.mubr.bf16.gmra.mrb[164].mxu1 %v5968_v63  ;;  %v5436_v37 = vpop.f32.mrb[172].mxu0 }
 0x296   :  { %5756 = vmatpush3.bf16.msra.mxu1 %v7956_v61  ;;  %3254 = vmatprep.mubr.bf16.mxu1 %v7380_v17  ;;  %v5437_v22 = vpop.f32.mrb[173].mxu0  ;;  %v3696_v61 = vpop.trf.xlu0  ;;  %v5969_v17 = vld [vmem:[%s11614_s0 + $0x20] ss:$8 sps:$4 sm:$0xff]  }
 0x297   :  { %5749 = vmatprep.subr.bf16.mxu1 %v8056_v23  ;;  %v9588_v55 = vadd.f32 %v5437_v22, %v5436_v37  ;;  %v5439_v43 = vpop.f32.mrb[174].mxu0  ;;  %v11707_v23 = vld [vmem:[#allocation24_spill] sm:$0xff]  ;;  %v3711_v60 = vpop.trf.xlu1  ;;  %v11718_v37 = vld [vmem:[#allocation15_spill] sm:$0xff] }
 0x298   :  { %v5440_v21 = vpop.f32.mrb[175].mxu0 }
 0x299   :  { %v9592_v11 = vadd.f32 %v5440_v21, %v5439_v43 }
 0x29a   :  { %5757 = vmatpush3.bf16.msra.mxu1 %v8049_v24  ;;  %v3697_v25 = vpop.trf.xlu0 }
 0x29b   :  { %5750 = vmatprep.subr.bf16.mxu1 %v8152_v28  ;;  %4025 = vmatmul.mubr.bf16.gmra.mrb[16].mxu0 %v3653_v36  ;;  %v3712_v21 = vpop.trf.xlu1 }
 0x29c   :  { %4032 = vmatprep.mubr.bf16.mxu0 %v3686_v26 }
 0x29d   :  { %3255 = vmatmul.mubr.bf16.gmra.mrb[168].mxu1 %v5969_v17  ;;  %v5442_v24 = vpop.f32.mrb[176].mxu0 }
 0x29e   :  { %5758 = vmatpush3.bf16.msra.mxu1 %v11707_v23  ;;  %3262 = vmatprep.mubr.bf16.mxu1 %v11708_v34  ;;  %v5443_v30 = vpop.f32.mrb[177].mxu0  ;;  %v3698_v48 = vpop.trf.xlu0 }
 0x29f   :  { %5751 = vmatprep.subr.bf16.mxu1 %v11709_v40  ;;  %v9600_v28 = vadd.f32 %v5443_v30, %v5442_v24  ;;  %v5445_v32 = vpop.f32.mrb[178].mxu0  ;;  %v5974_v40 = vld [vmem:[%s11614_s0 + $0x70] ss:$8 sps:$4 sm:$0xff]   ;;  %v5975_v24 = vld [vmem:[%s11614_s0 + $0x84] ss:$8 sps:$4 sm:$0xff]   ;;  %v3713_v30 = vpop.trf.xlu1 }
 0x2a0   :  { %v5446_v53 = vpop.f32.mrb[179].mxu0 }
 0x2a1   :  { %v9604_v10 = vadd.f32 %v5446_v53, %v5445_v32 }
 0x2a2   :  { %5759 = vmatpush3.bf16.msra.mxu1 %v11710_v8  ;;  %v3699_v57 = vpop.trf.xlu0 }
 0x2a3   :  { %5752 = vmatprep.subr.bf16.mxu1 %v11711_v52  ;;  %4033 = vmatmul.mubr.bf16.gmra.mrb[20].mxu0 %v3654_v33 }
 0x2a4   :  { %5714 = vmatprep.mubr.bf16.mxu0 %v3695_v13  ;;  %v5973_v13 = vld [vmem:[%s11614_s0 + $0x60] ss:$8 sps:$4 sm:$0xff]  }
 0x2a5   :  { %3263 = vmatmul.mubr.bf16.gmra.mrb[172].mxu1 %v5970_v4  ;;  %v5448_v7 = vpop.f32.mrb[180].mxu0  ;;  %v5976_v4 = vld [vmem:[%s11614_s0 + $0x80] ss:$8 sps:$4 sm:$0xff]  }
 0x2a6   :  { %5760 = vmatpush3.bf16.msra.mxu1 %v11712_v45  ;;  %3270 = vmatprep.mubr.bf16.mxu1 %v11713_v5  ;;  %v5449_v46 = vpop.f32.mrb[181].mxu0  ;;  %v3700_v9 = vpop.trf.xlu0  ;;  %v11719_v5 = vld [vmem:[#allocation4_spill] sm:$0xff] }
 0x2a7   :  { %5753 = vmatprep.subr.bf16.mxu1 %v11714_v20  ;;  %v9612_v47 = vadd.f32 %v5449_v46, %v5448_v7  ;;  %v5451_v12 = vpop.f32.mrb[182].mxu0  ;;  %v3714_v45 = vpop.trf.xlu1 }
 0x2a8   :  { %v5452_v38 = vpop.f32.mrb[183].mxu0 }
 0x2a9   :  { %v9615_v39 = vadd.f32 %v5452_v38, %v5451_v12 }
 0x2aa   :  { %5761 = vmatpush3.bf16.msra.mxu1 %v11715_v3  ;;  %v3701_v41 = vpop.trf.xlu0 }
 0x2ab   :  { %5715 = vmatmul.mubr.bf16.vlgmr.msra.gmra.mrb[24].mxu0 %v3696_v61  ;;  %v3715_v3 = vpop.trf.xlu1 }
 0x2ac   :  { %5718 = vmatprep.mubr.bf16.mxu0 %v3697_v25 }
 0x2ad   :  { %3271 = vmatmul.mubr.bf16.gmra.mrb[176].mxu1 %v5971_v2  ;;  %v5454_v18 = vpop.f32.mrb[184].mxu0  ;;  %v5977_v2 = vld [vmem:[%s11614_s0 + $0x90] ss:$8 sps:$4 sm:$0xff]  }
 0x2ae   :  { %3278 = vmatprep.mubr.bf16.mxu1 %v11716_v49  ;;  %v5455_v29 = vpop.f32.mrb[185].mxu0  ;;  %v3702_v36 = vpop.trf.xlu0 }
 0x2af   :  { %v9621_v58 = vadd.f32 %v5455_v29, %v5454_v18  ;;  %v5457_v14 = vpop.f32.mrb[186].mxu0  ;;  %v3716_v29 = vpop.trf.xlu1 }
 0x2b0   :  { %v5458_v35 = vpop.f32.mrb[187].mxu0 }
 0x2b1   :  { %v9623_v6 = vadd.f32 %v5458_v35, %v5457_v14 }
 0x2b3   :  { %5719 = vmatmul.mubr.bf16.gmra.mrb[28].mxu0 %v3698_v48 }
 0x2b4   :  { %5722 = vmatprep.mubr.bf16.mxu0 %v3699_v57  ;;  %v11720_v57 = vld [vmem:[#allocation5_spill] sm:$0xff] }
 0x2b5   :  { %3279 = vmatmul.mubr.bf16.gmra.mrb[180].mxu1 %v5972_v59  ;;  %v5460_v56 = vpop.f32.mrb[188].mxu0 }
 0x2b6   :  { %3286 = vmatprep.mubr.bf16.mxu1 %v11717_v50  ;;  %v5461_v16 = vpop.f32.mrb[189].mxu0  ;;  %v5978_v50 = vld [vmem:[%s11614_s0 + $0xa0] ss:$8 sps:$4 sm:$0xff]  }
 0x2b7   :  { %v9629_v26 = vadd.f32 %v5461_v16, %v5460_v56  ;;  %v5463_v27 = vpop.f32.mrb[190].mxu0  ;;  %v11721_v56 = vld [vmem:[#allocation6_spill] sm:$0xff] }
 0x2b8   :  { %v5464_v54 = vpop.f32.mrb[191].mxu0 }
 0x2b9   :  { %v9631_v63 = vadd.f32 %v5464_v54, %v5463_v27 }
 0x2bb   :  { %5723 = vmatmul.mubr.bf16.gmra.mrb[32].mxu0 %v3700_v9 }
 0x2bc   :  { %5726 = vmatprep.mubr.bf16.mxu0 %v3701_v41 }
 0x2bd   :  { %3287 = vmatmul.mubr.bf16.gmra.mrb[184].mxu1 %v5973_v13  ;;  %v5466_v22 = vpop.f32.mrb[192].mxu0 }
 0x2be   :  { %3294 = vmatprep.mubr.bf16.mxu1 %v11718_v37  ;;  %v5467_v43 = vpop.f32.mrb[193].mxu0  ;;  %v5979_v37 = vld [vmem:[%s11614_s0 + $0xb0] ss:$8 sps:$4 sm:$0xff]  }
 0x2bf   :  { %v9637_v61 = vadd.f32 %v5467_v43, %v5466_v22  ;;  %v5469_v17 = vpop.f32.mrb[194].mxu0  ;;  %v11722_v22 = vld [vmem:[#allocation8_spill] sm:$0xff] }
 0x2c0   :  { %v5470_v23 = vpop.f32.mrb[195].mxu0 }
 0x2c1   :  { %v9639_v34 = vadd.f32 %v5470_v23, %v5469_v17 }
 0x2c3   :  { %5727 = vmatmul.mubr.bf16.gmra.mrb[36].mxu0 %v3702_v36 }
 0x2c4   :  { %5730 = vmatprep.mubr.bf16.mxu0 %v3711_v60 }
 0x2c5   :  { %3295 = vmatmul.mubr.bf16.gmra.mrb[188].mxu1 %v5974_v40  ;;  %v5472_v33 = vpop.f32.mrb[196].mxu0 }
 0x2c6   :  { %3302 = vmatprep.mubr.bf16.mxu1 %v5975_v24  ;;  %v5473_v32 = vpop.f32.mrb[197].mxu0  ;;  %v5980_v24 = vld [vmem:[%s11614_s0 + $0xc0] ss:$8 sps:$4 sm:$0xff]  }
 0x2c7   :  { %v9647_v8 = vadd.f32 %v5473_v32, %v5472_v33  ;;  %v5475_v25 = vpop.f32.mrb[198].mxu0  ;;  %v5981_v33 = vld [vmem:[%s11614_s0 + $0xd0] ss:$8 sps:$4 sm:$0xff]   ;;  %v11724_v32 = vld [vmem:[#allocation12_spill] sm:$0xff] }
 0x2c8   :  { %v5476_v53 = vpop.f32.mrb[199].mxu0 }
 0x2c9   :  { %v9649_v52 = vadd.f32 %v5476_v53, %v5475_v25  ;;  %v5982_v25 = vld [vmem:[%s11614_s0 + $0xe0] ss:$8 sps:$4 sm:$0xff]   ;;  %v11725_v53 = vld [vmem:[#allocation14_spill] sm:$0xff] }
 0x2cb   :  { %5731 = vmatmul.mubr.bf16.gmra.mrb[40].mxu0 %v3712_v21 }
 0x2cc   :  { %5734 = vmatprep.mubr.bf16.mxu0 %v3713_v30  ;;  %v11723_v30 = vld [vmem:[#allocation10_spill] sm:$0xff] }
 0x2cd   :  { %3303 = vmatmul.mubr.bf16.gmra.mrb[192].mxu1 %v5976_v4  ;;  %v5478_v20 = vpop.f32.mrb[200].mxu0 }
 0x2ce   :  { %3310 = vmatprep.mubr.bf16.mxu1 %v11719_v5  ;;  %v5479_v7 = vpop.f32.mrb[201].mxu0 }
 0x2cf   :  { %v9655_v48 = vadd.f32 %v5479_v7, %v5478_v20  ;;  %v5481_v46 = vpop.f32.mrb[202].mxu0 }
 0x2d0   :  { %v5482_v12 = vpop.f32.mrb[203].mxu0 }
 0x2d1   :  { %v9657_v38 = vadd.f32 %v5482_v12, %v5481_v46 }
 0x2d3   :  { %5735 = vmatmul.mubr.bf16.gmra.mrb[44].mxu0 %v3714_v45 }
 0x2d4   :  { %5738 = vmatprep.mubr.bf16.mxu0 %v3715_v3  ;;  %v5983_v3 = vld [vmem:[%s11614_s0 + $0xf0] ss:$8 sps:$4 sm:$0xff]  }
 0x2d5   :  { %3311 = vmatmul.mubr.bf16.gmra.mrb[196].mxu1 %v5977_v2  ;;  %v5484_v49 = vpop.f32.mrb[204].mxu0 }
 0x2d6   :  { %3318 = vmatprep.mubr.bf16.mxu1 %v11720_v57  ;;  %v5485_v18 = vpop.f32.mrb[205].mxu0  ;;  %v11726_v57 = vld [vmem:[#allocation17_spill] sm:$0xff] }
 0x2d7   :  { %v9663_v14 = vadd.f32 %v5485_v18, %v5484_v49  ;;  %v5487_v35 = vpop.f32.mrb[206].mxu0 }
 0x2d8   :  { %v5488_v9 = vpop.f32.mrb[207].mxu0 }
 0x2d9   :  { %v9665_v59 = vadd.f32 %v5488_v9, %v5487_v35 }
 0x2db   :  { %5739 = vmatmul.mubr.bf16.gmra.mrb[48].mxu0 %v3716_v29 }
 0x2dd   :  { %3319 = vmatmul.mubr.bf16.gmra.mrb[200].mxu1 %v5978_v50  ;;  %v5490_v16 = vpop.f32.mrb[208].mxu0 }
 0x2de   :  { %3326 = vmatprep.mubr.bf16.mxu1 %v11721_v56  ;;  %v5491_v27 = vpop.f32.mrb[209].mxu0 }
 0x2df   :  { %v9671_v41 = vadd.f32 %v5491_v27, %v5490_v16  ;;  %v5493_v54 = vpop.f32.mrb[210].mxu0 }
 0x2e0   :  { %v5494_v60 = vpop.f32.mrb[211].mxu0 }
 0x2e1   :  { %v9673_v13 = vadd.f32 %v5494_v60, %v5493_v54 }
 0x2e5   :  { %3327 = vmatmul.mubr.bf16.gmra.mrb[204].mxu1 %v5979_v37  ;;  %v5496_v36 = vpop.f32.mrb[212].mxu0 }
 0x2e6   :  { %3334 = vmatprep.mubr.bf16.mxu1 %v11722_v22  ;;  %v5497_v43 = vpop.f32.mrb[213].mxu0 }
 0x2e7   :  { %v9679_v21 = vadd.f32 %v5497_v43, %v5496_v36  ;;  %v5499_v17 = vpop.f32.mrb[214].mxu0 }
 0x2e8   :  { %v5500_v23 = vpop.f32.mrb[215].mxu0 }
 0x2e9   :  { %v9681_v40 = vadd.f32 %v5500_v23, %v5499_v17 }
 0x2ed   :  { %3335 = vmatmul.mubr.bf16.gmra.mrb[208].mxu1 %v5980_v24 }
 0x2ee   :  { %3342 = vmatprep.mubr.bf16.mxu1 %v11723_v30 }
 0x2f5   :  { %3343 = vmatmul.mubr.bf16.gmra.mrb[212].mxu1 %v5981_v33 }
 0x2f6   :  { %3350 = vmatprep.mubr.bf16.mxu1 %v11724_v32 }
 0x2fd   :  { %3351 = vmatmul.mubr.bf16.gmra.mrb[216].mxu1 %v5982_v25  ;;  %v5530_v4 = vpop.f32.mrb[216].mxu0 }
 0x2fe   :  { %3358 = vmatprep.mubr.bf16.mxu1 %v11725_v53  ;;  %v5531_v45 = vpop.f32.mrb[217].mxu0 }
 0x2ff   :  { %v5532_v5 = vadd.f32 %v5531_v45, %v5530_v4  ;;  %v5533_v20 = vpop.f32.mrb[218].mxu0 }
 0x300   :  { %v5534_v7 = vpop.f32.mrb[219].mxu0 }
 0x301   :  { %v5535_v46 = vadd.f32 %v5534_v7, %v5533_v20  ;;  %v9696_v12 = vadd.f32 %v5532_v5, %v9559_v19  ;;  %v5984_v19 = vld [vmem:[%s11614_s0 + $0x100] ss:$8 sps:$4 sm:$0xff]  }
 0x303   :  { %v9702_v2 = vadd.f32 %v5535_v46, %v9562_v15  ;;  %v11727_v15 = vld [vmem:[#allocation19_spill] sm:$0xff] }
 0x305   :  { %3359 = vmatmul.mubr.bf16.gmra.mrb[220].mxu1 %v5983_v3  ;;  %v5536_v49 = vpop.f32.mrb[220].mxu0 }
 0x306   :  { %3366 = vmatprep.mubr.bf16.mxu1 %v11726_v57  ;;  %v5537_v18 = vpop.f32.mrb[221].mxu0 }
 0x307   :  { %v5538_v29 = vadd.f32 %v5537_v18, %v5536_v49  ;;  %v5539_v35 = vpop.f32.mrb[222].mxu0 }
 0x308   :  { %v5540_v9 = vpop.f32.mrb[223].mxu0 }
 0x309   :  { %v5541_v50 = vadd.f32 %v5540_v9, %v5539_v35  ;;  %v9706_v56 = vadd.f32 %v5538_v29, %v9565_v31  ;;  %v5985_v31 = vld [vmem:[%s11614_s0 + $0x110] ss:$8 sps:$4 sm:$0xff]  }
 0x30b   :  { %v9712_v16 = vadd.f32 %v5541_v50, %v9568_v1  ;;  %v11728_v1 = vld [vmem:[#allocation21_spill] sm:$0xff] }
 0x30d   :  { %3367 = vmatmul.mubr.bf16.gmra.mrb[224].mxu1 %v5984_v19  ;;  %v5542_v27 = vpop.f32.mrb[224].mxu0 }
 0x30e   :  { %3374 = vmatprep.mubr.bf16.mxu1 %v11727_v15  ;;  %v5543_v54 = vpop.f32.mrb[225].mxu0 }
 0x30f   :  { %v5544_v60 = vadd.f32 %v5543_v54, %v5542_v27  ;;  %v5545_v37 = vpop.f32.mrb[226].mxu0 }
 0x310   :  { %v5546_v22 = vpop.f32.mrb[227].mxu0 }
 0x311   :  { %v5547_v36 = vadd.f32 %v5546_v22, %v5545_v37  ;;  %v9716_v43 = vadd.f32 %v5544_v60, %v9576_v62  ;;  %v5986_v62 = vld [vmem:[%s11614_s0 + $0x120] ss:$8 sps:$4 sm:$0xff]  }
 0x313   :  { %v9722_v17 = vadd.f32 %v5547_v36, %v9580_v44  ;;  %v11729_v44 = vld [vmem:[#allocation23_spill] sm:$0xff] }
 0x315   :  { %3375 = vmatmul.mubr.bf16.gmra.mrb[228].mxu1 %v5985_v31  ;;  %v5548_v23 = vpop.f32.mrb[228].mxu0 }
 0x316   :  { %3382 = vmatprep.mubr.bf16.mxu1 %v11728_v1  ;;  %v5549_v24 = vpop.f32.mrb[229].mxu0 }
 0x317   :  { %v5550_v30 = vadd.f32 %v5549_v24, %v5548_v23  ;;  %v5551_v33 = vpop.f32.mrb[230].mxu0 }
 0x318   :  { %v5552_v32 = vpop.f32.mrb[231].mxu0 }
 0x319   :  { %v5553_v25 = vadd.f32 %v5552_v32, %v5551_v33  ;;  %v9726_v53 = vadd.f32 %v5550_v30, %v9588_v55  ;;  %v5987_v55 = vld [vmem:[%s11614_s0 + $0x130] ss:$8 sps:$4 sm:$0xff]  }
 0x31b   :  { %v9732_v4 = vadd.f32 %v5553_v25, %v9592_v11  ;;  %v11730_v11 = vld [vmem:[#allocation26_spill] sm:$0xff] }
 0x31d   :  { %3383 = vmatmul.mubr.bf16.gmra.mrb[232].mxu1 %v5986_v62  ;;  %v5554_v45 = vpop.f32.mrb[232].mxu0 }
 0x31e   :  { %3390 = vmatprep.mubr.bf16.mxu1 %v11729_v44  ;;  %v5555_v5 = vpop.f32.mrb[233].mxu0 }
 0x31f   :  { %v5556_v20 = vadd.f32 %v5555_v5, %v5554_v45  ;;  %v5557_v7 = vpop.f32.mrb[234].mxu0 }
 0x320   :  { %v5558_v46 = vpop.f32.mrb[235].mxu0 }
 0x321   :  { %v5559_v3 = vadd.f32 %v5558_v46, %v5557_v7  ;;  %v9736_v57 = vadd.f32 %v5556_v20, %v9600_v28  ;;  %v5988_v28 = vld [vmem:[%s11614_s0 + $0x140] ss:$8 sps:$4 sm:$0xff]  }
 0x323   :  { %v9742_v49 = vadd.f32 %v5559_v3, %v9604_v10  ;;  %v11731_v10 = vld [vmem:[#allocation30_spill] sm:$0xff] }
 0x325   :  { %3391 = vmatmul.mubr.bf16.gmra.mrb[236].mxu1 %v5987_v55  ;;  %v5560_v18 = vpop.f32.mrb[236].mxu0 }
 0x326   :  { %3398 = vmatprep.mubr.bf16.mxu1 %v11730_v11  ;;  %v5561_v29 = vpop.f32.mrb[237].mxu0 }
 0x327   :  { %v5562_v35 = vadd.f32 %v5561_v29, %v5560_v18  ;;  %v5563_v9 = vpop.f32.mrb[238].mxu0 }
 0x328   :  { %v5564_v50 = vpop.f32.mrb[239].mxu0 }
 0x329   :  { %v5565_v19 = vadd.f32 %v5564_v50, %v5563_v9  ;;  %v9746_v15 = vadd.f32 %v5562_v35, %v9612_v47  ;;  %v5989_v47 = vld [vmem:[%s11614_s0 + $0x150] ss:$8 sps:$4 sm:$0xff]  }
 0x32b   :  { %v9752_v27 = vadd.f32 %v5565_v19, %v9615_v39  ;;  %v11732_v39 = vld [vmem:[#allocation32_spill] sm:$0xff] }
 0x32d   :  { %3399 = vmatmul.mubr.bf16.gmra.mrb[240].mxu1 %v5988_v28  ;;  %v5566_v54 = vpop.f32.mrb[240].mxu0 }
 0x32e   :  { %3406 = vmatprep.mubr.bf16.mxu1 %v11731_v10  ;;  %v5567_v60 = vpop.f32.mrb[241].mxu0 }
 0x32f   :  { %v5568_v37 = vadd.f32 %v5567_v60, %v5566_v54  ;;  %v5569_v22 = vpop.f32.mrb[242].mxu0 }
 0x330   :  { %v5570_v36 = vpop.f32.mrb[243].mxu0 }
 0x331   :  { %v5571_v31 = vadd.f32 %v5570_v36, %v5569_v22  ;;  %v9756_v1 = vadd.f32 %v5568_v37, %v9621_v58  ;;  %v5990_v58 = vld [vmem:[%s11614_s0 + $0x160] ss:$8 sps:$4 sm:$0xff]  }
 0x333   :  { %v9762_v23 = vadd.f32 %v5571_v31, %v9623_v6  ;;  %v11733_v6 = vld [vmem:[#allocation36_spill] sm:$0xff]  ;;  %v3717_v31 = vpop.trf.xlu1 }
 0x334   :  { %5742 = vmatprep.mubr.bf16.mxu0 %v3717_v31 }
 0x335   :  { %3407 = vmatmul.mubr.bf16.gmra.mrb[244].mxu1 %v5989_v47  ;;  %v5572_v24 = vpop.f32.mrb[244].mxu0 }
 0x336   :  { %3414 = vmatprep.mubr.bf16.mxu1 %v11732_v39  ;;  %v5573_v30 = vpop.f32.mrb[245].mxu0 }
 0x337   :  { %v5574_v33 = vadd.f32 %v5573_v30, %v5572_v24  ;;  %v5575_v32 = vpop.f32.mrb[246].mxu0  ;;  %v5993_v24 = vld [vmem:[%s11614_s0 + $0x190] ss:$8 sps:$4 sm:$0xff]   ;;  %v3718_v30 = vpop.trf.xlu1 }
 0x338   :  { %v5576_v25 = vpop.f32.mrb[247].mxu0  ;;  %5743 = vmatmul.mubr.bf16.gmra.mrb[52].mxu0 %v3718_v30 }
 0x339   :  { %v5577_v62 = vadd.f32 %v5576_v25, %v5575_v32  ;;  %v9766_v44 = vadd.f32 %v5574_v33, %v9629_v26  ;;  %v5991_v26 = vld [vmem:[%s11614_s0 + $0x170] ss:$8 sps:$4 sm:$0xff]   ;;  %v11736_v33 = vld [vmem:[#allocation20_spill] sm:$0xff] }
 0x33b   :  { %v9772_v45 = vadd.f32 %v5577_v62, %v9631_v63  ;;  %v11734_v63 = vld [vmem:[#allocation16_spill] sm:$0xff] }
 0x33d   :  { %3415 = vmatmul.mubr.bf16.gmra.mrb[248].mxu1 %v5990_v58 }
 0x33e   :  { %3422 = vmatprep.mubr.bf16.mxu1 %v11733_v6  ;;  %v5578_v5 = vpop.f32.mrb[248].mxu0 }
 0x33f   :  { %v5579_v20 = vpop.f32.mrb[249].mxu0 }
 0x340   :  { %v5580_v7 = vadd.f32 %v5579_v20, %v5578_v5  ;;  %v5581_v46 = vpop.f32.mrb[250].mxu0  ;;  %v5994_v20 = vld [vmem:[%s11614_s0 + $0x1a0] ss:$8 sps:$4 sm:$0xff]  }
 0x341   :  { %v5582_v3 = vpop.f32.mrb[251].mxu0 }
 0x342   :  { %v5583_v55 = vadd.f32 %v5582_v3, %v5581_v46  ;;  %v9776_v11 = vadd.f32 %v5580_v7, %v9637_v61  ;;  %v5992_v61 = vld [vmem:[%s11614_s0 + $0x180] ss:$8 sps:$4 sm:$0xff]   ;;  %v11737_v7 = vld [vmem:[#allocation22_spill] sm:$0xff] }
 0x344   :  { %v9782_v18 = vadd.f32 %v5583_v55, %v9639_v34  ;;  %v11735_v34 = vld [vmem:[#allocation18_spill] sm:$0xff]  ;;  %v4314_v55 = vld [vmem:[%s11617_s3] sm:$0xff] }
 0x345   :  { %3423 = vmatmul.mubr.bf16.gmra.mrb[252].mxu1 %v5991_v26 }
 0x346   :  { %3430 = vmatprep.mubr.bf16.mxu1 %v11734_v63  ;;  %v5584_v29 = vpop.f32.mrb[252].mxu0 }
 0x347   :  { %v5585_v35 = vpop.f32.mrb[253].mxu0 }
 0x348   :  { %v5586_v9 = vadd.f32 %v5585_v35, %v5584_v29  ;;  %v5587_v50 = vpop.f32.mrb[254].mxu0 }
 0x349   :  { %v5588_v19 = vpop.f32.mrb[255].mxu0 }
 0x34a   :  { %v5589_v28 = vadd.f32 %v5588_v19, %v5587_v50  ;;  %v9786_v10 = vadd.f32 %v5586_v9, %v9647_v8 }
 0x34c   :  { %v9792_v54 = vadd.f32 %v5589_v28, %v9649_v52 }
 0x34d   :  { %3431 = vmatmul.mubr.bf16.gmra.mrb[0].mxu1 %v5992_v61 }
 0x34e   :  { %3438 = vmatprep.mubr.bf16.mxu1 %v11735_v34  ;;  %v5590_v60 = vpop.f32.mrb[0].mxu0 }
 0x34f   :  { %v5591_v37 = vpop.f32.mrb[1].mxu0 }
 0x350   :  { %v5592_v22 = vadd.f32 %v5591_v37, %v5590_v60  ;;  %v5593_v36 = vpop.f32.mrb[2].mxu0  ;;  %v5995_v60 = vld [vmem:[%s11614_s0 + $0x1b0] ss:$8 sps:$4 sm:$0xff]  }
 0x351   :  { %v5594_v47 = vpop.f32.mrb[3].mxu0 }
 0x352   :  { %v5595_v39 = vadd.f32 %v5594_v47, %v5593_v36  ;;  %v9796_v8 = vadd.f32 %v5592_v22, %v9655_v48  ;;  %v11738_v22 = vld [vmem:[#allocation25_spill] sm:$0xff] }
 0x354   :  { %v9802_v52 = vadd.f32 %v5595_v39, %v9657_v38 }
 0x355   :  { %3439 = vmatmul.mubr.bf16.gmra.mrb[4].mxu1 %v5993_v24 }
 0x356   :  { %3446 = vmatprep.mubr.bf16.mxu1 %v11736_v33  ;;  %v5596_v32 = vpop.f32.mrb[4].mxu0 }
 0x357   :  { %v5597_v25 = vpop.f32.mrb[5].mxu0 }
 0x358   :  { %v5598_v62 = vadd.f32 %v5597_v25, %v5596_v32  ;;  %v5599_v58 = vpop.f32.mrb[6].mxu0  ;;  %v4317_v25 = vld [vmem:[%s11617_s3 + $0x18] sm:$0xff] }
 0x359   :  { %v5600_v6 = vpop.f32.mrb[7].mxu0 }
 0x35a   :  { %v5601_v5 = vadd.f32 %v5600_v6, %v5599_v58  ;;  %v9806_v48 = vadd.f32 %v5598_v62, %v9663_v14 }
 0x35c   :  { %v9812_v38 = vadd.f32 %v5601_v5, %v9665_v59  ;;  %v4315_v59 = vld [vmem:[%s11617_s3 + $0x8] sm:$0xff] }
 0x35d   :  { %3447 = vmatmul.mubr.bf16.gmra.mrb[8].mxu1 %v5994_v20 }
 0x35e   :  { %3454 = vmatprep.mubr.bf16.mxu1 %v11737_v7  ;;  %v5602_v46 = vpop.f32.mrb[8].mxu0 }
 0x35f   :  { %v5603_v26 = vpop.f32.mrb[9].mxu0 }
 0x360   :  { %v3240_v3 = vpop.f32.mrb[160].mxu1  ;;  %v5604_v29 = vadd.f32 %v5603_v26, %v5602_v46  ;;  %v5605_v35 = vpop.f32.mrb[10].mxu0  ;;  %v11739_v26 = vld [vmem:[#allocation29_spill] sm:$0xff] }
 0x361   :  { %4202 = vst.msk [vmem:[#allocation2] sm:$0xff] %vm97_vm0, %v3240_v3  ;;  %v4394_v14 = vadd.f32 %v4314_v55, %v3240_v3  ;;  %v3242_v63 = vpop.f32.mrb[161].mxu1  ;;  %v5606_v50 = vpop.f32.mrb[11].mxu0 }
 0x362   :  { %v3243_v9 = vpop.f32.mrb[162].mxu1  ;;  %v5607_v61 = vadd.f32 %v5606_v50, %v5605_v35  ;;  %v9828_v34 = vadd.f32 %v5604_v29, %v9671_v41  ;;  %v4316_v41 = vld [vmem:[%s11617_s3 + $0x10] sm:$0xff]  ;;  %v4318_v29 = vld [vmem:[%s11617_s3 + $0x20] sm:$0xff] }
 0x363   :  { %4474 = vst.msk [vmem:[%s11617_s3] sm:$0xff] %vm97_vm0, %v4394_v14  ;;  %4203 = vst.msk [vmem:[#allocation2 + $0x8] sm:$0xff] %vm97_vm0, %v3243_v9  ;;  %v4395_v19 = vadd.f32 %v4315_v59, %v3243_v9  ;;  %v3245_v28 = vpop.f32.mrb[163].mxu1 }
 0x364   :  { %v9838_v37 = vadd.f32 %v5607_v61, %v9673_v13  ;;  %v4319_v61 = vld [vmem:[%s11617_s3 + $0x28] sm:$0xff] }
 0x365   :  { %4475 = vst.msk [vmem:[%s11617_s3 + $0x8] sm:$0xff] %vm97_vm0, %v4395_v19  ;;  %3455 = vmatmul.mubr.bf16.gmra.mrb[12].mxu1 %v5995_v60 }
 0x366   :  { %3462 = vmatprep.mubr.bf16.mxu1 %v11738_v22  ;;  %v5608_v36 = vpop.f32.mrb[12].mxu0 }
 0x367   :  { %v5609_v47 = vpop.f32.mrb[13].mxu0 }
 0x368   :  { %v3248_v31 = vpop.f32.mrb[164].mxu1  ;;  %v5610_v30 = vadd.f32 %v5609_v47, %v5608_v36  ;;  %v5611_v33 = vpop.f32.mrb[14].mxu0 }
 0x369   :  { %4204 = vst.msk [vmem:[#allocation2 + $0x10] sm:$0xff] %vm97_vm0, %v3248_v31  ;;  %v4396_v39 = vadd.f32 %v4316_v41, %v3248_v31  ;;  %v3250_v24 = vpop.f32.mrb[165].mxu1  ;;  %v5612_v62 = vpop.f32.mrb[15].mxu0 }
 0x36a   :  { %v4650_v13 = vld [vmem:[%s11617_s3] sm:$0xff]  ;;  %v3251_v32 = vpop.f32.mrb[166].mxu1  ;;  %v5613_v20 = vadd.f32 %v5612_v62, %v5611_v33  ;;  %v9857_v7 = vadd.f32 %v5610_v30, %v9679_v21  ;;  %v5997_v24 = vld [vmem:[%s11614_s0 + $0x1d0] ss:$8 sps:$4 sm:$0xff]  }
 0x36b   :  { %v4730_v58 = vmul.f32 0.33333334, %v4650_v13  ;;  %4476 = vst.msk [vmem:[%s11617_s3 + $0x10] sm:$0xff] %vm97_vm0, %v4396_v39  ;;  %4205 = vst.msk [vmem:[#allocation2 + $0x18] sm:$0xff] %vm97_vm0, %v3251_v32  ;;  %v4397_v6 = vadd.f32 %v4317_v25, %v3251_v32  ;;  %v3253_v5 = vpop.f32.mrb[167].mxu1  ;;  %v11740_v30 = vld [vmem:[#allocation31_spill] sm:$0xff] }
 0x36c   :  { %v4651_v46 = vld [vmem:[%s11617_s3 + $0x8] sm:$0xff]  ;;  %v9874_v55 = vadd.f32 %v5613_v20, %v9681_v40  ;;  %v4320_v25 = vld [vmem:[%s11617_s3 + $0x30] sm:$0xff] }
 0x36d   :  { %4810 = vst.msk [vmem:[%s11617_s3] sm:$0xff] %vm97_vm0, %v4730_v58  ;;  %v4731_v3 = vmul.f32 0.33333334, %v4651_v46  ;;  %4477 = vst.msk [vmem:[%s11617_s3 + $0x18] sm:$0xff] %vm97_vm0, %v4397_v6  ;;  %v5996_v21 = vld [vmem:[%s11614_s0 + $0x1c0] ss:$8 sps:$4 sm:$0xff]  }
 0x36e   :  { %3463 = vmatmul.mubr.bf16.gmra.mrb[16].mxu1 %v5996_v21  ;;  %v5614_v14 = vpop.f32.mrb[16].mxu0  ;;  %v4321_v21 = vld [vmem:[%s11617_s3 + $0x38] sm:$0xff] }
 0x36f   :  { %3470 = vmatprep.mubr.bf16.mxu1 %v11739_v26  ;;  %4811 = vst.msk [vmem:[%s11617_s3 + $0x8] sm:$0xff] %vm97_vm0, %v4731_v3  ;;  %v5615_v35 = vpop.f32.mrb[17].mxu0 }
 0x370   :  { %v3256_v63 = vpop.f32.mrb[168].mxu1  ;;  %v9885_v40 = vadd.f32 %v5615_v35, %v5614_v14  ;;  %v5617_v50 = vpop.f32.mrb[18].mxu0 }
 0x371   :  { %4206 = vst.msk [vmem:[#allocation2 + $0x20] sm:$0xff] %vm97_vm0, %v3256_v63  ;;  %v4398_v9 = vadd.f32 %v4318_v29, %v3256_v63  ;;  %v3258_v59 = vpop.f32.mrb[169].mxu1  ;;  %v5618_v60 = vpop.f32.mrb[19].mxu0 }
 0x372   :  { %v4652_v19 = vld [vmem:[%s11617_s3 + $0x10] sm:$0xff]  ;;  %v3259_v28 = vpop.f32.mrb[170].mxu1  ;;  %v9898_v41 = vadd.f32 %v5618_v60, %v5617_v50  ;;  %v5998_v59 = vld [vmem:[%s11614_s0 + $0x1e0] ss:$8 sps:$4 sm:$0xff]   ;;  %v11741_v50 = vld [vmem:[#allocation35_spill] sm:$0xff] }
 0x373   :  { %v4732_v22 = vmul.f32 0.33333334, %v4652_v19  ;;  %4478 = vst.msk [vmem:[%s11617_s3 + $0x20] sm:$0xff] %vm97_vm0, %v4398_v9  ;;  %4207 = vst.msk [vmem:[#allocation2 + $0x28] sm:$0xff] %vm97_vm0, %v3259_v28  ;;  %v4399_v36 = vadd.f32 %v4319_v61, %v3259_v28  ;;  %v3261_v31 = vpop.f32.mrb[171].mxu1 }
 0x374   :  { %v4653_v47 = vld [vmem:[%s11617_s3 + $0x18] sm:$0xff] }
 0x375   :  { %4812 = vst.msk [vmem:[%s11617_s3 + $0x10] sm:$0xff] %vm97_vm0, %v4732_v22  ;;  %v4733_v39 = vmul.f32 0.33333334, %v4653_v47  ;;  %4479 = vst.msk [vmem:[%s11617_s3 + $0x28] sm:$0xff] %vm97_vm0, %v4399_v36  ;;  %v4322_v22 = vld [vmem:[%s11617_s3 + $0x40] sm:$0xff]  ;;  %v4556_v36 = vld [vmem:[%s11618_s4 + $0x10] sm:$0xff] }
 0x376   :  { %3471 = vmatmul.mubr.bf16.gmra.mrb[20].mxu1 %v5997_v24  ;;  %v5620_v33 = vpop.f32.mrb[20].mxu0 }
 0x377   :  { %3478 = vmatprep.mubr.bf16.mxu1 %v11740_v30  ;;  %4813 = vst.msk [vmem:[%s11617_s3 + $0x18] sm:$0xff] %vm97_vm0, %v4733_v39  ;;  %v5621_v13 = vpop.f32.mrb[21].mxu0 }
 0x378   :  { %v3264_v32 = vpop.f32.mrb[172].mxu1  ;;  %v9922_v62 = vadd.f32 %v5621_v13, %v5620_v33  ;;  %v5623_v58 = vpop.f32.mrb[22].mxu0  ;;  %v4554_v33 = vld [vmem:[%s11618_s4] sm:$0xff] }
 0x379   :  { %4208 = vst.msk [vmem:[#allocation2 + $0x30] sm:$0xff] %vm97_vm0, %v3264_v32  ;;  %v4400_v6 = vadd.f32 %v4320_v25, %v3264_v32  ;;  %v3266_v5 = vpop.f32.mrb[173].mxu1  ;;  %v5624_v46 = vpop.f32.mrb[23].mxu0  ;;  %v4323_v25 = vld [vmem:[%s11617_s3 + $0x48] sm:$0xff] }
 0x37a   :  { %v4654_v20 = vld [vmem:[%s11617_s3 + $0x20] sm:$0xff]  ;;  %v3267_v3 = vpop.f32.mrb[174].mxu1  ;;  %v9935_v14 = vadd.f32 %v5624_v46, %v5623_v58  ;;  %v4557_v5 = vld [vmem:[%s11618_s4 + $0x18] sm:$0xff] }
 0x37b   :  { %v4734_v26 = vmul.f32 0.33333334, %v4654_v20  ;;  %4480 = vst.msk [vmem:[%s11617_s3 + $0x30] sm:$0xff] %vm97_vm0, %v4400_v6  ;;  %4209 = vst.msk [vmem:[#allocation2 + $0x38] sm:$0xff] %vm97_vm0, %v3267_v3  ;;  %v4401_v63 = vadd.f32 %v4321_v21, %v3267_v3  ;;  %v3269_v29 = vpop.f32.mrb[175].mxu1  ;;  %v4555_v21 = vld [vmem:[%s11618_s4 + $0x8] sm:$0xff] }
 0x37c   :  { %v4655_v35 = vld [vmem:[%s11617_s3 + $0x28] sm:$0xff]  ;;  %v5999_v29 = vld [vmem:[%s11614_s0 + $0x1f0] ss:$8 sps:$4 sm:$0xff]  }
 0x37d   :  { %4814 = vst.msk [vmem:[%s11617_s3 + $0x20] sm:$0xff] %vm97_vm0, %v4734_v26  ;;  %v4735_v9 = vmul.f32 0.33333334, %v4655_v35  ;;  %4481 = vst.msk [vmem:[%s11617_s3 + $0x38] sm:$0xff] %vm97_vm0, %v4401_v63  ;;  %v11742_v35 = vld [vmem:[#allocation39_spill] sm:$0xff] }
 0x37e   :  { %3479 = vmatmul.mubr.bf16.gmra.mrb[24].mxu1 %v5998_v59  ;;  %v5716_v19 = vpop.f32.mrb[24].mxu0 }
 0x37f   :  { %3486 = vmatprep.mubr.bf16.mxu1 %v11741_v50  ;;  %4815 = vst.msk [vmem:[%s11617_s3 + $0x28] sm:$0xff] %vm97_vm0, %v4735_v9  ;;  %v4084_v28 = vadd.f32 %v5716_v19, %v9706_v56  ;;  %v4075_v61 = vpop.f32.mrb[25].mxu0 }
 0x380   :  { %v3272_v60 = vpop.f32.mrb[176].mxu1  ;;  %v4076_v31 = vadd.f32 %v4075_v61, %v9696_v12  ;;  %v5717_v47 = vpop.f32.mrb[26].mxu0  ;;  %v4560_v61 = vld [vmem:[%s11618_s4 + $0x30] sm:$0xff] }
 0x381   :  { %4210 = vst.msk [vmem:[#allocation2 + $0x40] sm:$0xff] %vm97_vm0, %v3272_v60  ;;  %v4402_v39 = vadd.f32 %v4322_v22, %v3272_v60  ;;  %v3274_v24 = vpop.f32.mrb[177].mxu1  ;;  %4284 = vst.msk [vmem:[#allocation3 + $0x10] sm:$0xff] %vm97_vm0, %v4084_v28  ;;  %v4588_v30 = vadd.f32 %v4556_v36, %v4084_v28  ;;  %v4087_v13 = vadd.f32 %v5717_v47, %v9712_v16  ;;  %v4078_v32 = vpop.f32.mrb[27].mxu0  ;;  %v4324_v28 = vld [vmem:[%s11617_s3 + $0x50] sm:$0xff] }
 0x382   :  { %v4656_v56 = vld [vmem:[%s11617_s3 + $0x30] sm:$0xff]  ;;  %v3275_v12 = vpop.f32.mrb[178].mxu1  ;;  %4282 = vst.msk [vmem:[#allocation3] sm:$0xff] %vm97_vm0, %v4076_v31  ;;  %v4586_v6 = vadd.f32 %v4554_v33, %v4076_v31  ;;  %v4079_v20 = vadd.f32 %v4078_v32, %v9702_v2 }
 0x383   :  { %v4736_v58 = vmul.f32 0.33333334, %v4656_v56  ;;  %4482 = vst.msk [vmem:[%s11617_s3 + $0x40] sm:$0xff] %vm97_vm0, %v4402_v39  ;;  %4211 = vst.msk [vmem:[#allocation2 + $0x48] sm:$0xff] %vm97_vm0, %v3275_v12  ;;  %v4403_v16 = vadd.f32 %v4323_v25, %v3275_v12  ;;  %v3277_v46 = vpop.f32.mrb[179].mxu1  ;;  %v4589_v2 = vadd.f32 %v4557_v5, %v4087_v13  ;;  %v4558_v39 = vld [vmem:[%s11618_s4 + $0x20] sm:$0xff] }
 0x384   :  { %4620 = vst.msk [vmem:[%s11618_s4 + $0x10] sm:$0xff] %vm97_vm0, %v4588_v30  ;;  %v4657_v3 = vld [vmem:[%s11617_s3 + $0x38] sm:$0xff]  ;;  %4285 = vst.msk [vmem:[#allocation3 + $0x18] sm:$0xff] %vm97_vm0, %v4087_v13  ;;  %v4587_v63 = vadd.f32 %v4555_v21, %v4079_v20 }
 0x385   :  { %4816 = vst.msk [vmem:[%s11617_s3 + $0x30] sm:$0xff] %vm97_vm0, %v4736_v58  ;;  %v4737_v26 = vmul.f32 0.33333334, %v4657_v3  ;;  %4618 = vst.msk [vmem:[%s11618_s4] sm:$0xff] %vm97_vm0, %v4586_v6  ;;  %v4325_v30 = vld [vmem:[%s11617_s3 + $0x58] sm:$0xff] }
 0x386   :  { %4283 = vst.msk [vmem:[#allocation3 + $0x8] sm:$0xff] %vm97_vm0, %v4079_v20  ;;  %4483 = vst.msk [vmem:[%s11617_s3 + $0x48] sm:$0xff] %vm97_vm0, %v4403_v16  ;;  %3487 = vmatmul.mubr.bf16.gmra.mrb[28].mxu1 %v5999_v29  ;;  %v5720_v9 = vpop.f32.mrb[28].mxu0  ;;  %v4561_v12 = vld [vmem:[%s11618_s4 + $0x38] sm:$0xff]  ;;  %v4559_v16 = vld [vmem:[%s11618_s4 + $0x28] sm:$0xff] }
 0x387   :  { %4621 = vst.msk [vmem:[%s11618_s4 + $0x18] sm:$0xff] %vm97_vm0, %v4589_v2  ;;  %3494 = vmatprep.mubr.bf16.mxu1 %v11742_v35  ;;  %4817 = vst.msk [vmem:[%s11617_s3 + $0x38] sm:$0xff] %vm97_vm0, %v4737_v26  ;;  %v4100_v59 = vadd.f32 %v5720_v9, %v9726_v53  ;;  %v4091_v50 = vpop.f32.mrb[29].mxu0  ;;  %v6000_v26 = vld [vmem:[%s11614_s0 + $0x200] ss:$8 sps:$4 sm:$0xff]  }
 0x388   :  { %4619 = vst.msk [vmem:[%s11618_s4 + $0x8] sm:$0xff] %vm97_vm0, %v4587_v63  ;;  %v3280_v19 = vpop.f32.mrb[180].mxu1  ;;  %v4092_v60 = vadd.f32 %v4091_v50, %v9716_v43  ;;  %v5721_v22 = vpop.f32.mrb[30].mxu0  ;;  %v11743_v35 = vld [vmem:[#allocation40_spill] sm:$0xff] }
 0x389   :  { %4212 = vst.msk [vmem:[#allocation2 + $0x50] sm:$0xff] %vm97_vm0, %v3280_v19  ;;  %v4404_v36 = vadd.f32 %v4324_v28, %v3280_v19  ;;  %v3282_v31 = vpop.f32.mrb[181].mxu1  ;;  %4288 = vst.msk [vmem:[#allocation3 + $0x30] sm:$0xff] %vm97_vm0, %v4100_v59  ;;  %v4592_v47 = vadd.f32 %v4560_v61, %v4100_v59  ;;  %v4103_v24 = vadd.f32 %v5721_v22, %v9732_v4  ;;  %v4094_v56 = vpop.f32.mrb[31].mxu0  ;;  %v4326_v61 = vld [vmem:[%s11617_s3 + $0x60] sm:$0xff] }
 0x38a   :  { %v4658_v53 = vld [vmem:[%s11617_s3 + $0x40] sm:$0xff]  ;;  %v3283_v43 = vpop.f32.mrb[182].mxu1  ;;  %4286 = vst.msk [vmem:[#allocation3 + $0x20] sm:$0xff] %vm97_vm0, %v4092_v60  ;;  %v4590_v32 = vadd.f32 %v4558_v39, %v4092_v60  ;;  %v4095_v4 = vadd.f32 %v4094_v56, %v9722_v17  ;;  %v4564_v60 = vld [vmem:[%s11618_s4 + $0x50] sm:$0xff] }
 0x38b   :  { %v4892_v33 = vld [vmem:[%s11618_s4 + $0x10] sm:$0xff]  ;;  %v4738_v13 = vmul.f32 0.33333334, %v4658_v53  ;;  %4484 = vst.msk [vmem:[%s11617_s3 + $0x50] sm:$0xff] %vm97_vm0, %v4404_v36  ;;  %4213 = vst.msk [vmem:[#allocation2 + $0x58] sm:$0xff] %vm97_vm0, %v3283_v43  ;;  %v4405_v25 = vadd.f32 %v4325_v30, %v3283_v43  ;;  %v3285_v58 = vpop.f32.mrb[183].mxu1  ;;  %v4593_v20 = vadd.f32 %v4561_v12, %v4103_v24 }
 0x38c   :  { %v4924_v6 = vmul.f32 0.33333334, %v4892_v33  ;;  %v4890_v5 = vld [vmem:[%s11618_s4] sm:$0xff]  ;;  %4624 = vst.msk [vmem:[%s11618_s4 + $0x30] sm:$0xff] %vm97_vm0, %v4592_v47  ;;  %4289 = vst.msk [vmem:[#allocation3 + $0x38] sm:$0xff] %vm97_vm0, %v4103_v24  ;;  %v4591_v21 = vadd.f32 %v4559_v16, %v4095_v4  ;;  %v4327_v43 = vld [vmem:[%s11617_s3 + $0x68] sm:$0xff] }
 0x38d   :  { %v4659_v17 = vld [vmem:[%s11617_s3 + $0x48] sm:$0xff]  ;;  %v4922_v46 = vmul.f32 0.33333334, %v4890_v5  ;;  %4818 = vst.msk [vmem:[%s11617_s3 + $0x40] sm:$0xff] %vm97_vm0, %v4738_v13  ;;  %4622 = vst.msk [vmem:[%s11618_s4 + $0x20] sm:$0xff] %vm97_vm0, %v4590_v32  ;;  %v4562_v39 = vld [vmem:[%s11618_s4 + $0x40] sm:$0xff] }
 0x38e   :  { %v4893_v3 = vld [vmem:[%s11618_s4 + $0x18] sm:$0xff]  ;;  %v4739_v2 = vmul.f32 0.33333334, %v4659_v17  ;;  %4287 = vst.msk [vmem:[#allocation3 + $0x28] sm:$0xff] %vm97_vm0, %v4095_v4  ;;  %4485 = vst.msk [vmem:[%s11617_s3 + $0x58] sm:$0xff] %vm97_vm0, %v4405_v25  ;;  %3495 = vmatmul.mubr.bf16.gmra.mrb[32].mxu1 %v6000_v26  ;;  %v5724_v59 = vpop.f32.mrb[32].mxu0 }
 0x38f   :  { %4956 = vst.msk [vmem:[%s11618_s4 + $0x10] sm:$0xff] %vm97_vm0, %v4924_v6  ;;  %v4925_v63 = vmul.f32 0.33333334, %v4893_v3  ;;  %v4891_v29 = vld [vmem:[%s11618_s4 + $0x8] sm:$0xff]  ;;  %4625 = vst.msk [vmem:[%s11618_s4 + $0x38] sm:$0xff] %vm97_vm0, %v4593_v20  ;;  %3502 = vmatprep.mubr.bf16.mxu1 %v11743_v35  ;;  %v4116_v50 = vadd.f32 %v5724_v59, %v9746_v15  ;;  %v4107_v19 = vpop.f32.mrb[33].mxu0 }
 0x390   :  { %4954 = vst.msk [vmem:[%s11618_s4] sm:$0xff] %vm97_vm0, %v4922_v46  ;;  %v4923_v9 = vmul.f32 0.33333334, %v4891_v29  ;;  %4819 = vst.msk [vmem:[%s11617_s3 + $0x48] sm:$0xff] %vm97_vm0, %v4739_v2  ;;  %v3288_v28 = vpop.f32.mrb[184].mxu1  ;;  %v4108_v22 = vadd.f32 %v4107_v19, %v9736_v57  ;;  %v5725_v36 = vpop.f32.mrb[34].mxu0 }
 0x391   :  { %4623 = vst.msk [vmem:[%s11618_s4 + $0x28] sm:$0xff] %vm97_vm0, %v4591_v21  ;;  %4957 = vst.msk [vmem:[%s11618_s4 + $0x18] sm:$0xff] %vm97_vm0, %v4925_v63  ;;  %v4406_v15 = vadd.f32 %v4326_v61, %v3288_v28  ;;  %v3290_v31 = vpop.f32.mrb[185].mxu1  ;;  %v4596_v47 = vadd.f32 %v4564_v60, %v4116_v50  ;;  %v4119_v24 = vadd.f32 %v5725_v36, %v9752_v27  ;;  %v4110_v56 = vpop.f32.mrb[35].mxu0  ;;  %v4565_v32 = vld [vmem:[%s11618_s4 + $0x58] sm:$0xff]  ;;  %v4563_v5 = vld [vmem:[%s11618_s4 + $0x48] sm:$0xff] }
 0x392   :  { %4955 = vst.msk [vmem:[%s11618_s4 + $0x8] sm:$0xff] %vm97_vm0, %v4923_v9  ;;  %4214 = vst.msk [vmem:[#allocation2 + $0x60] sm:$0xff] %vm97_vm0, %v3288_v28  ;;  %v4660_v53 = vld [vmem:[%s11617_s3 + $0x50] sm:$0xff]  ;;  %v3291_v57 = vpop.f32.mrb[186].mxu1  ;;  %v4594_v13 = vadd.f32 %v4562_v39, %v4108_v22  ;;  %v4111_v27 = vadd.f32 %v4110_v56, %v9742_v49  ;;  %v11744_v26 = vld [vmem:[#allocation41_spill] sm:$0xff] }
 0x393   :  { %4292 = vst.msk [vmem:[#allocation3 + $0x50] sm:$0xff] %vm97_vm0, %v4116_v50  ;;  %v4896_v30 = vld [vmem:[%s11618_s4 + $0x30] sm:$0xff]  ;;  %v4740_v33 = vmul.f32 0.33333334, %v4660_v53  ;;  %4290 = vst.msk [vmem:[#allocation3 + $0x40] sm:$0xff] %vm97_vm0, %v4108_v22  ;;  %v4407_v12 = vadd.f32 %v4327_v43, %v3291_v57  ;;  %v3293_v4 = vpop.f32.mrb[187].mxu1  ;;  %v4597_v6 = vadd.f32 %v4565_v32, %v4119_v24 }
 0x394   :  { %4486 = vst.msk [vmem:[%s11617_s3 + $0x60] sm:$0xff] %vm97_vm0, %v4406_v15  ;;  %4215 = vst.msk [vmem:[#allocation2 + $0x68] sm:$0xff] %vm97_vm0, %v3291_v57  ;;  %v4928_v25 = vmul.f32 0.33333334, %v4896_v30  ;;  %v4894_v58 = vld [vmem:[%s11618_s4 + $0x20] sm:$0xff]  ;;  %v4595_v46 = vadd.f32 %v4563_v5, %v4111_v27  ;;  %v4328_v50 = vld [vmem:[%s11617_s3 + $0x70] sm:$0xff] }
 0x395   :  { %4628 = vst.msk [vmem:[%s11618_s4 + $0x50] sm:$0xff] %vm97_vm0, %v4596_v47  ;;  %v4661_v49 = vld [vmem:[%s11617_s3 + $0x58] sm:$0xff]  ;;  %4293 = vst.msk [vmem:[#allocation3 + $0x58] sm:$0xff] %vm97_vm0, %v4119_v24  ;;  %v4926_v17 = vmul.f32 0.33333334, %v4894_v58  ;;  %v4568_v19 = vld [vmem:[%s11618_s4 + $0x70] sm:$0xff] }
 0x396   :  { %v4897_v20 = vld [vmem:[%s11618_s4 + $0x38] sm:$0xff]  ;;  %4820 = vst.msk [vmem:[%s11617_s3 + $0x50] sm:$0xff] %vm97_vm0, %v4740_v33  ;;  %v4741_v16 = vmul.f32 0.33333334, %v4661_v49  ;;  %4626 = vst.msk [vmem:[%s11618_s4 + $0x40] sm:$0xff] %vm97_vm0, %v4594_v13  ;;  %v5728_v29 = vpop.f32.mrb[36].mxu0 }
 0x397   :  { %4291 = vst.msk [vmem:[#allocation3 + $0x48] sm:$0xff] %vm97_vm0, %v4111_v27  ;;  %4487 = vst.msk [vmem:[%s11617_s3 + $0x68] sm:$0xff] %vm97_vm0, %v4407_v12  ;;  %v6001_v3 = vld [vmem:[%s11614_s0 + $0x210] ss:$8 sps:$4 sm:$0xff]   ;;  %v4929_v2 = vmul.f32 0.33333334, %v4897_v20  ;;  %v4132_v35 = vadd.f32 %v5728_v29, %v9766_v44 }
 0x398   :  { %3503 = vmatmul.mubr.bf16.gmra.mrb[36].mxu1 %v6001_v3  ;;  %4960 = vst.msk [vmem:[%s11618_s4 + $0x30] sm:$0xff] %vm97_vm0, %v4928_v25  ;;  %v4895_v21 = vld [vmem:[%s11618_s4 + $0x28] sm:$0xff]  ;;  %4629 = vst.msk [vmem:[%s11618_s4 + $0x58] sm:$0xff] %vm97_vm0, %v4597_v6  ;;  %v4123_v9 = vpop.f32.mrb[37].mxu0  ;;  %v3296_v59 = vpop.f32.mrb[188].mxu1  ;;  %v4566_v15 = vld [vmem:[%s11618_s4 + $0x60] sm:$0xff] }
 0x399   :  { %3510 = vmatprep.mubr.bf16.mxu1 %v11744_v26  ;;  %4958 = vst.msk [vmem:[%s11618_s4 + $0x20] sm:$0xff] %vm97_vm0, %v4926_v17  ;;  %v4927_v63 = vmul.f32 0.33333334, %v4895_v21  ;;  %4821 = vst.msk [vmem:[%s11617_s3 + $0x58] sm:$0xff] %vm97_vm0, %v4741_v16  ;;  %v4124_v28 = vadd.f32 %v4123_v9, %v9756_v1  ;;  %v5729_v61 = vpop.f32.mrb[38].mxu0  ;;  %v4408_v44 = vadd.f32 %v4328_v50, %v3296_v59  ;;  %v3298_v60 = vpop.f32.mrb[189].mxu1 }
 0x39a   :  { %4627 = vst.msk [vmem:[%s11618_s4 + $0x48] sm:$0xff] %vm97_vm0, %v4595_v46  ;;  %4961 = vst.msk [vmem:[%s11618_s4 + $0x38] sm:$0xff] %vm97_vm0, %v4929_v2  ;;  %v4600_v36 = vadd.f32 %v4568_v19, %v4132_v35  ;;  %v4135_v31 = vadd.f32 %v5729_v61, %v9772_v45  ;;  %v4126_v53 = vpop.f32.mrb[39].mxu0  ;;  %v3299_v1 = vpop.f32.mrb[190].mxu1  ;;  %v4329_v47 = vld [vmem:[%s11617_s3 + $0x78] sm:$0xff]  ;;  %v4567_v27 = vld [vmem:[%s11618_s4 + $0x68] sm:$0xff] }
 0x39b   :  { %4959 = vst.msk [vmem:[%s11618_s4 + $0x28] sm:$0xff] %vm97_vm0, %v4927_v63  ;;  %4216 = vst.msk [vmem:[#allocation2 + $0x70] sm:$0xff] %vm97_vm0, %v3296_v59  ;;  %v4662_v22 = vld [vmem:[%s11617_s3 + $0x60] sm:$0xff]  ;;  %v4598_v56 = vadd.f32 %v4566_v15, %v4124_v28  ;;  %v4569_v57 = vld [vmem:[%s11618_s4 + $0x78] sm:$0xff]  ;;  %v4127_v45 = vadd.f32 %v4126_v53, %v9762_v23  ;;  %v4409_v43 = vadd.f32 %v4329_v47, %v3299_v1  ;;  %v3301_v30 = vpop.f32.mrb[191].mxu1 }
 0x39c   :  { %4296 = vst.msk [vmem:[#allocation3 + $0x70] sm:$0xff] %vm97_vm0, %v4132_v35  ;;  %v4900_v39 = vld [vmem:[%s11618_s4 + $0x50] sm:$0xff]  ;;  %v4742_v24 = vmul.f32 0.33333334, %v4662_v22  ;;  %4294 = vst.msk [vmem:[#allocation3 + $0x60] sm:$0xff] %vm97_vm0, %v4124_v28  ;;  %v4601_v32 = vadd.f32 %v4569_v57, %v4135_v31  ;;  %v4330_v21 = vld [vmem:[%s11617_s3 + $0x80] sm:$0xff] }
 0x39d   :  { %4488 = vst.msk [vmem:[%s11617_s3 + $0x70] sm:$0xff] %vm97_vm0, %v4408_v44  ;;  %4217 = vst.msk [vmem:[#allocation2 + $0x78] sm:$0xff] %vm97_vm0, %v3299_v1  ;;  %v4932_v33 = vmul.f32 0.33333334, %v4900_v39  ;;  %v4898_v13 = vld [vmem:[%s11618_s4 + $0x40] sm:$0xff]  ;;  %v4599_v58 = vadd.f32 %v4567_v27, %v4127_v45  ;;  %v11745_v17 = vld [vmem:[#allocation42_spill] sm:$0xff] }
 0x39e   :  { %4632 = vst.msk [vmem:[%s11618_s4 + $0x70] sm:$0xff] %vm97_vm0, %v4600_v36  ;;  %v4663_v23 = vld [vmem:[%s11617_s3 + $0x68] sm:$0xff]  ;;  %4297 = vst.msk [vmem:[#allocation3 + $0x78] sm:$0xff] %vm97_vm0, %v4135_v31  ;;  %v4930_v12 = vmul.f32 0.33333334, %v4898_v13  ;;  %v5732_v16 = vpop.f32.mrb[40].mxu0 }
 0x39f   :  { %v4901_v4 = vld [vmem:[%s11618_s4 + $0x58] sm:$0xff]  ;;  %4822 = vst.msk [vmem:[%s11617_s3 + $0x60] sm:$0xff] %vm97_vm0, %v4742_v24  ;;  %v4743_v25 = vmul.f32 0.33333334, %v4663_v23  ;;  %4630 = vst.msk [vmem:[%s11618_s4 + $0x60] sm:$0xff] %vm97_vm0, %v4598_v56  ;;  %v4148_v46 = vadd.f32 %v5732_v16, %v9786_v10  ;;  %v4139_v3 = vpop.f32.mrb[41].mxu0 }
 0x3a0   :  { %4295 = vst.msk [vmem:[#allocation3 + $0x68] sm:$0xff] %vm97_vm0, %v4127_v45  ;;  %4489 = vst.msk [vmem:[%s11617_s3 + $0x78] sm:$0xff] %vm97_vm0, %v4409_v43  ;;  %v6002_v49 = vld [vmem:[%s11614_s0 + $0x220] ss:$8 sps:$4 sm:$0xff]   ;;  %v4933_v6 = vmul.f32 0.33333334, %v4901_v4  ;;  %v4140_v63 = vadd.f32 %v4139_v3, %v9776_v11 }
 0x3a1   :  { %3511 = vmatmul.mubr.bf16.gmra.mrb[40].mxu1 %v6002_v49  ;;  %4964 = vst.msk [vmem:[%s11618_s4 + $0x50] sm:$0xff] %vm97_vm0, %v4932_v33  ;;  %v4899_v5 = vld [vmem:[%s11618_s4 + $0x48] sm:$0xff]  ;;  %4633 = vst.msk [vmem:[%s11618_s4 + $0x78] sm:$0xff] %vm97_vm0, %v4601_v32  ;;  %v3304_v2 = vpop.f32.mrb[192].mxu1  ;;  %v4572_v26 = vld [vmem:[%s11618_s4 + $0x90] sm:$0xff]  ;;  %v5733_v29 = vpop.f32.mrb[42].mxu0 }
 0x3a2   :  { %3518 = vmatprep.mubr.bf16.mxu1 %v11745_v17  ;;  %4962 = vst.msk [vmem:[%s11618_s4 + $0x40] sm:$0xff] %vm97_vm0, %v4930_v12  ;;  %v4931_v20 = vmul.f32 0.33333334, %v4899_v5  ;;  %4823 = vst.msk [vmem:[%s11617_s3 + $0x68] sm:$0xff] %vm97_vm0, %v4743_v25  ;;  %v4410_v10 = vadd.f32 %v4330_v21, %v3304_v2  ;;  %v3306_v35 = vpop.f32.mrb[193].mxu1  ;;  %v4604_v59 = vadd.f32 %v4572_v26, %v4148_v46  ;;  %v4570_v50 = vld [vmem:[%s11618_s4 + $0x80] sm:$0xff] }
 0x3a3   :  { %4631 = vst.msk [vmem:[%s11618_s4 + $0x68] sm:$0xff] %vm97_vm0, %v4599_v58  ;;  %4965 = vst.msk [vmem:[%s11618_s4 + $0x58] sm:$0xff] %vm97_vm0, %v4933_v6  ;;  %v4151_v19 = vadd.f32 %v5733_v29, %v9792_v54  ;;  %v4142_v28 = vpop.f32.mrb[43].mxu0  ;;  %v3307_v11 = vpop.f32.mrb[194].mxu1  ;;  %v4331_v61 = vld [vmem:[%s11617_s3 + $0x88] sm:$0xff]  ;;  %v4602_v22 = vadd.f32 %v4570_v50, %v4140_v63  ;;  %v4573_v36 = vld [vmem:[%s11618_s4 + $0x98] sm:$0xff] }
 0x3a4   :  { %4963 = vst.msk [vmem:[%s11618_s4 + $0x48] sm:$0xff] %vm97_vm0, %v4931_v20  ;;  %4218 = vst.msk [vmem:[#allocation2 + $0x80] sm:$0xff] %vm97_vm0, %v3304_v2  ;;  %v4664_v9 = vld [vmem:[%s11617_s3 + $0x70] sm:$0xff]  ;;  %v4143_v54 = vadd.f32 %v4142_v28, %v9782_v18  ;;  %v4411_v15 = vadd.f32 %v4331_v61, %v3307_v11  ;;  %v3309_v31 = vpop.f32.mrb[195].mxu1  ;;  %v4571_v39 = vld [vmem:[%s11618_s4 + $0x88] sm:$0xff] }
 0x3a5   :  { %4300 = vst.msk [vmem:[#allocation3 + $0x90] sm:$0xff] %vm97_vm0, %v4148_v46  ;;  %v4904_v44 = vld [vmem:[%s11618_s4 + $0x70] sm:$0xff]  ;;  %v4744_v60 = vmul.f32 0.33333334, %v4664_v9  ;;  %4298 = vst.msk [vmem:[#allocation3 + $0x80] sm:$0xff] %vm97_vm0, %v4140_v63  ;;  %v4605_v47 = vadd.f32 %v4573_v36, %v4151_v19  ;;  %v11746_v13 = vld [vmem:[#allocation43_spill] sm:$0xff] }
 0x3a6   :  { %4490 = vst.msk [vmem:[%s11617_s3 + $0x80] sm:$0xff] %vm97_vm0, %v4410_v10  ;;  %4219 = vst.msk [vmem:[#allocation2 + $0x88] sm:$0xff] %vm97_vm0, %v3307_v11  ;;  %v4936_v53 = vmul.f32 0.33333334, %v4904_v44  ;;  %v4902_v1 = vld [vmem:[%s11618_s4 + $0x60] sm:$0xff]  ;;  %v4603_v45 = vadd.f32 %v4571_v39, %v4143_v54  ;;  %v5736_v32 = vpop.f32.mrb[44].mxu0 }
 0x3a7   :  { %4636 = vst.msk [vmem:[%s11618_s4 + $0x90] sm:$0xff] %vm97_vm0, %v4604_v59  ;;  %v4665_v18 = vld [vmem:[%s11617_s3 + $0x78] sm:$0xff]  ;;  %4301 = vst.msk [vmem:[#allocation3 + $0x98] sm:$0xff] %vm97_vm0, %v4151_v19  ;;  %v4934_v24 = vmul.f32 0.33333334, %v4902_v1  ;;  %v4164_v27 = vadd.f32 %v5736_v32, %v9806_v48  ;;  %v4155_v12 = vpop.f32.mrb[45].mxu0 }
 0x3a8   :  { %v4905_v56 = vld [vmem:[%s11618_s4 + $0x78] sm:$0xff]  ;;  %4824 = vst.msk [vmem:[%s11617_s3 + $0x70] sm:$0xff] %vm97_vm0, %v4744_v60  ;;  %v4745_v57 = vmul.f32 0.33333334, %v4665_v18  ;;  %4634 = vst.msk [vmem:[%s11618_s4 + $0x80] sm:$0xff] %vm97_vm0, %v4602_v22  ;;  %v3312_v4 = vpop.f32.mrb[196].mxu1  ;;  %v4156_v49 = vadd.f32 %v4155_v12, %v9796_v8 }
 0x3a9   :  { %4299 = vst.msk [vmem:[#allocation3 + $0x88] sm:$0xff] %vm97_vm0, %v4143_v54  ;;  %4491 = vst.msk [vmem:[%s11617_s3 + $0x88] sm:$0xff] %vm97_vm0, %v4411_v15  ;;  %v6003_v43 = vld [vmem:[%s11614_s0 + $0x230] ss:$8 sps:$4 sm:$0xff]   ;;  %v4937_v30 = vmul.f32 0.33333334, %v4905_v56 }
 0x3aa   :  { %3519 = vmatmul.mubr.bf16.gmra.mrb[44].mxu1 %v6003_v43  ;;  %4968 = vst.msk [vmem:[%s11618_s4 + $0x70] sm:$0xff] %vm97_vm0, %v4936_v53  ;;  %v4903_v33 = vld [vmem:[%s11618_s4 + $0x68] sm:$0xff]  ;;  %4637 = vst.msk [vmem:[%s11618_s4 + $0x98] sm:$0xff] %vm97_vm0, %v4605_v47  ;;  %v4332_v25 = vld [vmem:[%s11617_s3 + $0x90] sm:$0xff]  ;;  %v5737_v6 = vpop.f32.mrb[46].mxu0  ;;  %v3314_v5 = vpop.f32.mrb[197].mxu1 }
 0x3ab   :  { %3526 = vmatprep.mubr.bf16.mxu1 %v11746_v13  ;;  %4966 = vst.msk [vmem:[%s11618_s4 + $0x60] sm:$0xff] %vm97_vm0, %v4934_v24  ;;  %v4935_v23 = vmul.f32 0.33333334, %v4903_v33  ;;  %4825 = vst.msk [vmem:[%s11617_s3 + $0x78] sm:$0xff] %vm97_vm0, %v4745_v57  ;;  %v4576_v58 = vld [vmem:[%s11618_s4 + $0xb0] sm:$0xff]  ;;  %v4412_v48 = vadd.f32 %v4332_v25, %v3312_v4  ;;  %v4574_v16 = vld [vmem:[%s11618_s4 + $0xa0] sm:$0xff]  ;;  %v4167_v46 = vadd.f32 %v5737_v6, %v9812_v38 }
 0x3ac   :  { %4635 = vst.msk [vmem:[%s11618_s4 + $0x88] sm:$0xff] %vm97_vm0, %v4603_v45  ;;  %4969 = vst.msk [vmem:[%s11618_s4 + $0x78] sm:$0xff] %vm97_vm0, %v4937_v30  ;;  %v4608_v20 = vadd.f32 %v4576_v58, %v4164_v27  ;;  %v4158_v3 = vpop.f32.mrb[47].mxu0  ;;  %v3315_v8 = vpop.f32.mrb[198].mxu1  ;;  %v4333_v2 = vld [vmem:[%s11617_s3 + $0x98] sm:$0xff]  ;;  %v4606_v63 = vadd.f32 %v4574_v16, %v4156_v49  ;;  %v4575_v19 = vld [vmem:[%s11618_s4 + $0xa8] sm:$0xff] }
 0x3ad   :  { %4967 = vst.msk [vmem:[%s11618_s4 + $0x68] sm:$0xff] %vm97_vm0, %v4935_v23  ;;  %4220 = vst.msk [vmem:[#allocation2 + $0x90] sm:$0xff] %vm97_vm0, %v3312_v4  ;;  %v4666_v17 = vld [vmem:[%s11617_s3 + $0x80] sm:$0xff]  ;;  %v4577_v29 = vld [vmem:[%s11618_s4 + $0xb8] sm:$0xff]  ;;  %v4159_v38 = vadd.f32 %v4158_v3, %v9802_v52  ;;  %v4413_v10 = vadd.f32 %v4333_v2, %v3315_v8  ;;  %v3317_v35 = vpop.f32.mrb[199].mxu1 }
 0x3ae   :  { %4304 = vst.msk [vmem:[#allocation3 + $0xb0] sm:$0xff] %vm97_vm0, %v4164_v27  ;;  %v4908_v21 = vld [vmem:[%s11618_s4 + $0x90] sm:$0xff]  ;;  %v4746_v26 = vmul.f32 0.33333334, %v4666_v17  ;;  %4302 = vst.msk [vmem:[#allocation3 + $0xa0] sm:$0xff] %vm97_vm0, %v4156_v49  ;;  %v4609_v50 = vadd.f32 %v4577_v29, %v4167_v46  ;;  %v5740_v15 = vpop.f32.mrb[48].mxu0 }
 0x3af   :  { %4492 = vst.msk [vmem:[%s11617_s3 + $0x90] sm:$0xff] %vm97_vm0, %v4412_v48  ;;  %4221 = vst.msk [vmem:[#allocation2 + $0x98] sm:$0xff] %vm97_vm0, %v3315_v8  ;;  %v4940_v9 = vmul.f32 0.33333334, %v4908_v21  ;;  %v4906_v59 = vld [vmem:[%s11618_s4 + $0x80] sm:$0xff]  ;;  %v4607_v44 = vadd.f32 %v4575_v19, %v4159_v38  ;;  %v4171_v31 = vpop.f32.mrb[49].mxu0 }
 0x3b0   :  { %4640 = vst.msk [vmem:[%s11618_s4 + $0xb0] sm:$0xff] %vm97_vm0, %v4608_v20  ;;  %v4667_v52 = vld [vmem:[%s11617_s3 + $0x88] sm:$0xff]  ;;  %4305 = vst.msk [vmem:[#allocation3 + $0xb8] sm:$0xff] %vm97_vm0, %v4167_v46  ;;  %v4938_v28 = vmul.f32 0.33333334, %v4906_v59  ;;  %v3320_v53 = vpop.f32.mrb[200].mxu1  ;;  %v4172_v47 = vadd.f32 %v4171_v31, %v9828_v34 }
 0x3b1   :  { %v4909_v11 = vld [vmem:[%s11618_s4 + $0x98] sm:$0xff]  ;;  %4826 = vst.msk [vmem:[%s11617_s3 + $0x80] sm:$0xff] %vm97_vm0, %v4746_v26  ;;  %v4747_v61 = vmul.f32 0.33333334, %v4667_v52  ;;  %4638 = vst.msk [vmem:[%s11618_s4 + $0xa0] sm:$0xff] %vm97_vm0, %v4606_v63  ;;  %v4334_v1 = vld [vmem:[%s11617_s3 + $0xa0] sm:$0xff] }
 0x3b2   :  { %4303 = vst.msk [vmem:[#allocation3 + $0xa8] sm:$0xff] %vm97_vm0, %v4159_v38  ;;  %4493 = vst.msk [vmem:[%s11617_s3 + $0x98] sm:$0xff] %vm97_vm0, %v4413_v10  ;;  %v6004_v60 = vld [vmem:[%s11614_s0 + $0x240] ss:$8 sps:$4 sm:$0xff]   ;;  %v4941_v22 = vmul.f32 0.33333334, %v4909_v11 }
 0x3b3   :  { %3527 = vmatmul.mubr.bf16.gmra.mrb[48].mxu1 %v6004_v60  ;;  %4972 = vst.msk [vmem:[%s11618_s4 + $0x90] sm:$0xff] %vm97_vm0, %v4940_v9  ;;  %v4907_v36 = vld [vmem:[%s11618_s4 + $0x88] sm:$0xff]  ;;  %4641 = vst.msk [vmem:[%s11618_s4 + $0xb8] sm:$0xff] %vm97_vm0, %v4609_v50  ;;  %v4580_v18 = vld [vmem:[%s11618_s4 + $0xd0] sm:$0xff]  ;;  %v5741_v39 = vpop.f32.mrb[50].mxu0  ;;  %v3322_v24 = vpop.f32.mrb[201].mxu1 }
 0x3b4   :  { %3534 = vmatprep.mubr.bf16.mxu1 %v8817_v0  ;;  %4970 = vst.msk [vmem:[%s11618_s4 + $0x80] sm:$0xff] %vm97_vm0, %v4938_v28  ;;  %v4939_v54 = vmul.f32 0.33333334, %v4907_v36  ;;  %4827 = vst.msk [vmem:[%s11617_s3 + $0x88] sm:$0xff] %vm97_vm0, %v4747_v61  ;;  %v4180_v0 = vadd.f32 %v5740_v15, %v9857_v7  ;;  %v4414_v7 = vadd.f32 %v4334_v1, %v3320_v53  ;;  %v4578_v45 = vld [vmem:[%s11618_s4 + $0xc0] sm:$0xff]  ;;  %v4174_v30 = vpop.f32.mrb[51].mxu0 }
 0x3b5   :  { %4639 = vst.msk [vmem:[%s11618_s4 + $0xa8] sm:$0xff] %vm97_vm0, %v4607_v44  ;;  %4973 = vst.msk [vmem:[%s11618_s4 + $0x98] sm:$0xff] %vm97_vm0, %v4941_v22  ;;  %v4183_v43 = vadd.f32 %v5741_v39, %v9874_v55  ;;  %v3323_v34 = vpop.f32.mrb[202].mxu1  ;;  %v4335_v33 = vld [vmem:[%s11617_s3 + $0xa8] sm:$0xff]  ;;  %v4610_v32 = vadd.f32 %v4578_v45, %v4172_v47  ;;  %v4581_v27 = vld [vmem:[%s11618_s4 + $0xd8] sm:$0xff]  ;;  %v4175_v55 = vadd.f32 %v4174_v30, %v9838_v37 }
 0x3b6   :  { %4971 = vst.msk [vmem:[%s11618_s4 + $0x88] sm:$0xff] %vm97_vm0, %v4939_v54  ;;  %4222 = vst.msk [vmem:[#allocation2 + $0xa0] sm:$0xff] %vm97_vm0, %v3320_v53  ;;  %v4668_v56 = vld [vmem:[%s11617_s3 + $0x90] sm:$0xff]  ;;  %v4612_v57 = vadd.f32 %v4580_v18, %v4180_v0  ;;  %v4415_v12 = vadd.f32 %v4335_v33, %v3323_v34  ;;  %v3325_v4 = vpop.f32.mrb[203].mxu1  ;;  %v4579_v6 = vld [vmem:[%s11618_s4 + $0xc8] sm:$0xff] }
 0x3b7   :  { %4308 = vst.msk [vmem:[#allocation3 + $0xd0] sm:$0xff] %vm97_vm0, %v4180_v0  ;;  %v4912_v13 = vld [vmem:[%s11618_s4 + $0xb0] sm:$0xff]  ;;  %v4748_v23 = vmul.f32 0.33333334, %v4668_v56  ;;  %4306 = vst.msk [vmem:[#allocation3 + $0xc0] sm:$0xff] %vm97_vm0, %v4172_v47  ;;  %v4613_v49 = vadd.f32 %v4581_v27, %v4183_v43  ;;  %v4611_v20 = vadd.f32 %v4579_v6, %v4175_v55  ;;  %v11747_v8 = vld [vmem:[#allocation44_spill] sm:$0xff] }
 0x3b8   :  { %4494 = vst.msk [vmem:[%s11617_s3 + $0xa0] sm:$0xff] %vm97_vm0, %v4414_v7  ;;  %4223 = vst.msk [vmem:[#allocation2 + $0xa8] sm:$0xff] %vm97_vm0, %v3323_v34  ;;  %v4944_v25 = vmul.f32 0.33333334, %v4912_v13  ;;  %v4910_v58 = vld [vmem:[%s11618_s4 + $0xa0] sm:$0xff]  ;;  %v3328_v21 = vpop.f32.mrb[204].mxu1 }
 0x3b9   :  { %4644 = vst.msk [vmem:[%s11618_s4 + $0xd0] sm:$0xff] %vm97_vm0, %v4612_v57  ;;  %v4669_v37 = vld [vmem:[%s11617_s3 + $0x98] sm:$0xff]  ;;  %4309 = vst.msk [vmem:[#allocation3 + $0xd8] sm:$0xff] %vm97_vm0, %v4183_v43  ;;  %v4942_v48 = vmul.f32 0.33333334, %v4910_v58  ;;  %v4336_v26 = vld [vmem:[%s11617_s3 + $0xb0] sm:$0xff] }
 0x3ba   :  { %v4913_v5 = vld [vmem:[%s11618_s4 + $0xb8] sm:$0xff]  ;;  %4828 = vst.msk [vmem:[%s11617_s3 + $0x90] sm:$0xff] %vm97_vm0, %v4748_v23  ;;  %v4749_v17 = vmul.f32 0.33333334, %v4669_v37  ;;  %4642 = vst.msk [vmem:[%s11618_s4 + $0xc0] sm:$0xff] %vm97_vm0, %v4610_v32  ;;  %v4416_v63 = vadd.f32 %v4336_v26, %v3328_v21  ;;  %v3330_v29 = vpop.f32.mrb[205].mxu1 }
 0x3bb   :  { %4307 = vst.msk [vmem:[#allocation3 + $0xc8] sm:$0xff] %vm97_vm0, %v4175_v55  ;;  %4495 = vst.msk [vmem:[%s11617_s3 + $0xa8] sm:$0xff] %vm97_vm0, %v4415_v12  ;;  %v6005_v16 = vld [vmem:[%s11614_s0 + $0x250] ss:$8 sps:$4 sm:$0xff]   ;;  %v4945_v46 = vmul.f32 0.33333334, %v4913_v5 }
 0x3bc   :  { %3535 = vmatmul.mubr.bf16.gmra.mrb[52].mxu1 %v6005_v16  ;;  %4976 = vst.msk [vmem:[%s11618_s4 + $0xb0] sm:$0xff] %vm97_vm0, %v4944_v25  ;;  %v4911_v3 = vld [vmem:[%s11618_s4 + $0xa8] sm:$0xff]  ;;  %4645 = vst.msk [vmem:[%s11618_s4 + $0xd8] sm:$0xff] %vm97_vm0, %v4613_v49  ;;  %v3331_v10 = vpop.f32.mrb[206].mxu1  ;;  %v4337_v35 = vld [vmem:[%s11617_s3 + $0xb8] sm:$0xff] }
 0x3bd   :  { %3542 = vmatprep.mubr.bf16.mxu1 %v11747_v8  ;;  %4974 = vst.msk [vmem:[%s11618_s4 + $0xa0] sm:$0xff] %vm97_vm0, %v4942_v48  ;;  %v4943_v2 = vmul.f32 0.33333334, %v4911_v3  ;;  %4829 = vst.msk [vmem:[%s11617_s3 + $0x98] sm:$0xff] %vm97_vm0, %v4749_v17  ;;  %v4417_v52 = vadd.f32 %v4337_v35, %v3331_v10  ;;  %v3333_v50 = vpop.f32.mrb[207].mxu1  ;;  %v4339_v47 = vld [vmem:[%s11617_s3 + $0xc8] sm:$0xff] }
 0x3be   :  { %4643 = vst.msk [vmem:[%s11618_s4 + $0xc8] sm:$0xff] %vm97_vm0, %v4611_v20  ;;  %4977 = vst.msk [vmem:[%s11618_s4 + $0xb8] sm:$0xff] %vm97_vm0, %v4945_v46  ;;  %v6006_v22 = vld [vmem:[%s11614_s0 + $0x260] ss:$8 sps:$4 sm:$0xff]   ;;  %v6007_v45 = vld [vmem:[%s11614_s0 + $0x270] ss:$8 sps:$4 sm:$0xff]  }
 0x3bf   :  { %4975 = vst.msk [vmem:[%s11618_s4 + $0xa8] sm:$0xff] %vm97_vm0, %v4943_v2  ;;  %4224 = vst.msk [vmem:[#allocation2 + $0xb0] sm:$0xff] %vm97_vm0, %v3328_v21  ;;  %v4670_v38 = vld [vmem:[%s11617_s3 + $0xa0] sm:$0xff]  ;;  %v4340_v30 = vld [vmem:[%s11617_s3 + $0xd0] sm:$0xff] }
 0x3c0   :  { %v4916_v9 = vld [vmem:[%s11618_s4 + $0xd0] sm:$0xff]  ;;  %v4750_v59 = vmul.f32 0.33333334, %v4670_v38  ;;  %4496 = vst.msk [vmem:[%s11617_s3 + $0xb0] sm:$0xff] %vm97_vm0, %v4416_v63  ;;  %4225 = vst.msk [vmem:[#allocation2 + $0xb8] sm:$0xff] %vm97_vm0, %v3331_v10  ;;  %v3336_v0 = vpop.f32.mrb[208].mxu1 }
 0x3c1   :  { %v4948_v19 = vmul.f32 0.33333334, %v4916_v9  ;;  %v4914_v28 = vld [vmem:[%s11618_s4 + $0xc0] sm:$0xff]  ;;  %4497 = vst.msk [vmem:[%s11617_s3 + $0xb8] sm:$0xff] %vm97_vm0, %v4417_v52  ;;  %4226 = vst.msk [vmem:[#allocation2 + $0xc0] sm:$0xff] %vm97_vm0, %v3336_v0  ;;  %v3338_v53 = vpop.f32.mrb[209].mxu1 }
 0x3c2   :  { %v4671_v11 = vld [vmem:[%s11617_s3 + $0xa8] sm:$0xff]  ;;  %v4946_v61 = vmul.f32 0.33333334, %v4914_v28  ;;  %4830 = vst.msk [vmem:[%s11617_s3 + $0xa0] sm:$0xff] %vm97_vm0, %v4750_v59  ;;  %v3339_v18 = vpop.f32.mrb[210].mxu1  ;;  %v11748_v25 = vld [vmem:[#allocation46_spill] sm:$0xff] }
 0x3c3   :  { %v4917_v44 = vld [vmem:[%s11618_s4 + $0xd8] sm:$0xff]  ;;  %v4751_v60 = vmul.f32 0.33333334, %v4671_v11  ;;  %4980 = vst.msk [vmem:[%s11618_s4 + $0xd0] sm:$0xff] %vm97_vm0, %v4948_v19  ;;  %4227 = vst.msk [vmem:[#allocation2 + $0xc8] sm:$0xff] %vm97_vm0, %v3339_v18  ;;  %v4419_v7 = vadd.f32 %v4339_v47, %v3339_v18  ;;  %v3341_v24 = vpop.f32.mrb[211].mxu1 }
 0x3c4   :  { %3543 = vmatmul.mubr.bf16.gmra.mrb[56].mxu1 %v6006_v22  ;;  %v4949_v36 = vmul.f32 0.33333334, %v4917_v44  ;;  %4978 = vst.msk [vmem:[%s11618_s4 + $0xc0] sm:$0xff] %vm97_vm0, %v4946_v61  ;;  %v11749_v58 = vld [vmem:[#allocation45_spill] sm:$0xff]  ;;  %v4342_v49 = vld [vmem:[%s11617_s3 + $0xe0] sm:$0xff]  ;;  %v11750_v21 = vld [vmem:[#allocation47_spill] sm:$0xff] }
 0x3c5   :  { %v4915_v54 = vld [vmem:[%s11618_s4 + $0xc8] sm:$0xff]  ;;  %3550 = vmatprep.mubr.bf16.mxu1 %v8879_v51  ;;  %4831 = vst.msk [vmem:[%s11617_s3 + $0xa8] sm:$0xff] %vm97_vm0, %v4751_v60  ;;  %v4338_v51 = vld [vmem:[%s11617_s3 + $0xc0] sm:$0xff]  ;;  %4499 = vst.msk [vmem:[%s11617_s3 + $0xc8] sm:$0xff] %vm97_vm0, %v4419_v7 }
 0x3c6   :  { %v4947_v15 = vmul.f32 0.33333334, %v4915_v54  ;;  %4981 = vst.msk [vmem:[%s11618_s4 + $0xd8] sm:$0xff] %vm97_vm0, %v4949_v36  ;;  %v4418_v31 = vadd.f32 %v4338_v51, %v3336_v0  ;;  %v4343_v20 = vld [vmem:[%s11617_s3 + $0xe8] sm:$0xff]  ;;  %v4344_v63 = vld [vmem:[%s11617_s3 + $0xf0] sm:$0xff]  ;;  %v4345_v9 = vld [vmem:[%s11617_s3 + $0xf8] sm:$0xff] }
 0x3c7   :  { %v4672_v1 = vld [vmem:[%s11617_s3 + $0xb0] sm:$0xff]  ;;  %v4346_v61 = vld [vmem:[%s11617_s3 + $0x100] sm:$0xff]  ;;  %v4347_v54 = vld [vmem:[%s11617_s3 + $0x108] sm:$0xff] }
 0x3c8   :  { %4979 = vst.msk [vmem:[%s11618_s4 + $0xc8] sm:$0xff] %vm97_vm0, %v4947_v15  ;;  %v4752_v39 = vmul.f32 0.33333334, %v4672_v1  ;;  %4498 = vst.msk [vmem:[%s11617_s3 + $0xc0] sm:$0xff] %vm97_vm0, %v4418_v31  ;;  %v4673_v56 = vld [vmem:[%s11617_s3 + $0xb8] sm:$0xff]  ;;  %v3344_v43 = vpop.f32.mrb[212].mxu1 }
 0x3c9   :  { %v4753_v57 = vmul.f32 0.33333334, %v4673_v56  ;;  %4228 = vst.msk [vmem:[#allocation2 + $0xd0] sm:$0xff] %vm97_vm0, %v3344_v43  ;;  %v4420_v34 = vadd.f32 %v4340_v30, %v3344_v43  ;;  %v3346_v33 = vpop.f32.mrb[213].mxu1  ;;  %v4348_v18 = vld [vmem:[%s11617_s3 + $0x110] sm:$0xff]  ;;  %v4349_v56 = vld [vmem:[%s11617_s3 + $0x118] sm:$0xff] }
 0x3ca   :  { %4832 = vst.msk [vmem:[%s11617_s3 + $0xb0] sm:$0xff] %vm97_vm0, %v4752_v39  ;;  %v3347_v23 = vpop.f32.mrb[214].mxu1 }
 0x3cb   :  { %4833 = vst.msk [vmem:[%s11617_s3 + $0xb8] sm:$0xff] %vm97_vm0, %v4753_v57  ;;  %4500 = vst.msk [vmem:[%s11617_s3 + $0xd0] sm:$0xff] %vm97_vm0, %v4420_v34  ;;  %v3349_v55 = vpop.f32.mrb[215].mxu1 }
 0x3cc   :  { %3551 = vmatmul.mubr.bf16.gmra.mrb[60].mxu1 %v6007_v45  ;;  %4229 = vst.msk [vmem:[#allocation2 + $0xd8] sm:$0xff] %vm97_vm0, %v3347_v23  ;;  %v4675_v12 = vld [vmem:[%s11617_s3 + $0xc8] sm:$0xff] }
 0x3cd   :  { %3863 = vmatprep.mubr.bf16.mxu1 %v8940_v42  ;;  %v4341_v42 = vld [vmem:[%s11617_s3 + $0xd8] sm:$0xff]  ;;  %v4755_v4 = vmul.f32 0.33333334, %v4675_v12  ;;  %v4351_v55 = vld [vmem:[%s11617_s3 + $0x128] sm:$0xff] }
 0x3ce   :  { %v4421_v27 = vadd.f32 %v4341_v42, %v3347_v23 }
 0x3cf   :  { %v4674_v13 = vld [vmem:[%s11617_s3 + $0xc0] sm:$0xff]  ;;  %4835 = vst.msk [vmem:[%s11617_s3 + $0xc8] sm:$0xff] %vm97_vm0, %v4755_v4 }
 0x3d0   :  { %v4754_v32 = vmul.f32 0.33333334, %v4674_v13  ;;  %4501 = vst.msk [vmem:[%s11617_s3 + $0xd8] sm:$0xff] %vm97_vm0, %v4421_v27  ;;  %v3352_v37 = vpop.f32.mrb[216].mxu1  ;;  %v4350_v13 = vld [vmem:[%s11617_s3 + $0x120] sm:$0xff] }
 0x3d1   :  { %4230 = vst.msk [vmem:[#allocation2 + $0xe0] sm:$0xff] %vm97_vm0, %v3352_v37  ;;  %v4422_v6 = vadd.f32 %v4342_v49, %v3352_v37  ;;  %v3354_v48 = vpop.f32.mrb[217].mxu1 }
 0x3d2   :  { %4834 = vst.msk [vmem:[%s11617_s3 + $0xc0] sm:$0xff] %vm97_vm0, %v4754_v32  ;;  %v4676_v5 = vld [vmem:[%s11617_s3 + $0xd0] sm:$0xff]  ;;  %v3355_v17 = vpop.f32.mrb[218].mxu1 }
 0x3d3   :  { %v4756_v16 = vmul.f32 0.33333334, %v4676_v5  ;;  %4502 = vst.msk [vmem:[%s11617_s3 + $0xe0] sm:$0xff] %vm97_vm0, %v4422_v6  ;;  %4231 = vst.msk [vmem:[#allocation2 + $0xe8] sm:$0xff] %vm97_vm0, %v3355_v17  ;;  %v4423_v46 = vadd.f32 %v4343_v20, %v3355_v17  ;;  %v3357_v3 = vpop.f32.mrb[219].mxu1  ;;  %v4352_v6 = vld [vmem:[%s11617_s3 + $0x130] sm:$0xff] }
 0x3d4   :  { %3864 = vmatmul.mubr.bf16.vlgmr.msra.gmra.mrb[64].mxu1 %v11748_v25 }
 0x3d5   :  { %3871 = vmatprep.mubr.bf16.mxu1 %v11749_v58  ;;  %4836 = vst.msk [vmem:[%s11617_s3 + $0xd0] sm:$0xff] %vm97_vm0, %v4756_v16  ;;  %4503 = vst.msk [vmem:[%s11617_s3 + $0xe8] sm:$0xff] %vm97_vm0, %v4423_v46  ;;  %v4353_v16 = vld [vmem:[%s11617_s3 + $0x138] sm:$0xff] }
 0x3d7   :  { %v4677_v8 = vld [vmem:[%s11617_s3 + $0xd8] sm:$0xff] }
 0x3d8   :  { %v4757_v2 = vmul.f32 0.33333334, %v4677_v8  ;;  %v3360_v26 = vpop.f32.mrb[220].mxu1 }
 0x3d9   :  { %4232 = vst.msk [vmem:[#allocation2 + $0xf0] sm:$0xff] %vm97_vm0, %v3360_v26  ;;  %v4424_v29 = vadd.f32 %v4344_v63, %v3360_v26  ;;  %v3362_v38 = vpop.f32.mrb[221].mxu1  ;;  %v4354_v63 = vld [vmem:[%s11617_s3 + $0x140] sm:$0xff] }
 0x3da   :  { %4837 = vst.msk [vmem:[%s11617_s3 + $0xd8] sm:$0xff] %vm97_vm0, %v4757_v2  ;;  %v4678_v10 = vld [vmem:[%s11617_s3 + $0xe0] sm:$0xff]  ;;  %v3363_v35 = vpop.f32.mrb[222].mxu1 }
 0x3db   :  { %v4758_v59 = vmul.f32 0.33333334, %v4678_v10  ;;  %4504 = vst.msk [vmem:[%s11617_s3 + $0xf0] sm:$0xff] %vm97_vm0, %v4424_v29  ;;  %4233 = vst.msk [vmem:[#allocation2 + $0xf8] sm:$0xff] %vm97_vm0, %v3363_v35  ;;  %v4425_v52 = vadd.f32 %v4345_v9, %v3363_v35  ;;  %v3365_v50 = vpop.f32.mrb[223].mxu1  ;;  %v4355_v9 = vld [vmem:[%s11617_s3 + $0x148] sm:$0xff] }
 0x3dc   :  { %3872 = vmatmul.mubr.bf16.gmra.mrb[68].mxu1 %v11750_v21  ;;  %v4679_v19 = vld [vmem:[%s11617_s3 + $0xe8] sm:$0xff] }
 0x3dd   :  { %4838 = vst.msk [vmem:[%s11617_s3 + $0xe0] sm:$0xff] %vm97_vm0, %v4758_v59  ;;  %v4759_v28 = vmul.f32 0.33333334, %v4679_v19  ;;  %4505 = vst.msk [vmem:[%s11617_s3 + $0xf8] sm:$0xff] %vm97_vm0, %v4425_v52 }
 0x3df   :  { %4839 = vst.msk [vmem:[%s11617_s3 + $0xe8] sm:$0xff] %vm97_vm0, %v4759_v28 }
 0x3e0   :  { %v3368_v11 = vpop.f32.mrb[224].mxu1 }
 0x3e1   :  { %4234 = vst.msk [vmem:[#allocation2 + $0x100] sm:$0xff] %vm97_vm0, %v3368_v11  ;;  %v4426_v44 = vadd.f32 %v4346_v61, %v3368_v11  ;;  %v3370_v60 = vpop.f32.mrb[225].mxu1  ;;  %v4356_v61 = vld [vmem:[%s11617_s3 + $0x150] sm:$0xff] }
 0x3e2   :  { %v4680_v22 = vld [vmem:[%s11617_s3 + $0xf0] sm:$0xff]  ;;  %v3371_v36 = vpop.f32.mrb[226].mxu1 }
 0x3e3   :  { %v4760_v15 = vmul.f32 0.33333334, %v4680_v22  ;;  %4506 = vst.msk [vmem:[%s11617_s3 + $0x100] sm:$0xff] %vm97_vm0, %v4426_v44  ;;  %4235 = vst.msk [vmem:[#allocation2 + $0x108] sm:$0xff] %vm97_vm0, %v3371_v36  ;;  %v4427_v0 = vadd.f32 %v4347_v54, %v3371_v36  ;;  %v3373_v51 = vpop.f32.mrb[227].mxu1  ;;  %v4357_v54 = vld [vmem:[%s11617_s3 + $0x158] sm:$0xff] }
 0x3e4   :  { %v4681_v31 = vld [vmem:[%s11617_s3 + $0xf8] sm:$0xff] }
 0x3e5   :  { %4840 = vst.msk [vmem:[%s11617_s3 + $0xf0] sm:$0xff] %vm97_vm0, %v4760_v15  ;;  %v4761_v53 = vmul.f32 0.33333334, %v4681_v31  ;;  %4507 = vst.msk [vmem:[%s11617_s3 + $0x108] sm:$0xff] %vm97_vm0, %v4427_v0 }
 0x3e7   :  { %4841 = vst.msk [vmem:[%s11617_s3 + $0xf8] sm:$0xff] %vm97_vm0, %v4761_v53 }
 0x3e8   :  { %v3376_v1 = vpop.f32.mrb[228].mxu1 }
 0x3e9   :  { %4236 = vst.msk [vmem:[#allocation2 + $0x110] sm:$0xff] %vm97_vm0, %v3376_v1  ;;  %v4428_v47 = vadd.f32 %v4348_v18, %v3376_v1  ;;  %v3378_v39 = vpop.f32.mrb[229].mxu1  ;;  %v4358_v18 = vld [vmem:[%s11617_s3 + $0x160] sm:$0xff] }
 0x3ea   :  { %v4682_v7 = vld [vmem:[%s11617_s3 + $0x100] sm:$0xff]  ;;  %v3379_v24 = vpop.f32.mrb[230].mxu1 }
 0x3eb   :  { %v4762_v57 = vmul.f32 0.33333334, %v4682_v7  ;;  %4508 = vst.msk [vmem:[%s11617_s3 + $0x110] sm:$0xff] %vm97_vm0, %v4428_v47  ;;  %4237 = vst.msk [vmem:[#allocation2 + $0x118] sm:$0xff] %vm97_vm0, %v3379_v24  ;;  %v4429_v45 = vadd.f32 %v4349_v56, %v3379_v24  ;;  %v3381_v43 = vpop.f32.mrb[231].mxu1  ;;  %v4359_v56 = vld [vmem:[%s11617_s3 + $0x168] sm:$0xff] }
 0x3ec   :  { %v4683_v30 = vld [vmem:[%s11617_s3 + $0x108] sm:$0xff] }
 0x3ed   :  { %4842 = vst.msk [vmem:[%s11617_s3 + $0x100] sm:$0xff] %vm97_vm0, %v4762_v57  ;;  %v4763_v34 = vmul.f32 0.33333334, %v4683_v30  ;;  %4509 = vst.msk [vmem:[%s11617_s3 + $0x118] sm:$0xff] %vm97_vm0, %v4429_v45 }
 0x3ef   :  { %4843 = vst.msk [vmem:[%s11617_s3 + $0x108] sm:$0xff] %vm97_vm0, %v4763_v34 }
 0x3f0   :  { %v3384_v33 = vpop.f32.mrb[232].mxu1 }
 0x3f1   :  { %4238 = vst.msk [vmem:[#allocation2 + $0x120] sm:$0xff] %vm97_vm0, %v3384_v33  ;;  %v4430_v23 = vadd.f32 %v4350_v13, %v3384_v33  ;;  %v3386_v42 = vpop.f32.mrb[233].mxu1  ;;  %v4360_v13 = vld [vmem:[%s11617_s3 + $0x170] sm:$0xff] }
 0x3f2   :  { %v4684_v32 = vld [vmem:[%s11617_s3 + $0x110] sm:$0xff]  ;;  %v3387_v27 = vpop.f32.mrb[234].mxu1 }
 0x3f3   :  { %v4764_v12 = vmul.f32 0.33333334, %v4684_v32  ;;  %4510 = vst.msk [vmem:[%s11617_s3 + $0x120] sm:$0xff] %vm97_vm0, %v4430_v23  ;;  %4239 = vst.msk [vmem:[#allocation2 + $0x128] sm:$0xff] %vm97_vm0, %v3387_v27  ;;  %v4431_v4 = vadd.f32 %v4351_v55, %v3387_v27  ;;  %v3389_v25 = vpop.f32.mrb[235].mxu1  ;;  %v4361_v55 = vld [vmem:[%s11617_s3 + $0x178] sm:$0xff] }
 0x3f4   :  { %v4685_v58 = vld [vmem:[%s11617_s3 + $0x118] sm:$0xff] }
 0x3f5   :  { %4844 = vst.msk [vmem:[%s11617_s3 + $0x110] sm:$0xff] %vm97_vm0, %v4764_v12  ;;  %v4765_v37 = vmul.f32 0.33333334, %v4685_v58  ;;  %4511 = vst.msk [vmem:[%s11617_s3 + $0x128] sm:$0xff] %vm97_vm0, %v4431_v4 }
 0x3f7   :  { %4845 = vst.msk [vmem:[%s11617_s3 + $0x118] sm:$0xff] %vm97_vm0, %v4765_v37 }
 0x3f8   :  { %v3392_v49 = vpop.f32.mrb[236].mxu1 }
 0x3f9   :  { %4240 = vst.msk [vmem:[#allocation2 + $0x130] sm:$0xff] %vm97_vm0, %v3392_v49  ;;  %v4432_v48 = vadd.f32 %v4352_v6, %v3392_v49  ;;  %v3394_v5 = vpop.f32.mrb[237].mxu1  ;;  %v4362_v6 = vld [vmem:[%s11617_s3 + $0x180] sm:$0xff] }
 0x3fa   :  { %v4686_v17 = vld [vmem:[%s11617_s3 + $0x120] sm:$0xff]  ;;  %v3395_v20 = vpop.f32.mrb[238].mxu1 }
 0x3fb   :  { %v4766_v46 = vmul.f32 0.33333334, %v4686_v17  ;;  %4512 = vst.msk [vmem:[%s11617_s3 + $0x130] sm:$0xff] %vm97_vm0, %v4432_v48  ;;  %4241 = vst.msk [vmem:[#allocation2 + $0x138] sm:$0xff] %vm97_vm0, %v3395_v20  ;;  %v4433_v3 = vadd.f32 %v4353_v16, %v3395_v20  ;;  %v3397_v8 = vpop.f32.mrb[239].mxu1  ;;  %v4363_v16 = vld [vmem:[%s11617_s3 + $0x188] sm:$0xff] }
 0x3fc   :  { %v4687_v2 = vld [vmem:[%s11617_s3 + $0x128] sm:$0xff] }
 0x3fd   :  { %4846 = vst.msk [vmem:[%s11617_s3 + $0x120] sm:$0xff] %vm97_vm0, %v4766_v46  ;;  %v4767_v21 = vmul.f32 0.33333334, %v4687_v2  ;;  %4513 = vst.msk [vmem:[%s11617_s3 + $0x138] sm:$0xff] %vm97_vm0, %v4433_v3 }
 0x3ff   :  { %4847 = vst.msk [vmem:[%s11617_s3 + $0x128] sm:$0xff] %vm97_vm0, %v4767_v21 }
 0x400   :  { %v3400_v26 = vpop.f32.mrb[240].mxu1 }
 0x401   :  { %4242 = vst.msk [vmem:[#allocation2 + $0x140] sm:$0xff] %vm97_vm0, %v3400_v26  ;;  %v4434_v29 = vadd.f32 %v4354_v63, %v3400_v26  ;;  %v3402_v38 = vpop.f32.mrb[241].mxu1  ;;  %v4364_v63 = vld [vmem:[%s11617_s3 + $0x190] sm:$0xff] }
 0x402   :  { %v4688_v10 = vld [vmem:[%s11617_s3 + $0x130] sm:$0xff]  ;;  %v3403_v35 = vpop.f32.mrb[242].mxu1 }
 0x403   :  { %v4768_v59 = vmul.f32 0.33333334, %v4688_v10  ;;  %4514 = vst.msk [vmem:[%s11617_s3 + $0x140] sm:$0xff] %vm97_vm0, %v4434_v29  ;;  %4243 = vst.msk [vmem:[#allocation2 + $0x148] sm:$0xff] %vm97_vm0, %v3403_v35  ;;  %v4435_v52 = vadd.f32 %v4355_v9, %v3403_v35  ;;  %v3405_v50 = vpop.f32.mrb[243].mxu1 }
 0x404   :  { %v4689_v19 = vld [vmem:[%s11617_s3 + $0x138] sm:$0xff] }
 0x405   :  { %4848 = vst.msk [vmem:[%s11617_s3 + $0x130] sm:$0xff] %vm97_vm0, %v4768_v59  ;;  %v4769_v28 = vmul.f32 0.33333334, %v4689_v19  ;;  %4515 = vst.msk [vmem:[%s11617_s3 + $0x148] sm:$0xff] %vm97_vm0, %v4435_v52  ;;  %v4365_v59 = vld [vmem:[%s11617_s3 + $0x198] sm:$0xff] }
 0x407   :  { %4849 = vst.msk [vmem:[%s11617_s3 + $0x138] sm:$0xff] %vm97_vm0, %v4769_v28 }
 0x408   :  { %v3408_v11 = vpop.f32.mrb[244].mxu1 }
 0x409   :  { %4244 = vst.msk [vmem:[#allocation2 + $0x150] sm:$0xff] %vm97_vm0, %v3408_v11  ;;  %v4436_v44 = vadd.f32 %v4356_v61, %v3408_v11  ;;  %v3410_v60 = vpop.f32.mrb[245].mxu1 }
 0x40a   :  { %v4690_v22 = vld [vmem:[%s11617_s3 + $0x140] sm:$0xff]  ;;  %v3411_v36 = vpop.f32.mrb[246].mxu1 }
 0x40b   :  { %v4770_v15 = vmul.f32 0.33333334, %v4690_v22  ;;  %4516 = vst.msk [vmem:[%s11617_s3 + $0x150] sm:$0xff] %vm97_vm0, %v4436_v44  ;;  %4245 = vst.msk [vmem:[#allocation2 + $0x158] sm:$0xff] %vm97_vm0, %v3411_v36  ;;  %v4437_v0 = vadd.f32 %v4357_v54, %v3411_v36  ;;  %v3413_v51 = vpop.f32.mrb[247].mxu1  ;;  %v11078_v10 = vpop.f32.mrb[52].mxu0 }
 0x40c   :  { %v4691_v31 = vld [vmem:[%s11617_s3 + $0x148] sm:$0xff]  ;;  %v11086_v52 = vpop.f32.mrb[53].mxu0  ;;  %v4366_v36 = vld [vmem:[%s11617_s3 + $0x1a0] sm:$0xff] }
 0x40d   :  { %4850 = vst.msk [vmem:[%s11617_s3 + $0x140] sm:$0xff] %vm97_vm0, %v4770_v15  ;;  %v4771_v53 = vmul.f32 0.33333334, %v4691_v31  ;;  %4517 = vst.msk [vmem:[%s11617_s3 + $0x158] sm:$0xff] %vm97_vm0, %v4437_v0  ;;  %v11093_v11 = vpop.f32.mrb[54].mxu0  ;;  %v4367_v31 = vld [vmem:[%s11617_s3 + $0x1a8] sm:$0xff] }
 0x40e   :  { %v11098_v44 = vpop.f32.mrb[55].mxu0 }
 0x40f   :  { %4851 = vst.msk [vmem:[%s11617_s3 + $0x148] sm:$0xff] %vm97_vm0, %v4771_v53 }
 0x410   :  { %v3416_v1 = vpop.f32.mrb[248].mxu1 }
 0x411   :  { %4246 = vst.msk [vmem:[#allocation2 + $0x160] sm:$0xff] %vm97_vm0, %v3416_v1  ;;  %v4438_v47 = vadd.f32 %v4358_v18, %v3416_v1  ;;  %v3418_v39 = vpop.f32.mrb[249].mxu1 }
 0x412   :  { %v4692_v7 = vld [vmem:[%s11617_s3 + $0x150] sm:$0xff]  ;;  %v3419_v24 = vpop.f32.mrb[250].mxu1 }
 0x413   :  { %v4772_v57 = vmul.f32 0.33333334, %v4692_v7  ;;  %4518 = vst.msk [vmem:[%s11617_s3 + $0x160] sm:$0xff] %vm97_vm0, %v4438_v47  ;;  %4247 = vst.msk [vmem:[#allocation2 + $0x168] sm:$0xff] %vm97_vm0, %v3419_v24  ;;  %v4439_v45 = vadd.f32 %v4359_v56, %v3419_v24  ;;  %v3421_v43 = vpop.f32.mrb[251].mxu1  ;;  %v4368_v24 = vld [vmem:[%s11617_s3 + $0x1b0] sm:$0xff] }
 0x414   :  { %v4693_v30 = vld [vmem:[%s11617_s3 + $0x158] sm:$0xff] }
 0x415   :  { %4852 = vst.msk [vmem:[%s11617_s3 + $0x150] sm:$0xff] %vm97_vm0, %v4772_v57  ;;  %v4773_v34 = vmul.f32 0.33333334, %v4693_v30  ;;  %4519 = vst.msk [vmem:[%s11617_s3 + $0x168] sm:$0xff] %vm97_vm0, %v4439_v45  ;;  %v4369_v30 = vld [vmem:[%s11617_s3 + $0x1b8] sm:$0xff] }
 0x417   :  { %4853 = vst.msk [vmem:[%s11617_s3 + $0x158] sm:$0xff] %vm97_vm0, %v4773_v34 }
 0x418   :  { %v3424_v33 = vpop.f32.mrb[252].mxu1 }
 0x419   :  { %4248 = vst.msk [vmem:[#allocation2 + $0x170] sm:$0xff] %vm97_vm0, %v3424_v33  ;;  %v4440_v23 = vadd.f32 %v4360_v13, %v3424_v33  ;;  %v3426_v42 = vpop.f32.mrb[253].mxu1 }
 0x41a   :  { %v4694_v32 = vld [vmem:[%s11617_s3 + $0x160] sm:$0xff]  ;;  %v3427_v27 = vpop.f32.mrb[254].mxu1 }
 0x41b   :  { %v4774_v12 = vmul.f32 0.33333334, %v4694_v32  ;;  %4520 = vst.msk [vmem:[%s11617_s3 + $0x170] sm:$0xff] %vm97_vm0, %v4440_v23  ;;  %4249 = vst.msk [vmem:[#allocation2 + $0x178] sm:$0xff] %vm97_vm0, %v3427_v27  ;;  %v4441_v4 = vadd.f32 %v4361_v55, %v3427_v27  ;;  %v3429_v25 = vpop.f32.mrb[255].mxu1  ;;  %v4370_v27 = vld [vmem:[%s11617_s3 + $0x1c0] sm:$0xff] }
 0x41c   :  { %v4695_v58 = vld [vmem:[%s11617_s3 + $0x168] sm:$0xff] }
 0x41d   :  { %4854 = vst.msk [vmem:[%s11617_s3 + $0x160] sm:$0xff] %vm97_vm0, %v4774_v12  ;;  %v4775_v37 = vmul.f32 0.33333334, %v4695_v58  ;;  %4521 = vst.msk [vmem:[%s11617_s3 + $0x178] sm:$0xff] %vm97_vm0, %v4441_v4  ;;  %v4371_v58 = vld [vmem:[%s11617_s3 + $0x1c8] sm:$0xff] }
 0x41f   :  { %4855 = vst.msk [vmem:[%s11617_s3 + $0x168] sm:$0xff] %vm97_vm0, %v4775_v37 }
 0x420   :  { %v3432_v49 = vpop.f32.mrb[0].mxu1 }
 0x421   :  { %4250 = vst.msk [vmem:[#allocation2 + $0x180] sm:$0xff] %vm97_vm0, %v3432_v49  ;;  %v4442_v48 = vadd.f32 %v4362_v6, %v3432_v49  ;;  %v3434_v5 = vpop.f32.mrb[1].mxu1 }
 0x422   :  { %v4696_v17 = vld [vmem:[%s11617_s3 + $0x170] sm:$0xff]  ;;  %v3435_v20 = vpop.f32.mrb[2].mxu1 }
 0x423   :  { %v4776_v46 = vmul.f32 0.33333334, %v4696_v17  ;;  %4522 = vst.msk [vmem:[%s11617_s3 + $0x180] sm:$0xff] %vm97_vm0, %v4442_v48  ;;  %4251 = vst.msk [vmem:[#allocation2 + $0x188] sm:$0xff] %vm97_vm0, %v3435_v20  ;;  %v4443_v3 = vadd.f32 %v4363_v16, %v3435_v20  ;;  %v3437_v8 = vpop.f32.mrb[3].mxu1  ;;  %v4372_v20 = vld [vmem:[%s11617_s3 + $0x1d0] sm:$0xff] }
 0x424   :  { %v4697_v2 = vld [vmem:[%s11617_s3 + $0x178] sm:$0xff] }
 0x425   :  { %4856 = vst.msk [vmem:[%s11617_s3 + $0x170] sm:$0xff] %vm97_vm0, %v4776_v46  ;;  %v4777_v21 = vmul.f32 0.33333334, %v4697_v2  ;;  %4523 = vst.msk [vmem:[%s11617_s3 + $0x188] sm:$0xff] %vm97_vm0, %v4443_v3  ;;  %v4373_v2 = vld [vmem:[%s11617_s3 + $0x1d8] sm:$0xff] }
 0x427   :  { %4857 = vst.msk [vmem:[%s11617_s3 + $0x178] sm:$0xff] %vm97_vm0, %v4777_v21 }
 0x428   :  { %v3440_v26 = vpop.f32.mrb[4].mxu1 }
 0x429   :  { %4252 = vst.msk [vmem:[#allocation2 + $0x190] sm:$0xff] %vm97_vm0, %v3440_v26  ;;  %v4444_v29 = vadd.f32 %v4364_v63, %v3440_v26  ;;  %v3442_v38 = vpop.f32.mrb[5].mxu1 }
 0x42a   :  { %v4698_v35 = vld [vmem:[%s11617_s3 + $0x180] sm:$0xff]  ;;  %v3443_v9 = vpop.f32.mrb[6].mxu1 }
 0x42b   :  { %v4778_v50 = vmul.f32 0.33333334, %v4698_v35  ;;  %4524 = vst.msk [vmem:[%s11617_s3 + $0x190] sm:$0xff] %vm97_vm0, %v4444_v29  ;;  %4253 = vst.msk [vmem:[#allocation2 + $0x198] sm:$0xff] %vm97_vm0, %v3443_v9  ;;  %v4445_v19 = vadd.f32 %v4365_v59, %v3443_v9  ;;  %v3445_v28 = vpop.f32.mrb[7].mxu1  ;;  %v4374_v9 = vld [vmem:[%s11617_s3 + $0x1e0] sm:$0xff] }
 0x42c   :  { %v4699_v61 = vld [vmem:[%s11617_s3 + $0x188] sm:$0xff] }
 0x42d   :  { %4858 = vst.msk [vmem:[%s11617_s3 + $0x180] sm:$0xff] %vm97_vm0, %v4778_v50  ;;  %v4779_v60 = vmul.f32 0.33333334, %v4699_v61  ;;  %4525 = vst.msk [vmem:[%s11617_s3 + $0x198] sm:$0xff] %vm97_vm0, %v4445_v19  ;;  %v4375_v61 = vld [vmem:[%s11617_s3 + $0x1e8] sm:$0xff] }
 0x42f   :  { %4859 = vst.msk [vmem:[%s11617_s3 + $0x188] sm:$0xff] %vm97_vm0, %v4779_v60 }
 0x430   :  { %v3448_v22 = vpop.f32.mrb[8].mxu1 }
 0x431   :  { %4254 = vst.msk [vmem:[#allocation2 + $0x1a0] sm:$0xff] %vm97_vm0, %v3448_v22  ;;  %v4446_v54 = vadd.f32 %v4366_v36, %v3448_v22  ;;  %v3450_v15 = vpop.f32.mrb[9].mxu1 }
 0x432   :  { %v4700_v0 = vld [vmem:[%s11617_s3 + $0x190] sm:$0xff]  ;;  %v3451_v51 = vpop.f32.mrb[10].mxu1 }
 0x433   :  { %v4780_v53 = vmul.f32 0.33333334, %v4700_v0  ;;  %4526 = vst.msk [vmem:[%s11617_s3 + $0x1a0] sm:$0xff] %vm97_vm0, %v4446_v54  ;;  %4255 = vst.msk [vmem:[#allocation2 + $0x1a8] sm:$0xff] %vm97_vm0, %v3451_v51  ;;  %v4447_v1 = vadd.f32 %v4367_v31, %v3451_v51  ;;  %v3453_v18 = vpop.f32.mrb[11].mxu1  ;;  %v4376_v51 = vld [vmem:[%s11617_s3 + $0x1f0] sm:$0xff] }
 0x434   :  { %v4701_v47 = vld [vmem:[%s11617_s3 + $0x198] sm:$0xff] }
 0x435   :  { %4860 = vst.msk [vmem:[%s11617_s3 + $0x190] sm:$0xff] %vm97_vm0, %v4780_v53  ;;  %v4781_v39 = vmul.f32 0.33333334, %v4701_v47  ;;  %4527 = vst.msk [vmem:[%s11617_s3 + $0x1a8] sm:$0xff] %vm97_vm0, %v4447_v1  ;;  %v4377_v47 = vld [vmem:[%s11617_s3 + $0x1f8] sm:$0xff] }
 0x437   :  { %4861 = vst.msk [vmem:[%s11617_s3 + $0x198] sm:$0xff] %vm97_vm0, %v4781_v39 }
 0x438   :  { %v3456_v7 = vpop.f32.mrb[12].mxu1 }
 0x439   :  { %4256 = vst.msk [vmem:[#allocation2 + $0x1b0] sm:$0xff] %vm97_vm0, %v3456_v7  ;;  %v4448_v56 = vadd.f32 %v4368_v24, %v3456_v7  ;;  %v3458_v57 = vpop.f32.mrb[13].mxu1 }
 0x43a   :  { %v4702_v45 = vld [vmem:[%s11617_s3 + $0x1a0] sm:$0xff]  ;;  %v3459_v43 = vpop.f32.mrb[14].mxu1 }
 0x43b   :  { %v4782_v34 = vmul.f32 0.33333334, %v4702_v45  ;;  %4528 = vst.msk [vmem:[%s11617_s3 + $0x1b0] sm:$0xff] %vm97_vm0, %v4448_v56  ;;  %4257 = vst.msk [vmem:[#allocation2 + $0x1b8] sm:$0xff] %vm97_vm0, %v3459_v43  ;;  %v4449_v33 = vadd.f32 %v4369_v30, %v3459_v43  ;;  %v3461_v13 = vpop.f32.mrb[15].mxu1  ;;  %v4378_v43 = vld [vmem:[%s11617_s3 + $0x200] sm:$0xff] }
 0x43c   :  { %v4703_v23 = vld [vmem:[%s11617_s3 + $0x1a8] sm:$0xff] }
 0x43d   :  { %4862 = vst.msk [vmem:[%s11617_s3 + $0x1a0] sm:$0xff] %vm97_vm0, %v4782_v34  ;;  %v4783_v42 = vmul.f32 0.33333334, %v4703_v23  ;;  %4529 = vst.msk [vmem:[%s11617_s3 + $0x1b8] sm:$0xff] %vm97_vm0, %v4449_v33  ;;  %v4379_v23 = vld [vmem:[%s11617_s3 + $0x208] sm:$0xff] }
 0x43f   :  { %4863 = vst.msk [vmem:[%s11617_s3 + $0x1a8] sm:$0xff] %vm97_vm0, %v4783_v42 }
 0x441   :  { %v3464_v32 = vpop.f32.mrb[16].mxu1 }
 0x442   :  { %4258 = vst.msk [vmem:[#allocation2 + $0x1c0] sm:$0xff] %vm97_vm0, %v3464_v32  ;;  %v4450_v55 = vadd.f32 %v4370_v27, %v3464_v32  ;;  %v3466_v12 = vpop.f32.mrb[17].mxu1  ;;  %v4704_v4 = vld [vmem:[%s11617_s3 + $0x1b0] sm:$0xff] }
 0x443   :  { %v3467_v25 = vpop.f32.mrb[18].mxu1  ;;  %v4784_v37 = vmul.f32 0.33333334, %v4704_v4 }
 0x444   :  { %4530 = vst.msk [vmem:[%s11617_s3 + $0x1c0] sm:$0xff] %vm97_vm0, %v4450_v55  ;;  %4259 = vst.msk [vmem:[#allocation2 + $0x1c8] sm:$0xff] %vm97_vm0, %v3467_v25  ;;  %v4451_v49 = vadd.f32 %v4371_v58, %v3467_v25  ;;  %v3469_v6 = vpop.f32.mrb[19].mxu1  ;;  %v4705_v48 = vld [vmem:[%s11617_s3 + $0x1b8] sm:$0xff]  ;;  %v4380_v25 = vld [vmem:[%s11617_s3 + $0x210] sm:$0xff] }
 0x445   :  { %4864 = vst.msk [vmem:[%s11617_s3 + $0x1b0] sm:$0xff] %vm97_vm0, %v4784_v37  ;;  %v4785_v5 = vmul.f32 0.33333334, %v4705_v48  ;;  %v4381_v48 = vld [vmem:[%s11617_s3 + $0x218] sm:$0xff] }
 0x446   :  { %4531 = vst.msk [vmem:[%s11617_s3 + $0x1c8] sm:$0xff] %vm97_vm0, %v4451_v49 }
 0x447   :  { %4865 = vst.msk [vmem:[%s11617_s3 + $0x1b8] sm:$0xff] %vm97_vm0, %v4785_v5 }
 0x449   :  { %v3472_v17 = vpop.f32.mrb[20].mxu1 }
 0x44a   :  { %4260 = vst.msk [vmem:[#allocation2 + $0x1d0] sm:$0xff] %vm97_vm0, %v3472_v17  ;;  %v4452_v16 = vadd.f32 %v4372_v20, %v3472_v17  ;;  %v3474_v46 = vpop.f32.mrb[21].mxu1 }
 0x44b   :  { %v4706_v3 = vld [vmem:[%s11617_s3 + $0x1c0] sm:$0xff]  ;;  %v3475_v8 = vpop.f32.mrb[22].mxu1 }
 0x44c   :  { %v4786_v21 = vmul.f32 0.33333334, %v4706_v3  ;;  %4532 = vst.msk [vmem:[%s11617_s3 + $0x1d0] sm:$0xff] %vm97_vm0, %v4452_v16  ;;  %4261 = vst.msk [vmem:[#allocation2 + $0x1d8] sm:$0xff] %vm97_vm0, %v3475_v8  ;;  %v4453_v26 = vadd.f32 %v4373_v2, %v3475_v8  ;;  %v3477_v63 = vpop.f32.mrb[23].mxu1  ;;  %v4382_v8 = vld [vmem:[%s11617_s3 + $0x220] sm:$0xff] }
 0x44d   :  { %v4707_v29 = vld [vmem:[%s11617_s3 + $0x1c8] sm:$0xff] }
 0x44e   :  { %4866 = vst.msk [vmem:[%s11617_s3 + $0x1c0] sm:$0xff] %vm97_vm0, %v4786_v21  ;;  %v4787_v38 = vmul.f32 0.33333334, %v4707_v29  ;;  %4533 = vst.msk [vmem:[%s11617_s3 + $0x1d8] sm:$0xff] %vm97_vm0, %v4453_v26  ;;  %v4383_v29 = vld [vmem:[%s11617_s3 + $0x228] sm:$0xff] }
 0x450   :  { %4867 = vst.msk [vmem:[%s11617_s3 + $0x1c8] sm:$0xff] %vm97_vm0, %v4787_v38 }
 0x451   :  { %v3480_v35 = vpop.f32.mrb[24].mxu1 }
 0x452   :  { %4262 = vst.msk [vmem:[#allocation2 + $0x1e0] sm:$0xff] %vm97_vm0, %v3480_v35  ;;  %v4454_v59 = vadd.f32 %v4374_v9, %v3480_v35  ;;  %v3482_v50 = vpop.f32.mrb[25].mxu1 }
 0x453   :  { %v4708_v19 = vld [vmem:[%s11617_s3 + $0x1d0] sm:$0xff]  ;;  %v3483_v28 = vpop.f32.mrb[26].mxu1 }
 0x454   :  { %v4788_v60 = vmul.f32 0.33333334, %v4708_v19  ;;  %4534 = vst.msk [vmem:[%s11617_s3 + $0x1e0] sm:$0xff] %vm97_vm0, %v4454_v59  ;;  %4263 = vst.msk [vmem:[#allocation2 + $0x1e8] sm:$0xff] %vm97_vm0, %v3483_v28  ;;  %v4455_v22 = vadd.f32 %v4375_v61, %v3483_v28  ;;  %v3485_v36 = vpop.f32.mrb[27].mxu1  ;;  %v4384_v28 = vld [vmem:[%s11617_s3 + $0x230] sm:$0xff] }
 0x455   :  { %v4709_v54 = vld [vmem:[%s11617_s3 + $0x1d8] sm:$0xff] }
 0x456   :  { %4868 = vst.msk [vmem:[%s11617_s3 + $0x1d0] sm:$0xff] %vm97_vm0, %v4788_v60  ;;  %v4789_v15 = vmul.f32 0.33333334, %v4709_v54  ;;  %4535 = vst.msk [vmem:[%s11617_s3 + $0x1e8] sm:$0xff] %vm97_vm0, %v4455_v22  ;;  %v4385_v54 = vld [vmem:[%s11617_s3 + $0x238] sm:$0xff] }
 0x458   :  { %4869 = vst.msk [vmem:[%s11617_s3 + $0x1d8] sm:$0xff] %vm97_vm0, %v4789_v15 }
 0x459   :  { %v3488_v0 = vpop.f32.mrb[28].mxu1 }
 0x45a   :  { %4264 = vst.msk [vmem:[#allocation2 + $0x1f0] sm:$0xff] %vm97_vm0, %v3488_v0  ;;  %v4456_v31 = vadd.f32 %v4376_v51, %v3488_v0  ;;  %v3490_v53 = vpop.f32.mrb[29].mxu1 }
 0x45b   :  { %v4710_v1 = vld [vmem:[%s11617_s3 + $0x1e0] sm:$0xff]  ;;  %v3491_v18 = vpop.f32.mrb[30].mxu1 }
 0x45c   :  { %v4790_v39 = vmul.f32 0.33333334, %v4710_v1  ;;  %4536 = vst.msk [vmem:[%s11617_s3 + $0x1f0] sm:$0xff] %vm97_vm0, %v4456_v31  ;;  %4265 = vst.msk [vmem:[#allocation2 + $0x1f8] sm:$0xff] %vm97_vm0, %v3491_v18  ;;  %v4457_v7 = vadd.f32 %v4377_v47, %v3491_v18  ;;  %v3493_v24 = vpop.f32.mrb[31].mxu1  ;;  %v4386_v18 = vld [vmem:[%s11617_s3 + $0x240] sm:$0xff] }
 0x45d   :  { %v4711_v56 = vld [vmem:[%s11617_s3 + $0x1e8] sm:$0xff] }
 0x45e   :  { %4870 = vst.msk [vmem:[%s11617_s3 + $0x1e0] sm:$0xff] %vm97_vm0, %v4790_v39  ;;  %v4791_v57 = vmul.f32 0.33333334, %v4711_v56  ;;  %4537 = vst.msk [vmem:[%s11617_s3 + $0x1f8] sm:$0xff] %vm97_vm0, %v4457_v7  ;;  %v4387_v56 = vld [vmem:[%s11617_s3 + $0x248] sm:$0xff] }
 0x460   :  { %4871 = vst.msk [vmem:[%s11617_s3 + $0x1e8] sm:$0xff] %vm97_vm0, %v4791_v57 }
 0x461   :  { %v3496_v45 = vpop.f32.mrb[32].mxu1 }
 0x462   :  { %4266 = vst.msk [vmem:[#allocation2 + $0x200] sm:$0xff] %vm97_vm0, %v3496_v45  ;;  %v4458_v30 = vadd.f32 %v4378_v43, %v3496_v45  ;;  %v3498_v34 = vpop.f32.mrb[33].mxu1 }
 0x463   :  { %v4712_v33 = vld [vmem:[%s11617_s3 + $0x1f0] sm:$0xff]  ;;  %v3499_v13 = vpop.f32.mrb[34].mxu1 }
 0x464   :  { %v4792_v42 = vmul.f32 0.33333334, %v4712_v33  ;;  %4538 = vst.msk [vmem:[%s11617_s3 + $0x200] sm:$0xff] %vm97_vm0, %v4458_v30  ;;  %4267 = vst.msk [vmem:[#allocation2 + $0x208] sm:$0xff] %vm97_vm0, %v3499_v13  ;;  %v4459_v32 = vadd.f32 %v4379_v23, %v3499_v13  ;;  %v3501_v27 = vpop.f32.mrb[35].mxu1  ;;  %v4388_v13 = vld [vmem:[%s11617_s3 + $0x250] sm:$0xff] }
 0x465   :  { %v4713_v55 = vld [vmem:[%s11617_s3 + $0x1f8] sm:$0xff] }
 0x466   :  { %4872 = vst.msk [vmem:[%s11617_s3 + $0x1f0] sm:$0xff] %vm97_vm0, %v4792_v42  ;;  %v4793_v12 = vmul.f32 0.33333334, %v4713_v55  ;;  %4539 = vst.msk [vmem:[%s11617_s3 + $0x208] sm:$0xff] %vm97_vm0, %v4459_v32  ;;  %v4389_v55 = vld [vmem:[%s11617_s3 + $0x258] sm:$0xff] }
 0x468   :  { %4873 = vst.msk [vmem:[%s11617_s3 + $0x1f8] sm:$0xff] %vm97_vm0, %v4793_v12 }
 0x46b   :  { %v3504_v4 = vpop.f32.mrb[36].mxu1  ;;  %v4714_v49 = vld [vmem:[%s11617_s3 + $0x200] sm:$0xff] }
 0x46c   :  { %4268 = vst.msk [vmem:[#allocation2 + $0x210] sm:$0xff] %vm97_vm0, %v3504_v4  ;;  %v4460_v58 = vadd.f32 %v4380_v25, %v3504_v4  ;;  %v3506_v37 = vpop.f32.mrb[37].mxu1  ;;  %v4794_v5 = vmul.f32 0.33333334, %v4714_v49 }
 0x46d   :  { %v3507_v6 = vpop.f32.mrb[38].mxu1  ;;  %v4715_v16 = vld [vmem:[%s11617_s3 + $0x208] sm:$0xff] }
 0x46e   :  { %4540 = vst.msk [vmem:[%s11617_s3 + $0x210] sm:$0xff] %vm97_vm0, %v4460_v58  ;;  %4269 = vst.msk [vmem:[#allocation2 + $0x218] sm:$0xff] %vm97_vm0, %v3507_v6  ;;  %v4461_v17 = vadd.f32 %v4381_v48, %v3507_v6  ;;  %v3509_v20 = vpop.f32.mrb[39].mxu1  ;;  %v4795_v46 = vmul.f32 0.33333334, %v4715_v16  ;;  %v4390_v6 = vld [vmem:[%s11617_s3 + $0x260] sm:$0xff] }
 0x46f   :  { %4874 = vst.msk [vmem:[%s11617_s3 + $0x200] sm:$0xff] %vm97_vm0, %v4794_v5  ;;  %v4391_v16 = vld [vmem:[%s11617_s3 + $0x268] sm:$0xff] }
 0x470   :  { %4541 = vst.msk [vmem:[%s11617_s3 + $0x218] sm:$0xff] %vm97_vm0, %v4461_v17  ;;  %4875 = vst.msk [vmem:[%s11617_s3 + $0x208] sm:$0xff] %vm97_vm0, %v4795_v46 }
 0x474   :  { %v3512_v3 = vpop.f32.mrb[40].mxu1 }
 0x475   :  { %4270 = vst.msk [vmem:[#allocation2 + $0x220] sm:$0xff] %vm97_vm0, %v3512_v3  ;;  %v4462_v2 = vadd.f32 %v4382_v8, %v3512_v3  ;;  %v3514_v21 = vpop.f32.mrb[41].mxu1  ;;  %v4716_v26 = vld [vmem:[%s11617_s3 + $0x210] sm:$0xff] }
 0x476   :  { %v3515_v63 = vpop.f32.mrb[42].mxu1  ;;  %v4796_v38 = vmul.f32 0.33333334, %v4716_v26 }
 0x477   :  { %4542 = vst.msk [vmem:[%s11617_s3 + $0x220] sm:$0xff] %vm97_vm0, %v4462_v2  ;;  %4271 = vst.msk [vmem:[#allocation2 + $0x228] sm:$0xff] %vm97_vm0, %v3515_v63  ;;  %v4463_v35 = vadd.f32 %v4383_v29, %v3515_v63  ;;  %v3517_v9 = vpop.f32.mrb[43].mxu1  ;;  %v4717_v59 = vld [vmem:[%s11617_s3 + $0x218] sm:$0xff]  ;;  %v4392_v63 = vld [vmem:[%s11617_s3 + $0x270] sm:$0xff] }
 0x478   :  { %4876 = vst.msk [vmem:[%s11617_s3 + $0x210] sm:$0xff] %vm97_vm0, %v4796_v38  ;;  %v4797_v50 = vmul.f32 0.33333334, %v4717_v59  ;;  %v4393_v59 = vld [vmem:[%s11617_s3 + $0x278] sm:$0xff] }
 0x479   :  { %4543 = vst.msk [vmem:[%s11617_s3 + $0x228] sm:$0xff] %vm97_vm0, %v4463_v35 }
 0x47a   :  { %4877 = vst.msk [vmem:[%s11617_s3 + $0x218] sm:$0xff] %vm97_vm0, %v4797_v50 }
 0x47d   :  { %v3520_v19 = vpop.f32.mrb[44].mxu1 }
 0x47e   :  { %4272 = vst.msk [vmem:[#allocation2 + $0x230] sm:$0xff] %vm97_vm0, %v3520_v19  ;;  %v4464_v61 = vadd.f32 %v4384_v28, %v3520_v19  ;;  %v3522_v60 = vpop.f32.mrb[45].mxu1  ;;  %v4718_v22 = vld [vmem:[%s11617_s3 + $0x220] sm:$0xff] }
 0x47f   :  { %v3523_v36 = vpop.f32.mrb[46].mxu1  ;;  %v4798_v15 = vmul.f32 0.33333334, %v4718_v22 }
 0x480   :  { %4544 = vst.msk [vmem:[%s11617_s3 + $0x230] sm:$0xff] %vm97_vm0, %v4464_v61  ;;  %4273 = vst.msk [vmem:[#allocation2 + $0x238] sm:$0xff] %vm97_vm0, %v3523_v36  ;;  %v4465_v0 = vadd.f32 %v4385_v54, %v3523_v36  ;;  %v3525_v51 = vpop.f32.mrb[47].mxu1  ;;  %v4719_v31 = vld [vmem:[%s11617_s3 + $0x228] sm:$0xff] }
 0x481   :  { %4878 = vst.msk [vmem:[%s11617_s3 + $0x220] sm:$0xff] %vm97_vm0, %v4798_v15  ;;  %v4799_v53 = vmul.f32 0.33333334, %v4719_v31 }
 0x482   :  { %4545 = vst.msk [vmem:[%s11617_s3 + $0x238] sm:$0xff] %vm97_vm0, %v4465_v0 }
 0x483   :  { %4879 = vst.msk [vmem:[%s11617_s3 + $0x228] sm:$0xff] %vm97_vm0, %v4799_v53 }
 0x486   :  { %v3528_v1 = vpop.f32.mrb[48].mxu1 }
 0x487   :  { %4274 = vst.msk [vmem:[#allocation2 + $0x240] sm:$0xff] %vm97_vm0, %v3528_v1  ;;  %v4466_v47 = vadd.f32 %v4386_v18, %v3528_v1  ;;  %v3530_v39 = vpop.f32.mrb[49].mxu1  ;;  %v4720_v7 = vld [vmem:[%s11617_s3 + $0x230] sm:$0xff] }
 0x488   :  { %v3531_v24 = vpop.f32.mrb[50].mxu1  ;;  %v4800_v57 = vmul.f32 0.33333334, %v4720_v7 }
 0x489   :  { %4546 = vst.msk [vmem:[%s11617_s3 + $0x240] sm:$0xff] %vm97_vm0, %v4466_v47  ;;  %4275 = vst.msk [vmem:[#allocation2 + $0x248] sm:$0xff] %vm97_vm0, %v3531_v24  ;;  %v4467_v45 = vadd.f32 %v4387_v56, %v3531_v24  ;;  %v3533_v43 = vpop.f32.mrb[51].mxu1  ;;  %v4721_v30 = vld [vmem:[%s11617_s3 + $0x238] sm:$0xff]  ;;  %v4582_v24 = vld [vmem:[%s11618_s4 + $0xe0] sm:$0xff] }
 0x48a   :  { %4880 = vst.msk [vmem:[%s11617_s3 + $0x230] sm:$0xff] %vm97_vm0, %v4800_v57  ;;  %v4801_v34 = vmul.f32 0.33333334, %v4721_v30 }
 0x48b   :  { %4547 = vst.msk [vmem:[%s11617_s3 + $0x248] sm:$0xff] %vm97_vm0, %v4467_v45 }
 0x48c   :  { %4881 = vst.msk [vmem:[%s11617_s3 + $0x238] sm:$0xff] %vm97_vm0, %v4801_v34 }
 0x48f   :  { %v3536_v33 = vpop.f32.mrb[52].mxu1 }
 0x490   :  { %4276 = vst.msk [vmem:[#allocation2 + $0x250] sm:$0xff] %vm97_vm0, %v3536_v33  ;;  %v4468_v23 = vadd.f32 %v4388_v13, %v3536_v33  ;;  %v3538_v42 = vpop.f32.mrb[53].mxu1  ;;  %v4722_v32 = vld [vmem:[%s11617_s3 + $0x240] sm:$0xff] }
 0x491   :  { %v3539_v27 = vpop.f32.mrb[54].mxu1  ;;  %v4802_v12 = vmul.f32 0.33333334, %v4722_v32  ;;  %v4584_v42 = vld [vmem:[%s11618_s4 + $0xf0] sm:$0xff] }
 0x492   :  { %4548 = vst.msk [vmem:[%s11617_s3 + $0x250] sm:$0xff] %vm97_vm0, %v4468_v23  ;;  %4277 = vst.msk [vmem:[#allocation2 + $0x258] sm:$0xff] %vm97_vm0, %v3539_v27  ;;  %v4469_v4 = vadd.f32 %v4389_v55, %v3539_v27  ;;  %v3541_v25 = vpop.f32.mrb[55].mxu1  ;;  %v4723_v58 = vld [vmem:[%s11617_s3 + $0x248] sm:$0xff] }
 0x493   :  { %4882 = vst.msk [vmem:[%s11617_s3 + $0x240] sm:$0xff] %vm97_vm0, %v4802_v12  ;;  %v4803_v37 = vmul.f32 0.33333334, %v4723_v58 }
 0x494   :  { %4549 = vst.msk [vmem:[%s11617_s3 + $0x258] sm:$0xff] %vm97_vm0, %v4469_v4 }
 0x495   :  { %4883 = vst.msk [vmem:[%s11617_s3 + $0x248] sm:$0xff] %vm97_vm0, %v4803_v37 }
 0x497   :  { %v3544_v49 = vpop.f32.mrb[56].mxu1 }
 0x498   :  { %4278 = vst.msk [vmem:[#allocation2 + $0x260] sm:$0xff] %vm97_vm0, %v3544_v49  ;;  %v4470_v48 = vadd.f32 %v4390_v6, %v3544_v49  ;;  %v3546_v5 = vpop.f32.mrb[57].mxu1 }
 0x499   :  { %v4724_v17 = vld [vmem:[%s11617_s3 + $0x250] sm:$0xff]  ;;  %v3547_v20 = vpop.f32.mrb[58].mxu1 }
 0x49a   :  { %v4804_v46 = vmul.f32 0.33333334, %v4724_v17  ;;  %4550 = vst.msk [vmem:[%s11617_s3 + $0x260] sm:$0xff] %vm97_vm0, %v4470_v48  ;;  %4279 = vst.msk [vmem:[#allocation2 + $0x268] sm:$0xff] %vm97_vm0, %v3547_v20  ;;  %v4471_v3 = vadd.f32 %v4391_v16, %v3547_v20  ;;  %v3549_v8 = vpop.f32.mrb[59].mxu1 }
 0x49b   :  { %v4725_v2 = vld [vmem:[%s11617_s3 + $0x258] sm:$0xff] }
 0x49c   :  { %4884 = vst.msk [vmem:[%s11617_s3 + $0x250] sm:$0xff] %vm97_vm0, %v4804_v46  ;;  %v4805_v21 = vmul.f32 0.33333334, %v4725_v2  ;;  %4551 = vst.msk [vmem:[%s11617_s3 + $0x268] sm:$0xff] %vm97_vm0, %v4471_v3 }
 0x49e   :  { %4885 = vst.msk [vmem:[%s11617_s3 + $0x258] sm:$0xff] %vm97_vm0, %v4805_v21 }
 0x49f   :  { %v3552_v26 = vpop.f32.mrb[60].mxu1 }
 0x4a0   :  { %4280 = vst.msk [vmem:[#allocation2 + $0x270] sm:$0xff] %vm97_vm0, %v3552_v26  ;;  %v4472_v29 = vadd.f32 %v4392_v63, %v3552_v26  ;;  %v3554_v38 = vpop.f32.mrb[61].mxu1 }
 0x4a1   :  { %v4726_v35 = vld [vmem:[%s11617_s3 + $0x260] sm:$0xff]  ;;  %v3555_v9 = vpop.f32.mrb[62].mxu1 }
 0x4a2   :  { %v4806_v50 = vmul.f32 0.33333334, %v4726_v35  ;;  %4552 = vst.msk [vmem:[%s11617_s3 + $0x270] sm:$0xff] %vm97_vm0, %v4472_v29  ;;  %4281 = vst.msk [vmem:[#allocation2 + $0x278] sm:$0xff] %vm97_vm0, %v3555_v9  ;;  %v4473_v19 = vadd.f32 %v4393_v59, %v3555_v9  ;;  %v3557_v28 = vpop.f32.mrb[63].mxu1 }
 0x4a3   :  { %v4727_v61 = vld [vmem:[%s11617_s3 + $0x268] sm:$0xff] }
 0x4a4   :  { %4886 = vst.msk [vmem:[%s11617_s3 + $0x260] sm:$0xff] %vm97_vm0, %v4806_v50  ;;  %v4807_v60 = vmul.f32 0.33333334, %v4727_v61  ;;  %4553 = vst.msk [vmem:[%s11617_s3 + $0x278] sm:$0xff] %vm97_vm0, %v4473_v19 }
 0x4a6   :  { %4887 = vst.msk [vmem:[%s11617_s3 + $0x268] sm:$0xff] %vm97_vm0, %v4807_v60 }
 0x4a7   :  { %v5502_v22 = vpop.f32.mrb[64].mxu1 }
 0x4a8   :  { %v5503_v36 = vpop.f32.mrb[65].mxu1 }
 0x4a9   :  { %v4728_v54 = vld [vmem:[%s11617_s3 + $0x270] sm:$0xff]  ;;  %v5504_v15 = vadd.f32 %v5503_v36, %v5502_v22  ;;  %v5505_v0 = vpop.f32.mrb[66].mxu1 }
 0x4aa   :  { %v4808_v51 = vmul.f32 0.33333334, %v4728_v54  ;;  %v5506_v31 = vpop.f32.mrb[67].mxu1 }
 0x4ab   :  { %v4729_v53 = vld [vmem:[%s11617_s3 + $0x278] sm:$0xff]  ;;  %v5507_v1 = vadd.f32 %v5506_v31, %v5505_v0  ;;  %v4027_v18 = vadd.f32 %v9885_v40, %v5504_v15 }
 0x4ac   :  { %4888 = vst.msk [vmem:[%s11617_s3 + $0x270] sm:$0xff] %vm97_vm0, %v4808_v51  ;;  %v4809_v47 = vmul.f32 0.33333334, %v4729_v53 }
 0x4ad   :  { %v4188_v39 = vadd.f32 %v11086_v52, %v4027_v18  ;;  %v4030_v7 = vadd.f32 %v9898_v41, %v5507_v1  ;;  %v4583_v52 = vld [vmem:[%s11618_s4 + $0xe8] sm:$0xff] }
 0x4ae   :  { %4889 = vst.msk [vmem:[%s11617_s3 + $0x278] sm:$0xff] %vm97_vm0, %v4809_v47 }
 0x4af   :  { %4310 = vst.msk [vmem:[#allocation3 + $0xe0] sm:$0xff] %vm97_vm0, %v4188_v39  ;;  %v4614_v40 = vadd.f32 %v4582_v24, %v4188_v39  ;;  %v4191_v56 = vadd.f32 %v11098_v44, %v4030_v7  ;;  %v5508_v57 = vpop.f32.mrb[68].mxu1 }
 0x4b0   :  { %v5509_v41 = vpop.f32.mrb[69].mxu1 }
 0x4b1   :  { %4646 = vst.msk [vmem:[%s11618_s4 + $0xe0] sm:$0xff] %vm97_vm0, %v4614_v40  ;;  %4311 = vst.msk [vmem:[#allocation3 + $0xe8] sm:$0xff] %vm97_vm0, %v4191_v56  ;;  %v4615_v45 = vadd.f32 %v4583_v52, %v4191_v56  ;;  %v5510_v43 = vadd.f32 %v5509_v41, %v5508_v57  ;;  %v5511_v30 = vpop.f32.mrb[70].mxu1 }
 0x4b2   :  { %v5512_v34 = vpop.f32.mrb[71].mxu1 }
 0x4b3   :  { %4647 = vst.msk [vmem:[%s11618_s4 + $0xe8] sm:$0xff] %vm97_vm0, %v4615_v45  ;;  %v4035_v44 = vadd.f32 %v9922_v62, %v5510_v43  ;;  %v5513_v33 = vadd.f32 %v5512_v34, %v5511_v30  ;;  %v4585_v62 = vld [vmem:[%s11618_s4 + $0xf8] sm:$0xff] }
 0x4b5   :  { %v4196_v13 = vadd.f32 %v11078_v10, %v4035_v44  ;;  %v4038_v23 = vadd.f32 %v9935_v14, %v5513_v33 }
 0x4b7   :  { %4312 = vst.msk [vmem:[#allocation3 + $0xf0] sm:$0xff] %vm97_vm0, %v4196_v13  ;;  %v4616_v32 = vadd.f32 %v4584_v42, %v4196_v13  ;;  %v4199_v27 = vadd.f32 %v11093_v11, %v4038_v23 }
 0x4b8   :  { %v4918_v55 = vld [vmem:[%s11618_s4 + $0xe0] sm:$0xff] }
 0x4b9   :  { %v4950_v10 = vmul.f32 0.33333334, %v4918_v55  ;;  %4648 = vst.msk [vmem:[%s11618_s4 + $0xf0] sm:$0xff] %vm97_vm0, %v4616_v32  ;;  %4313 = vst.msk [vmem:[#allocation3 + $0xf8] sm:$0xff] %vm97_vm0, %v4199_v27  ;;  %v4617_v14 = vadd.f32 %v4585_v62, %v4199_v27 }
 0x4ba   :  { %v4919_v11 = vld [vmem:[%s11618_s4 + $0xe8] sm:$0xff] }
 0x4bb   :  { %4982 = vst.msk [vmem:[%s11618_s4 + $0xe0] sm:$0xff] %vm97_vm0, %v4950_v10  ;;  %v4951_v12 = vmul.f32 0.33333334, %v4919_v11  ;;  %4649 = vst.msk [vmem:[%s11618_s4 + $0xf8] sm:$0xff] %vm97_vm0, %v4617_v14 }
 0x4bd   :  { %4983 = vst.msk [vmem:[%s11618_s4 + $0xe8] sm:$0xff] %vm97_vm0, %v4951_v12 }
 0x4c0   :  { %v4920_v4 = vld [vmem:[%s11618_s4 + $0xf0] sm:$0xff] }
 0x4c1   :  { %v4952_v25 = vmul.f32 0.33333334, %v4920_v4 }
 0x4c2   :  { %v4921_v58 = vld [vmem:[%s11618_s4 + $0xf8] sm:$0xff] }
 0x4c3   :  { %4984 = vst.msk [vmem:[%s11618_s4 + $0xf0] sm:$0xff] %vm97_vm0, %v4952_v25  ;;  %v4953_v37 = vmul.f32 0.33333334, %v4921_v58 }
 0x4c5   :  { %4985 = vst.msk [vmem:[%s11618_s4 + $0xf8] sm:$0xff] %vm97_vm0, %v4953_v37 }

</bundles_post_ra>
